<compile_context>
chip_gen: v7x
topology: tpu7x:2x2x1
jax: 0.10.0
libtpu: 0.0.40
codegen_flags: <defaults>
</compile_context>

<pallas_src>
import functools

import jax
import jax.numpy as jnp
from jax.experimental import pallas as pl
from jax.experimental.pallas import tpu as pltpu

CP = 128          # lane-dense padded channel width for every activation/weight
SE_H = 8          # squeeze-excite hidden width, padded to 8 sublanes
C_HEAD = 64       # logical channel count of the backbone.features output


@functools.lru_cache(maxsize=None)
def _vmem_limit_bytes():
    """Generation-dependent VMEM budget: ~96 MiB on v5e/v6e, ~48 MiB on v7x."""
    cap = 64 * 1024 * 1024
    try:
        info = pltpu.get_tpu_info()
        cap = int(getattr(info, "vmem_capacity_bytes", cap))
    except Exception:
        pass
    return int(min((cap * 3) // 4, 96 * 1024 * 1024))


def _cparams(*semantics):
    return pltpu.CompilerParams(dimension_semantics=semantics,
                                vmem_limit_bytes=_vmem_limit_bytes())


def _row_col(n, w):
    """(row, col) int32 index vectors, shape (n, 1), for a row-major W=w grid."""
    p = jax.lax.broadcasted_iota(jnp.int32, (n, 1), 0)
    if w & (w - 1) == 0:          # power-of-two W -> pure bit ops on the VPU
        return jnp.right_shift(p, w.bit_length() - 1), jnp.bitwise_and(p, w - 1)
    return p // w, p % w


# ---------------------------------------------------------------------------
# One fused MBConv block kernel (per-batch grid step):
#   expand 1x1 (or stem im2col matmul) + BN + SiLU
#   -> depthwise 3x3 (stride 1 or 2) + BN + SiLU      [XLU rolls + masks]
#   -> squeeze-excite (GAP, FC1+SiLU, FC2+sigmoid, gate)  [VPU/XLU only]
#   -> project 1x1 + BN  [+ residual]
#   [-> head 1x1 + BN + SiLU -> GAP -> Linear classifier]   (last block only)
# ---------------------------------------------------------------------------
def _mbconv_kernel(*refs, stride, H, W, has_residual, has_head):
    it = iter(refs)
    x_ref = next(it)
    ex_w, ex_s, ex_b = next(it), next(it), next(it)
    dw_w, dw_s, dw_b = next(it), next(it), next(it)
    se_w1, se_b1, se_w2, se_b2 = next(it), next(it), next(it), next(it)
    pr_w, pr_s, pr_b = next(it), next(it), next(it)
    if has_head:
        hd_w, hd_s, hd_b = next(it), next(it), next(it)
        fc_w, fc_b = next(it), next(it)
        feat_ref, logit_ref = next(it), next(it)
        out_ref = None
    else:
        out_ref = next(it)

    Ho, Wo = H // stride, W // stride
    HWo = Ho * Wo

    # ---- expand 1x1 conv (stem conv for block 1) + folded BN + SiLU (f32) ----
    xin = x_ref[0]
    x2d = xin.reshape(-1, xin.shape[-1])                       # (M, K) bf16
    y = jnp.dot(x2d, ex_w[...], preferred_element_type=jnp.float32)
    y = y * ex_s[...] + ex_b[...]
    y = y * jax.nn.sigmoid(y)                                  # SiLU

    # ---- depthwise 3x3 via XLU rolls on the flattened spatial layout ----
    wk = dw_w[...]                                             # (9, CP) f32
    row, col = _row_col(HWo, Wo)

    def fmask(conds):
        m = None
        for c in conds:
            m = c if m is None else jnp.logical_and(m, c)
        return None if m is None else m.astype(jnp.float32)

    taps = [(di, dj) for di in range(3) for dj in range(3)]
    accs = [None, None, None]                                  # 3 independent accumulators
    if stride == 1:
        for k, (di, dj) in enumerate(taps):
            ri, cj = di - 1, dj - 1
            shift = (-(ri * Wo + cj)) % HWo
            t = pltpu.roll(y, shift, axis=0) if shift else y
            conds = []
            if ri == -1:
                conds.append(row >= 1)
            if ri == 1:
                conds.append(row <= Ho - 2)
            if cj == -1:
                conds.append(col >= 1)
            if cj == 1:
                conds.append(col <= Wo - 2)
            m = fmask(conds)
            term = (t if m is None else t * m) * wk[k:k + 1]
            a = k % 3
            accs[a] = term if accs[a] is None else accs[a] + term
    else:
        # stride 2: y holds the 4 expanded parity phases, phase-major
        ph = y.reshape(4, HWo, y.shape[-1])
        for k, (di, dj) in enumerate(taps):
            rp, cpar = (di + 1) % 2, (dj + 1) % 2
            phi = rp * 2 + cpar
            roff = -1 if di == 0 else 0
            coff = -1 if dj == 0 else 0
            shift = (-(roff * Wo + coff)) % HWo
            src = ph[phi]
            t = pltpu.roll(src, shift, axis=0) if shift else src
            conds = []
            if di == 0:
                conds.append(row >= 1)
            if dj == 0:
                conds.append(col >= 1)
            m = fmask(conds)
            term = (t if m is None else t * m) * wk[k:k + 1]
            a = k % 3
            accs[a] = term if accs[a] is None else accs[a] + term
    z = (accs[0] + accs[1]) + accs[2]

    z = z * dw_s[...] + dw_b[...]                              # folded BN
    z = z * jax.nn.sigmoid(z)                                  # SiLU

    # ---- squeeze-excite: GAP -> FC1+SiLU -> FC2+sigmoid -> gate (VPU/XLU) ----
    s = jnp.mean(z, axis=0, keepdims=True)                     # (1, CP)
    h1 = jnp.sum(se_w1[...] * s, axis=1, keepdims=True) + se_b1[...]   # (SE_H, 1)
    h1 = h1 * jax.nn.sigmoid(h1)
    g = jnp.sum(se_w2[...] * h1, axis=0, keepdims=True) + se_b2[...]   # (1, CP)
    g = jax.nn.sigmoid(g)
    z = z * g

    # ---- project 1x1 conv + BN (+ fused residual) ----
    p = jnp.dot(z.astype(jnp.bfloat16), pr_w[...],
                preferred_element_type=jnp.float32)
    p = p * pr_s[...] + pr_b[...]
    if has_residual:
        p = p + xin.reshape(-1, xin.shape[-1]).astype(jnp.float32)

    if not has_head:
        out_ref[0] = p.astype(out_ref.dtype)
        return

    # ---- fused head 1x1 conv + BN + SiLU, GAP and Linear classifier ----
    hy = jnp.dot(p.astype(jnp.bfloat16), hd_w[...],
                 preferred_element_type=jnp.float32)
    hy = hy * hd_s[...] + hd_b[...]
    hy = hy * jax.nn.sigmoid(hy)
    feat_ref[0] = hy.astype(feat_ref.dtype)                    # features hook (f32)
    pooled = jnp.mean(hy, axis=0, keepdims=True)               # (1, CP) f32
    logits = jnp.dot(pooled, fc_w[...],
                     preferred_element_type=jnp.float32) + fc_b[...]
    logit_ref[0] = logits


def _wspec(a):
    return pl.BlockSpec(tuple(a.shape), lambda b: (0,) * a.ndim)


def mbconv_block(x, weights, *, stride, H, W, has_residual=False,
                 head_weights=None):
    """Launch one fused MBConv block; grid=(B,), weights stay VMEM-resident."""
    B = x.shape[0]
    Ho, Wo = H // stride, W // stride
    HWo = Ho * Wo
    with_head = head_weights is not None

    args = [x] + list(weights) + (list(head_weights) if with_head else [])
    nd = x.ndim
    in_specs = ([pl.BlockSpec((1,) + tuple(x.shape[1:]),
                              lambda b: (b,) + (0,) * (nd - 1))]
                + [_wspec(a) for a in args[1:]])

    if with_head:
        out_shape = (jax.ShapeDtypeStruct((B, HWo, CP), jnp.float32),
                     jax.ShapeDtypeStruct((B, 1, CP), jnp.float32))
        out_specs = (pl.BlockSpec((1, HWo, CP), lambda b: (b, 0, 0)),
                     pl.BlockSpec((1, 1, CP), lambda b: (b, 0, 0)))
    else:
        out_shape = jax.ShapeDtypeStruct((B, HWo, CP), jnp.bfloat16)
        out_specs = pl.BlockSpec((1, HWo, CP), lambda b: (b, 0, 0))

    kern = functools.partial(_mbconv_kernel, stride=stride, H=H, W=W,
                             has_residual=has_residual, has_head=with_head)
    return pl.pallas_call(
        kern,
        grid=(B,),
        in_specs=in_specs,
        out_specs=out_specs,
        out_shape=out_shape,
        compiler_params=_cparams("parallel"),
    )(*args)


# ---------------------------------------------------------------------------
# Wrapper glue (tiny XLA passes between the 3 kernels)
# ---------------------------------------------------------------------------
def _stem_im2col(x_nhwc):
    """im2col for the 3x3/stride-2 RGB stem, bf16, K padded 27 -> 128."""
    B, H, W, C = x_nhwc.shape
    xp = jnp.pad(x_nhwc, ((0, 0), (1, 1), (1, 1), (0, 0)))
    Ho, Wo = H // 2, W // 2
    cols = [xp[:, di:di + 2 * Ho:2, dj:dj + 2 * Wo:2, :]
            for di in range(3) for dj in range(3)]
    col = jnp.concatenate(cols, axis=-1)                       # (B, Ho, Wo, 27)
    col = jnp.pad(col, ((0, 0), (0, 0), (0, 0), (0, CP - 9 * C)))
    return col.reshape(B, Ho * Wo, CP).astype(jnp.bfloat16), Ho, Wo


def _parity_split(x_flat, H, W):
    """Space-to-depth parity phases so the stride-2 dw only needs unit rolls."""
    B, _, C = x_flat.shape
    x4 = x_flat.reshape(B, H, W, C)
    Ho, Wo = H // 2, W // 2
    ph = [x4[:, pi::2, pj::2, :].reshape(B, Ho * Wo, C)
          for pi in (0, 1) for pj in (0, 1)]
    return jnp.stack(ph, axis=1)                               # (B, 4, Ho*Wo, C)


# ---------------------------------------------------------------------------
# Parameters (deterministic synthetic init, zero-padded to lane-dense CP=128)
# ---------------------------------------------------------------------------
def init_params(key, num_classes):
    keys = iter(jax.random.split(key, 64))

    def rnd(shape, sc=0.1):
        return sc * jax.random.normal(next(keys), shape, jnp.float32)

    def pad2(a, r, c):
        return jnp.pad(a, ((0, r - a.shape[0]), (0, c - a.shape[1])))

    def bn(c):  # folded eval-mode BN: pad scale=1 / bias=0 keeps padded lanes zero
        s = 1.0 + 0.05 * jax.random.normal(next(keys), (1, c), jnp.float32)
        b = 0.05 * jax.random.normal(next(keys), (1, c), jnp.float32)
        return (jnp.pad(s, ((0, 0), (0, CP - c)), constant_values=1.0),
                jnp.pad(b, ((0, 0), (0, CP - c))))

    def mm(cin, cout):      # 1x1-conv weight, zero-padded, bf16 for the MXU
        return pad2(rnd((cin, cout)), CP, CP).astype(jnp.bfloat16)

    def dw(c):              # depthwise 3x3 taps as (9, CP) f32 (VPU path)
        return jnp.pad(rnd((9, c)), ((0, 0), (0, CP - c)))

    def se(c, hidden):      # SE weights stored lane-dense as (SE_H, CP)
        w1 = jnp.pad(rnd((hidden, c)), ((0, SE_H - hidden), (0, CP - c)))
        b1 = jnp.pad(rnd((hidden, 1), 0.01), ((0, SE_H - hidden), (0, 0)))
        w2 = jnp.pad(rnd((hidden, c)), ((0, SE_H - hidden), (0, CP - c)))
        b2 = jnp.pad(rnd((1, c), 0.01), ((0, 0), (0, CP - c)))
        return w1, b1, w2, b2

    p = {}
    # stem 3x3/s2 conv 3->16 (im2col K=27 padded to 128), acts as block1 "expand"
    p["stem_w"] = pad2(rnd((27, 16)), CP, CP).astype(jnp.bfloat16)
    p["stem_s"], p["stem_b"] = bn(16)
    # block1: MBConv1 (no expansion), 16 -> 8, stride 1, SE 16->4
    p["b1_dw_w"] = dw(16); p["b1_dw_s"], p["b1_dw_b"] = bn(16)
    p["b1_se"] = se(16, 4)
    p["b1_pr_w"] = mm(16, 8); p["b1_pr_s"], p["b1_pr_b"] = bn(8)
    # block2: MBConv6, 8 -> 16, stride 2, SE 48->2
    p["b2_ex_w"] = mm(8, 48); p["b2_ex_s"], p["b2_ex_b"] = bn(48)
    p["b2_dw_w"] = dw(48); p["b2_dw_s"], p["b2_dw_b"] = bn(48)
    p["b2_se"] = se(48, 2)
    p["b2_pr_w"] = mm(48, 16); p["b2_pr_s"], p["b2_pr_b"] = bn(16)
    # block3: MBConv6, 16 -> 16, stride 1 (residual), SE 96->4
    p["b3_ex_w"] = mm(16, 96); p["b3_ex_s"], p["b3_ex_b"] = bn(96)
    p["b3_dw_w"] = dw(96); p["b3_dw_s"], p["b3_dw_b"] = bn(96)
    p["b3_se"] = se(96, 4)
    p["b3_pr_w"] = mm(96, 16); p["b3_pr_s"], p["b3_pr_b"] = bn(16)
    # head 1x1 conv 16 -> 64 + BN + SiLU, then Linear(64, num_classes) in f32
    p["head_w"] = mm(16, 64); p["head_s"], p["head_b"] = bn(64)
    p["fc_w"] = pad2(rnd((64, num_classes)), CP, CP)            # f32 classifier
    p["fc_b"] = jnp.pad(rnd((1, num_classes), 0.01), ((0, 0), (0, CP - num_classes)))
    return p


# ---------------------------------------------------------------------------
# Forward pass: 3 pallas_calls, jitted so the wrapper glue fuses.
# ---------------------------------------------------------------------------
def _forward(params, x_nchw):
    p = params
    B = x_nchw.shape[0]
    x = jnp.transpose(x_nchw, (0, 2, 3, 1)).astype(jnp.float32)   # NCHW -> NHWC

    # ---- call 1: stem conv + MBConv1 (dw + SE + project), one kernel ----
    col, H, W = _stem_im2col(x)                                   # (B, H*W, 128)
    b1 = (p["stem_w"], p["stem_s"], p["stem_b"],
          p["b1_dw_w"], p["b1_dw_s"], p["b1_dw_b"], *p["b1_se"],
          p["b1_pr_w"], p["b1_pr_s"], p["b1_pr_b"])
    x1 = mbconv_block(col, b1, stride=1, H=H, W=W)                # (B, H*W, CP)

    # ---- call 2: MBConv6 stride-2 (expand + dw/s2 + SE + project) ----
    xph = _parity_split(x1, H, W)                                 # (B, 4, HoWo, CP)
    b2 = (p["b2_ex_w"], p["b2_ex_s"], p["b2_ex_b"],
          p["b2_dw_w"], p["b2_dw_s"], p["b2_dw_b"], *p["b2_se"],
          p["b2_pr_w"], p["b2_pr_s"], p["b2_pr_b"])
    x2 = mbconv_block(xph, b2, stride=2, H=H, W=W)                # (B, HoWo, CP)
    H, W = H // 2, W // 2

    # ---- call 3: MBConv6 (residual) + head conv + GAP + classifier ----
    b3 = (p["b3_ex_w"], p["b3_ex_s"], p["b3_ex_b"],
          p["b3_dw_w"], p["b3_dw_s"], p["b3_dw_b"], *p["b3_se"],
          p["b3_pr_w"], p["b3_pr_s"], p["b3_pr_b"])
    head = (p["head_w"], p["head_s"], p["head_b"], p["fc_w"], p["fc_b"])
    feat, logits3 = mbconv_block(x2, b3, stride=1, H=H, W=W,
                                 has_residual=True, head_weights=head)

    # mirror of the backbone.features forward hook (logical channels, NCHW, f32)
    features = jnp.transpose(
        feat[..., :C_HEAD].reshape(B, H, W, C_HEAD), (0, 3, 1, 2))
    return logits3[:, 0, :], features


class EfficientNetDefectClassifier:
    """EfficientNet-B0-style defect classifier built from fused Pallas kernels."""

    def __init__(self, num_classes, key):
        self.num_classes = num_classes
        self.params = init_params(key, num_classes)
        self.features = None               # mirrors the PyTorch forward hook
        self._fwd = jax.jit(_forward)

    def __call__(self, x_nchw):
        logits_padded, feats = self._fwd(self.params, x_nchw)
        self.features = feats
        return logits_padded[:, : self.num_classes]


# ---------------------------------------------------------------------------
if __name__ == "__main__":
    key = jax.random.PRNGKey(0)
    pkey, xkey = jax.random.split(key)

    num_classes = 6  # stands in for len(class_to_idx)
    model = EfficientNetDefectClassifier(num_classes, pkey)

    # NCHW input, small shape consistent with an image classifier
    x = jax.random.normal(xkey, (2, 3, 32, 32), jnp.float32)

    logits = model(x)
    jax.block_until_ready(logits)
    jax.block_until_ready(model.features)

    assert logits.shape == (2, num_classes)
    assert logits.dtype == jnp.float32
    assert model.features.shape == (2, C_HEAD, 8, 8)
    assert bool(jnp.all(jnp.isfinite(logits)))
    print("KERNEL_OK")
</pallas_src>

<mosaic_0001>
module attributes {stable_mosaic.version = 11 : i64} {
  func.func @_mbconv_kernel(%arg0: i32, %arg1: memref<1x256x128xbf16, #tpu.memory_space<vmem>>, %arg2: memref<128x128xbf16, #tpu.memory_space<vmem>>, %arg3: memref<1x128xf32, #tpu.memory_space<vmem>>, %arg4: memref<1x128xf32, #tpu.memory_space<vmem>>, %arg5: memref<9x128xf32, #tpu.memory_space<vmem>>, %arg6: memref<1x128xf32, #tpu.memory_space<vmem>>, %arg7: memref<1x128xf32, #tpu.memory_space<vmem>>, %arg8: memref<8x128xf32, #tpu.memory_space<vmem>>, %arg9: memref<8x1xf32, #tpu.memory_space<vmem>>, %arg10: memref<8x128xf32, #tpu.memory_space<vmem>>, %arg11: memref<1x128xf32, #tpu.memory_space<vmem>>, %arg12: memref<128x128xbf16, #tpu.memory_space<vmem>>, %arg13: memref<1x128xf32, #tpu.memory_space<vmem>>, %arg14: memref<1x128xf32, #tpu.memory_space<vmem>>, %arg15: memref<1x256x128xbf16, #tpu.memory_space<vmem>>) attributes {dimension_semantics = [#tpu.dimension_semantics<parallel>], iteration_bounds = array<i64: 2>, scalar_prefetch = 0 : i64, scratch_operands = 0 : i64, tpu.core_type = #tpu.core_type<tc>, window_params = [{transform_indices = @transform_0, window_bounds = array<i64: 1, 256, 128>}, {pipeline_mode = #tpu.pipeline_mode<synchronous>, transform_indices = @transform_1, window_bounds = array<i64: 128, 128>}, {pipeline_mode = #tpu.pipeline_mode<synchronous>, transform_indices = @transform_2, window_bounds = array<i64: 1, 128>}, {pipeline_mode = #tpu.pipeline_mode<synchronous>, transform_indices = @transform_3, window_bounds = array<i64: 1, 128>}, {pipeline_mode = #tpu.pipeline_mode<synchronous>, transform_indices = @transform_4, window_bounds = array<i64: 9, 128>}, {pipeline_mode = #tpu.pipeline_mode<synchronous>, transform_indices = @transform_5, window_bounds = array<i64: 1, 128>}, {pipeline_mode = #tpu.pipeline_mode<synchronous>, transform_indices = @transform_6, window_bounds = array<i64: 1, 128>}, {pipeline_mode = #tpu.pipeline_mode<synchronous>, transform_indices = @transform_7, window_bounds = array<i64: 8, 128>}, {pipeline_mode = #tpu.pipeline_mode<synchronous>, transform_indices = @transform_8, window_bounds = array<i64: 8, 1>}, {pipeline_mode = #tpu.pipeline_mode<synchronous>, transform_indices = @transform_9, window_bounds = array<i64: 8, 128>}, {pipeline_mode = #tpu.pipeline_mode<synchronous>, transform_indices = @transform_10, window_bounds = array<i64: 1, 128>}, {pipeline_mode = #tpu.pipeline_mode<synchronous>, transform_indices = @transform_11, window_bounds = array<i64: 128, 128>}, {pipeline_mode = #tpu.pipeline_mode<synchronous>, transform_indices = @transform_12, window_bounds = array<i64: 1, 128>}, {pipeline_mode = #tpu.pipeline_mode<synchronous>, transform_indices = @transform_13, window_bounds = array<i64: 1, 128>}, {transform_indices = @transform_14, window_bounds = array<i64: 1, 256, 128>}]} {
    %c0 = arith.constant 0 : index
    %c0_0 = arith.constant 0 : index
    %c0_1 = arith.constant 0 : index
    %0 = vector.load %arg1[%c0, %c0_0, %c0_1] : memref<1x256x128xbf16, #tpu.memory_space<vmem>>, vector<1x256x128xbf16>
    %1 = vector.shape_cast %0 : vector<1x256x128xbf16> to vector<256x128xbf16>
    %c0_2 = arith.constant 0 : index
    %c0_3 = arith.constant 0 : index
    %2 = vector.load %arg2[%c0_2, %c0_3] : memref<128x128xbf16, #tpu.memory_space<vmem>>, vector<128x128xbf16>
    %cst = arith.constant dense<0.000000e+00> : vector<256x128xf32>
    %3 = tpu.matmul %1, %2, %cst {dimension_numbers = #tpu.dot_dimension_numbers<[1], [0], [0], [1], [0, 0, 1, 1], [], []>} : vector<256x128xbf16>, vector<128x128xbf16>, vector<256x128xf32> -> vector<256x128xf32>
    %c0_4 = arith.constant 0 : index
    %c0_5 = arith.constant 0 : index
    %4 = vector.load %arg3[%c0_4, %c0_5] : memref<1x128xf32, #tpu.memory_space<vmem>>, vector<1x128xf32>
    %5 = vector.broadcast %4 : vector<1x128xf32> to vector<256x128xf32>
    %6 = arith.mulf %3, %5 : vector<256x128xf32>
    %c0_6 = arith.constant 0 : index
    %c0_7 = arith.constant 0 : index
    %7 = vector.load %arg4[%c0_6, %c0_7] : memref<1x128xf32, #tpu.memory_space<vmem>>, vector<1x128xf32>
    %8 = vector.broadcast %7 : vector<1x128xf32> to vector<256x128xf32>
    %9 = arith.addf %6, %8 : vector<256x128xf32>
    %10 = arith.negf %9 : vector<256x128xf32>
    %11 = math.exp %10 : vector<256x128xf32>
    %cst_8 = arith.constant 1.000000e+00 : f32
    %12 = vector.broadcast %cst_8 : f32 to vector<256x128xf32>
    %13 = arith.addf %12, %11 : vector<256x128xf32>
    %14 = arith.divf %12, %13 : vector<256x128xf32>
    %15 = arith.mulf %9, %14 : vector<256x128xf32>
    %c0_9 = arith.constant 0 : index
    %c0_10 = arith.constant 0 : index
    %16 = vector.load %arg5[%c0_9, %c0_10] : memref<9x128xf32, #tpu.memory_space<vmem>>, vector<9x128xf32>
    %17 = tpu.iota {dimensions = array<i32: 0>} : vector<256x1xi32>
    %c4_i32 = arith.constant 4 : i32
    %18 = vector.broadcast %c4_i32 : i32 to vector<256x1xi32>
    %19 = arith.shrsi %17, %18 : vector<256x1xi32>
    %c15_i32 = arith.constant 15 : i32
    %20 = vector.broadcast %c15_i32 : i32 to vector<256x1xi32>
    %21 = arith.andi %17, %20 : vector<256x1xi32>
    %c17_i32 = arith.constant 17 : i32
    %22 = tpu.dynamic_rotate %15 by %c17_i32 dim 0 : vector<256x128xf32>, i32 -> vector<256x128xf32>
    %c1_i32 = arith.constant 1 : i32
    %23 = vector.broadcast %c1_i32 : i32 to vector<256x1xi32>
    %24 = arith.cmpi sge, %19, %23 : vector<256x1xi32>
    %c1_i32_11 = arith.constant 1 : i32
    %25 = vector.broadcast %c1_i32_11 : i32 to vector<256x1xi32>
    %26 = arith.cmpi sge, %21, %25 : vector<256x1xi32>
    %27 = arith.andi %24, %26 : vector<256x1xi1>
    %28 = arith.extui %27 : vector<256x1xi1> to vector<256x1xi32>
    %29 = arith.sitofp %28 : vector<256x1xi32> to vector<256x1xf32>
    %30 = vector.broadcast %29 : vector<256x1xf32> to vector<256x128xf32>
    %31 = arith.mulf %22, %30 : vector<256x128xf32>
    %32 = vector.extract_strided_slice %16 {offsets = [0, 0], sizes = [1, 128], strides = [1, 1]} : vector<9x128xf32> to vector<1x128xf32>
    %33 = vector.broadcast %32 : vector<1x128xf32> to vector<256x128xf32>
    %34 = arith.mulf %31, %33 : vector<256x128xf32>
    %c16_i32 = arith.constant 16 : i32
    %35 = tpu.dynamic_rotate %15 by %c16_i32 dim 0 : vector<256x128xf32>, i32 -> vector<256x128xf32>
    %c1_i32_12 = arith.constant 1 : i32
    %36 = vector.broadcast %c1_i32_12 : i32 to vector<256x1xi32>
    %37 = arith.cmpi sge, %19, %36 : vector<256x1xi32>
    %38 = arith.extui %37 : vector<256x1xi1> to vector<256x1xi32>
    %39 = arith.sitofp %38 : vector<256x1xi32> to vector<256x1xf32>
    %40 = vector.broadcast %39 : vector<256x1xf32> to vector<256x128xf32>
    %41 = arith.mulf %35, %40 : vector<256x128xf32>
    %42 = vector.extract_strided_slice %16 {offsets = [1, 0], sizes = [1, 128], strides = [1, 1]} : vector<9x128xf32> to vector<1x128xf32>
    %43 = vector.broadcast %42 : vector<1x128xf32> to vector<256x128xf32>
    %44 = arith.mulf %41, %43 : vector<256x128xf32>
    %c15_i32_13 = arith.constant 15 : i32
    %45 = tpu.dynamic_rotate %15 by %c15_i32_13 dim 0 : vector<256x128xf32>, i32 -> vector<256x128xf32>
    %c1_i32_14 = arith.constant 1 : i32
    %46 = vector.broadcast %c1_i32_14 : i32 to vector<256x1xi32>
    %47 = arith.cmpi sge, %19, %46 : vector<256x1xi32>
    %c14_i32 = arith.constant 14 : i32
    %48 = vector.broadcast %c14_i32 : i32 to vector<256x1xi32>
    %49 = arith.cmpi sle, %21, %48 : vector<256x1xi32>
    %50 = arith.andi %47, %49 : vector<256x1xi1>
    %51 = arith.extui %50 : vector<256x1xi1> to vector<256x1xi32>
    %52 = arith.sitofp %51 : vector<256x1xi32> to vector<256x1xf32>
    %53 = vector.broadcast %52 : vector<256x1xf32> to vector<256x128xf32>
    %54 = arith.mulf %45, %53 : vector<256x128xf32>
    %55 = vector.extract_strided_slice %16 {offsets = [2, 0], sizes = [1, 128], strides = [1, 1]} : vector<9x128xf32> to vector<1x128xf32>
    %56 = vector.broadcast %55 : vector<1x128xf32> to vector<256x128xf32>
    %57 = arith.mulf %54, %56 : vector<256x128xf32>
    %c1_i32_15 = arith.constant 1 : i32
    %58 = tpu.dynamic_rotate %15 by %c1_i32_15 dim 0 : vector<256x128xf32>, i32 -> vector<256x128xf32>
    %c1_i32_16 = arith.constant 1 : i32
    %59 = vector.broadcast %c1_i32_16 : i32 to vector<256x1xi32>
    %60 = arith.cmpi sge, %21, %59 : vector<256x1xi32>
    %61 = arith.extui %60 : vector<256x1xi1> to vector<256x1xi32>
    %62 = arith.sitofp %61 : vector<256x1xi32> to vector<256x1xf32>
    %63 = vector.broadcast %62 : vector<256x1xf32> to vector<256x128xf32>
    %64 = arith.mulf %58, %63 : vector<256x128xf32>
    %65 = vector.extract_strided_slice %16 {offsets = [3, 0], sizes = [1, 128], strides = [1, 1]} : vector<9x128xf32> to vector<1x128xf32>
    %66 = vector.broadcast %65 : vector<1x128xf32> to vector<256x128xf32>
    %67 = arith.mulf %64, %66 : vector<256x128xf32>
    %68 = arith.addf %34, %67 : vector<256x128xf32>
    %69 = vector.extract_strided_slice %16 {offsets = [4, 0], sizes = [1, 128], strides = [1, 1]} : vector<9x128xf32> to vector<1x128xf32>
    %70 = vector.broadcast %69 : vector<1x128xf32> to vector<256x128xf32>
    %71 = arith.mulf %15, %70 : vector<256x128xf32>
    %72 = arith.addf %44, %71 : vector<256x128xf32>
    %c255_i32 = arith.constant 255 : i32
    %73 = tpu.dynamic_rotate %15 by %c255_i32 dim 0 : vector<256x128xf32>, i32 -> vector<256x128xf32>
    %c14_i32_17 = arith.constant 14 : i32
    %74 = vector.broadcast %c14_i32_17 : i32 to vector<256x1xi32>
    %75 = arith.cmpi sle, %21, %74 : vector<256x1xi32>
    %76 = arith.extui %75 : vector<256x1xi1> to vector<256x1xi32>
    %77 = arith.sitofp %76 : vector<256x1xi32> to vector<256x1xf32>
    %78 = vector.broadcast %77 : vector<256x1xf32> to vector<256x128xf32>
    %79 = arith.mulf %73, %78 : vector<256x128xf32>
    %80 = vector.extract_strided_slice %16 {offsets = [5, 0], sizes = [1, 128], strides = [1, 1]} : vector<9x128xf32> to vector<1x128xf32>
    %81 = vector.broadcast %80 : vector<1x128xf32> to vector<256x128xf32>
    %82 = arith.mulf %79, %81 : vector<256x128xf32>
    %83 = arith.addf %57, %82 : vector<256x128xf32>
    %c241_i32 = arith.constant 241 : i32
    %84 = tpu.dynamic_rotate %15 by %c241_i32 dim 0 : vector<256x128xf32>, i32 -> vector<256x128xf32>
    %c14_i32_18 = arith.constant 14 : i32
    %85 = vector.broadcast %c14_i32_18 : i32 to vector<256x1xi32>
    %86 = arith.cmpi sle, %19, %85 : vector<256x1xi32>
    %c1_i32_19 = arith.constant 1 : i32
    %87 = vector.broadcast %c1_i32_19 : i32 to vector<256x1xi32>
    %88 = arith.cmpi sge, %21, %87 : vector<256x1xi32>
    %89 = arith.andi %86, %88 : vector<256x1xi1>
    %90 = arith.extui %89 : vector<256x1xi1> to vector<256x1xi32>
    %91 = arith.sitofp %90 : vector<256x1xi32> to vector<256x1xf32>
    %92 = vector.broadcast %91 : vector<256x1xf32> to vector<256x128xf32>
    %93 = arith.mulf %84, %92 : vector<256x128xf32>
    %94 = vector.extract_strided_slice %16 {offsets = [6, 0], sizes = [1, 128], strides = [1, 1]} : vector<9x128xf32> to vector<1x128xf32>
    %95 = vector.broadcast %94 : vector<1x128xf32> to vector<256x128xf32>
    %96 = arith.mulf %93, %95 : vector<256x128xf32>
    %97 = arith.addf %68, %96 : vector<256x128xf32>
    %c240_i32 = arith.constant 240 : i32
    %98 = tpu.dynamic_rotate %15 by %c240_i32 dim 0 : vector<256x128xf32>, i32 -> vector<256x128xf32>
    %c14_i32_20 = arith.constant 14 : i32
    %99 = vector.broadcast %c14_i32_20 : i32 to vector<256x1xi32>
    %100 = arith.cmpi sle, %19, %99 : vector<256x1xi32>
    %101 = arith.extui %100 : vector<256x1xi1> to vector<256x1xi32>
    %102 = arith.sitofp %101 : vector<256x1xi32> to vector<256x1xf32>
    %103 = vector.broadcast %102 : vector<256x1xf32> to vector<256x128xf32>
    %104 = arith.mulf %98, %103 : vector<256x128xf32>
    %105 = vector.extract_strided_slice %16 {offsets = [7, 0], sizes = [1, 128], strides = [1, 1]} : vector<9x128xf32> to vector<1x128xf32>
    %106 = vector.broadcast %105 : vector<1x128xf32> to vector<256x128xf32>
    %107 = arith.mulf %104, %106 : vector<256x128xf32>
    %108 = arith.addf %72, %107 : vector<256x128xf32>
    %c239_i32 = arith.constant 239 : i32
    %109 = tpu.dynamic_rotate %15 by %c239_i32 dim 0 : vector<256x128xf32>, i32 -> vector<256x128xf32>
    %c14_i32_21 = arith.constant 14 : i32
    %110 = vector.broadcast %c14_i32_21 : i32 to vector<256x1xi32>
    %111 = arith.cmpi sle, %19, %110 : vector<256x1xi32>
    %c14_i32_22 = arith.constant 14 : i32
    %112 = vector.broadcast %c14_i32_22 : i32 to vector<256x1xi32>
    %113 = arith.cmpi sle, %21, %112 : vector<256x1xi32>
    %114 = arith.andi %111, %113 : vector<256x1xi1>
    %115 = arith.extui %114 : vector<256x1xi1> to vector<256x1xi32>
    %116 = arith.sitofp %115 : vector<256x1xi32> to vector<256x1xf32>
    %117 = vector.broadcast %116 : vector<256x1xf32> to vector<256x128xf32>
    %118 = arith.mulf %109, %117 : vector<256x128xf32>
    %119 = vector.extract_strided_slice %16 {offsets = [8, 0], sizes = [1, 128], strides = [1, 1]} : vector<9x128xf32> to vector<1x128xf32>
    %120 = vector.broadcast %119 : vector<1x128xf32> to vector<256x128xf32>
    %121 = arith.mulf %118, %120 : vector<256x128xf32>
    %122 = arith.addf %83, %121 : vector<256x128xf32>
    %123 = arith.addf %97, %108 : vector<256x128xf32>
    %124 = arith.addf %123, %122 : vector<256x128xf32>
    %c0_23 = arith.constant 0 : index
    %c0_24 = arith.constant 0 : index
    %125 = vector.load %arg6[%c0_23, %c0_24] : memref<1x128xf32, #tpu.memory_space<vmem>>, vector<1x128xf32>
    %126 = vector.broadcast %125 : vector<1x128xf32> to vector<256x128xf32>
    %127 = arith.mulf %124, %126 : vector<256x128xf32>
    %c0_25 = arith.constant 0 : index
    %c0_26 = arith.constant 0 : index
    %128 = vector.load %arg7[%c0_25, %c0_26] : memref<1x128xf32, #tpu.memory_space<vmem>>, vector<1x128xf32>
    %129 = vector.broadcast %128 : vector<1x128xf32> to vector<256x128xf32>
    %130 = arith.addf %127, %129 : vector<256x128xf32>
    %131 = arith.negf %130 : vector<256x128xf32>
    %132 = math.exp %131 : vector<256x128xf32>
    %cst_27 = arith.constant 1.000000e+00 : f32
    %133 = vector.broadcast %cst_27 : f32 to vector<256x128xf32>
    %134 = arith.addf %133, %132 : vector<256x128xf32>
    %135 = arith.divf %133, %134 : vector<256x128xf32>
    %136 = arith.mulf %130, %135 : vector<256x128xf32>
    %cst_28 = arith.constant dense<0.000000e+00> : vector<128xf32>
    %137 = vector.multi_reduction <add>, %136, %cst_28 [0] : vector<256x128xf32> to vector<128xf32>
    %138 = vector.shape_cast %137 : vector<128xf32> to vector<1x128xf32>
    %cst_29 = arith.constant 2.560000e+02 : f32
    %139 = vector.broadcast %cst_29 : f32 to vector<1x128xf32>
    %140 = arith.divf %138, %139 : vector<1x128xf32>
    %c0_30 = arith.constant 0 : index
    %c0_31 = arith.constant 0 : index
    %141 = vector.load %arg8[%c0_30, %c0_31] : memref<8x128xf32, #tpu.memory_space<vmem>>, vector<8x128xf32>
    %142 = vector.broadcast %140 : vector<1x128xf32> to vector<8x128xf32>
    %143 = arith.mulf %141, %142 : vector<8x128xf32>
    %cst_32 = arith.constant dense<0.000000e+00> : vector<8xf32>
    %144 = vector.multi_reduction <add>, %143, %cst_32 [1] : vector<8x128xf32> to vector<8xf32>
    %145 = vector.shape_cast %144 : vector<8xf32> to vector<8x1xf32>
    %c0_33 = arith.constant 0 : index
    %c0_34 = arith.constant 0 : index
    %146 = vector.load %arg9[%c0_33, %c0_34] : memref<8x1xf32, #tpu.memory_space<vmem>>, vector<8x1xf32>
    %147 = arith.addf %145, %146 : vector<8x1xf32>
    %148 = arith.negf %147 : vector<8x1xf32>
    %149 = math.exp %148 : vector<8x1xf32>
    %cst_35 = arith.constant 1.000000e+00 : f32
    %150 = vector.broadcast %cst_35 : f32 to vector<8x1xf32>
    %151 = arith.addf %150, %149 : vector<8x1xf32>
    %152 = arith.divf %150, %151 : vector<8x1xf32>
    %153 = arith.mulf %147, %152 : vector<8x1xf32>
    %c0_36 = arith.constant 0 : index
    %c0_37 = arith.constant 0 : index
    %154 = vector.load %arg10[%c0_36, %c0_37] : memref<8x128xf32, #tpu.memory_space<vmem>>, vector<8x128xf32>
    %155 = vector.broadcast %153 : vector<8x1xf32> to vector<8x128xf32>
    %156 = arith.mulf %154, %155 : vector<8x128xf32>
    %cst_38 = arith.constant dense<0.000000e+00> : vector<128xf32>
    %157 = vector.multi_reduction <add>, %156, %cst_38 [0] : vector<8x128xf32> to vector<128xf32>
    %158 = vector.shape_cast %157 : vector<128xf32> to vector<1x128xf32>
    %c0_39 = arith.constant 0 : index
    %c0_40 = arith.constant 0 : index
    %159 = vector.load %arg11[%c0_39, %c0_40] : memref<1x128xf32, #tpu.memory_space<vmem>>, vector<1x128xf32>
    %160 = arith.addf %158, %159 : vector<1x128xf32>
    %161 = arith.negf %160 : vector<1x128xf32>
    %162 = math.exp %161 : vector<1x128xf32>
    %cst_41 = arith.constant 1.000000e+00 : f32
    %163 = vector.broadcast %cst_41 : f32 to vector<1x128xf32>
    %164 = arith.addf %163, %162 : vector<1x128xf32>
    %165 = arith.divf %163, %164 : vector<1x128xf32>
    %166 = vector.broadcast %165 : vector<1x128xf32> to vector<256x128xf32>
    %167 = arith.mulf %136, %166 : vector<256x128xf32>
    %168 = arith.truncf %167 : vector<256x128xf32> to vector<256x128xbf16>
    %c0_42 = arith.constant 0 : index
    %c0_43 = arith.constant 0 : index
    %169 = vector.load %arg12[%c0_42, %c0_43] : memref<128x128xbf16, #tpu.memory_space<vmem>>, vector<128x128xbf16>
    %cst_44 = arith.constant dense<0.000000e+00> : vector<256x128xf32>
    %170 = tpu.matmul %168, %169, %cst_44 {dimension_numbers = #tpu.dot_dimension_numbers<[1], [0], [0], [1], [0, 0, 1, 1], [], []>} : vector<256x128xbf16>, vector<128x128xbf16>, vector<256x128xf32> -> vector<256x128xf32>
    %c0_45 = arith.constant 0 : index
    %c0_46 = arith.constant 0 : index
    %171 = vector.load %arg13[%c0_45, %c0_46] : memref<1x128xf32, #tpu.memory_space<vmem>>, vector<1x128xf32>
    %172 = vector.broadcast %171 : vector<1x128xf32> to vector<256x128xf32>
    %173 = arith.mulf %170, %172 : vector<256x128xf32>
    %c0_47 = arith.constant 0 : index
    %c0_48 = arith.constant 0 : index
    %174 = vector.load %arg14[%c0_47, %c0_48] : memref<1x128xf32, #tpu.memory_space<vmem>>, vector<1x128xf32>
    %175 = vector.broadcast %174 : vector<1x128xf32> to vector<256x128xf32>
    %176 = arith.addf %173, %175 : vector<256x128xf32>
    %177 = arith.truncf %176 : vector<256x128xf32> to vector<256x128xbf16>
    %c0_49 = arith.constant 0 : index
    %c0_50 = arith.constant 0 : index
    %c0_51 = arith.constant 0 : index
    %178 = vector.load %arg15[%c0_49, %c0_50, %c0_51] : memref<1x256x128xbf16, #tpu.memory_space<vmem>>, vector<1x256x128xbf16>
    %179 = vector.shape_cast %178 : vector<1x256x128xbf16> to vector<256x128xbf16>
    %180 = vector.shape_cast %177 : vector<256x128xbf16> to vector<1x256x128xbf16>
    tpu.vector_store %arg15[%c0_49, %c0_50, %c0_51], %180 {strides = array<i32>} : memref<1x256x128xbf16, #tpu.memory_space<vmem>>, vector<1x256x128xbf16>,
    return
  }
  func.func @transform_0(%arg0: i32) -> (i32, i32, i32) {
    %c0_i32 = arith.constant 0 : i32
    %c0_i32_0 = arith.constant 0 : i32
    %c0_i32_1 = arith.constant 0 : i32
    return %arg0, %c0_i32, %c0_i32_0 : i32, i32, i32
  }
  func.func @transform_1(%arg0: i32) -> (i32, i32) {
    %c0_i32 = arith.constant 0 : i32
    %c0_i32_0 = arith.constant 0 : i32
    %c0_i32_1 = arith.constant 0 : i32
    return %c0_i32, %c0_i32_0 : i32, i32
  }
  func.func @transform_2(%arg0: i32) -> (i32, i32) {
    %c0_i32 = arith.constant 0 : i32
    %c0_i32_0 = arith.constant 0 : i32
    %c0_i32_1 = arith.constant 0 : i32
    return %c0_i32, %c0_i32_0 : i32, i32
  }
  func.func @transform_3(%arg0: i32) -> (i32, i32) {
    %c0_i32 = arith.constant 0 : i32
    %c0_i32_0 = arith.constant 0 : i32
    %c0_i32_1 = arith.constant 0 : i32
    return %c0_i32, %c0_i32_0 : i32, i32
  }
  func.func @transform_4(%arg0: i32) -> (i32, i32) {
    %c0_i32 = arith.constant 0 : i32
    %c0_i32_0 = arith.constant 0 : i32
    %c0_i32_1 = arith.constant 0 : i32
    return %c0_i32, %c0_i32_0 : i32, i32
  }
  func.func @transform_5(%arg0: i32) -> (i32, i32) {
    %c0_i32 = arith.constant 0 : i32
    %c0_i32_0 = arith.constant 0 : i32
    %c0_i32_1 = arith.constant 0 : i32
    return %c0_i32, %c0_i32_0 : i32, i32
  }
  func.func @transform_6(%arg0: i32) -> (i32, i32) {
    %c0_i32 = arith.constant 0 : i32
    %c0_i32_0 = arith.constant 0 : i32
    %c0_i32_1 = arith.constant 0 : i32
    return %c0_i32, %c0_i32_0 : i32, i32
  }
  func.func @transform_7(%arg0: i32) -> (i32, i32) {
    %c0_i32 = arith.constant 0 : i32
    %c0_i32_0 = arith.constant 0 : i32
    %c0_i32_1 = arith.constant 0 : i32
    return %c0_i32, %c0_i32_0 : i32, i32
  }
  func.func @transform_8(%arg0: i32) -> (i32, i32) {
    %c0_i32 = arith.constant 0 : i32
    %c0_i32_0 = arith.constant 0 : i32
    %c0_i32_1 = arith.constant 0 : i32
    return %c0_i32, %c0_i32_0 : i32, i32
  }
  func.func @transform_9(%arg0: i32) -> (i32, i32) {
    %c0_i32 = arith.constant 0 : i32
    %c0_i32_0 = arith.constant 0 : i32
    %c0_i32_1 = arith.constant 0 : i32
    return %c0_i32, %c0_i32_0 : i32, i32
  }
  func.func @transform_10(%arg0: i32) -> (i32, i32) {
    %c0_i32 = arith.constant 0 : i32
    %c0_i32_0 = arith.constant 0 : i32
    %c0_i32_1 = arith.constant 0 : i32
    return %c0_i32, %c0_i32_0 : i32, i32
  }
  func.func @transform_11(%arg0: i32) -> (i32, i32) {
    %c0_i32 = arith.constant 0 : i32
    %c0_i32_0 = arith.constant 0 : i32
    %c0_i32_1 = arith.constant 0 : i32
    return %c0_i32, %c0_i32_0 : i32, i32
  }
  func.func @transform_12(%arg0: i32) -> (i32, i32) {
    %c0_i32 = arith.constant 0 : i32
    %c0_i32_0 = arith.constant 0 : i32
    %c0_i32_1 = arith.constant 0 : i32
    return %c0_i32, %c0_i32_0 : i32, i32
  }
  func.func @transform_13(%arg0: i32) -> (i32, i32) {
    %c0_i32 = arith.constant 0 : i32
    %c0_i32_0 = arith.constant 0 : i32
    %c0_i32_1 = arith.constant 0 : i32
    return %c0_i32, %c0_i32_0 : i32, i32
  }
  func.func @transform_14(%arg0: i32) -> (i32, i32, i32) {
    %c0_i32 = arith.constant 0 : i32
    %c0_i32_0 = arith.constant 0 : i32
    %c0_i32_1 = arith.constant 0 : i32
    return %arg0, %c0_i32, %c0_i32_0 : i32, i32, i32
  }
}

module attributes {stable_mosaic.version = 11 : i64} {
  func.func @_mbconv_kernel(%arg0: i32, %arg1: memref<1x4x64x128xbf16, #tpu.memory_space<vmem>>, %arg2: memref<128x128xbf16, #tpu.memory_space<vmem>>, %arg3: memref<1x128xf32, #tpu.memory_space<vmem>>, %arg4: memref<1x128xf32, #tpu.memory_space<vmem>>, %arg5: memref<9x128xf32, #tpu.memory_space<vmem>>, %arg6: memref<1x128xf32, #tpu.memory_space<vmem>>, %arg7: memref<1x128xf32, #tpu.memory_space<vmem>>, %arg8: memref<8x128xf32, #tpu.memory_space<vmem>>, %arg9: memref<8x1xf32, #tpu.memory_space<vmem>>, %arg10: memref<8x128xf32, #tpu.memory_space<vmem>>, %arg11: memref<1x128xf32, #tpu.memory_space<vmem>>, %arg12: memref<128x128xbf16, #tpu.memory_space<vmem>>, %arg13: memref<1x128xf32, #tpu.memory_space<vmem>>, %arg14: memref<1x128xf32, #tpu.memory_space<vmem>>, %arg15: memref<1x64x128xbf16, #tpu.memory_space<vmem>>) attributes {dimension_semantics = [#tpu.dimension_semantics<parallel>], iteration_bounds = array<i64: 2>, scalar_prefetch = 0 : i64, scratch_operands = 0 : i64, tpu.core_type = #tpu.core_type<tc>, window_params = [{transform_indices = @transform_0, window_bounds = array<i64: 1, 4, 64, 128>}, {pipeline_mode = #tpu.pipeline_mode<synchronous>, transform_indices = @transform_1, window_bounds = array<i64: 128, 128>}, {pipeline_mode = #tpu.pipeline_mode<synchronous>, transform_indices = @transform_2, window_bounds = array<i64: 1, 128>}, {pipeline_mode = #tpu.pipeline_mode<synchronous>, transform_indices = @transform_3, window_bounds = array<i64: 1, 128>}, {pipeline_mode = #tpu.pipeline_mode<synchronous>, transform_indices = @transform_4, window_bounds = array<i64: 9, 128>}, {pipeline_mode = #tpu.pipeline_mode<synchronous>, transform_indices = @transform_5, window_bounds = array<i64: 1, 128>}, {pipeline_mode = #tpu.pipeline_mode<synchronous>, transform_indices = @transform_6, window_bounds = array<i64: 1, 128>}, {pipeline_mode = #tpu.pipeline_mode<synchronous>, transform_indices = @transform_7, window_bounds = array<i64: 8, 128>}, {pipeline_mode = #tpu.pipeline_mode<synchronous>, transform_indices = @transform_8, window_bounds = array<i64: 8, 1>}, {pipeline_mode = #tpu.pipeline_mode<synchronous>, transform_indices = @transform_9, window_bounds = array<i64: 8, 128>}, {pipeline_mode = #tpu.pipeline_mode<synchronous>, transform_indices = @transform_10, window_bounds = array<i64: 1, 128>}, {pipeline_mode = #tpu.pipeline_mode<synchronous>, transform_indices = @transform_11, window_bounds = array<i64: 128, 128>}, {pipeline_mode = #tpu.pipeline_mode<synchronous>, transform_indices = @transform_12, window_bounds = array<i64: 1, 128>}, {pipeline_mode = #tpu.pipeline_mode<synchronous>, transform_indices = @transform_13, window_bounds = array<i64: 1, 128>}, {transform_indices = @transform_14, window_bounds = array<i64: 1, 64, 128>}]} {
    %c0 = arith.constant 0 : index
    %c0_0 = arith.constant 0 : index
    %c0_1 = arith.constant 0 : index
    %c0_2 = arith.constant 0 : index
    %0 = vector.load %arg1[%c0, %c0_0, %c0_1, %c0_2] : memref<1x4x64x128xbf16, #tpu.memory_space<vmem>>, vector<1x4x64x128xbf16>
    %1 = vector.shape_cast %0 : vector<1x4x64x128xbf16> to vector<4x64x128xbf16>
    %2 = vector.shape_cast %1 : vector<4x64x128xbf16> to vector<256x128xbf16>
    %c0_3 = arith.constant 0 : index
    %c0_4 = arith.constant 0 : index
    %3 = vector.load %arg2[%c0_3, %c0_4] : memref<128x128xbf16, #tpu.memory_space<vmem>>, vector<128x128xbf16>
    %cst = arith.constant dense<0.000000e+00> : vector<256x128xf32>
    %4 = tpu.matmul %2, %3, %cst {dimension_numbers = #tpu.dot_dimension_numbers<[1], [0], [0], [1], [0, 0, 1, 1], [], []>} : vector<256x128xbf16>, vector<128x128xbf16>, vector<256x128xf32> -> vector<256x128xf32>
    %c0_5 = arith.constant 0 : index
    %c0_6 = arith.constant 0 : index
    %5 = vector.load %arg3[%c0_5, %c0_6] : memref<1x128xf32, #tpu.memory_space<vmem>>, vector<1x128xf32>
    %6 = vector.broadcast %5 : vector<1x128xf32> to vector<256x128xf32>
    %7 = arith.mulf %4, %6 : vector<256x128xf32>
    %c0_7 = arith.constant 0 : index
    %c0_8 = arith.constant 0 : index
    %8 = vector.load %arg4[%c0_7, %c0_8] : memref<1x128xf32, #tpu.memory_space<vmem>>, vector<1x128xf32>
    %9 = vector.broadcast %8 : vector<1x128xf32> to vector<256x128xf32>
    %10 = arith.addf %7, %9 : vector<256x128xf32>
    %11 = arith.negf %10 : vector<256x128xf32>
    %12 = math.exp %11 : vector<256x128xf32>
    %cst_9 = arith.constant 1.000000e+00 : f32
    %13 = vector.broadcast %cst_9 : f32 to vector<256x128xf32>
    %14 = arith.addf %13, %12 : vector<256x128xf32>
    %15 = arith.divf %13, %14 : vector<256x128xf32>
    %16 = arith.mulf %10, %15 : vector<256x128xf32>
    %c0_10 = arith.constant 0 : index
    %c0_11 = arith.constant 0 : index
    %17 = vector.load %arg5[%c0_10, %c0_11] : memref<9x128xf32, #tpu.memory_space<vmem>>, vector<9x128xf32>
    %18 = tpu.iota {dimensions = array<i32: 0>} : vector<64x1xi32>
    %c3_i32 = arith.constant 3 : i32
    %19 = vector.broadcast %c3_i32 : i32 to vector<64x1xi32>
    %20 = arith.shrsi %18, %19 : vector<64x1xi32>
    %c7_i32 = arith.constant 7 : i32
    %21 = vector.broadcast %c7_i32 : i32 to vector<64x1xi32>
    %22 = arith.andi %18, %21 : vector<64x1xi32>
    %23 = vector.shape_cast %16 : vector<256x128xf32> to vector<4x64x128xf32>
    %24 = vector.extract_strided_slice %23 {offsets = [3, 0, 0], sizes = [1, 64, 128], strides = [1, 1, 1]} : vector<4x64x128xf32> to vector<1x64x128xf32>
    %25 = vector.shape_cast %24 : vector<1x64x128xf32> to vector<64x128xf32>
    %c9_i32 = arith.constant 9 : i32
    %26 = tpu.dynamic_rotate %25 by %c9_i32 dim 0 : vector<64x128xf32>, i32 -> vector<64x128xf32>
    %c1_i32 = arith.constant 1 : i32
    %27 = vector.broadcast %c1_i32 : i32 to vector<64x1xi32>
    %28 = arith.cmpi sge, %20, %27 : vector<64x1xi32>
    %c1_i32_12 = arith.constant 1 : i32
    %29 = vector.broadcast %c1_i32_12 : i32 to vector<64x1xi32>
    %30 = arith.cmpi sge, %22, %29 : vector<64x1xi32>
    %31 = arith.andi %28, %30 : vector<64x1xi1>
    %32 = arith.extui %31 : vector<64x1xi1> to vector<64x1xi32>
    %33 = arith.sitofp %32 : vector<64x1xi32> to vector<64x1xf32>
    %34 = vector.broadcast %33 : vector<64x1xf32> to vector<64x128xf32>
    %35 = arith.mulf %26, %34 : vector<64x128xf32>
    %36 = vector.extract_strided_slice %17 {offsets = [0, 0], sizes = [1, 128], strides = [1, 1]} : vector<9x128xf32> to vector<1x128xf32>
    %37 = vector.broadcast %36 : vector<1x128xf32> to vector<64x128xf32>
    %38 = arith.mulf %35, %37 : vector<64x128xf32>
    %39 = vector.extract_strided_slice %23 {offsets = [2, 0, 0], sizes = [1, 64, 128], strides = [1, 1, 1]} : vector<4x64x128xf32> to vector<1x64x128xf32>
    %40 = vector.shape_cast %39 : vector<1x64x128xf32> to vector<64x128xf32>
    %c8_i32 = arith.constant 8 : i32
    %41 = tpu.dynamic_rotate %40 by %c8_i32 dim 0 : vector<64x128xf32>, i32 -> vector<64x128xf32>
    %c1_i32_13 = arith.constant 1 : i32
    %42 = vector.broadcast %c1_i32_13 : i32 to vector<64x1xi32>
    %43 = arith.cmpi sge, %20, %42 : vector<64x1xi32>
    %44 = arith.extui %43 : vector<64x1xi1> to vector<64x1xi32>
    %45 = arith.sitofp %44 : vector<64x1xi32> to vector<64x1xf32>
    %46 = vector.broadcast %45 : vector<64x1xf32> to vector<64x128xf32>
    %47 = arith.mulf %41, %46 : vector<64x128xf32>
    %48 = vector.extract_strided_slice %17 {offsets = [1, 0], sizes = [1, 128], strides = [1, 1]} : vector<9x128xf32> to vector<1x128xf32>
    %49 = vector.broadcast %48 : vector<1x128xf32> to vector<64x128xf32>
    %50 = arith.mulf %47, %49 : vector<64x128xf32>
    %51 = vector.extract_strided_slice %23 {offsets = [3, 0, 0], sizes = [1, 64, 128], strides = [1, 1, 1]} : vector<4x64x128xf32> to vector<1x64x128xf32>
    %52 = vector.shape_cast %51 : vector<1x64x128xf32> to vector<64x128xf32>
    %c8_i32_14 = arith.constant 8 : i32
    %53 = tpu.dynamic_rotate %52 by %c8_i32_14 dim 0 : vector<64x128xf32>, i32 -> vector<64x128xf32>
    %c1_i32_15 = arith.constant 1 : i32
    %54 = vector.broadcast %c1_i32_15 : i32 to vector<64x1xi32>
    %55 = arith.cmpi sge, %20, %54 : vector<64x1xi32>
    %56 = arith.extui %55 : vector<64x1xi1> to vector<64x1xi32>
    %57 = arith.sitofp %56 : vector<64x1xi32> to vector<64x1xf32>
    %58 = vector.broadcast %57 : vector<64x1xf32> to vector<64x128xf32>
    %59 = arith.mulf %53, %58 : vector<64x128xf32>
    %60 = vector.extract_strided_slice %17 {offsets = [2, 0], sizes = [1, 128], strides = [1, 1]} : vector<9x128xf32> to vector<1x128xf32>
    %61 = vector.broadcast %60 : vector<1x128xf32> to vector<64x128xf32>
    %62 = arith.mulf %59, %61 : vector<64x128xf32>
    %63 = vector.extract_strided_slice %23 {offsets = [1, 0, 0], sizes = [1, 64, 128], strides = [1, 1, 1]} : vector<4x64x128xf32> to vector<1x64x128xf32>
    %64 = vector.shape_cast %63 : vector<1x64x128xf32> to vector<64x128xf32>
    %c1_i32_16 = arith.constant 1 : i32
    %65 = tpu.dynamic_rotate %64 by %c1_i32_16 dim 0 : vector<64x128xf32>, i32 -> vector<64x128xf32>
    %c1_i32_17 = arith.constant 1 : i32
    %66 = vector.broadcast %c1_i32_17 : i32 to vector<64x1xi32>
    %67 = arith.cmpi sge, %22, %66 : vector<64x1xi32>
    %68 = arith.extui %67 : vector<64x1xi1> to vector<64x1xi32>
    %69 = arith.sitofp %68 : vector<64x1xi32> to vector<64x1xf32>
    %70 = vector.broadcast %69 : vector<64x1xf32> to vector<64x128xf32>
    %71 = arith.mulf %65, %70 : vector<64x128xf32>
    %72 = vector.extract_strided_slice %17 {offsets = [3, 0], sizes = [1, 128], strides = [1, 1]} : vector<9x128xf32> to vector<1x128xf32>
    %73 = vector.broadcast %72 : vector<1x128xf32> to vector<64x128xf32>
    %74 = arith.mulf %71, %73 : vector<64x128xf32>
    %75 = arith.addf %38, %74 : vector<64x128xf32>
    %76 = vector.extract_strided_slice %23 {offsets = [0, 0, 0], sizes = [1, 64, 128], strides = [1, 1, 1]} : vector<4x64x128xf32> to vector<1x64x128xf32>
    %77 = vector.shape_cast %76 : vector<1x64x128xf32> to vector<64x128xf32>
    %78 = vector.extract_strided_slice %17 {offsets = [4, 0], sizes = [1, 128], strides = [1, 1]} : vector<9x128xf32> to vector<1x128xf32>
    %79 = vector.broadcast %78 : vector<1x128xf32> to vector<64x128xf32>
    %80 = arith.mulf %77, %79 : vector<64x128xf32>
    %81 = arith.addf %50, %80 : vector<64x128xf32>
    %82 = vector.extract_strided_slice %23 {offsets = [1, 0, 0], sizes = [1, 64, 128], strides = [1, 1, 1]} : vector<4x64x128xf32> to vector<1x64x128xf32>
    %83 = vector.shape_cast %82 : vector<1x64x128xf32> to vector<64x128xf32>
    %84 = vector.extract_strided_slice %17 {offsets = [5, 0], sizes = [1, 128], strides = [1, 1]} : vector<9x128xf32> to vector<1x128xf32>
    %85 = vector.broadcast %84 : vector<1x128xf32> to vector<64x128xf32>
    %86 = arith.mulf %83, %85 : vector<64x128xf32>
    %87 = arith.addf %62, %86 : vector<64x128xf32>
    %88 = vector.extract_strided_slice %23 {offsets = [3, 0, 0], sizes = [1, 64, 128], strides = [1, 1, 1]} : vector<4x64x128xf32> to vector<1x64x128xf32>
    %89 = vector.shape_cast %88 : vector<1x64x128xf32> to vector<64x128xf32>
    %c1_i32_18 = arith.constant 1 : i32
    %90 = tpu.dynamic_rotate %89 by %c1_i32_18 dim 0 : vector<64x128xf32>, i32 -> vector<64x128xf32>
    %c1_i32_19 = arith.constant 1 : i32
    %91 = vector.broadcast %c1_i32_19 : i32 to vector<64x1xi32>
    %92 = arith.cmpi sge, %22, %91 : vector<64x1xi32>
    %93 = arith.extui %92 : vector<64x1xi1> to vector<64x1xi32>
    %94 = arith.sitofp %93 : vector<64x1xi32> to vector<64x1xf32>
    %95 = vector.broadcast %94 : vector<64x1xf32> to vector<64x128xf32>
    %96 = arith.mulf %90, %95 : vector<64x128xf32>
    %97 = vector.extract_strided_slice %17 {offsets = [6, 0], sizes = [1, 128], strides = [1, 1]} : vector<9x128xf32> to vector<1x128xf32>
    %98 = vector.broadcast %97 : vector<1x128xf32> to vector<64x128xf32>
    %99 = arith.mulf %96, %98 : vector<64x128xf32>
    %100 = arith.addf %75, %99 : vector<64x128xf32>
    %101 = vector.extract_strided_slice %23 {offsets = [2, 0, 0], sizes = [1, 64, 128], strides = [1, 1, 1]} : vector<4x64x128xf32> to vector<1x64x128xf32>
    %102 = vector.shape_cast %101 : vector<1x64x128xf32> to vector<64x128xf32>
    %103 = vector.extract_strided_slice %17 {offsets = [7, 0], sizes = [1, 128], strides = [1, 1]} : vector<9x128xf32> to vector<1x128xf32>
    %104 = vector.broadcast %103 : vector<1x128xf32> to vector<64x128xf32>
    %105 = arith.mulf %102, %104 : vector<64x128xf32>
    %106 = arith.addf %81, %105 : vector<64x128xf32>
    %107 = vector.extract_strided_slice %23 {offsets = [3, 0, 0], sizes = [1, 64, 128], strides = [1, 1, 1]} : vector<4x64x128xf32> to vector<1x64x128xf32>
    %108 = vector.shape_cast %107 : vector<1x64x128xf32> to vector<64x128xf32>
    %109 = vector.extract_strided_slice %17 {offsets = [8, 0], sizes = [1, 128], strides = [1, 1]} : vector<9x128xf32> to vector<1x128xf32>
    %110 = vector.broadcast %109 : vector<1x128xf32> to vector<64x128xf32>
    %111 = arith.mulf %108, %110 : vector<64x128xf32>
    %112 = arith.addf %87, %111 : vector<64x128xf32>
    %113 = arith.addf %100, %106 : vector<64x128xf32>
    %114 = arith.addf %113, %112 : vector<64x128xf32>
    %c0_20 = arith.constant 0 : index
    %c0_21 = arith.constant 0 : index
    %115 = vector.load %arg6[%c0_20, %c0_21] : memref<1x128xf32, #tpu.memory_space<vmem>>, vector<1x128xf32>
    %116 = vector.broadcast %115 : vector<1x128xf32> to vector<64x128xf32>
    %117 = arith.mulf %114, %116 : vector<64x128xf32>
    %c0_22 = arith.constant 0 : index
    %c0_23 = arith.constant 0 : index
    %118 = vector.load %arg7[%c0_22, %c0_23] : memref<1x128xf32, #tpu.memory_space<vmem>>, vector<1x128xf32>
    %119 = vector.broadcast %118 : vector<1x128xf32> to vector<64x128xf32>
    %120 = arith.addf %117, %119 : vector<64x128xf32>
    %121 = arith.negf %120 : vector<64x128xf32>
    %122 = math.exp %121 : vector<64x128xf32>
    %cst_24 = arith.constant 1.000000e+00 : f32
    %123 = vector.broadcast %cst_24 : f32 to vector<64x128xf32>
    %124 = arith.addf %123, %122 : vector<64x128xf32>
    %125 = arith.divf %123, %124 : vector<64x128xf32>
    %126 = arith.mulf %120, %125 : vector<64x128xf32>
    %cst_25 = arith.constant dense<0.000000e+00> : vector<128xf32>
    %127 = vector.multi_reduction <add>, %126, %cst_25 [0] : vector<64x128xf32> to vector<128xf32>
    %128 = vector.shape_cast %127 : vector<128xf32> to vector<1x128xf32>
    %cst_26 = arith.constant 6.400000e+01 : f32
    %129 = vector.broadcast %cst_26 : f32 to vector<1x128xf32>
    %130 = arith.divf %128, %129 : vector<1x128xf32>
    %c0_27 = arith.constant 0 : index
    %c0_28 = arith.constant 0 : index
    %131 = vector.load %arg8[%c0_27, %c0_28] : memref<8x128xf32, #tpu.memory_space<vmem>>, vector<8x128xf32>
    %132 = vector.broadcast %130 : vector<1x128xf32> to vector<8x128xf32>
    %133 = arith.mulf %131, %132 : vector<8x128xf32>
    %cst_29 = arith.constant dense<0.000000e+00> : vector<8xf32>
    %134 = vector.multi_reduction <add>, %133, %cst_29 [1] : vector<8x128xf32> to vector<8xf32>
    %135 = vector.shape_cast %134 : vector<8xf32> to vector<8x1xf32>
    %c0_30 = arith.constant 0 : index
    %c0_31 = arith.constant 0 : index
    %136 = vector.load %arg9[%c0_30, %c0_31] : memref<8x1xf32, #tpu.memory_space<vmem>>, vector<8x1xf32>
    %137 = arith.addf %135, %136 : vector<8x1xf32>
    %138 = arith.negf %137 : vector<8x1xf32>
    %139 = math.exp %138 : vector<8x1xf32>
    %cst_32 = arith.constant 1.000000e+00 : f32
    %140 = vector.broadcast %cst_32 : f32 to vector<8x1xf32>
    %141 = arith.addf %140, %139 : vector<8x1xf32>
    %142 = arith.divf %140, %141 : vector<8x1xf32>
    %143 = arith.mulf %137, %142 : vector<8x1xf32>
    %c0_33 = arith.constant 0 : index
    %c0_34 = arith.constant 0 : index
    %144 = vector.load %arg10[%c0_33, %c0_34] : memref<8x128xf32, #tpu.memory_space<vmem>>, vector<8x128xf32>
    %145 = vector.broadcast %143 : vector<8x1xf32> to vector<8x128xf32>
    %146 = arith.mulf %144, %145 : vector<8x128xf32>
    %cst_35 = arith.constant dense<0.000000e+00> : vector<128xf32>
    %147 = vector.multi_reduction <add>, %146, %cst_35 [0] : vector<8x128xf32> to vector<128xf32>
    %148 = vector.shape_cast %147 : vector<128xf32> to vector<1x128xf32>
    %c0_36 = arith.constant 0 : index
    %c0_37 = arith.constant 0 : index
    %149 = vector.load %arg11[%c0_36, %c0_37] : memref<1x128xf32, #tpu.memory_space<vmem>>, vector<1x128xf32>
    %150 = arith.addf %148, %149 : vector<1x128xf32>
    %151 = arith.negf %150 : vector<1x128xf32>
    %152 = math.exp %151 : vector<1x128xf32>
    %cst_38 = arith.constant 1.000000e+00 : f32
    %153 = vector.broadcast %cst_38 : f32 to vector<1x128xf32>
    %154 = arith.addf %153, %152 : vector<1x128xf32>
    %155 = arith.divf %153, %154 : vector<1x128xf32>
    %156 = vector.broadcast %155 : vector<1x128xf32> to vector<64x128xf32>
    %157 = arith.mulf %126, %156 : vector<64x128xf32>
    %158 = arith.truncf %157 : vector<64x128xf32> to vector<64x128xbf16>
    %c0_39 = arith.constant 0 : index
    %c0_40 = arith.constant 0 : index
    %159 = vector.load %arg12[%c0_39, %c0_40] : memref<128x128xbf16, #tpu.memory_space<vmem>>, vector<128x128xbf16>
    %cst_41 = arith.constant dense<0.000000e+00> : vector<64x128xf32>
    %160 = tpu.matmul %158, %159, %cst_41 {dimension_numbers = #tpu.dot_dimension_numbers<[1], [0], [0], [1], [0, 0, 1, 1], [], []>} : vector<64x128xbf16>, vector<128x128xbf16>, vector<64x128xf32> -> vector<64x128xf32>
    %c0_42 = arith.constant 0 : index
    %c0_43 = arith.constant 0 : index
    %161 = vector.load %arg13[%c0_42, %c0_43] : memref<1x128xf32, #tpu.memory_space<vmem>>, vector<1x128xf32>
    %162 = vector.broadcast %161 : vector<1x128xf32> to vector<64x128xf32>
    %163 = arith.mulf %160, %162 : vector<64x128xf32>
    %c0_44 = arith.constant 0 : index
    %c0_45 = arith.constant 0 : index
    %164 = vector.load %arg14[%c0_44, %c0_45] : memref<1x128xf32, #tpu.memory_space<vmem>>, vector<1x128xf32>
    %165 = vector.broadcast %164 : vector<1x128xf32> to vector<64x128xf32>
    %166 = arith.addf %163, %165 : vector<64x128xf32>
    %167 = arith.truncf %166 : vector<64x128xf32> to vector<64x128xbf16>
    %c0_46 = arith.constant 0 : index
    %c0_47 = arith.constant 0 : index
    %c0_48 = arith.constant 0 : index
    %168 = vector.load %arg15[%c0_46, %c0_47, %c0_48] : memref<1x64x128xbf16, #tpu.memory_space<vmem>>, vector<1x64x128xbf16>
    %169 = vector.shape_cast %168 : vector<1x64x128xbf16> to vector<64x128xbf16>
    %170 = vector.shape_cast %167 : vector<64x128xbf16> to vector<1x64x128xbf16>
    tpu.vector_store %arg15[%c0_46, %c0_47, %c0_48], %170 {strides = array<i32>} : memref<1x64x128xbf16, #tpu.memory_space<vmem>>, vector<1x64x128xbf16>,
    return
  }
  func.func @transform_0(%arg0: i32) -> (i32, i32, i32, i32) {
    %c0_i32 = arith.constant 0 : i32
    %c0_i32_0 = arith.constant 0 : i32
    %c0_i32_1 = arith.constant 0 : i32
    %c0_i32_2 = arith.constant 0 : i32
    return %arg0, %c0_i32, %c0_i32_0, %c0_i32_1 : i32, i32, i32, i32
  }
  func.func @transform_1(%arg0: i32) -> (i32, i32) {
    %c0_i32 = arith.constant 0 : i32
    %c0_i32_0 = arith.constant 0 : i32
    %c0_i32_1 = arith.constant 0 : i32
    return %c0_i32, %c0_i32_0 : i32, i32
  }
  func.func @transform_2(%arg0: i32) -> (i32, i32) {
    %c0_i32 = arith.constant 0 : i32
    %c0_i32_0 = arith.constant 0 : i32
    %c0_i32_1 = arith.constant 0 : i32
    return %c0_i32, %c0_i32_0 : i32, i32
  }
  func.func @transform_3(%arg0: i32) -> (i32, i32) {
    %c0_i32 = arith.constant 0 : i32
    %c0_i32_0 = arith.constant 0 : i32
    %c0_i32_1 = arith.constant 0 : i32
    return %c0_i32, %c0_i32_0 : i32, i32
  }
  func.func @transform_4(%arg0: i32) -> (i32, i32) {
    %c0_i32 = arith.constant 0 : i32
    %c0_i32_0 = arith.constant 0 : i32
    %c0_i32_1 = arith.constant 0 : i32
    return %c0_i32, %c0_i32_0 : i32, i32
  }
  func.func @transform_5(%arg0: i32) -> (i32, i32) {
    %c0_i32 = arith.constant 0 : i32
    %c0_i32_0 = arith.constant 0 : i32
    %c0_i32_1 = arith.constant 0 : i32
    return %c0_i32, %c0_i32_0 : i32, i32
  }
  func.func @transform_6(%arg0: i32) -> (i32, i32) {
    %c0_i32 = arith.constant 0 : i32
    %c0_i32_0 = arith.constant 0 : i32
    %c0_i32_1 = arith.constant 0 : i32
    return %c0_i32, %c0_i32_0 : i32, i32
  }
  func.func @transform_7(%arg0: i32) -> (i32, i32) {
    %c0_i32 = arith.constant 0 : i32
    %c0_i32_0 = arith.constant 0 : i32
    %c0_i32_1 = arith.constant 0 : i32
    return %c0_i32, %c0_i32_0 : i32, i32
  }
  func.func @transform_8(%arg0: i32) -> (i32, i32) {
    %c0_i32 = arith.constant 0 : i32
    %c0_i32_0 = arith.constant 0 : i32
    %c0_i32_1 = arith.constant 0 : i32
    return %c0_i32, %c0_i32_0 : i32, i32
  }
  func.func @transform_9(%arg0: i32) -> (i32, i32) {
    %c0_i32 = arith.constant 0 : i32
    %c0_i32_0 = arith.constant 0 : i32
    %c0_i32_1 = arith.constant 0 : i32
    return %c0_i32, %c0_i32_0 : i32, i32
  }
  func.func @transform_10(%arg0: i32) -> (i32, i32) {
    %c0_i32 = arith.constant 0 : i32
    %c0_i32_0 = arith.constant 0 : i32
    %c0_i32_1 = arith.constant 0 : i32
    return %c0_i32, %c0_i32_0 : i32, i32
  }
  func.func @transform_11(%arg0: i32) -> (i32, i32) {
    %c0_i32 = arith.constant 0 : i32
    %c0_i32_0 = arith.constant 0 : i32
    %c0_i32_1 = arith.constant 0 : i32
    return %c0_i32, %c0_i32_0 : i32, i32
  }
  func.func @transform_12(%arg0: i32) -> (i32, i32) {
    %c0_i32 = arith.constant 0 : i32
    %c0_i32_0 = arith.constant 0 : i32
    %c0_i32_1 = arith.constant 0 : i32
    return %c0_i32, %c0_i32_0 : i32, i32
  }
  func.func @transform_13(%arg0: i32) -> (i32, i32) {
    %c0_i32 = arith.constant 0 : i32
    %c0_i32_0 = arith.constant 0 : i32
    %c0_i32_1 = arith.constant 0 : i32
    return %c0_i32, %c0_i32_0 : i32, i32
  }
  func.func @transform_14(%arg0: i32) -> (i32, i32, i32) {
    %c0_i32 = arith.constant 0 : i32
    %c0_i32_0 = arith.constant 0 : i32
    %c0_i32_1 = arith.constant 0 : i32
    return %arg0, %c0_i32, %c0_i32_0 : i32, i32, i32
  }
}

module attributes {stable_mosaic.version = 11 : i64} {
  func.func @_mbconv_kernel(%arg0: i32, %arg1: memref<1x64x128xbf16, #tpu.memory_space<vmem>>, %arg2: memref<128x128xbf16, #tpu.memory_space<vmem>>, %arg3: memref<1x128xf32, #tpu.memory_space<vmem>>, %arg4: memref<1x128xf32, #tpu.memory_space<vmem>>, %arg5: memref<9x128xf32, #tpu.memory_space<vmem>>, %arg6: memref<1x128xf32, #tpu.memory_space<vmem>>, %arg7: memref<1x128xf32, #tpu.memory_space<vmem>>, %arg8: memref<8x128xf32, #tpu.memory_space<vmem>>, %arg9: memref<8x1xf32, #tpu.memory_space<vmem>>, %arg10: memref<8x128xf32, #tpu.memory_space<vmem>>, %arg11: memref<1x128xf32, #tpu.memory_space<vmem>>, %arg12: memref<128x128xbf16, #tpu.memory_space<vmem>>, %arg13: memref<1x128xf32, #tpu.memory_space<vmem>>, %arg14: memref<1x128xf32, #tpu.memory_space<vmem>>, %arg15: memref<128x128xbf16, #tpu.memory_space<vmem>>, %arg16: memref<1x128xf32, #tpu.memory_space<vmem>>, %arg17: memref<1x128xf32, #tpu.memory_space<vmem>>, %arg18: memref<128x128xf32, #tpu.memory_space<vmem>>, %arg19: memref<1x128xf32, #tpu.memory_space<vmem>>, %arg20: memref<1x64x128xf32, #tpu.memory_space<vmem>>, %arg21: memref<1x1x128xf32, #tpu.memory_space<vmem>>) attributes {dimension_semantics = [#tpu.dimension_semantics<parallel>], iteration_bounds = array<i64: 2>, scalar_prefetch = 0 : i64, scratch_operands = 0 : i64, tpu.core_type = #tpu.core_type<tc>, window_params = [{transform_indices = @transform_0, window_bounds = array<i64: 1, 64, 128>}, {pipeline_mode = #tpu.pipeline_mode<synchronous>, transform_indices = @transform_1, window_bounds = array<i64: 128, 128>}, {pipeline_mode = #tpu.pipeline_mode<synchronous>, transform_indices = @transform_2, window_bounds = array<i64: 1, 128>}, {pipeline_mode = #tpu.pipeline_mode<synchronous>, transform_indices = @transform_3, window_bounds = array<i64: 1, 128>}, {pipeline_mode = #tpu.pipeline_mode<synchronous>, transform_indices = @transform_4, window_bounds = array<i64: 9, 128>}, {pipeline_mode = #tpu.pipeline_mode<synchronous>, transform_indices = @transform_5, window_bounds = array<i64: 1, 128>}, {pipeline_mode = #tpu.pipeline_mode<synchronous>, transform_indices = @transform_6, window_bounds = array<i64: 1, 128>}, {pipeline_mode = #tpu.pipeline_mode<synchronous>, transform_indices = @transform_7, window_bounds = array<i64: 8, 128>}, {pipeline_mode = #tpu.pipeline_mode<synchronous>, transform_indices = @transform_8, window_bounds = array<i64: 8, 1>}, {pipeline_mode = #tpu.pipeline_mode<synchronous>, transform_indices = @transform_9, window_bounds = array<i64: 8, 128>}, {pipeline_mode = #tpu.pipeline_mode<synchronous>, transform_indices = @transform_10, window_bounds = array<i64: 1, 128>}, {pipeline_mode = #tpu.pipeline_mode<synchronous>, transform_indices = @transform_11, window_bounds = array<i64: 128, 128>}, {pipeline_mode = #tpu.pipeline_mode<synchronous>, transform_indices = @transform_12, window_bounds = array<i64: 1, 128>}, {pipeline_mode = #tpu.pipeline_mode<synchronous>, transform_indices = @transform_13, window_bounds = array<i64: 1, 128>}, {pipeline_mode = #tpu.pipeline_mode<synchronous>, transform_indices = @transform_14, window_bounds = array<i64: 128, 128>}, {pipeline_mode = #tpu.pipeline_mode<synchronous>, transform_indices = @transform_15, window_bounds = array<i64: 1, 128>}, {pipeline_mode = #tpu.pipeline_mode<synchronous>, transform_indices = @transform_16, window_bounds = array<i64: 1, 128>}, {pipeline_mode = #tpu.pipeline_mode<synchronous>, transform_indices = @transform_17, window_bounds = array<i64: 128, 128>}, {pipeline_mode = #tpu.pipeline_mode<synchronous>, transform_indices = @transform_18, window_bounds = array<i64: 1, 128>}, {transform_indices = @transform_19, window_bounds = array<i64: 1, 64, 128>}, {transform_indices = @transform_20, window_bounds = array<i64: 1, 1, 128>}]} {
    %c0 = arith.constant 0 : index
    %c0_0 = arith.constant 0 : index
    %c0_1 = arith.constant 0 : index
    %0 = vector.load %arg1[%c0, %c0_0, %c0_1] : memref<1x64x128xbf16, #tpu.memory_space<vmem>>, vector<1x64x128xbf16>
    %1 = vector.shape_cast %0 : vector<1x64x128xbf16> to vector<64x128xbf16>
    %c0_2 = arith.constant 0 : index
    %c0_3 = arith.constant 0 : index
    %2 = vector.load %arg2[%c0_2, %c0_3] : memref<128x128xbf16, #tpu.memory_space<vmem>>, vector<128x128xbf16>
    %cst = arith.constant dense<0.000000e+00> : vector<64x128xf32>
    %3 = tpu.matmul %1, %2, %cst {dimension_numbers = #tpu.dot_dimension_numbers<[1], [0], [0], [1], [0, 0, 1, 1], [], []>} : vector<64x128xbf16>, vector<128x128xbf16>, vector<64x128xf32> -> vector<64x128xf32>
    %c0_4 = arith.constant 0 : index
    %c0_5 = arith.constant 0 : index
    %4 = vector.load %arg3[%c0_4, %c0_5] : memref<1x128xf32, #tpu.memory_space<vmem>>, vector<1x128xf32>
    %5 = vector.broadcast %4 : vector<1x128xf32> to vector<64x128xf32>
    %6 = arith.mulf %3, %5 : vector<64x128xf32>
    %c0_6 = arith.constant 0 : index
    %c0_7 = arith.constant 0 : index
    %7 = vector.load %arg4[%c0_6, %c0_7] : memref<1x128xf32, #tpu.memory_space<vmem>>, vector<1x128xf32>
    %8 = vector.broadcast %7 : vector<1x128xf32> to vector<64x128xf32>
    %9 = arith.addf %6, %8 : vector<64x128xf32>
    %10 = arith.negf %9 : vector<64x128xf32>
    %11 = math.exp %10 : vector<64x128xf32>
    %cst_8 = arith.constant 1.000000e+00 : f32
    %12 = vector.broadcast %cst_8 : f32 to vector<64x128xf32>
    %13 = arith.addf %12, %11 : vector<64x128xf32>
    %14 = arith.divf %12, %13 : vector<64x128xf32>
    %15 = arith.mulf %9, %14 : vector<64x128xf32>
    %c0_9 = arith.constant 0 : index
    %c0_10 = arith.constant 0 : index
    %16 = vector.load %arg5[%c0_9, %c0_10] : memref<9x128xf32, #tpu.memory_space<vmem>>, vector<9x128xf32>
    %17 = tpu.iota {dimensions = array<i32: 0>} : vector<64x1xi32>
    %c3_i32 = arith.constant 3 : i32
    %18 = vector.broadcast %c3_i32 : i32 to vector<64x1xi32>
    %19 = arith.shrsi %17, %18 : vector<64x1xi32>
    %c7_i32 = arith.constant 7 : i32
    %20 = vector.broadcast %c7_i32 : i32 to vector<64x1xi32>
    %21 = arith.andi %17, %20 : vector<64x1xi32>
    %c9_i32 = arith.constant 9 : i32
    %22 = tpu.dynamic_rotate %15 by %c9_i32 dim 0 : vector<64x128xf32>, i32 -> vector<64x128xf32>
    %c1_i32 = arith.constant 1 : i32
    %23 = vector.broadcast %c1_i32 : i32 to vector<64x1xi32>
    %24 = arith.cmpi sge, %19, %23 : vector<64x1xi32>
    %c1_i32_11 = arith.constant 1 : i32
    %25 = vector.broadcast %c1_i32_11 : i32 to vector<64x1xi32>
    %26 = arith.cmpi sge, %21, %25 : vector<64x1xi32>
    %27 = arith.andi %24, %26 : vector<64x1xi1>
    %28 = arith.extui %27 : vector<64x1xi1> to vector<64x1xi32>
    %29 = arith.sitofp %28 : vector<64x1xi32> to vector<64x1xf32>
    %30 = vector.broadcast %29 : vector<64x1xf32> to vector<64x128xf32>
    %31 = arith.mulf %22, %30 : vector<64x128xf32>
    %32 = vector.extract_strided_slice %16 {offsets = [0, 0], sizes = [1, 128], strides = [1, 1]} : vector<9x128xf32> to vector<1x128xf32>
    %33 = vector.broadcast %32 : vector<1x128xf32> to vector<64x128xf32>
    %34 = arith.mulf %31, %33 : vector<64x128xf32>
    %c8_i32 = arith.constant 8 : i32
    %35 = tpu.dynamic_rotate %15 by %c8_i32 dim 0 : vector<64x128xf32>, i32 -> vector<64x128xf32>
    %c1_i32_12 = arith.constant 1 : i32
    %36 = vector.broadcast %c1_i32_12 : i32 to vector<64x1xi32>
    %37 = arith.cmpi sge, %19, %36 : vector<64x1xi32>
    %38 = arith.extui %37 : vector<64x1xi1> to vector<64x1xi32>
    %39 = arith.sitofp %38 : vector<64x1xi32> to vector<64x1xf32>
    %40 = vector.broadcast %39 : vector<64x1xf32> to vector<64x128xf32>
    %41 = arith.mulf %35, %40 : vector<64x128xf32>
    %42 = vector.extract_strided_slice %16 {offsets = [1, 0], sizes = [1, 128], strides = [1, 1]} : vector<9x128xf32> to vector<1x128xf32>
    %43 = vector.broadcast %42 : vector<1x128xf32> to vector<64x128xf32>
    %44 = arith.mulf %41, %43 : vector<64x128xf32>
    %c7_i32_13 = arith.constant 7 : i32
    %45 = tpu.dynamic_rotate %15 by %c7_i32_13 dim 0 : vector<64x128xf32>, i32 -> vector<64x128xf32>
    %c1_i32_14 = arith.constant 1 : i32
    %46 = vector.broadcast %c1_i32_14 : i32 to vector<64x1xi32>
    %47 = arith.cmpi sge, %19, %46 : vector<64x1xi32>
    %c6_i32 = arith.constant 6 : i32
    %48 = vector.broadcast %c6_i32 : i32 to vector<64x1xi32>
    %49 = arith.cmpi sle, %21, %48 : vector<64x1xi32>
    %50 = arith.andi %47, %49 : vector<64x1xi1>
    %51 = arith.extui %50 : vector<64x1xi1> to vector<64x1xi32>
    %52 = arith.sitofp %51 : vector<64x1xi32> to vector<64x1xf32>
    %53 = vector.broadcast %52 : vector<64x1xf32> to vector<64x128xf32>
    %54 = arith.mulf %45, %53 : vector<64x128xf32>
    %55 = vector.extract_strided_slice %16 {offsets = [2, 0], sizes = [1, 128], strides = [1, 1]} : vector<9x128xf32> to vector<1x128xf32>
    %56 = vector.broadcast %55 : vector<1x128xf32> to vector<64x128xf32>
    %57 = arith.mulf %54, %56 : vector<64x128xf32>
    %c1_i32_15 = arith.constant 1 : i32
    %58 = tpu.dynamic_rotate %15 by %c1_i32_15 dim 0 : vector<64x128xf32>, i32 -> vector<64x128xf32>
    %c1_i32_16 = arith.constant 1 : i32
    %59 = vector.broadcast %c1_i32_16 : i32 to vector<64x1xi32>
    %60 = arith.cmpi sge, %21, %59 : vector<64x1xi32>
    %61 = arith.extui %60 : vector<64x1xi1> to vector<64x1xi32>
    %62 = arith.sitofp %61 : vector<64x1xi32> to vector<64x1xf32>
    %63 = vector.broadcast %62 : vector<64x1xf32> to vector<64x128xf32>
    %64 = arith.mulf %58, %63 : vector<64x128xf32>
    %65 = vector.extract_strided_slice %16 {offsets = [3, 0], sizes = [1, 128], strides = [1, 1]} : vector<9x128xf32> to vector<1x128xf32>
    %66 = vector.broadcast %65 : vector<1x128xf32> to vector<64x128xf32>
    %67 = arith.mulf %64, %66 : vector<64x128xf32>
    %68 = arith.addf %34, %67 : vector<64x128xf32>
    %69 = vector.extract_strided_slice %16 {offsets = [4, 0], sizes = [1, 128], strides = [1, 1]} : vector<9x128xf32> to vector<1x128xf32>
    %70 = vector.broadcast %69 : vector<1x128xf32> to vector<64x128xf32>
    %71 = arith.mulf %15, %70 : vector<64x128xf32>
    %72 = arith.addf %44, %71 : vector<64x128xf32>
    %c63_i32 = arith.constant 63 : i32
    %73 = tpu.dynamic_rotate %15 by %c63_i32 dim 0 : vector<64x128xf32>, i32 -> vector<64x128xf32>
    %c6_i32_17 = arith.constant 6 : i32
    %74 = vector.broadcast %c6_i32_17 : i32 to vector<64x1xi32>
    %75 = arith.cmpi sle, %21, %74 : vector<64x1xi32>
    %76 = arith.extui %75 : vector<64x1xi1> to vector<64x1xi32>
    %77 = arith.sitofp %76 : vector<64x1xi32> to vector<64x1xf32>
    %78 = vector.broadcast %77 : vector<64x1xf32> to vector<64x128xf32>
    %79 = arith.mulf %73, %78 : vector<64x128xf32>
    %80 = vector.extract_strided_slice %16 {offsets = [5, 0], sizes = [1, 128], strides = [1, 1]} : vector<9x128xf32> to vector<1x128xf32>
    %81 = vector.broadcast %80 : vector<1x128xf32> to vector<64x128xf32>
    %82 = arith.mulf %79, %81 : vector<64x128xf32>
    %83 = arith.addf %57, %82 : vector<64x128xf32>
    %c57_i32 = arith.constant 57 : i32
    %84 = tpu.dynamic_rotate %15 by %c57_i32 dim 0 : vector<64x128xf32>, i32 -> vector<64x128xf32>
    %c6_i32_18 = arith.constant 6 : i32
    %85 = vector.broadcast %c6_i32_18 : i32 to vector<64x1xi32>
    %86 = arith.cmpi sle, %19, %85 : vector<64x1xi32>
    %c1_i32_19 = arith.constant 1 : i32
    %87 = vector.broadcast %c1_i32_19 : i32 to vector<64x1xi32>
    %88 = arith.cmpi sge, %21, %87 : vector<64x1xi32>
    %89 = arith.andi %86, %88 : vector<64x1xi1>
    %90 = arith.extui %89 : vector<64x1xi1> to vector<64x1xi32>
    %91 = arith.sitofp %90 : vector<64x1xi32> to vector<64x1xf32>
    %92 = vector.broadcast %91 : vector<64x1xf32> to vector<64x128xf32>
    %93 = arith.mulf %84, %92 : vector<64x128xf32>
    %94 = vector.extract_strided_slice %16 {offsets = [6, 0], sizes = [1, 128], strides = [1, 1]} : vector<9x128xf32> to vector<1x128xf32>
    %95 = vector.broadcast %94 : vector<1x128xf32> to vector<64x128xf32>
    %96 = arith.mulf %93, %95 : vector<64x128xf32>
    %97 = arith.addf %68, %96 : vector<64x128xf32>
    %c56_i32 = arith.constant 56 : i32
    %98 = tpu.dynamic_rotate %15 by %c56_i32 dim 0 : vector<64x128xf32>, i32 -> vector<64x128xf32>
    %c6_i32_20 = arith.constant 6 : i32
    %99 = vector.broadcast %c6_i32_20 : i32 to vector<64x1xi32>
    %100 = arith.cmpi sle, %19, %99 : vector<64x1xi32>
    %101 = arith.extui %100 : vector<64x1xi1> to vector<64x1xi32>
    %102 = arith.sitofp %101 : vector<64x1xi32> to vector<64x1xf32>
    %103 = vector.broadcast %102 : vector<64x1xf32> to vector<64x128xf32>
    %104 = arith.mulf %98, %103 : vector<64x128xf32>
    %105 = vector.extract_strided_slice %16 {offsets = [7, 0], sizes = [1, 128], strides = [1, 1]} : vector<9x128xf32> to vector<1x128xf32>
    %106 = vector.broadcast %105 : vector<1x128xf32> to vector<64x128xf32>
    %107 = arith.mulf %104, %106 : vector<64x128xf32>
    %108 = arith.addf %72, %107 : vector<64x128xf32>
    %c55_i32 = arith.constant 55 : i32
    %109 = tpu.dynamic_rotate %15 by %c55_i32 dim 0 : vector<64x128xf32>, i32 -> vector<64x128xf32>
    %c6_i32_21 = arith.constant 6 : i32
    %110 = vector.broadcast %c6_i32_21 : i32 to vector<64x1xi32>
    %111 = arith.cmpi sle, %19, %110 : vector<64x1xi32>
    %c6_i32_22 = arith.constant 6 : i32
    %112 = vector.broadcast %c6_i32_22 : i32 to vector<64x1xi32>
    %113 = arith.cmpi sle, %21, %112 : vector<64x1xi32>
    %114 = arith.andi %111, %113 : vector<64x1xi1>
    %115 = arith.extui %114 : vector<64x1xi1> to vector<64x1xi32>
    %116 = arith.sitofp %115 : vector<64x1xi32> to vector<64x1xf32>
    %117 = vector.broadcast %116 : vector<64x1xf32> to vector<64x128xf32>
    %118 = arith.mulf %109, %117 : vector<64x128xf32>
    %119 = vector.extract_strided_slice %16 {offsets = [8, 0], sizes = [1, 128], strides = [1, 1]} : vector<9x128xf32> to vector<1x128xf32>
    %120 = vector.broadcast %119 : vector<1x128xf32> to vector<64x128xf32>
    %121 = arith.mulf %118, %120 : vector<64x128xf32>
    %122 = arith.addf %83, %121 : vector<64x128xf32>
    %123 = arith.addf %97, %108 : vector<64x128xf32>
    %124 = arith.addf %123, %122 : vector<64x128xf32>
    %c0_23 = arith.constant 0 : index
    %c0_24 = arith.constant 0 : index
    %125 = vector.load %arg6[%c0_23, %c0_24] : memref<1x128xf32, #tpu.memory_space<vmem>>, vector<1x128xf32>
    %126 = vector.broadcast %125 : vector<1x128xf32> to vector<64x128xf32>
    %127 = arith.mulf %124, %126 : vector<64x128xf32>
    %c0_25 = arith.constant 0 : index
    %c0_26 = arith.constant 0 : index
    %128 = vector.load %arg7[%c0_25, %c0_26] : memref<1x128xf32, #tpu.memory_space<vmem>>, vector<1x128xf32>
    %129 = vector.broadcast %128 : vector<1x128xf32> to vector<64x128xf32>
    %130 = arith.addf %127, %129 : vector<64x128xf32>
    %131 = arith.negf %130 : vector<64x128xf32>
    %132 = math.exp %131 : vector<64x128xf32>
    %cst_27 = arith.constant 1.000000e+00 : f32
    %133 = vector.broadcast %cst_27 : f32 to vector<64x128xf32>
    %134 = arith.addf %133, %132 : vector<64x128xf32>
    %135 = arith.divf %133, %134 : vector<64x128xf32>
    %136 = arith.mulf %130, %135 : vector<64x128xf32>
    %cst_28 = arith.constant dense<0.000000e+00> : vector<128xf32>
    %137 = vector.multi_reduction <add>, %136, %cst_28 [0] : vector<64x128xf32> to vector<128xf32>
    %138 = vector.shape_cast %137 : vector<128xf32> to vector<1x128xf32>
    %cst_29 = arith.constant 6.400000e+01 : f32
    %139 = vector.broadcast %cst_29 : f32 to vector<1x128xf32>
    %140 = arith.divf %138, %139 : vector<1x128xf32>
    %c0_30 = arith.constant 0 : index
    %c0_31 = arith.constant 0 : index
    %141 = vector.load %arg8[%c0_30, %c0_31] : memref<8x128xf32, #tpu.memory_space<vmem>>, vector<8x128xf32>
    %142 = vector.broadcast %140 : vector<1x128xf32> to vector<8x128xf32>
    %143 = arith.mulf %141, %142 : vector<8x128xf32>
    %cst_32 = arith.constant dense<0.000000e+00> : vector<8xf32>
    %144 = vector.multi_reduction <add>, %143, %cst_32 [1] : vector<8x128xf32> to vector<8xf32>
    %145 = vector.shape_cast %144 : vector<8xf32> to vector<8x1xf32>
    %c0_33 = arith.constant 0 : index
    %c0_34 = arith.constant 0 : index
    %146 = vector.load %arg9[%c0_33, %c0_34] : memref<8x1xf32, #tpu.memory_space<vmem>>, vector<8x1xf32>
    %147 = arith.addf %145, %146 : vector<8x1xf32>
    %148 = arith.negf %147 : vector<8x1xf32>
    %149 = math.exp %148 : vector<8x1xf32>
    %cst_35 = arith.constant 1.000000e+00 : f32
    %150 = vector.broadcast %cst_35 : f32 to vector<8x1xf32>
    %151 = arith.addf %150, %149 : vector<8x1xf32>
    %152 = arith.divf %150, %151 : vector<8x1xf32>
    %153 = arith.mulf %147, %152 : vector<8x1xf32>
    %c0_36 = arith.constant 0 : index
    %c0_37 = arith.constant 0 : index
    %154 = vector.load %arg10[%c0_36, %c0_37] : memref<8x128xf32, #tpu.memory_space<vmem>>, vector<8x128xf32>
    %155 = vector.broadcast %153 : vector<8x1xf32> to vector<8x128xf32>
    %156 = arith.mulf %154, %155 : vector<8x128xf32>
    %cst_38 = arith.constant dense<0.000000e+00> : vector<128xf32>
    %157 = vector.multi_reduction <add>, %156, %cst_38 [0] : vector<8x128xf32> to vector<128xf32>
    %158 = vector.shape_cast %157 : vector<128xf32> to vector<1x128xf32>
    %c0_39 = arith.constant 0 : index
    %c0_40 = arith.constant 0 : index
    %159 = vector.load %arg11[%c0_39, %c0_40] : memref<1x128xf32, #tpu.memory_space<vmem>>, vector<1x128xf32>
    %160 = arith.addf %158, %159 : vector<1x128xf32>
    %161 = arith.negf %160 : vector<1x128xf32>
    %162 = math.exp %161 : vector<1x128xf32>
    %cst_41 = arith.constant 1.000000e+00 : f32
    %163 = vector.broadcast %cst_41 : f32 to vector<1x128xf32>
    %164 = arith.addf %163, %162 : vector<1x128xf32>
    %165 = arith.divf %163, %164 : vector<1x128xf32>
    %166 = vector.broadcast %165 : vector<1x128xf32> to vector<64x128xf32>
    %167 = arith.mulf %136, %166 : vector<64x128xf32>
    %168 = arith.truncf %167 : vector<64x128xf32> to vector<64x128xbf16>
    %c0_42 = arith.constant 0 : index
    %c0_43 = arith.constant 0 : index
    %169 = vector.load %arg12[%c0_42, %c0_43] : memref<128x128xbf16, #tpu.memory_space<vmem>>, vector<128x128xbf16>
    %cst_44 = arith.constant dense<0.000000e+00> : vector<64x128xf32>
    %170 = tpu.matmul %168, %169, %cst_44 {dimension_numbers = #tpu.dot_dimension_numbers<[1], [0], [0], [1], [0, 0, 1, 1], [], []>} : vector<64x128xbf16>, vector<128x128xbf16>, vector<64x128xf32> -> vector<64x128xf32>
    %c0_45 = arith.constant 0 : index
    %c0_46 = arith.constant 0 : index
    %171 = vector.load %arg13[%c0_45, %c0_46] : memref<1x128xf32, #tpu.memory_space<vmem>>, vector<1x128xf32>
    %172 = vector.broadcast %171 : vector<1x128xf32> to vector<64x128xf32>
    %173 = arith.mulf %170, %172 : vector<64x128xf32>
    %c0_47 = arith.constant 0 : index
    %c0_48 = arith.constant 0 : index
    %174 = vector.load %arg14[%c0_47, %c0_48] : memref<1x128xf32, #tpu.memory_space<vmem>>, vector<1x128xf32>
    %175 = vector.broadcast %174 : vector<1x128xf32> to vector<64x128xf32>
    %176 = arith.addf %173, %175 : vector<64x128xf32>
    %177 = arith.extf %1 : vector<64x128xbf16> to vector<64x128xf32>
    %178 = arith.addf %176, %177 : vector<64x128xf32>
    %179 = arith.truncf %178 : vector<64x128xf32> to vector<64x128xbf16>
    %c0_49 = arith.constant 0 : index
    %c0_50 = arith.constant 0 : index
    %180 = vector.load %arg15[%c0_49, %c0_50] : memref<128x128xbf16, #tpu.memory_space<vmem>>, vector<128x128xbf16>
    %cst_51 = arith.constant dense<0.000000e+00> : vector<64x128xf32>
    %181 = tpu.matmul %179, %180, %cst_51 {dimension_numbers = #tpu.dot_dimension_numbers<[1], [0], [0], [1], [0, 0, 1, 1], [], []>} : vector<64x128xbf16>, vector<128x128xbf16>, vector<64x128xf32> -> vector<64x128xf32>
    %c0_52 = arith.constant 0 : index
    %c0_53 = arith.constant 0 : index
    %182 = vector.load %arg16[%c0_52, %c0_53] : memref<1x128xf32, #tpu.memory_space<vmem>>, vector<1x128xf32>
    %183 = vector.broadcast %182 : vector<1x128xf32> to vector<64x128xf32>
    %184 = arith.mulf %181, %183 : vector<64x128xf32>
    %c0_54 = arith.constant 0 : index
    %c0_55 = arith.constant 0 : index
    %185 = vector.load %arg17[%c0_54, %c0_55] : memref<1x128xf32, #tpu.memory_space<vmem>>, vector<1x128xf32>
    %186 = vector.broadcast %185 : vector<1x128xf32> to vector<64x128xf32>
    %187 = arith.addf %184, %186 : vector<64x128xf32>
    %188 = arith.negf %187 : vector<64x128xf32>
    %189 = math.exp %188 : vector<64x128xf32>
    %cst_56 = arith.constant 1.000000e+00 : f32
    %190 = vector.broadcast %cst_56 : f32 to vector<64x128xf32>
    %191 = arith.addf %190, %189 : vector<64x128xf32>
    %192 = arith.divf %190, %191 : vector<64x128xf32>
    %193 = arith.mulf %187, %192 : vector<64x128xf32>
    %c0_57 = arith.constant 0 : index
    %c0_58 = arith.constant 0 : index
    %c0_59 = arith.constant 0 : index
    %194 = vector.load %arg20[%c0_57, %c0_58, %c0_59] : memref<1x64x128xf32, #tpu.memory_space<vmem>>, vector<1x64x128xf32>
    %195 = vector.shape_cast %194 : vector<1x64x128xf32> to vector<64x128xf32>
    %196 = vector.shape_cast %193 : vector<64x128xf32> to vector<1x64x128xf32>
    tpu.vector_store %arg20[%c0_57, %c0_58, %c0_59], %196 {strides = array<i32>} : memref<1x64x128xf32, #tpu.memory_space<vmem>>, vector<1x64x128xf32>,
    %cst_60 = arith.constant dense<0.000000e+00> : vector<128xf32>
    %197 = vector.multi_reduction <add>, %193, %cst_60 [0] : vector<64x128xf32> to vector<128xf32>
    %198 = vector.shape_cast %197 : vector<128xf32> to vector<1x128xf32>
    %cst_61 = arith.constant 6.400000e+01 : f32
    %199 = vector.broadcast %cst_61 : f32 to vector<1x128xf32>
    %200 = arith.divf %198, %199 : vector<1x128xf32>
    %c0_62 = arith.constant 0 : index
    %c0_63 = arith.constant 0 : index
    %201 = vector.load %arg18[%c0_62, %c0_63] : memref<128x128xf32, #tpu.memory_space<vmem>>, vector<128x128xf32>
    %cst_64 = arith.constant dense<0.000000e+00> : vector<1x128xf32>
    %202 = tpu.matmul %200, %201, %cst_64 {dimension_numbers = #tpu.dot_dimension_numbers<[1], [0], [0], [1], [0, 0, 1, 1], [], []>} : vector<1x128xf32>, vector<128x128xf32>, vector<1x128xf32> -> vector<1x128xf32>
    %c0_65 = arith.constant 0 : index
    %c0_66 = arith.constant 0 : index
    %203 = vector.load %arg19[%c0_65, %c0_66] : memref<1x128xf32, #tpu.memory_space<vmem>>, vector<1x128xf32>
    %204 = arith.addf %202, %203 : vector<1x128xf32>
    %c0_67 = arith.constant 0 : index
    %c0_68 = arith.constant 0 : index
    %c0_69 = arith.constant 0 : index
    %205 = vector.load %arg21[%c0_67, %c0_68, %c0_69] : memref<1x1x128xf32, #tpu.memory_space<vmem>>, vector<1x1x128xf32>
    %206 = vector.shape_cast %205 : vector<1x1x128xf32> to vector<1x128xf32>
    %207 = vector.shape_cast %204 : vector<1x128xf32> to vector<1x1x128xf32>
    tpu.vector_store %arg21[%c0_67, %c0_68, %c0_69], %207 {strides = array<i32>} : memref<1x1x128xf32, #tpu.memory_space<vmem>>, vector<1x1x128xf32>,
    return
  }
  func.func @transform_0(%arg0: i32) -> (i32, i32, i32) {
    %c0_i32 = arith.constant 0 : i32
    %c0_i32_0 = arith.constant 0 : i32
    %c0_i32_1 = arith.constant 0 : i32
    return %arg0, %c0_i32, %c0_i32_0 : i32, i32, i32
  }
  func.func @transform_1(%arg0: i32) -> (i32, i32) {
    %c0_i32 = arith.constant 0 : i32
    %c0_i32_0 = arith.constant 0 : i32
    %c0_i32_1 = arith.constant 0 : i32
    return %c0_i32, %c0_i32_0 : i32, i32
  }
  func.func @transform_2(%arg0: i32) -> (i32, i32) {
    %c0_i32 = arith.constant 0 : i32
    %c0_i32_0 = arith.constant 0 : i32
    %c0_i32_1 = arith.constant 0 : i32
    return %c0_i32, %c0_i32_0 : i32, i32
  }
  func.func @transform_3(%arg0: i32) -> (i32, i32) {
    %c0_i32 = arith.constant 0 : i32
    %c0_i32_0 = arith.constant 0 : i32
    %c0_i32_1 = arith.constant 0 : i32
    return %c0_i32, %c0_i32_0 : i32, i32
  }
  func.func @transform_4(%arg0: i32) -> (i32, i32) {
    %c0_i32 = arith.constant 0 : i32
    %c0_i32_0 = arith.constant 0 : i32
    %c0_i32_1 = arith.constant 0 : i32
    return %c0_i32, %c0_i32_0 : i32, i32
  }
  func.func @transform_5(%arg0: i32) -> (i32, i32) {
    %c0_i32 = arith.constant 0 : i32
    %c0_i32_0 = arith.constant 0 : i32
    %c0_i32_1 = arith.constant 0 : i32
    return %c0_i32, %c0_i32_0 : i32, i32
  }
  func.func @transform_6(%arg0: i32) -> (i32, i32) {
    %c0_i32 = arith.constant 0 : i32
    %c0_i32_0 = arith.constant 0 : i32
    %c0_i32_1 = arith.constant 0 : i32
    return %c0_i32, %c0_i32_0 : i32, i32
  }
  func.func @transform_7(%arg0: i32) -> (i32, i32) {
    %c0_i32 = arith.constant 0 : i32
    %c0_i32_0 = arith.constant 0 : i32
    %c0_i32_1 = arith.constant 0 : i32
    return %c0_i32, %c0_i32_0 : i32, i32
  }
  func.func @transform_8(%arg0: i32) -> (i32, i32) {
    %c0_i32 = arith.constant 0 : i32
    %c0_i32_0 = arith.constant 0 : i32
    %c0_i32_1 = arith.constant 0 : i32
    return %c0_i32, %c0_i32_0 : i32, i32
  }
  func.func @transform_9(%arg0: i32) -> (i32, i32) {
    %c0_i32 = arith.constant 0 : i32
    %c0_i32_0 = arith.constant 0 : i32
    %c0_i32_1 = arith.constant 0 : i32
    return %c0_i32, %c0_i32_0 : i32, i32
  }
  func.func @transform_10(%arg0: i32) -> (i32, i32) {
    %c0_i32 = arith.constant 0 : i32
    %c0_i32_0 = arith.constant 0 : i32
    %c0_i32_1 = arith.constant 0 : i32
    return %c0_i32, %c0_i32_0 : i32, i32
  }
  func.func @transform_11(%arg0: i32) -> (i32, i32) {
    %c0_i32 = arith.constant 0 : i32
    %c0_i32_0 = arith.constant 0 : i32
    %c0_i32_1 = arith.constant 0 : i32
    return %c0_i32, %c0_i32_0 : i32, i32
  }
  func.func @transform_12(%arg0: i32) -> (i32, i32) {
    %c0_i32 = arith.constant 0 : i32
    %c0_i32_0 = arith.constant 0 : i32
    %c0_i32_1 = arith.constant 0 : i32
    return %c0_i32, %c0_i32_0 : i32, i32
  }
  func.func @transform_13(%arg0: i32) -> (i32, i32) {
    %c0_i32 = arith.constant 0 : i32
    %c0_i32_0 = arith.constant 0 : i32
    %c0_i32_1 = arith.constant 0 : i32
    return %c0_i32, %c0_i32_0 : i32, i32
  }
  func.func @transform_14(%arg0: i32) -> (i32, i32) {
    %c0_i32 = arith.constant 0 : i32
    %c0_i32_0 = arith.constant 0 : i32
    %c0_i32_1 = arith.constant 0 : i32
    return %c0_i32, %c0_i32_0 : i32, i32
  }
  func.func @transform_15(%arg0: i32) -> (i32, i32) {
    %c0_i32 = arith.constant 0 : i32
    %c0_i32_0 = arith.constant 0 : i32
    %c0_i32_1 = arith.constant 0 : i32
    return %c0_i32, %c0_i32_0 : i32, i32
  }
  func.func @transform_16(%arg0: i32) -> (i32, i32) {
    %c0_i32 = arith.constant 0 : i32
    %c0_i32_0 = arith.constant 0 : i32
    %c0_i32_1 = arith.constant 0 : i32
    return %c0_i32, %c0_i32_0 : i32, i32
  }
  func.func @transform_17(%arg0: i32) -> (i32, i32) {
    %c0_i32 = arith.constant 0 : i32
    %c0_i32_0 = arith.constant 0 : i32
    %c0_i32_1 = arith.constant 0 : i32
    return %c0_i32, %c0_i32_0 : i32, i32
  }
  func.func @transform_18(%arg0: i32) -> (i32, i32) {
    %c0_i32 = arith.constant 0 : i32
    %c0_i32_0 = arith.constant 0 : i32
    %c0_i32_1 = arith.constant 0 : i32
    return %c0_i32, %c0_i32_0 : i32, i32
  }
  func.func @transform_19(%arg0: i32) -> (i32, i32, i32) {
    %c0_i32 = arith.constant 0 : i32
    %c0_i32_0 = arith.constant 0 : i32
    %c0_i32_1 = arith.constant 0 : i32
    return %arg0, %c0_i32, %c0_i32_0 : i32, i32, i32
  }
  func.func @transform_20(%arg0: i32) -> (i32, i32, i32) {
    %c0_i32 = arith.constant 0 : i32
    %c0_i32_0 = arith.constant 0 : i32
    %c0_i32_1 = arith.constant 0 : i32
    return %arg0, %c0_i32, %c0_i32_0 : i32, i32, i32
  }
}

</mosaic_0001>

<bundles_post_ra>
// kernel: _forward.4
= control target key start
LH: loop header
LB: loop body
LE: loop exit
PB: predicated region body
PF: predicated region fallthrough
CT: control target
= control target key end

     0   :  { %s2434_s29 = smov 0   ;;  %s3485_s0 = inlined_call_operand.vmem [shape: bf16[2,4,64,128], index: 0, kind: input, shape index: {}]   ;;  %s3486_s1 = inlined_call_operand.vmem [shape: bf16[128,128], index: 1, kind: input, shape index: {}]   ;;  %s3487_s2 = inlined_call_operand.vmem [shape: f32[1,128], index: 2, kind: input, shape index: {}]   ;;  %s3488_s3 = inlined_call_operand.vmem [shape: f32[1,128], index: 3, kind: input, shape index: {}]   ;;  %s3489_s4 = inlined_call_operand.vmem [shape: f32[9,128], index: 4, kind: input, shape index: {}]   ;;  %s3490_s5 = inlined_call_operand.vmem [shape: f32[1,128], index: 5, kind: input, shape index: {}]   ;;  %s3491_s6 = inlined_call_operand.vmem [shape: f32[1,128], index: 6, kind: input, shape index: {}]   ;;  %s3492_s7 = inlined_call_operand.vmem [shape: f32[8,128], index: 7, kind: input, shape index: {}]   ;;  %s3493_s8 = inlined_call_operand.vmem [shape: f32[8,1], index: 8, kind: input, shape index: {}]   ;;  %s3494_s9 = inlined_call_operand.vmem [shape: f32[8,128], index: 9, kind: input, shape index: {}]   ;;  %s3495_s10 = inlined_call_operand.vmem [shape: f32[1,128], index: 10, kind: input, shape index: {}]   ;;  %s3496_s11 = inlined_call_operand.vmem [shape: bf16[128,128], index: 11, kind: input, shape index: {}]   ;;  %s3497_s12 = inlined_call_operand.vmem [shape: f32[1,128], index: 12, kind: input, shape index: {}]   ;;  %s3498_s13 = inlined_call_operand.vmem [shape: f32[1,128], index: 13, kind: input, shape index: {}]   ;;  %s3499_s14 = inlined_call_operand.vmem [shape: bf16[2,64,128], index: 14, kind: output, shape index: {}]  }
   0x1 LB: > { %s1873_s30 = sadd.s32 4294967295, %s2355_s29   ;;  %p1877_p0 = scmp.ge.s32.totalorder %s2355_s29, 1  ;;  %s2355_s29 = sphi %s2434_s29, %s24_s29  }
   0x2   : > { %p412_p1 = scmp.lt.s32.totalorder %s2355_s29, 3 }
   0x4   : > { %p413_p2 = pnand %p1877_p0, %p412_p1 }
   0x6   : > { %416 = sbr.rel (%p413_p2) target bundleno = 1035 (0x40b), region = 76 }
   0xd   : > { %v2149_v0 = vld [vmem:[%s3486_s1] sm:$0xff]   ;;  %p458_p3 = scmp.lt.s32.totalorder %s1873_s30, 1  ;;  %v2150_v1 = vld [vmem:[%s3486_s1 + $0x8] sm:$0xff]   ;;  %v2151_v2 = vld [vmem:[%s3486_s1 + $0x10] sm:$0xff]   ;;  %v1126_v25 = vlaneseq  ;;  %v3546_v62 = vmov 0 }
   0xe   : > { %2066 = vmatprep.subr.bf16.mxu0 %v2149_v0  ;;  %v2152_v3 = vld [vmem:[%s3486_s1 + $0x18] sm:$0xff]   ;;  %v2153_v5 = vld [vmem:[%s3486_s1 + $0x20] sm:$0xff]   ;;  %v2154_v6 = vld [vmem:[%s3486_s1 + $0x28] sm:$0xff]  }
   0xf   : > { %s3680_s30 = smov (!%p458_p3, %s1873_s30), 1  ;;  %2067 = vmatpush3.bf16.msra.mxu0 %v2149_v0  ;;  %v2155_v7 = vld [vmem:[%s3486_s1 + $0x30] sm:$0xff]   ;;  %v2156_v8 = vld [vmem:[%s3486_s1 + $0x38] sm:$0xff]   ;;  %v2493_v24 = vld [vmem:[%s3487_s2] ss:$0 sm:$0xff]  ;;  %v2505_v33 = vshrl.u32 %v1126_v25, 7 }
  0x10   : > { %2068 = vmatprep.subr.bf16.mxu0 %v2150_v1  ;;  %s1997_s21 = sshll.u32 %s3680_s30, 7  ;;  %v2498_v27 = vld [vmem:[%s3488_s3] ss:$0 sm:$0xff]  ;;  %s1998_s19 = sshll.u32 %s3680_s30, 5 }
  0x11   : > { %s2457_s24 = scalar_lea.vmem %s3485_s0, %s1997_s21  ;;  %v2517_v40 = vadd.s32 24, %v2505_v33  ;;  %v2528_v49 = vadd.s32 8, %v2505_v33  ;;  %v1346_v52 = vsub.s32 4, %v2505_v33  ;;  %v1366_v55 = vsub.s32 5, %v2505_v33  ;;  %v2537_v56 = vld [vmem:[%s3489_s4] sm:$0xff]  ;;  %s467_s22 = scalar_lea.vmem %s3499_s14, %s1998_s19 }
  0x12   : > { %v2157_v4 = vld [vmem:[%s2457_s24] sm:$0xff]   ;;  %v2158_v9 = vld [vmem:[%s2457_s24 + $0x8] sm:$0xff]   ;;  %v2159_v10 = vld [vmem:[%s2457_s24 + $0x10] sm:$0xff]   ;;  %3545 = vst [vmem:[#allocation2_spill] sm:$0xff] %v2537_v56  ;;  %v2544_v59 = vadd.s32 16, %v2505_v33  ;;  %vm3537_vm8 = vcmp.lt.s32.totalorder %v2505_v33, 1 }
  0x13   : > { %2069 = vmatpush3.bf16.msra.mxu0 %v2150_v1  ;;  %2082 = vmatprep.mubr.bf16.mxu0 %v2157_v4  ;;  %v2160_v11 = vld [vmem:[%s2457_s24 + $0x18] sm:$0xff]   ;;  %v2161_v12 = vld [vmem:[%s2457_s24 + $0x20] sm:$0xff]   ;;  %v2162_v13 = vld [vmem:[%s2457_s24 + $0x28] sm:$0xff]   ;;  %v1146_v48 = vand.u32 7, %v2517_v40  ;;  %v1144_v63 = vand.u32 7, %v2528_v49 }
  0x14   : > { %2070 = vmatprep.subr.bf16.mxu0 %v2151_v2  ;;  %v2163_v14 = vld [vmem:[%s2457_s24 + $0x30] sm:$0xff]   ;;  %v2164_v15 = vld [vmem:[%s2457_s24 + $0x38] sm:$0xff]   ;;  %v2165_v16 = vld [vmem:[%s2457_s24 + $0x40] sm:$0xff]  }
  0x15   : > { %v2166_v17 = vld [vmem:[%s2457_s24 + $0x48] sm:$0xff]   ;;  %v2167_v18 = vld [vmem:[%s2457_s24 + $0x50] sm:$0xff]   ;;  %v2168_v19 = vld [vmem:[%s2457_s24 + $0x58] sm:$0xff]   ;;  %vm2552_vm0 = vcmp.ge.s32.totalorder %v1146_v48, 1  ;;  %vm2582_vm1 = vcmp.ge.s32.totalorder %v1144_v63, 1 }
  0x16   : > { %v2169_v20 = vld [vmem:[%s2457_s24 + $0x60] sm:$0xff]   ;;  %v2170_v21 = vld [vmem:[%s2457_s24 + $0x68] sm:$0xff]   ;;  %v2171_v22 = vld [vmem:[%s2457_s24 + $0x70] sm:$0xff]   ;;  %v3547_v62 = vsel %vm2552_vm0, 4294967295, %v3546_v62 }
  0x17   : > { %2071 = vmatpush3.bf16.msra.mxu0 %v2151_v2  ;;  %v2172_v23 = vld [vmem:[%s2457_s24 + $0x78] sm:$0xff]   ;;  %3548 = vst [vmem:[#allocation3_spill] sm:$0xff] %v3547_v62  ;;  %v2562_v2 = vadd.s32 32, %v2505_v33 }
  0x18   : > { %2072 = vmatprep.subr.bf16.mxu0 %v2152_v3 }
  0x1b   : > { %2073 = vmatpush3.bf16.msra.mxu0 %v2152_v3  ;;  %v2565_v3 = vrot.slane %v2537_v56, %v1346_v52 }
  0x1c   : > { %2074 = vmatprep.subr.bf16.mxu0 %v2153_v5 }
  0x1f   : > { %2075 = vmatpush3.bf16.msra.mxu0 %v2153_v5  ;;  %v2569_v5 = vrot.slane %v2537_v56, %v1366_v55 }
  0x20   : > { %2076 = vmatprep.subr.bf16.mxu0 %v2154_v6 }
  0x21   : > { %3549 = vst [vmem:[#allocation4_spill] sm:$0xff] %v2569_v5 }
  0x23   : > { %2077 = vmatpush3.bf16.msra.mxu0 %v2154_v6 }
  0x24   : > { %2078 = vmatprep.subr.bf16.mxu0 %v2155_v7 }
  0x27   : > { %2079 = vmatpush3.bf16.msra.mxu0 %v2155_v7 }
  0x28   : > { %2080 = vmatprep.subr.bf16.mxu0 %v2156_v8 }
  0x2b   : > { %2081 = vmatpush3.bf16.msra.mxu0 %v2156_v8  ;;  %v1326_v8 = vsub.s32 3, %v2505_v33 }
  0x2e   : > { %2083 = vmatmul.mubr.bf16.vlgmr.msra.gmra.mrb[0].mxu0 %v2158_v9  ;;  %v1145_v9 = vand.u32 7, %v2544_v59 }
  0x2f   : > { %2086 = vmatprep.mubr.bf16.mxu0 %v2159_v10 }
  0x30   : > { %vm2598_vm2 = vcmp.ge.s32.totalorder %v1145_v9, 1 }
  0x36   : > { %2087 = vmatmul.mubr.bf16.gmra.mrb[4].mxu0 %v2160_v11 }
  0x37   : > { %2090 = vmatprep.mubr.bf16.mxu0 %v2161_v12 }
  0x3e   : > { %2091 = vmatmul.mubr.bf16.gmra.mrb[8].mxu0 %v2162_v13 }
  0x3f   : > { %2094 = vmatprep.mubr.bf16.mxu0 %v2163_v14  ;;  %v3503_v14 = vmov 0.0  }
  0x40   : > { %v2626_v48 = vsel %vm2598_vm2, 1.0, %v3503_v14 }
  0x41   : > { %3562 = vst [vmem:[#allocation11_spill] sm:$0xff] %v2626_v48 }
  0x46   : > { %2095 = vmatmul.mubr.bf16.gmra.mrb[12].mxu0 %v2164_v15  ;;  %v2579_v15 = vsel %vm2552_vm0, 1.0, %v3503_v14 }
  0x47   : > { %2098 = vmatprep.mubr.bf16.mxu0 %v2165_v16  ;;  %3550 = vst [vmem:[#allocation5_spill] sm:$0xff] %v2579_v15 }
  0x4e   : > { %2099 = vmatmul.mubr.bf16.gmra.mrb[16].mxu0 %v2166_v17 }
  0x4f   : > { %2102 = vmatprep.mubr.bf16.mxu0 %v2167_v18 }
  0x56   : > { %2103 = vmatmul.mubr.bf16.gmra.mrb[20].mxu0 %v2168_v19 }
  0x57   : > { %2106 = vmatprep.mubr.bf16.mxu0 %v2169_v20  ;;  %v3551_v20 = vmov 0 }
  0x58   : > { %v3552_v20 = vsel %vm2582_vm1, 4294967295, %v3551_v20 }
  0x59   : > { %3553 = vst [vmem:[#allocation6_spill] sm:$0xff] %v3552_v20 }
  0x5e   : > { %2107 = vmatmul.mubr.bf16.gmra.mrb[24].mxu0 %v2170_v21  ;;  %v1147_v21 = vand.u32 7, %v2562_v2 }
  0x5f   : > { %2110 = vmatprep.mubr.bf16.mxu0 %v2171_v22 }
  0x60   : > { %vm2613_vm3 = vcmp.ge.s32.totalorder %v1147_v21, 1 }
  0x61   : > { %v2636_v63 = vsel %vm2613_vm3, 1.0, %v3503_v14 }
  0x62   : > { %3564 = vst [vmem:[#allocation13_spill] sm:$0xff] %v2636_v63 }
  0x66   : > { %2111 = vmatmul.mubr.bf16.gmra.mrb[28].mxu0 %v2172_v23 }
 0x101   : > { %v2084_v26 = vpop.f32.mrb[0].mxu0 }
 0x102   : > { %v831_v28 = vmul.f32 %v2084_v26, %v2493_v24  ;;  %v695_v29 = vpop.f32.mrb[1].mxu0 }
 0x103   : > { %v829_v30 = vmul.f32 %v2493_v24, %v695_v29  ;;  %v2085_v31 = vpop.f32.mrb[2].mxu0 }
 0x104   : > { %v2503_v32 = vadd.f32 %v2498_v27, %v831_v28  ;;  %v832_v34 = vmul.f32 %v2085_v31, %v2493_v24  ;;  %v698_v35 = vpop.f32.mrb[3].mxu0  ;;  %v3555_v31 = vmov 0 }
 0x105   : > { %v2509_v36 = vadd.f32 %v2498_v27, %v829_v30  ;;  %v830_v37 = vmul.f32 %v2493_v24, %v698_v35  ;;  %v2596_v30 = vrot.slane %v2537_v56, %v1326_v8  ;;  %v3556_v31 = vsel %vm2598_vm2, 4294967295, %v3555_v31 }
 0x106   : > { %v1910_v38 = vmul.f32 -1.442695, %v2503_v32  ;;  %v2514_v39 = vadd.f32 %v2498_v27, %v832_v34  ;;  %3557 = vst [vmem:[#allocation8_spill] sm:$0xff] %v3556_v31 }
 0x107   : > { %v1908_v41 = vmul.f32 -1.442695, %v2509_v36  ;;  %v2521_v42 = vadd.f32 %v2498_v27, %v830_v37  ;;  %3554 = vst [vmem:[#allocation7_spill] sm:$0xff] %v2596_v30 }
 0x108   : > { %2181 = vpow2.f32 %v1910_v38  ;;  %v1911_v43 = vmul.f32 -1.442695, %v2514_v39  ;;  %v2607_v38 = vadd.s32 56, %v2505_v33 }
 0x109   : > { %2183 = vpow2.f32 %v1908_v41  ;;  %v1909_v44 = vmul.f32 -1.442695, %v2521_v42  ;;  %v2088_v45 = vpop.f32.mrb[4].mxu0 }
 0x10a   : > { %v835_v46 = vmul.f32 %v2088_v45, %v2493_v24  ;;  %v711_v47 = vpop.f32.mrb[5].mxu0  ;;  %2185 = vpow2.f32 %v1911_v43  ;;  %v3558_v45 = vmov 0 }
 0x10b   : > { %v833_v50 = vmul.f32 %v2493_v24, %v711_v47  ;;  %v2089_v51 = vpop.f32.mrb[6].mxu0  ;;  %2187 = vpow2.f32 %v1909_v44  ;;  %v3559_v45 = vsel %vm2613_vm3, 4294967295, %v3558_v45  ;;  %v2621_v47 = vsel %vm2582_vm1, 1.0, %v3503_v14 }
 0x10c   : > { %v836_v53 = vmul.f32 %v2089_v51, %v2493_v24  ;;  %v714_v54 = vpop.f32.mrb[7].mxu0  ;;  %v2547_v60 = vadd.f32 %v2498_v27, %v835_v46  ;;  %3560 = vst [vmem:[#allocation9_spill] sm:$0xff] %v3559_v45  ;;  %3561 = vst [vmem:[#allocation10_spill] sm:$0xff] %v2621_v47 }
 0x10d   : > { %v2540_v57 = vadd.f32 %v2498_v27, %v833_v50  ;;  %v834_v58 = vmul.f32 %v2493_v24, %v714_v54 }
 0x10e   : > { %v2550_v61 = vadd.f32 %v2498_v27, %v836_v53  ;;  %v1914_v11 = vmul.f32 -1.442695, %v2547_v60  ;;  %v2630_v53 = vadd.s32 40, %v2505_v33 }
 0x10f   : > { %v1912_v0 = vmul.f32 -1.442695, %v2540_v57  ;;  %v2559_v1 = vadd.f32 %v2498_v27, %v834_v58 }
 0x110   : > { %v1915_v4 = vmul.f32 -1.442695, %v2550_v61  ;;  %3563 = vst [vmem:[#allocation12_spill] sm:$0xff] %v2630_v53 }
 0x111   : > { %2189 = vpow2.f32 %v1912_v0  ;;  %v1913_v6 = vmul.f32 -1.442695, %v2559_v1  ;;  %v2092_v7 = vpop.f32.mrb[8].mxu0 }
 0x112   : > { %v2182_v10 = vpop.eup %2181  ;;  %2191 = vpow2.f32 %v1915_v4  ;;  %v839_v12 = vmul.f32 %v2092_v7, %v2493_v24  ;;  %v727_v13 = vpop.f32.mrb[9].mxu0  ;;  %v1138_v7 = vshra.s32 %v2517_v40, 3 }
 0x113   : > { %v2184_v16 = vpop.eup %2183  ;;  %v998_v17 = vadd.f32 1.0, %v2182_v10  ;;  %v837_v18 = vmul.f32 %v2493_v24, %v727_v13  ;;  %v2093_v19 = vpop.f32.mrb[10].mxu0  ;;  %2193 = vpow2.f32 %v1913_v6 }
 0x114   : > { %v996_v22 = vadd.f32 1.0, %v2184_v16  ;;  %v2588_v23 = vadd.f32 %v2498_v27, %v839_v12  ;;  %v840_v25 = vmul.f32 %v2093_v19, %v2493_v24  ;;  %v730_v26 = vpop.f32.mrb[11].mxu0  ;;  %v2186_v34 = vpop.eup %2185  ;;  %2195 = vpow2.f32 %v1914_v11 }
 0x115   : > { %v2592_v28 = vadd.f32 %v2498_v27, %v837_v18  ;;  %v838_v29 = vmul.f32 %v2493_v24, %v730_v26  ;;  %v2188_v41 = vpop.eup %2187  ;;  %2197 = vrcp.f32 %v998_v17  ;;  %v999_v50 = vadd.f32 1.0, %v2186_v34 }
 0x116   : > { %v1918_v35 = vmul.f32 -1.442695, %v2588_v23  ;;  %v2604_v37 = vadd.f32 %v2498_v27, %v840_v25  ;;  %2199 = vrcp.f32 %v996_v22  ;;  %v997_v54 = vadd.f32 1.0, %v2188_v41 }
 0x117   : > { %v1916_v43 = vmul.f32 -1.442695, %v2592_v28  ;;  %v2611_v44 = vadd.f32 %v2498_v27, %v838_v29  ;;  %v1136_v22 = vshra.s32 %v2528_v49, 3  ;;  %v1139_v29 = vshra.s32 %v2562_v2, 3 }
 0x118   : > { %v1919_v46 = vmul.f32 -1.442695, %v2604_v37  ;;  %2201 = vpow2.f32 %v1918_v35  ;;  %v1414_v41 = vsub.s32 7, %v2505_v33  ;;  %vm2673_vm4 = vcmp.ge.s32.totalorder %v1138_v7, 1 }
 0x119   : > { %v1917_v51 = vmul.f32 -1.442695, %v2611_v44  ;;  %v2096_v52 = vpop.f32.mrb[12].mxu0  ;;  %2203 = vpow2.f32 %v1916_v43  ;;  %vm2679_vm5 = vcmp.ge.s32.totalorder %v1136_v22, 1  ;;  %vm2683_vm6 = vcmp.ge.s32.totalorder %v1139_v29, 1 }
 0x11a   : > { %v843_v55 = vmul.f32 %v2096_v52, %v2493_v24  ;;  %v743_v58 = vpop.f32.mrb[13].mxu0  ;;  %2205 = vpow2.f32 %v1919_v46  ;;  %v2668_v52 = vadd.s32 48, %v2505_v33  ;;  %v3575_v43 = vmov 0 }
 0x11b   : > { %v2190_v0 = vpop.eup %2189  ;;  %v841_v4 = vmul.f32 %v2493_v24, %v743_v58  ;;  %v2097_v6 = vpop.f32.mrb[14].mxu0  ;;  %2207 = vpow2.f32 %v1917_v51  ;;  %v1254_v58 = vsub.s32 1, %v2505_v33 }
 0x11c   : > { %v2192_v9 = vpop.eup %2191  ;;  %v1000_v10 = vadd.f32 1.0, %v2190_v0  ;;  %v2642_v11 = vadd.f32 %v2498_v27, %v843_v55  ;;  %v844_v12 = vmul.f32 %v2097_v6, %v2493_v24  ;;  %v746_v13 = vpop.f32.mrb[15].mxu0  ;;  %2209 = vrcp.f32 %v999_v50  ;;  %3565 = vst [vmem:[#allocation14_spill] sm:$0xff] %v2668_v52 }
 0x11d   : > { %v1003_v16 = vadd.f32 1.0, %v2192_v9  ;;  %v2646_v17 = vadd.f32 %v2498_v27, %v841_v4  ;;  %v842_v18 = vmul.f32 %v2493_v24, %v746_v13  ;;  %v2194_v19 = vpop.eup %2193  ;;  %2211 = vrcp.f32 %v997_v54 }
 0x11e   : > { %v1922_v40 = vmul.f32 -1.442695, %v2642_v11  ;;  %v2651_v21 = vadd.f32 %v2498_v27, %v844_v12  ;;  %2213 = vrcp.f32 %v1000_v10  ;;  %v2659_v34 = vpop.eup %2195  ;;  %v1001_v49 = vadd.f32 1.0, %v2194_v19 }
 0x11f   : > { %v1920_v25 = vmul.f32 -1.442695, %v2646_v17  ;;  %v2656_v26 = vadd.f32 %v2498_v27, %v842_v18  ;;  %2215 = vrcp.f32 %v1003_v16  ;;  %v2664_v46 = vpop.eup %2197  ;;  %v3566_v55 = vmov 0 }
 0x120   : > { %v1923_v35 = vmul.f32 -1.442695, %v2651_v21  ;;  %2217 = vpow2.f32 %v1922_v40  ;;  %v2670_v2 = vpop.eup %2199  ;;  %v3567_v55 = vsel %vm2673_vm4, 4294967295, %v3566_v55  ;;  %v3569_v9 = vmov 0 }
 0x121   : > { %v1921_v50 = vmul.f32 -1.442695, %v2656_v26  ;;  %v2100_v51 = vpop.f32.mrb[16].mxu0  ;;  %2219 = vpow2.f32 %v1920_v25  ;;  %3568 = vst [vmem:[#allocation15_spill] sm:$0xff] %v3567_v55  ;;  %v3570_v9 = vsel %vm2679_vm5, 4294967295, %v3569_v9  ;;  %v3572_v12 = vmov 0 }
 0x122   : > { %v847_v54 = vmul.f32 %v2100_v51, %v2493_v24  ;;  %v759_v0 = vpop.f32.mrb[17].mxu0  ;;  %v2202_v4 = vpop.eup %2201  ;;  %2221 = vpow2.f32 %v1923_v35  ;;  %3571 = vst [vmem:[#allocation16_spill] sm:$0xff] %v3570_v9  ;;  %v3573_v12 = vsel %vm2683_vm6, 4294967295, %v3572_v12  ;;  %v1137_v19 = vshra.s32 %v2544_v59, 3 }
 0x123   : > { %v845_v6 = vmul.f32 %v2493_v24, %v759_v0  ;;  %v2101_v10 = vpop.f32.mrb[18].mxu0  ;;  %3574 = vst [vmem:[#allocation17_spill] sm:$0xff] %v3573_v12  ;;  %v2204_v7 = vpop.eup %2203  ;;  %v1006_v13 = vadd.f32 1.0, %v2202_v4  ;;  %2223 = vpow2.f32 %v1921_v50 }
 0x124   : > { %v2688_v16 = vadd.f32 %v2498_v27, %v847_v54  ;;  %v762_v18 = vpop.f32.mrb[19].mxu0  ;;  %v2206_v40 = vpop.eup %2205  ;;  %2225 = vrcp.f32 %v1001_v49  ;;  %v1004_v22 = vadd.f32 1.0, %v2204_v7  ;;  %v848_v29 = vmul.f32 %v2101_v10, %v2493_v24 }
 0x125   : > { %v2692_v25 = vadd.f32 %v2498_v27, %v845_v6  ;;  %v2208_v35 = vpop.eup %2207  ;;  %2227 = vrcp.f32 %v1006_v13  ;;  %v1007_v51 = vadd.f32 1.0, %v2206_v40  ;;  %v846_v50 = vmul.f32 %v2493_v24, %v762_v18 }
 0x126   : > { %v1926_v0 = vmul.f32 -1.442695, %v2688_v16  ;;  %v2697_v54 = vpop.eup %2209  ;;  %2229 = vrcp.f32 %v1004_v22  ;;  %v1005_v4 = vadd.f32 1.0, %v2208_v35  ;;  %v2701_v49 = vadd.f32 %v2498_v27, %v848_v29 }
 0x127   : > { %v1924_v59 = vmul.f32 -1.442695, %v2692_v25  ;;  %v2703_v6 = vpop.eup %2211  ;;  %2231 = vrcp.f32 %v1007_v51  ;;  %v2706_v10 = vrot.slane %v2537_v56, %v1414_v41  ;;  %v2709_v7 = vadd.f32 %v2498_v27, %v846_v50 }
 0x128   : > { %v2712_v18 = vpop.eup %2213  ;;  %2233 = vrcp.f32 %v1005_v4  ;;  %v2717_v40 = vsel %vm2673_vm4, 1.0, %v3503_v14  ;;  %v2720_v22 = vrot.slane %v2537_v56, %v1254_v58  ;;  %v1927_v29 = vmul.f32 -1.442695, %v2701_v49 }
 0x129   : > { %v2104_v41 = vpop.f32.mrb[20].mxu0  ;;  %v2723_v35 = vpop.eup %2215  ;;  %2235 = vpow2.f32 %v1926_v0  ;;  %v2728_v51 = vsel %vm2679_vm5, 1.0, %v3503_v14  ;;  %v2733_v50 = vsel %vm2683_vm6, 1.0, %v3503_v14  ;;  %v1925_v4 = vmul.f32 -1.442695, %v2709_v7 }
 0x12a   : > { %v775_v58 = vpop.f32.mrb[21].mxu0  ;;  %v2218_v13 = vpop.eup %2217  ;;  %2237 = vpow2.f32 %v1924_v59  ;;  %vm2736_vm7 = vcmp.ge.s32.totalorder %v1137_v19, 1  ;;  %v851_v0 = vmul.f32 %v2104_v41, %v2493_v24  ;;  %v1142_v14 = vshra.s32 %v2607_v38, 3 }
 0x12b   : > { %v3576_v43 = vsel %vm2736_vm7, 4294967295, %v3575_v43  ;;  %v2105_v8 = vpop.f32.mrb[22].mxu0  ;;  %v2220_v30 = vpop.eup %2219  ;;  %v1010_v48 = vadd.f32 1.0, %v2218_v13  ;;  %2239 = vpow2.f32 %v1927_v29  ;;  %v849_v5 = vmul.f32 %v2493_v24, %v775_v58 }
 0x12c   : > { %3577 = vst [vmem:[#allocation18_spill] sm:$0xff] %v3576_v43  ;;  %v778_v47 = vpop.f32.mrb[23].mxu0  ;;  %v2222_v59 = vpop.eup %2221  ;;  %v1008_v19 = vadd.f32 1.0, %v2220_v30  ;;  %2241 = vpow2.f32 %v1925_v4  ;;  %v2746_v15 = vadd.f32 %v2498_v27, %v851_v0  ;;  %v1140_v41 = vshra.s32 %v2630_v53, 3 }
 0x12d   : > { %v2224_v56 = vpop.eup %2223  ;;  %2243 = vrcp.f32 %v1010_v48  ;;  %v1011_v63 = vadd.f32 1.0, %v2222_v59  ;;  %v2750_v31 = vadd.f32 %v2498_v27, %v849_v5  ;;  %v852_v13 = vmul.f32 %v2105_v8, %v2493_v24 }
 0x12e   : > { %v2753_v29 = vpop.eup %2225  ;;  %2245 = vrcp.f32 %v1008_v19  ;;  %v1009_v58 = vadd.f32 1.0, %v2224_v56  ;;  %v1930_v30 = vmul.f32 -1.442695, %v2746_v15  ;;  %v850_v4 = vmul.f32 %v2493_v24, %v778_v47 }
 0x12f   : > { %v2228_v0 = vpop.eup %2227  ;;  %2247 = vrcp.f32 %v1011_v63  ;;  %vm2757_vm9 = vcmp.ge.s32.totalorder %v1142_v14, 1  ;;  %v3578_v53 = vmov 0  ;;  %v1928_v48 = vmul.f32 -1.442695, %v2750_v31 }
 0x130   : > { %v3579_v53 = vsel %vm2757_vm9, 4294967295, %v3578_v53  ;;  %v2763_v5 = vadd.f32 %v2498_v27, %v852_v13  ;;  %v2230_v8 = vpop.eup %2229  ;;  %v1002_v59 = vadd.f32 1.0, %v2659_v34  ;;  %v2767_v56 = vmul.f32 %v2228_v0, %v2588_v23 }
 0x131   : > { %3580 = vst [vmem:[#allocation19_spill] sm:$0xff] %v3579_v53  ;;  %2249 = vrcp.f32 %v1009_v58  ;;  %v3582_v19 = vmov 0.0   ;;  %v2108_v14 = vpop.f32.mrb[24].mxu0  ;;  %v2232_v63 = vpop.eup %2231  ;;  %v2775_v12 = vmul.f32 %v2230_v8, %v2592_v28  ;;  %v2779_v45 = vadd.f32 %v2498_v27, %v850_v4 }
 0x132   : > { %3581 = vst [vmem:[#allocation20_spill] sm:$0xff] %v2767_v56  ;;  %v2772_v47 = vsel %vm2736_vm7, 1.0, %v3582_v19  ;;  %2251 = vpow2.f32 %v1930_v30  ;;  %v1931_v13 = vmul.f32 -1.442695, %v2763_v5  ;;  %v2781_v34 = vpop.f32.mrb[25].mxu0  ;;  %v2234_v23 = vpop.eup %2233  ;;  %v2784_v58 = vmul.f32 %v2232_v63, %v2604_v37 }
 0x133   : > { %3583 = vst [vmem:[#allocation21_spill] sm:$0xff] %v2775_v12  ;;  %v2789_v0 = vsel %vm2757_vm9, 1.0, %v3582_v19  ;;  %2253 = vpow2.f32 %v1928_v48  ;;  %v1135_v28 = vshra.s32 %v2505_v33, 3  ;;  %v2792_v30 = vpop.f32.mrb[26].mxu0  ;;  %v2236_v8 = vpop.eup %2235  ;;  %v2795_v4 = vmul.f32 %v2234_v23, %v2611_v44 }
 0x134   : > { %3584 = vst [vmem:[#allocation22_spill] sm:$0xff] %v2784_v58  ;;  %vm2797_vm10 = vcmp.ge.s32.totalorder %v1140_v41, 1  ;;  %2255 = vpow2.f32 %v1931_v13  ;;  %v1141_v37 = vshra.s32 %v2668_v52, 3  ;;  %v2802_v63 = vpop.f32.mrb[27].mxu0  ;;  %v2238_v53 = vpop.eup %2237  ;;  %v1286_v48 = vrot.slane %v2767_v56, 7 }
 0x135   : > { %3585 = vst [vmem:[#allocation23_spill] sm:$0xff] %v2795_v4  ;;  %2257 = vrcp.f32 %v1002_v59  ;;  %v1287_v9 = vrot.slane %v2784_v58, 7  ;;  %v1014_v20 = vadd.f32 1.0, %v2236_v8  ;;  %v2240_v55 = vpop.eup %2239  ;;  %v1284_v44 = vrot.slane %v2775_v12, 7 }
 0x136   : > { %v1285_v41 = vrot.slane %v2795_v4, 7  ;;  %v1012_v23 = vadd.f32 1.0, %v2238_v53  ;;  %v1929_v62 = vmul.f32 -1.442695, %v2779_v45  ;;  %v2242_v13 = vpop.eup %2241  ;;  %v1015_v59 = vadd.f32 1.0, %v2240_v55 }
 0x137   : > { %v2811_v52 = vsel %vm3537_vm8, %v1286_v48, %v1287_v9  ;;  %2259 = vrcp.f32 %v1014_v20  ;;  %vm2813_vm11 = vcmp.ge.s32.totalorder %v1135_v28, 1  ;;  %v3589_v56 = vmov 0  ;;  %v2244_v8 = vpop.eup %2243 }
 0x138   : > { %3588 = vst [vmem:[#allocation24_spill] sm:$0xff] %v2811_v52  ;;  %v3590_v56 = vsel %vm2813_vm11, 4294967295, %v3589_v56  ;;  %v2819_v58 = vsel %vm3537_vm8, %v1285_v41, %v1286_v48  ;;  %v2823_v53 = vsel %vm3537_vm8, %v1284_v44, %v1285_v41  ;;  %2261 = vrcp.f32 %v1012_v23  ;;  %v2246_v20 = vpop.eup %2245 }
 0x139   : > { %3591 = vst [vmem:[#allocation25_spill] sm:$0xff] %v3590_v56  ;;  %3592 = vst [vmem:[#allocation26_spill] sm:$0xff] %v2819_v58  ;;  %vm2825_vm12 = vcmp.ge.s32.totalorder %v1141_v37, 1  ;;  %v3594_v4 = vmov 0  ;;  %v2830_v55 = vmul.f32 %v2244_v8, %v2642_v11  ;;  %2263 = vrcp.f32 %v1015_v59  ;;  %v2837_v58 = vpop.f32.mrb[28].mxu0  ;;  %v2248_v41 = vpop.eup %2247 }
 0x13a   : > { %3593 = vst [vmem:[#allocation27_spill] sm:$0xff] %v2823_v53  ;;  %v3595_v4 = vsel %vm2825_vm12, 4294967295, %v3594_v4  ;;  %v1013_v28 = vadd.f32 1.0, %v2242_v13  ;;  %v2835_v48 = vsel %vm2797_vm10, 1.0, %v3582_v19  ;;  %v2840_v23 = vmul.f32 %v2246_v20, %v2646_v17  ;;  %v2848_v13 = vpop.f32.mrb[29].mxu0 }
 0x13b   : > { %3596 = vst [vmem:[#allocation28_spill] sm:$0xff] %v3595_v4  ;;  %v2845_v37 = vsel %vm2813_vm11, 1.0, %v3582_v19  ;;  %2265 = vpow2.f32 %v1929_v62  ;;  %v855_v11 = vmul.f32 %v2108_v14, %v2493_v24  ;;  %v2250_v59 = vpop.eup %2249  ;;  %v1094_v8 = vmul.f32 %v2664_v46, %v2503_v32  ;;  %v2862_v62 = vpop.f32.mrb[30].mxu0  ;;  %vm3625_vm11 = vmand %vm2673_vm4, %vm2552_vm0 }
 0x13c   : > { %v1092_v12 = vmul.f32 %v2670_v2, %v2509_v36  ;;  %v2855_v17 = vmul.f32 %v2248_v41, %v2651_v21  ;;  %v2860_v20 = vsel %vm2825_vm12, 1.0, %v3582_v19  ;;  %v2252_v14 = vpop.eup %2251  ;;  %v1095_v53 = vmul.f32 %v2697_v54, %v2514_v39  ;;  %v2870_v36 = vpop.f32.mrb[31].mxu0  ;;  %vm3629_vm0 = vmand %vm2679_vm5, %vm2582_vm1 }
 0x13d   : > { %3597 = vst [vmem:[#allocation29_spill] sm:$0xff] %v2860_v20  ;;  %v1288_v52 = vrot.slane %v2840_v23, 7  ;;  %v2868_v32 = vmul.f32 %v2250_v59, %v2656_v26  ;;  %2267 = vrcp.f32 %v1013_v28  ;;  %v2254_v21 = vpop.eup %2253  ;;  %v1093_v46 = vmul.f32 %v2703_v6, %v2521_v42  ;;  %vm3630_vm4 = vmand %vm2683_vm6, %vm2613_vm3 }
 0x13e   : > { %v1290_v2 = vrot.slane %v2830_v55, 7  ;;  %v1291_v41 = vrot.slane %v2855_v17, 7  ;;  %v1018_v4 = vadd.f32 1.0, %v2252_v14  ;;  %v2256_v56 = vpop.eup %2255  ;;  %v1016_v54 = vadd.f32 1.0, %v2254_v21 }
 0x13f   : > { %3598 = vst [vmem:[#allocation30_spill] sm:$0xff] %v2868_v32  ;;  %v2878_v39 = vsel %vm3537_vm8, %v1287_v9, %v1288_v52  ;;  %v1289_v26 = vrot.slane %v2868_v32, 7  ;;  %v2882_v28 = vadd.f32 %v2498_v27, %v855_v11  ;;  %v2258_v59 = vpop.eup %2257  ;;  %v1096_v42 = vmul.f32 %v2712_v18, %v2540_v57 }
 0x140   : > { %v2888_v6 = vsel %vm3537_vm8, %v1290_v2, %v1291_v41  ;;  %v2892_v14 = vsel %vm3537_vm8, %v1291_v41, %v1284_v44  ;;  %2269 = vrcp.f32 %v1018_v4  ;;  %v1099_v9 = vmul.f32 %v2723_v35, %v2550_v61 }
 0x141   : > { %v2898_v11 = vsel %vm3537_vm8, %v1289_v26, %v1290_v2  ;;  %v2902_v21 = vsel %vm3537_vm8, %v1288_v52, %v1289_v26  ;;  %2271 = vrcp.f32 %v1016_v54  ;;  %v2260_v57 = vpop.eup %2259  ;;  %v1350_v18 = vmul.f32 %v2565_v3, %v1094_v8 }
 0x142   : > { %v2906_v32 = vmul.f32 %v2565_v3, %v1092_v12  ;;  %v1097_v4 = vmul.f32 %v2753_v29, %v2559_v1  ;;  %v1019_v44 = vadd.f32 1.0, %v2256_v56  ;;  %v2262_v61 = vpop.eup %2261  ;;  %v1351_v35 = vmul.f32 %v2565_v3, %v1095_v53 }
 0x143   : > { %v1110_v2 = vmul.f32 %v2260_v57, %v2688_v16  ;;  %v1934_v41 = vmul.f32 -1.442695, %v2882_v28  ;;  %v853_v52 = vmul.f32 %v2493_v24, %v2781_v34  ;;  %v2264_v26 = vpop.eup %2263  ;;  %v1349_v8 = vmul.f32 %v2565_v3, %v1093_v46 }
 0x144   : > { %v2917_v12 = vmul.f32 %v2258_v59, %v2547_v60  ;;  %v2920_v54 = vmul.f32 %v2262_v61, %v2692_v25  ;;  %2273 = vrcp.f32 %v1019_v44  ;;  %v1352_v29 = vmul.f32 %v2565_v3, %v1096_v42 }
 0x145   : > { %v2266_v1 = vpop.eup %2265  ;;  %v1355_v16 = vmul.f32 %v2565_v3, %v1099_v9  ;;  %v1247_v56 = vmul.f32 %v2717_v40, %v1110_v2  ;;  %v1111_v53 = vmul.f32 %v2264_v26, %v2701_v49  ;;  %v1353_v34 = vmul.f32 %v2565_v3, %v1097_v4 }
 0x146   : > { %v1245_v46 = vmul.f32 %v2728_v51, %v2920_v54  ;;  %v1017_v60 = vadd.f32 1.0, %v2266_v1  ;;  %2275 = vpow2.f32 %v1934_v41  ;;  %v2933_v9 = vadd.f32 %v2498_v27, %v853_v52 }
 0x147   : > { %v2268_v59 = vpop.eup %2267  ;;  %v1259_v25 = vmul.f32 %v2720_v22, %v1247_v56  ;;  %v1248_v57 = vmul.f32 %v2733_v50, %v1111_v53  ;;  %v1419_v42 = vmul.f32 %v2706_v10, %v1111_v53  ;;  %v856_v4 = vmul.f32 %v2792_v30, %v2493_v24 }
 0x148   : > { %v1257_v44 = vmul.f32 %v2720_v22, %v1245_v46  ;;  %v1109_v49 = vmul.f32 %v2268_v59, %v2709_v7  ;;  %2277 = vrcp.f32 %v1017_v60  ;;  %v1932_v26 = vmul.f32 -1.442695, %v2933_v9 }
 0x149   : > { %v1260_v61 = vmul.f32 %v2720_v22, %v1248_v57  ;;  %v1359_v41 = vadd.f32 %v1351_v35, %v1259_v25  ;;  %v854_v1 = vmul.f32 %v2493_v24, %v2802_v63  ;;  %v2946_v7 = vadd.f32 %v2498_v27, %v856_v4 }
 0x14a   : > { %v2270_v56 = vpop.eup %2269  ;;  %v1246_v52 = vmul.f32 %v2772_v47, %v1109_v49  ;;  %v1357_v53 = vadd.f32 %v1349_v8, %v1257_v44  ;;  %v1417_v46 = vmul.f32 %v2706_v10, %v1109_v49  ;;  %2279 = vpow2.f32 %v1932_v26 }
 0x14b   : > { %v2272_v60 = vpop.eup %2271  ;;  %v2948_v59 = vadd.f32 %v1419_v42, %v1359_v41  ;;  %v2951_v30 = vmul.f32 %v2270_v56, %v2746_v15  ;;  %v1360_v35 = vadd.f32 %v1352_v29, %v1260_v61  ;;  %v1935_v8 = vmul.f32 -1.442695, %v2946_v7 }
 0x14c   : > { %v1258_v25 = vmul.f32 %v2720_v22, %v1246_v52  ;;  %v2954_v63 = vadd.f32 %v1417_v46, %v1357_v53  ;;  %v1112_v57 = vmul.f32 %v2272_v60, %v2750_v31  ;;  %v1418_v44 = vmul.f32 %v2706_v10, %v1110_v2 }
 0x14d   : > { %v3600_v49 = vand.u32 7, %v2607_v38  ;;  %v1251_v15 = vmul.f32 %v2789_v0, %v2951_v30  ;;  %v2968_v29 = vadd.f32 %v2498_v27, %v854_v1  ;;  %v859_v4 = vmul.f32 %v2837_v58, %v2493_v24 }
 0x14e   : > { %3599 = vst [vmem:[#allocation31_spill] sm:$0xff] %v2954_v63  ;;  %v2274_v31 = vpop.eup %2273  ;;  %v1358_v61 = vadd.f32 %v1350_v18, %v1258_v25  ;;  %v1249_v41 = vmul.f32 %v2835_v48, %v1112_v57  ;;  %v1420_v2 = vmul.f32 %v2706_v10, %v1112_v57  ;;  %2281 = vpow2.f32 %v1935_v8 }
 0x14f   : > { %vm2961_vm13 = vcmp.ge.s32.totalorder %v3600_v49, 1  ;;  %v1263_v38 = vmul.f32 %v2720_v22, %v1251_v15  ;;  %v1115_v26 = vmul.f32 %v2274_v31, %v2763_v5  ;;  %v1933_v56 = vmul.f32 -1.442695, %v2968_v29 }
 0x150   : > { %v2978_v52 = vadd.f32 %v2498_v27, %v859_v4  ;;  %v2276_v1 = vpop.eup %2275  ;;  %v2980_v53 = vadd.f32 %v1418_v44, %v1358_v61  ;;  %v1261_v58 = vmul.f32 %v2720_v22, %v1249_v41  ;;  %v2983_v18 = vadd.f32 %v1420_v2, %v1360_v35  ;;  %vm1191_vm12 = vmand %vm2757_vm9, %vm2961_vm13 }
 0x151   : > { %v3603_v46 = vand.u32 7, %v2505_v33  ;;  %v857_v5 = vmul.f32 %v2493_v24, %v2848_v13  ;;  %v1244_v25 = vmul.f32 %v2845_v37, %v1115_v26  ;;  %v1363_v57 = vadd.f32 %v1355_v16, %v1263_v38 }
 0x152   : > { %v1423_v8 = vmul.f32 %v2706_v10, %v1115_v26  ;;  %v1022_v44 = vadd.f32 1.0, %v2276_v1  ;;  %v2278_v49 = vpop.eup %2277  ;;  %v1361_v15 = vadd.f32 %v1353_v34, %v1261_v58  ;;  %2283 = vpow2.f32 %v1933_v56 }
 0x153   : > { %vm2987_vm14 = vcmp.ge.s32.totalorder %v3603_v46, 1  ;;  %v1938_v35 = vmul.f32 -1.442695, %v2978_v52  ;;  %v2997_v4 = vadd.f32 %v2498_v27, %v857_v5  ;;  %v1256_v31 = vmul.f32 %v2720_v22, %v1244_v25 }
 0x154   : > { %v3000_v61 = vadd.f32 %v1423_v8, %v1363_v57  ;;  %v1113_v13 = vmul.f32 %v2278_v49, %v2779_v45  ;;  %2285 = vrcp.f32 %v1022_v44  ;;  %v860_v41 = vmul.f32 %v2862_v62, %v2493_v24  ;;  %v2280_v2 = vpop.eup %2279  ;;  %v3637_v49 = vld [vmem:[#allocation28_spill] sm:$0xff] }
 0x155   : > { %2287 = vpow2.f32 %v1938_v35  ;;  %v1936_v16 = vmul.f32 -1.442695, %v2997_v4  ;;  %v858_v34 = vmul.f32 %v2493_v24, %v2870_v36  ;;  %v1416_v38 = vmul.f32 %v2706_v10, %v2920_v54  ;;  %v3643_v35 = vld [vmem:[#allocation27_spill] sm:$0xff] }
 0x156   : > { %3606 = vst [vmem:[#allocation32_spill] sm:$0xff] %v3000_v61  ;;  %v1356_v26 = vadd.f32 %v2906_v32, %v1256_v31  ;;  %v1250_v56 = vmul.f32 %v2860_v20, %v1113_v13  ;;  %v1421_v45 = vmul.f32 %v2706_v10, %v1113_v13  ;;  %v1020_v46 = vadd.f32 1.0, %v2280_v2 }
 0x157   : > { %2289 = vpow2.f32 %v1936_v16  ;;  %v3018_v62 = vadd.f32 %v2498_v27, %v860_v41  ;;  %v3021_v24 = vadd.f32 %v2498_v27, %v858_v34  ;;  %v1354_v32 = vmul.f32 %v2565_v3, %v2917_v12  ;;  %v3615_v3 = vld [vmem:[#allocation12_spill] sm:$0xff]  ;;  %v3621_v16 = vld [vmem:[#allocation14_spill] sm:$0xff]  ;;  %v3642_v34 = vld [vmem:[#allocation5_spill] sm:$0xff] }
 0x158   : > { %v3029_v5 = vadd.f32 %v1416_v38, %v1356_v26  ;;  %v1262_v25 = vmul.f32 %v2720_v22, %v1250_v56  ;;  %v3032_v57 = vadd.f32 %v1421_v45, %v1361_v15  ;;  %v2282_v8 = vpop.eup %2281  ;;  %v3041_v27 = vsel %vm2961_vm13, 1.0, %v3582_v19  ;;  %v3619_v15 = vld [vmem:[#allocation8_spill] sm:$0xff] }
 0x159   : > { %v3616_v12 = vand.u32 7, %v3615_v3  ;;  %2291 = vrcp.f32 %v1020_v46  ;;  %v1939_v22 = vmul.f32 -1.442695, %v3018_v62  ;;  %v1422_v13 = vmul.f32 %v2706_v10, %v2951_v30 }
 0x15a   : > { %3611 = vst [vmem:[#allocation3_spill] sm:$0xff] %v3029_v5  ;;  %3612 = vst [vmem:[#allocation15_spill] sm:$0xff] %v3032_v57  ;;  %v3622_v41 = vand.u32 7, %v3621_v16  ;;  %v1362_v2 = vadd.f32 %v1354_v32, %v1262_v25  ;;  %v1023_v38 = vadd.f32 1.0, %v2282_v8  ;;  %v3068_v26 = vsel %vm3625_vm11, 1.0, %v3582_v19  ;;  %v3631_v8 = vld [vmem:[#allocation25_spill] sm:$0xff] }
 0x15b   : > { %vm3045_vm8 = vcmp.ge.s32.totalorder %v3616_v12, 1  ;;  %v1274_v10 = vsub.s32 2, %v2505_v33  ;;  %2293 = vpow2.f32 %v1939_v22  ;;  %v1937_v30 = vmul.f32 -1.442695, %v3021_v24  ;;  %v3650_v57 = vld [vmem:[#allocation26_spill] sm:$0xff] }
 0x15c   : > { %vm3058_vm15 = vcmp.ge.s32.totalorder %v3622_v41, 1  ;;  %v3083_v45 = vsel %vm3045_vm8, 1.0, %v3582_v19  ;;  %v3088_v1 = vsel %vm2987_vm14, 1.0, %v3582_v19  ;;  %v3090_v58 = vadd.f32 %v1422_v13, %v1362_v2  ;;  %v2284_v46 = vpop.eup %2283  ;;  %v3640_v13 = vld [vmem:[#allocation2_spill] sm:$0xff]  ;;  %v3641_v41 = vld [vmem:[#allocation24_spill] sm:$0xff] }
 0x15d   : > { %3627 = vst [vmem:[#allocation6_spill] sm:$0xff] %v3083_v45  ;;  %2295 = vrcp.f32 %v1023_v38  ;;  %v3098_v32 = vsel %vm3629_vm0, 1.0, %v3582_v19  ;;  %v3106_v25 = vsel %vm3630_vm4, 1.0, %v3582_v19  ;;  %vm3632_vm11 = vnez %v3631_v8 }
 0x15e   : > { %3628 = vst [vmem:[#allocation16_spill] sm:$0xff] %v3090_v58  ;;  %vm1184_vm2 = vmand %vm3632_vm11, %vm2987_vm14  ;;  %v3115_v36 = vsel %vm3058_vm15, 1.0, %v3582_v19  ;;  %v3541_v54 = vsub.s32 0, %v2505_v33  ;;  %v2286_v3 = vpop.eup %2285  ;;  %vm3634_vm1 = vnez %v3619_v15  ;;  %v3132_v60 = vsel %vm1191_vm12, 1.0, %v3582_v19 }
 0x15f   : > { %3633 = vst [vmem:[#allocation9_spill] sm:$0xff] %v3115_v36  ;;  %vm3635_vm3 = vmand %vm2736_vm7, %vm3634_vm1  ;;  %vm3638_vm5 = vnez %v3637_v49  ;;  %v1394_v12 = vsub.s32 6, %v2505_v33  ;;  %v1021_v22 = vadd.f32 1.0, %v2284_v46  ;;  %v2288_v15 = vpop.eup %2287  ;;  %v3148_v42 = vmul.f32 %v2286_v3, %v2882_v28  ;;  %v3644_v46 = vld [vmem:[#allocation10_spill] sm:$0xff]  ;;  %v3647_v3 = vld [vmem:[#allocation4_spill] sm:$0xff] }
 0x160   : > { %v3124_v44 = vsel %vm3635_vm3, 1.0, %v3582_v19  ;;  %3636 = vst [vmem:[#allocation17_spill] sm:$0xff] %v3132_v60  ;;  %vm1190_vm6 = vmand %vm3638_vm5, %vm3058_vm15  ;;  %v3151_v16 = vrot.slane %v3640_v13, %v1274_v10  ;;  %2297 = vpow2.f32 %v1937_v30  ;;  %v1319_v2 = vmul.f32 %v3642_v34, %v3641_v41  ;;  %v3646_v30 = vld [vmem:[#allocation20_spill] sm:$0xff] }
 0x161   : > { %vm3639_vm7 = vmand %vm2797_vm10, %vm3045_vm8  ;;  %v3156_v38 = vsel %vm1184_vm2, 1.0, %v3582_v19  ;;  %2299 = vrcp.f32 %v1021_v22  ;;  %v1026_v43 = vadd.f32 1.0, %v2288_v15  ;;  %v2290_v56 = vpop.eup %2289  ;;  %v1317_v8 = vmul.f32 %v3644_v46, %v3643_v35 }
 0x162   : > { %v3145_v31 = vsel %vm3639_vm7, 1.0, %v3582_v19  ;;  %v3161_v49 = vsel %vm1190_vm6, 1.0, %v3582_v19  ;;  %v1267_v28 = vmul.f32 %v2717_v40, %v3148_v42  ;;  %v3168_v10 = vrot.slane %v3640_v13, %v3541_v54  ;;  %v3648_v19 = vld [vmem:[#allocation21_spill] sm:$0xff]  ;;  %v3649_v40 = vld [vmem:[#allocation22_spill] sm:$0xff]  ;;  %v3651_v54 = vld [vmem:[#allocation11_spill] sm:$0xff] }
 0x163   : > { %3645 = vst [vmem:[#allocation12_spill] sm:$0xff] %v3161_v49  ;;  %v3172_v41 = vmul.f32 %v3647_v3, %v3646_v30  ;;  %v3175_v22 = vrot.slane %v3640_v13, %v1394_v12  ;;  %2301 = vrcp.f32 %v1026_v43  ;;  %v1024_v15 = vadd.f32 1.0, %v2290_v56  ;;  %v2292_v35 = vpop.eup %2291  ;;  %v3652_v30 = vld [vmem:[#allocation23_spill] sm:$0xff]  ;;  %v3654_v43 = vld [vmem:[#allocation13_spill] sm:$0xff] }
 0x164   : > { %v3179_v58 = vmul.f32 %v3647_v3, %v3648_v19  ;;  %v1371_v61 = vmul.f32 %v3647_v3, %v3649_v40  ;;  %v1318_v49 = vmul.f32 %v3651_v54, %v3650_v57  ;;  %v1279_v60 = vmul.f32 %v3151_v16, %v1267_v28  ;;  %v3653_v12 = vld [vmem:[#allocation7_spill] sm:$0xff] }
 0x165   : > { %v1369_v63 = vmul.f32 %v3647_v3, %v3652_v30  ;;  %v3189_v13 = vmul.f32 %v3653_v12, %v1319_v2  ;;  %v1320_v56 = vmul.f32 %v3654_v43, %v2878_v39  ;;  %v3194_v19 = vmul.f32 %v2292_v35, %v2933_v9  ;;  %v2294_v5 = vpop.eup %2293  ;;  %v3656_v35 = vld [vmem:[#allocation30_spill] sm:$0xff] }
 0x166   : > { %v3198_v40 = vmul.f32 %v3647_v3, %v2830_v55  ;;  %v1372_v57 = vmul.f32 %v3647_v3, %v2840_v23  ;;  %v3203_v28 = vmul.f32 %v3653_v12, %v1317_v8  ;;  %v1379_v30 = vadd.f32 %v1371_v61, %v1279_v60 }
 0x167   : > { %v2296_v2 = vpop.eup %2295  ;;  %v1323_v20 = vmul.f32 %v3041_v27, %v2888_v6  ;;  %v1265_v39 = vmul.f32 %v2728_v51, %v3194_v19  ;;  %2303 = vrcp.f32 %v1024_v15  ;;  %v1027_v9 = vadd.f32 1.0, %v2294_v5  ;;  %v3227_v5 = vld [vmem:[%s3489_s4 + $0x8] ss:$0 sm:$0xff] }
 0x168   : > { %3655 = vst [vmem:[#allocation8_spill] sm:$0xff] %v3198_v40  ;;  %v3211_v55 = vmul.f32 %v3647_v3, %v2855_v17  ;;  %v3215_v23 = vmul.f32 %v3647_v3, %v3656_v35  ;;  %v1330_v8 = vmul.f32 %v3653_v12, %v1318_v49  ;;  %v3219_v61 = vmul.f32 %v2296_v2, %v2946_v7 }
 0x169   : > { %v1332_v6 = vmul.f32 %v3653_v12, %v1320_v56  ;;  %v1321_v51 = vmul.f32 %v3083_v45, %v2902_v21  ;;  %v1277_v17 = vmul.f32 %v3151_v16, %v1265_v39  ;;  %2305 = vrcp.f32 %v1027_v9 }
 0x16a   : > { %v2298_v60 = vpop.eup %2297  ;;  %v1153_v3 = vrot.slane %v3148_v42, 7  ;;  %v1154_v49 = vrot.slane %v3219_v61, 7  ;;  %v1268_v7 = vmul.f32 %v2733_v50, %v3219_v61  ;;  %v1439_v15 = vmul.f32 %v3227_v5, %v3219_v61 }
 0x16b   : > { %v2300_v21 = vpop.eup %2299  ;;  %v3237_v56 = vmul.f32 %v3653_v12, %v1323_v20  ;;  %v1316_v2 = vmul.f32 %v3088_v1, %v2892_v14  ;;  %v3243_v39 = vmul.f32 %v3115_v36, %v2898_v11  ;;  %v1377_v9 = vadd.f32 %v1369_v63, %v1277_v17 }
 0x16c   : > { %vm3658_vm2 = vcmp.lt.s32.totalorder %v2505_v33, 1  ;;  %v1280_v50 = vmul.f32 %v3151_v16, %v1268_v7  ;;  %v3248_v40 = vadd.f32 %v1439_v15, %v1379_v30  ;;  %v1117_v61 = vmul.f32 %v2300_v21, %v2968_v29 }
 0x16d   : > { %3657 = vst [vmem:[#allocation18_spill] sm:$0xff] %v3237_v56  ;;  %v1164_v35 = vsel %vm3658_vm2, %v1153_v3, %v1154_v49  ;;  %v2302_v45 = vpop.eup %2301  ;;  %v3252_v20 = vmul.f32 %v3653_v12, %v1321_v51  ;;  %v1151_v14 = vrot.slane %v3194_v19, 7  ;;  %v1025_v11 = vadd.f32 1.0, %v2298_v60  ;;  %vm3659_vm8 = vmmov %vm3658_vm2 }
 0x16e   : > { %v1212_v56 = vmul.f32 %v3106_v25, %v1164_v35  ;;  %v1152_v36 = vrot.slane %v1117_v61, 7  ;;  %v1266_v63 = vmul.f32 %v2772_v47, %v1117_v61  ;;  %v1437_v17 = vmul.f32 %v3227_v5, %v1117_v61  ;;  %vm3660_vm9 = vmmov %vm3658_vm2 }
 0x16f   : > { %v3259_v7 = vmul.f32 %v2302_v45, %v2978_v52  ;;  %v3262_v30 = vmul.f32 %v3653_v12, %v1316_v2  ;;  %v1387_v51 = vmul.f32 %v3642_v34, %v1164_v35  ;;  %v1380_v15 = vadd.f32 %v1372_v57, %v1280_v50  ;;  %vm3661_vm10 = vmmov %vm3658_vm2 }
 0x170   : > { %v1224_v29 = vmul.f32 %v3168_v10, %v1212_v56  ;;  %v1165_v25 = vsel %vm3659_vm8, %v1152_v36, %v1153_v3  ;;  %v1166_v60 = vsel %vm3660_vm9, %v1151_v14, %v1152_v36  ;;  %v1278_v47 = vmul.f32 %v3151_v16, %v1266_v63  ;;  %vm3662_vm12 = vmmov %vm3658_vm2 }
 0x171   : > { %v3271_v21 = vadd.f32 %v1437_v17, %v1377_v9  ;;  %v2304_v52 = vpop.eup %2303  ;;  %v1438_v45 = vmul.f32 %v3227_v5, %v3148_v42  ;;  %v1210_v56 = vmul.f32 %v3124_v44, %v1166_v60  ;;  %v1211_v34 = vmul.f32 %v3068_v26, %v1165_v25  ;;  %vm3663_vm13 = vmmov %vm3658_vm2 }
 0x172   : > { %v1340_v2 = vadd.f32 %v1332_v6, %v1224_v29  ;;  %v1378_v57 = vadd.f32 %v3172_v41, %v1278_v47  ;;  %v1386_v3 = vmul.f32 %v3651_v54, %v1165_v25  ;;  %v1271_v36 = vmul.f32 %v2789_v0, %v3259_v7  ;;  %vm3666_vm14 = vmmov %vm3658_vm2 }
 0x173   : > { %2307 = vrcp.f32 %v1025_v11  ;;  %v2306_v35 = vpop.eup %2305  ;;  %v1436_v9 = vmul.f32 %v3227_v5, %v3194_v19  ;;  %v1399_v50 = vmul.f32 %v3175_v22, %v1387_v51  ;;  %v1222_v42 = vmul.f32 %v3168_v10, %v1210_v56  ;;  %vm3668_vm15 = vmmov %vm3658_vm2 }
 0x174   : > { %v1223_v44 = vmul.f32 %v3168_v10, %v1211_v34  ;;  %v1385_v26 = vmul.f32 %v3644_v46, %v1166_v60  ;;  %v1446_v6 = vadd.f32 %v1438_v45, %v1378_v57  ;;  %v1283_v41 = vmul.f32 %v3151_v16, %v1271_v36 }
 0x175   : > { %v3289_v54 = vmul.f32 %v2304_v52, %v2997_v4  ;;  %v1338_v0 = vadd.f32 %v1330_v8, %v1222_v42  ;;  %v1398_v11 = vmul.f32 %v3175_v22, %v1386_v3  ;;  %v1123_v19 = vmul.f32 %v2306_v35, %v3018_v62 }
 0x176   : > { %v1339_v61 = vadd.f32 %v3189_v13, %v1223_v44  ;;  %v1157_v63 = vrot.slane %v3259_v7, 7  ;;  %v1383_v29 = vadd.f32 %v3211_v55, %v1283_v41 }
 0x177   : > { %v1155_v17 = vrot.slane %v3289_v54, 7  ;;  %v1440_v46 = vmul.f32 %v3227_v5, %v3289_v54  ;;  %v1406_v51 = vadd.f32 %v1398_v11, %v1338_v0  ;;  %v1158_v4 = vrot.slane %v1123_v19, 7 }
 0x178   : > { %v1407_v25 = vadd.f32 %v1399_v50, %v1339_v61  ;;  %v1264_v8 = vmul.f32 %v2845_v37, %v1123_v19  ;;  %v1269_v62 = vmul.f32 %v2835_v48, %v3289_v54  ;;  %v1443_v47 = vmul.f32 %v3227_v5, %v1123_v19 }
 0x179   : > { %v1163_v13 = vsel %vm3661_vm10, %v1154_v49, %v1155_v17  ;;  %v1448_v60 = vadd.f32 %v1440_v46, %v1380_v15  ;;  %v1454_v52 = vadd.f32 %v2980_v53, %v1406_v51  ;;  %v1160_v37 = vsel %vm3662_vm12, %v1157_v63, %v1158_v4  ;;  %v3319_v53 = vld [vmem:[%s3490_s5] ss:$0 sm:$0xff]  ;;  %v3665_v51 = vld [vmem:[#allocation3_spill] sm:$0xff] }
 0x17a   : > { %v1455_v45 = vadd.f32 %v2948_v59, %v1407_v25  ;;  %v1213_v55 = vmul.f32 %v3145_v31, %v1163_v13  ;;  %v1388_v56 = vmul.f32 %v3654_v43, %v1163_v13  ;;  %v1167_v49 = vsel %vm3663_vm13, %v1158_v4, %v1151_v14  ;;  %v3667_v25 = vld [vmem:[#allocation31_spill] sm:$0xff]  ;;  %v3669_v13 = vld [vmem:[#allocation17_spill] sm:$0xff] }
 0x17b   : > { %v1276_v34 = vmul.f32 %v3151_v16, %v1264_v8  ;;  %v3314_v48 = vadd.f32 %v1443_v47, %v1383_v29  ;;  %v1462_v15 = vadd.f32 %v1454_v52, %v1446_v6  ;;  %v1208_v43 = vmul.f32 %v3156_v38, %v1160_v37  ;;  %v3664_v29 = vld [vmem:[#allocation29_spill] sm:$0xff]  ;;  %v3670_v52 = vld [vmem:[#allocation12_spill] sm:$0xff] }
 0x17c   : > { %v1225_v59 = vmul.f32 %v3168_v10, %v1213_v55  ;;  %v1400_v31 = vmul.f32 %v3175_v22, %v1388_v56  ;;  %v1281_v3 = vmul.f32 %v3151_v16, %v1269_v62  ;;  %v1209_v14 = vmul.f32 %v3098_v32, %v1167_v49  ;;  %v3671_v55 = vld [vmem:[#allocation6_spill] sm:$0xff] }
 0x17d   : > { %v2308_v57 = vpop.eup %2307  ;;  %v1376_v36 = vadd.f32 %v3179_v58, %v1276_v34  ;;  %v1384_v35 = vmul.f32 %v3088_v1, %v1167_v49  ;;  %v1334_v50 = vmul.f32 %v3653_v12, %v3243_v39  ;;  %v1220_v6 = vmul.f32 %v3168_v10, %v1208_v43  ;;  %v3338_v58 = vld [vmem:[%s3491_s6] ss:$0 sm:$0xff]  ;;  %v3672_v49 = vld [vmem:[#allocation8_spill] sm:$0xff] }
 0x17e   : > { %v1341_v42 = vadd.f32 %v3252_v20, %v1225_v59  ;;  %v1408_v44 = vadd.f32 %v1400_v31, %v1340_v2  ;;  %v1477_v41 = vmul.f32 %v3319_v53, %v1462_v15  ;;  %v1221_v38 = vmul.f32 %v3168_v10, %v1209_v14  ;;  %v3673_v15 = vld [vmem:[#allocation9_spill] sm:$0xff] }
 0x17f   : > { %v1391_v54 = vmul.f32 %v3041_v27, %v1160_v37  ;;  %v1444_v0 = vadd.f32 %v1436_v9, %v1376_v36  ;;  %v1336_v32 = vadd.f32 %v3262_v30, %v1220_v6  ;;  %v1396_v12 = vmul.f32 %v3175_v22, %v1384_v35 }
 0x180   : > { %v1456_v1 = vadd.f32 %v2983_v18, %v1408_v44  ;;  %v1121_v39 = vmul.f32 %v2308_v57, %v3021_v24  ;;  %v1397_v20 = vmul.f32 %v3175_v22, %v1385_v26  ;;  %v1337_v2 = vadd.f32 %v3203_v28, %v1221_v38 }
 0x181   : > { %v1381_v27 = vadd.f32 %v3215_v23, %v1281_v3  ;;  %v1463_v9 = vadd.f32 %v1455_v45, %v3248_v40  ;;  %v1442_v61 = vmul.f32 %v3227_v5, %v3259_v7  ;;  %v1404_v19 = vadd.f32 %v1396_v12, %v1336_v32  ;;  %v3674_v3 = vld [vmem:[#allocation18_spill] sm:$0xff]  ;;  %v3675_v32 = vld [vmem:[#allocation15_spill] sm:$0xff] }
 0x182   : > { %v1464_v11 = vadd.f32 %v1456_v1, %v1448_v60  ;;  %v1156_v18 = vrot.slane %v1121_v39, 7  ;;  %v3351_v30 = vadd.f32 %v3338_v58, %v1477_v41  ;;  %v1403_v46 = vmul.f32 %v3175_v22, %v1391_v54 }
 0x183   : > { %v1405_v24 = vadd.f32 %v1397_v20, %v1337_v2  ;;  %v1270_v26 = vmul.f32 %v3664_v29, %v1121_v39  ;;  %v1452_v23 = vadd.f32 %v3665_v51, %v1404_v19  ;;  %v1441_v7 = vmul.f32 %v3227_v5, %v1121_v39  ;;  %v3676_v20 = vld [vmem:[#allocation32_spill] sm:$0xff] }
 0x184   : > { %v1479_v28 = vmul.f32 %v3319_v53, %v1464_v11  ;;  %v1161_v40 = vsel %vm3666_vm14, %v1156_v18, %v1157_v63  ;;  %v1162_v8 = vsel %vm3668_vm15, %v1155_v17, %v1156_v18  ;;  %v1478_v37 = vmul.f32 %v3319_v53, %v1463_v9 }
 0x185   : > { %v1453_v4 = vadd.f32 %v3667_v25, %v1405_v24  ;;  %v1215_v62 = vmul.f32 %v3669_v13, %v1161_v40  ;;  %v1282_v60 = vmul.f32 %v3151_v16, %v1270_v26  ;;  %v1460_v47 = vadd.f32 %v1452_v23, %v1444_v0 }
 0x186   : > { %v1214_v45 = vmul.f32 %v3670_v52, %v1162_v8  ;;  %v1389_v56 = vmul.f32 %v3671_v55, %v1162_v8  ;;  %v1390_v59 = vmul.f32 %v3673_v15, %v1161_v40  ;;  %v1969_v17 = vmul.f32 -1.442695, %v3351_v30 }
 0x187   : > { %v1461_v63 = vadd.f32 %v1453_v4, %v3271_v21  ;;  %v1227_v5 = vmul.f32 %v3168_v10, %v1215_v62  ;;  %v1382_v34 = vadd.f32 %v3672_v49, %v1282_v60  ;;  %v1475_v31 = vmul.f32 %v3319_v53, %v1460_v47 }
 0x188   : > { %v1226_v16 = vmul.f32 %v3168_v10, %v1214_v45  ;;  %v1401_v43 = vmul.f32 %v3175_v22, %v1389_v56  ;;  %v3377_v57 = vadd.f32 %v3338_v58, %v1479_v28  ;;  %v1449_v21 = vadd.f32 %v1441_v7, %v1381_v27 }
 0x189   : > { %v1343_v14 = vadd.f32 %v3674_v3, %v1227_v5  ;;  %v1450_v36 = vadd.f32 %v1442_v61, %v1382_v34  ;;  %v1490_v35 = vadd.f32 %v3338_v58, %v1475_v31  ;;  %v1402_v6 = vmul.f32 %v3175_v22, %v1390_v59 }
 0x18a   : > { %v1342_v44 = vadd.f32 %v1334_v50, %v1226_v16  ;;  %v1409_v41 = vadd.f32 %v1401_v43, %v1341_v42  ;;  %v1476_v54 = vmul.f32 %v3319_v53, %v1461_v63  ;;  %v3384_v10 = vadd.f32 %v3338_v58, %v1478_v37  ;;  %v3677_v42 = vld [vmem:[#allocation16_spill] sm:$0xff] }
 0x18b   : > { %v1411_v38 = vadd.f32 %v1403_v46, %v1343_v14  ;;  %2309 = vpow2.f32 %v1969_v17  ;;  %v1967_v0 = vmul.f32 -1.442695, %v1490_v35  ;;  %v1971_v39 = vmul.f32 -1.442695, %v3377_v57 }
 0x18c   : > { %v1410_v1 = vadd.f32 %v1402_v6, %v1342_v44  ;;  %v1457_v12 = vadd.f32 %v3675_v32, %v1409_v41  ;;  %v1491_v50 = vadd.f32 %v3338_v58, %v1476_v54  ;;  %v1970_v22 = vmul.f32 -1.442695, %v3384_v10 }
 0x18d   : > { %v1459_v2 = vadd.f32 %v3676_v20, %v1411_v38  ;;  %2311 = vpow2.f32 %v1967_v0 }
 0x18e   : > { %v1458_v27 = vadd.f32 %v3677_v42, %v1410_v1  ;;  %v1465_v9 = vadd.f32 %v1457_v12, %v1449_v21  ;;  %v1968_v11 = vmul.f32 -1.442695, %v1491_v50  ;;  %2313 = vpow2.f32 %v1970_v22 }
 0x18f   : > { %v1467_v61 = vadd.f32 %v1459_v2, %v3314_v48  ;;  %2315 = vpow2.f32 %v1971_v39  ;;  %v1569_v2 = vld [vmem:[%s3492_s7] sm:$0xff]  ;;  %v2358_v42 = vmov 0  }
 0x190   : > { %v1466_v19 = vadd.f32 %v1458_v27, %v1450_v36  ;;  %v1480_v18 = vmul.f32 %v3319_v53, %v1465_v9  ;;  %2317 = vpow2.f32 %v1968_v11  ;;  %2148 = vset.pattern.permute.xlu0 %v2358_v42  ;;  %v1573_v27 = vld [vmem:[%s3493_s8] sm:$0xff] }
 0x191   : > { %v1482_v46 = vmul.f32 %v3319_v53, %v1467_v61 }
 0x192   : > { %v1481_v24 = vmul.f32 %v3319_v53, %v1466_v19  ;;  %v1495_v29 = vadd.f32 %v3338_v58, %v1480_v18 }
 0x193   : > { %v1497_v26 = vadd.f32 %v3338_v58, %v1482_v46 }
 0x194   : > { %v1496_v28 = vadd.f32 %v3338_v58, %v1481_v24  ;;  %v1972_v51 = vmul.f32 -1.442695, %v1495_v29 }
 0x195   : > { %v1974_v23 = vmul.f32 -1.442695, %v1497_v26  ;;  %v2310_v48 = vpop.eup %2309 }
 0x196   : > { %2319 = vpow2.f32 %v1972_v51  ;;  %v1973_v40 = vmul.f32 -1.442695, %v1496_v28  ;;  %v1524_v8 = vadd.f32 1.0, %v2310_v48  ;;  %v2176_v51 = vld [vmem:[%s3496_s11 + $0x18] sm:$0xff]   ;;  %v2178_v48 = vld [vmem:[%s3496_s11 + $0x28] sm:$0xff]  }
 0x197   : > { %v2312_v7 = vpop.eup %2311 }
 0x198   : > { %2321 = vpow2.f32 %v1973_v40  ;;  %v1522_v25 = vadd.f32 1.0, %v2312_v7  ;;  %v2314_v4 = vpop.eup %2313  ;;  %v2179_v40 = vld [vmem:[%s3496_s11 + $0x30] sm:$0xff]   ;;  %v2180_v7 = vld [vmem:[%s3496_s11 + $0x38] sm:$0xff]  }
 0x199   : > { %2323 = vpow2.f32 %v1974_v23  ;;  %v2316_v13 = vpop.eup %2315  ;;  %v1525_v60 = vadd.f32 1.0, %v2314_v4  ;;  %v2177_v23 = vld [vmem:[%s3496_s11 + $0x20] sm:$0xff]  }
 0x19a   : > { %2325 = vrcp.f32 %v1522_v25  ;;  %v2318_v53 = vpop.eup %2317  ;;  %v1526_v47 = vadd.f32 1.0, %v2316_v13  ;;  %v1582_v25 = vld [vmem:[%s3494_s9] sm:$0xff] }
 0x19b   : > { %v1523_v62 = vadd.f32 1.0, %v2318_v53  ;;  %2327 = vrcp.f32 %v1524_v8 }
 0x19d   : > { %2329 = vrcp.f32 %v1523_v62 }
 0x19e   : > { %2331 = vrcp.f32 %v1525_v60 }
 0x19f   : > { %2333 = vrcp.f32 %v1526_v47 }
 0x1a0   : > { %v2320_v58 = vpop.eup %2319 }
 0x1a1   : > { %v1527_v52 = vadd.f32 1.0, %v2320_v58  ;;  %v1595_v58 = vld [vmem:[%s3495_s10] sm:$0x1] }
 0x1a2   : > { %v2322_v45 = vpop.eup %2321 }
 0x1a3   : > { %v2324_v55 = vpop.eup %2323  ;;  %v1528_v56 = vadd.f32 1.0, %v2322_v45  ;;  %2335 = vrcp.f32 %v1527_v52 }
 0x1a4   : > { %v2326_v37 = vpop.eup %2325  ;;  %v1529_v63 = vadd.f32 1.0, %v2324_v55 }
 0x1a5   : > { %2337 = vrcp.f32 %v1528_v56  ;;  %v2328_v5 = vpop.eup %2327  ;;  %v3399_v49 = vmul.f32 %v2326_v37, %v1490_v35 }
 0x1a6   : > { %2339 = vrcp.f32 %v1529_v63  ;;  %v3404_v17 = vmul.f32 %v2328_v5, %v3351_v30  ;;  %v3678_v5 = vsub.s32 0, %v2505_v33 }
 0x1a7   : > { %v2330_v34 = vpop.eup %2329 }
 0x1a8   : > { %v3401_v15 = vmul.f32 %v2330_v34, %v1491_v50  ;;  %v2332_v59 = vpop.eup %2331 }
 0x1a9   : > { %v2334_v16 = vpop.eup %2333  ;;  %v3409_v43 = vmul.f32 %v2332_v59, %v3384_v10 }
 0x1aa   : > { %v1554_v31 = vadd.f32 %v3401_v15, %v3399_v49  ;;  %v3413_v21 = vmul.f32 %v2334_v16, %v3377_v57 }
 0x1ac   : > { %v1555_v3 = vadd.f32 %v1554_v31, %v3404_v17 }
 0x1ad   : > { %v2336_v14 = vpop.eup %2335 }
 0x1ae   : > { %v1556_v36 = vadd.f32 %v1555_v3, %v3409_v43  ;;  %v3416_v44 = vmul.f32 %v2336_v14, %v1495_v29  ;;  %v2173_v29 = vld [vmem:[%s3496_s11] sm:$0xff]  }
 0x1af   : > { %v2338_v35 = vpop.eup %2337  ;;  %2114 = vmatprep.subr.bf16.mxu1 %v2173_v29 }
 0x1b0   : > { %v1557_v30 = vadd.f32 %v1556_v36, %v3413_v21  ;;  %v2340_v6 = vpop.eup %2339  ;;  %v3419_v41 = vmul.f32 %v2338_v35, %v1496_v28  ;;  %2115 = vmatpush3.bf16.msra.mxu1 %v2173_v29  ;;  %v2175_v28 = vld [vmem:[%s3496_s11 + $0x10] sm:$0xff]  }
 0x1b1   : > { %v3422_v54 = vmul.f32 %v2340_v6, %v1497_v26  ;;  %v2174_v26 = vld [vmem:[%s3496_s11 + $0x8] sm:$0xff]  }
 0x1b2   : > { %v1558_v38 = vadd.f32 %v1557_v30, %v3416_v44  ;;  %2116 = vmatprep.subr.bf16.mxu1 %v2174_v26 }
 0x1b4   : > { %v1559_v10 = vadd.f32 %v1558_v38, %v3419_v41  ;;  %2117 = vmatpush3.bf16.msra.mxu1 %v2174_v26  ;;  %v1986_v38 = vld [vmem:[%s3498_s13] ss:$0 sm:$0xff] }
 0x1b5   : > { %2118 = vmatprep.subr.bf16.mxu1 %v2175_v28 }
 0x1b6   : > { %v1560_v0 = vadd.f32 %v1559_v10, %v3422_v54 }
 0x1b8   : > { %v1561_v57 = vrot.slane %v1560_v0, 4  ;;  %2119 = vmatpush3.bf16.msra.mxu1 %v2175_v28 }
 0x1b9   : > { %2120 = vmatprep.subr.bf16.mxu1 %v2176_v51 }
 0x1ba   : > { %v1562_v1 = vadd.f32 %v1561_v57, %v1560_v0 }
 0x1bc   : > { %v1563_v32 = vrot.slane %v1562_v1, 2  ;;  %2121 = vmatpush3.bf16.msra.mxu1 %v2176_v51 }
 0x1bd   : > { %2122 = vmatprep.subr.bf16.mxu1 %v2177_v23 }
 0x1be   : > { %v1564_v12 = vadd.f32 %v1563_v32, %v1562_v1 }
 0x1c0   : > { %v1565_v39 = vrot.slane %v1564_v12, 1  ;;  %2123 = vmatpush3.bf16.msra.mxu1 %v2177_v23 }
 0x1c1   : > { %2124 = vmatprep.subr.bf16.mxu1 %v2178_v48 }
 0x1c2   : > { %v1566_v20 = vadd.f32 %v1565_v39, %v1564_v12 }
 0x1c4   : > { %v1568_v50 = vmul.f32 0.015625, %v1566_v20  ;;  %2125 = vmatpush3.bf16.msra.mxu1 %v2178_v48 }
 0x1c5   : > { %2126 = vmatprep.subr.bf16.mxu1 %v2179_v40 }
 0x1c6   : > { %v1570_v22 = vmul.f32 %v1569_v2, %v1568_v50 }
 0x1c8   : > { %1571 = vadd.xlane.f32.xlu0 %v1570_v22  ;;  %2127 = vmatpush3.bf16.msra.mxu1 %v2179_v40 }
 0x1c9   : > { %2128 = vmatprep.subr.bf16.mxu1 %v2180_v7 }
 0x1cc   : > { %2129 = vmatpush3.bf16.msra.mxu1 %v2180_v7 }
 0x255   : > { %v1572_v9 = vpop.xlane.xlu0 %1571 }
 0x256   : > { %v1574_v61 = vadd.f32 %v1573_v27, %v1572_v9 }
 0x258   : > { %v1975_v11 = vmul.f32 -1.442695, %v1574_v61 }
 0x25a   : > { %2341 = vpow2.f32 %v1975_v11 }
 0x264   : > { %v2342_v19 = vpop.eup %2341 }
 0x265   : > { %v1578_v18 = vadd.f32 1.0, %v2342_v19 }
 0x267   : > { %2343 = vrcp.f32 %v1578_v18 }
 0x271   : > { %v2344_v46 = vpop.eup %2343 }
 0x272   : > { %v1581_v24 = vmul.f32 %v2344_v46, %v1574_v61 }
 0x274   : > { %1585 = vperm.xlu0 %2148, %v1581_v24  }
 0x2f3   : > { %v1586_v4 = vpop.permute.xlu0 %1585 }
 0x2f4   : > { %v1588_v8 = vmul.f32 %v1586_v4, %v1582_v25 }
 0x2f6   : > { %v1589_v13 = vrot.slane %v1588_v8, 4 }
 0x2f8   : > { %v1590_v53 = vadd.f32 %v1589_v13, %v1588_v8 }
 0x2fa   : > { %v1591_v62 = vrot.slane %v1590_v53, 2 }
 0x2fc   : > { %v1592_v60 = vadd.f32 %v1591_v62, %v1590_v53 }
 0x2fe   : > { %v1593_v47 = vrot.slane %v1592_v60, 1 }
 0x300   : > { %v1594_v52 = vadd.f32 %v1593_v47, %v1592_v60 }
 0x302   : > { %v1596_v45 = vadd.f32 %v1595_v58, %v1594_v52 }
 0x304   : > { %v1976_v55 = vmul.f32 -1.442695, %v1596_v45 }
 0x306   : > { %2345 = vpow2.f32 %v1976_v55 }
 0x310   : > { %v2346_v56 = vpop.eup %2345 }
 0x311   : > { %v1600_v37 = vadd.f32 1.0, %v2346_v56 }
 0x313   : > { %2347 = vrcp.f32 %v1600_v37 }
 0x31d   : > { %v2348_v63 = vpop.eup %2347 }
 0x31e   : > { %v1606_v34 = vrot.slane %v2348_v63, %v3678_v5 }
 0x320   : > { %v1607_v59 = vmul.f32 %v1606_v34, %v3399_v49  ;;  %v1608_v31 = vmul.f32 %v1606_v34, %v3401_v15  ;;  %v1609_v16 = vmul.f32 %v1606_v34, %v3404_v17  ;;  %v1610_v3 = vmul.f32 %v1606_v34, %v3409_v43  ;;  %v1985_v17 = vld [vmem:[%s3497_s12] ss:$0 sm:$0xff] }
 0x321   : > { %v1611_v14 = vmul.f32 %v1606_v34, %v3413_v21  ;;  %v1612_v36 = vmul.f32 %v1606_v34, %v3416_v44  ;;  %v1613_v33 = vmul.f32 %v1606_v34, %v3419_v41  ;;  %v1614_v49 = vmul.f32 %v1606_v34, %v3422_v54 }
 0x322   : > { %v1615_v35 = vpack.c.bf16 %v1608_v31, %v1607_v59  ;;  %v1616_v30 = vpack.c.bf16 %v1610_v3, %v1609_v16 }
 0x323   : > { %v1617_v6 = vpack.c.bf16 %v1612_v36, %v1611_v14  ;;  %v1618_v15 = vpack.c.bf16 %v1614_v49, %v1613_v33 }
 0x324   : > { %2130 = vmatprep.mubr.bf16.mxu1 %v1615_v35 }
 0x325   : > { %2131 = vmatmul.mubr.bf16.vlgmr.msra.gmra.mrb[0].mxu1 %v1616_v30 }
 0x326   : > { %2134 = vmatprep.mubr.bf16.mxu1 %v1617_v6 }
 0x32d   : > { %2135 = vmatmul.mubr.bf16.gmra.mrb[4].mxu1 %v1618_v15 }
 0x3f8   : > { %v2132_v43 = vpop.f32.mrb[0].mxu1 }
 0x3f9   : > { %v1757_v21 = vmul.f32 %v2132_v43, %v1985_v17  ;;  %v1717_v44 = vpop.f32.mrb[1].mxu1 }
 0x3fa   : > { %v1755_v10 = vmul.f32 %v1985_v17, %v1717_v44  ;;  %v2133_v0 = vpop.f32.mrb[2].mxu1 }
 0x3fb   : > { %v1758_v57 = vmul.f32 %v2133_v0, %v1985_v17  ;;  %v1720_v41 = vpop.f32.mrb[3].mxu1  ;;  %v1772_v54 = vadd.f32 %v1986_v38, %v1757_v21 }
 0x3fc   : > { %v1756_v1 = vmul.f32 %v1985_v17, %v1720_v41  ;;  %v1770_v12 = vadd.f32 %v1986_v38, %v1755_v10 }
 0x3fd   : > { %v1773_v32 = vadd.f32 %v1986_v38, %v1758_v57 }
 0x3fe   : > { %v1771_v39 = vadd.f32 %v1986_v38, %v1756_v1 }
 0x3ff   : > { %v2015_v20 = vpack.c.bf16 %v1773_v32, %v1772_v54 }
 0x400   : > { %v2010_v2 = vpack.c.bf16 %v1771_v39, %v1770_v12  ;;  %v2136_v50 = vpop.f32.mrb[4].mxu1 }
 0x401   : > { %2027 = vst [vmem:[%s467_s22 + $0x8] sm:$0xff] %v2015_v20   ;;  %v1761_v22 = vmul.f32 %v2136_v50, %v1985_v17  ;;  %v1733_v42 = vpop.f32.mrb[5].mxu1 }
 0x402   : > { %2011 = vst [vmem:[%s467_s22] sm:$0xff] %v2010_v2   ;;  %v1759_v27 = vmul.f32 %v1985_v17, %v1733_v42  ;;  %v2137_v9 = vpop.f32.mrb[6].mxu1 }
 0x403   : > { %v1762_v61 = vmul.f32 %v2137_v9, %v1985_v17  ;;  %v1736_v11 = vpop.f32.mrb[7].mxu1  ;;  %v1776_v18 = vadd.f32 %v1986_v38, %v1761_v22 }
 0x404   : > { %v1760_v19 = vmul.f32 %v1985_v17, %v1736_v11  ;;  %v1774_v24 = vadd.f32 %v1986_v38, %v1759_v27 }
 0x405   : > { %v1777_v46 = vadd.f32 %v1986_v38, %v1762_v61 }
 0x406   : > { %v1775_v29 = vadd.f32 %v1986_v38, %v1760_v19 }
 0x407   : > { %v2025_v26 = vpack.c.bf16 %v1777_v46, %v1776_v18 }
 0x408   : > { %v2020_v28 = vpack.c.bf16 %v1775_v29, %v1774_v24 }
 0x409   : > { %2029 = vst [vmem:[%s467_s22 + $0x18] sm:$0xff] %v2025_v26  }
 0x40a   : > { %2028 = vst [vmem:[%s467_s22 + $0x10] sm:$0xff] %v2020_v28  }
 0x40b PF: > { %s24_s29 = sadd.s32 1, %s2355_s29  }
 0x40c   : > { %p21_p4 = scmp.ge.s32.totalorder %s24_s29, 4  }
 0x40e   :  { %23 = sbr.rel (!%p21_p4) target bundleno = 1 (0x1), region = 106 }

// kernel: _forward.5
= control target key start
LH: loop header
LB: loop body
LE: loop exit
PB: predicated region body
PF: predicated region fallthrough
CT: control target
= control target key end

     0   :  { %s4239_s0 = inlined_call_operand.vmem [shape: bf16[2,64,128], index: 0, kind: input, shape index: {}]   ;;  %s4240_s1 = inlined_call_operand.vmem [shape: bf16[128,128], index: 1, kind: input, shape index: {}]   ;;  %s4241_s2 = inlined_call_operand.vmem [shape: f32[1,128], index: 2, kind: input, shape index: {}]   ;;  %s4242_s3 = inlined_call_operand.vmem [shape: f32[1,128], index: 3, kind: input, shape index: {}]   ;;  %s4243_s4 = inlined_call_operand.vmem [shape: f32[9,128], index: 4, kind: input, shape index: {}]   ;;  %s4244_s5 = inlined_call_operand.vmem [shape: f32[1,128], index: 5, kind: input, shape index: {}]   ;;  %s4245_s6 = inlined_call_operand.vmem [shape: f32[1,128], index: 6, kind: input, shape index: {}]   ;;  %s4246_s7 = inlined_call_operand.vmem [shape: f32[8,128], index: 7, kind: input, shape index: {}]   ;;  %s4247_s8 = inlined_call_operand.vmem [shape: f32[8,1], index: 8, kind: input, shape index: {}]   ;;  %s4248_s9 = inlined_call_operand.vmem [shape: f32[8,128], index: 9, kind: input, shape index: {}]   ;;  %s4249_s10 = inlined_call_operand.vmem [shape: f32[1,128], index: 10, kind: input, shape index: {}]   ;;  %s4250_s11 = inlined_call_operand.vmem [shape: bf16[128,128], index: 11, kind: input, shape index: {}]   ;;  %s4251_s12 = inlined_call_operand.vmem [shape: f32[1,128], index: 12, kind: input, shape index: {}]   ;;  %s4252_s13 = inlined_call_operand.vmem [shape: f32[1,128], index: 13, kind: input, shape index: {}]   ;;  %s4253_s14 = inlined_call_operand.vmem [shape: bf16[128,128], index: 14, kind: input, shape index: {}]   ;;  %s4254_s15 = inlined_call_operand.vmem [shape: f32[1,128], index: 15, kind: input, shape index: {}]   ;;  %s4255_s16 = inlined_call_operand.vmem [shape: f32[1,128], index: 16, kind: input, shape index: {}]   ;;  %s4256_s17 = inlined_call_operand.vmem [shape: f32[128,128], index: 17, kind: input, shape index: {}]   ;;  %s4257_s18 = inlined_call_operand.vmem [shape: f32[1,128], index: 18, kind: input, shape index: {}]   ;;  %s4258_s19 = inlined_call_operand.vmem [shape: f32[2,64,128], index: 19, kind: output, shape index: {0}]   ;;  %s4259_s20 = inlined_call_operand.hbm [shape: f32[2,1,128], index: 20, kind: output, shape index: {1}]  }
   0x1   :  { %4297 = sst [smem:[#allocation51_spill]] %s4239_s0 }
   0x2   :  { %4298 = sst [smem:[#allocation52_spill]] %s4240_s1 }
   0x3   :  { %4299 = sst [smem:[#allocation53_spill]] %s4241_s2 }
   0x4   :  { %4300 = sst [smem:[#allocation54_spill]] %s4242_s3 }
   0x5   :  { %4301 = sst [smem:[#allocation55_spill]] %s4243_s4 }
   0x6   :  { %4302 = sst [smem:[#allocation56_spill]] %s4244_s5 }
   0x7   :  { %4303 = sst [smem:[#allocation57_spill]] %s4259_s20 }
   0x8   :  { %26 = vsyncpa [#allocation3], 0 }
   0x9   :  { %28 = vsyncpa [#allocation3 + $0x1], 0  ;;  %s2815_s1 = smov 0   ;;  %s2817_s22 = smov 0  }
   0xa   :  { %s2819_s23 = smov 0   ;;  %s2821_s24 = smov 0  }
   0xb LB: > { %4304 = sst [smem:[#allocation5_spill]] %s2691_s1  ;;  %s2836_s2 = sadd.s32 4294967295, %s2703_s24   ;;  %s2703_s24 = sphi %s2821_s24, %s4512_s24   ;;  %s2699_s23 = sphi %s2819_s23, %s4514_s23   ;;  %s2695_s22 = sphi %s2817_s22, %s4516_s22   ;;  %s2691_s1 = sphi %s2815_s1, %s4515_s1  }
   0xc   : > { %4305 = sst [smem:[#allocation6_spill]] %s2699_s23  ;;  %s2133_s25 = sadd.s32 4294967294, %s2703_s24  }
   0xd   : > { %4306 = sst [smem:[#allocation7_spill]] %s2703_s24  ;;  %s2840_s3 = sadd.s32 1, %s2703_s24  }
   0xe   : > { %4307 = sst [smem:[#allocation8_spill]] %s2840_s3  ;;  %s471_s26 = sadd.s32 1, %s2699_s23 }
   0xf   : > { %s468_s27 = ssub.s32 %s2703_s24, %s2840_s3  ;;  %p481_p0 = scmp.ne.s32.totalorder %s2699_s23, %s2695_s22 }
  0x10   : > { %p469_p1 = scmp.eq.s32.totalorder %s468_s27, 0  ;;  %p482_p2 = scmp.eq.s32.totalorder %s2836_s2, 1 }
  0x11   : > { %p487_p3 = scmp.ne.s32.totalorder %s2695_s22, %s2691_s1  ;;  %p488_p4 = scmp.eq.s32.totalorder %s2133_s25, 1 }
  0x12   : > { %s2851_s28 = scalar_select %p469_p1, %s2699_s23, %s471_s26  }
  0x13   : > { %p2853_p5 = por %p482_p2, %p481_p0  ;;  %p2857_p6 = por %p488_p4, %p487_p3 }
  0x14   : > { %4308 = sst [smem:[#allocation9_spill]] %s2851_s28  ;;  %p2136_p7 = scmp.ge.s32.totalorder %s2703_s24, 1 }
  0x15   : > { %s4310_s29 = scalar_select %p2857_p6, 1, 0 }
  0x16   : > { %p568_p8 = scmp.lt.s32.totalorder %s2703_s24, 3 }
  0x17   : > { %4311 = sst [smem:[#allocation10_spill]] %s4310_s29 }
  0x18   : > { %p569_p9 = pnand %p2136_p7, %p568_p8 }
  0x1a   : > { %572 = sbr.rel (%p569_p9) target bundleno = 1521 (0x5f1), region = 96 }
  0x21   : > { %s4312_s21 = sld [smem:[#allocation52_spill]]  ;;  %p630_p10 = scmp.lt.s32.totalorder %s2836_s2, 1  ;;  %v890_v12 = vlaneseq  ;;  %v4314_v21 = vmov 0  ;;  %v4275_v36 = vmov 0.0   ;;  %v4329_v42 = vmov 0 }
  0x22   : > { %s4313_s29 = sld [smem:[#allocation51_spill]]  ;;  %s4322_s25 = sld [smem:[#allocation55_spill]]  ;;  %v4331_v44 = vmov 0  ;;  %v4335_v50 = vmov 0 }
  0x23   : > { %s2871_s27 = scalar_select %p630_p10, %s2836_s2, 1  ;;  %v2901_v13 = vshrl.u32 %v890_v12, 7 }
  0x24   : > { %s4351_s20 = sld [smem:[#allocation54_spill]]  ;;  %s4505_s5 = sld [smem:[#allocation56_spill]] }
  0x25   : > { %s2271_s3 = sshll.u32 %s2871_s27, 5  ;;  %v2904_v14 = vadd.s32 24, %v2901_v13  ;;  %v892_v15 = vadd.s32 8, %v2901_v13  ;;  %v2910_v20 = vadd.s32 56, %v2901_v13  ;;  %v1143_v23 = vsub.s32 4, %v2901_v13  ;;  %s2272_s30 = sshll.u32 %s2871_s27, 6 }
  0x26   : > { %v2922_v24 = vadd.s32 32, %v2901_v13  ;;  %v1018_v26 = vsub.s32 1, %v2901_v13  ;;  %v1291_v33 = vsub.s32 7, %v2901_v13  ;;  %v2961_v35 = vadd.s32 16, %v2901_v13  ;;  %s639_s23 = scalar_lea.vmem %s4258_s19, %s2272_s30  ;;  %s628_s27 = sand.u32 1, %s2695_s22  }
  0x27   : > { %v2501_v0 = vld [vmem:[%s4312_s21] sm:$0xff]   ;;  %v2502_v1 = vld [vmem:[%s4312_s21 + $0x8] sm:$0xff]   ;;  %v2503_v2 = vld [vmem:[%s4312_s21 + $0x10] sm:$0xff]   ;;  %v910_v16 = vand.u32 7, %v2904_v14  ;;  %v908_v17 = vand.u32 7, %v892_v15  ;;  %v4273_v18 = vshra.s32 %v2904_v14, 3 }
  0x28   : > { %2326 = vmatprep.subr.bf16.mxu0 %v2501_v0  ;;  %s2880_s1 = scalar_lea.vmem %s4313_s29, %s2271_s3  ;;  %v2504_v3 = vld [vmem:[%s4312_s21 + $0x18] sm:$0xff]   ;;  %v2505_v5 = vld [vmem:[%s4312_s21 + $0x20] sm:$0xff]   ;;  %v2506_v6 = vld [vmem:[%s4312_s21 + $0x28] sm:$0xff]   ;;  %v900_v19 = vshra.s32 %v892_v15, 3  ;;  %v4274_v31 = vshra.s32 %v2910_v20, 3  ;;  %v911_v32 = vand.u32 7, %v2922_v24 }
  0x29   : > { %2327 = vmatpush3.bf16.msra.mxu0 %v2501_v0  ;;  %v641_v4 = vld [vmem:[%s2880_s1] sm:$0xff]   ;;  %v2507_v7 = vld [vmem:[%s4312_s21 + $0x30] sm:$0xff]   ;;  %v2508_v8 = vld [vmem:[%s4312_s21 + $0x38] sm:$0xff]   ;;  %vm2912_vm0 = vcmp.ge.s32.totalorder %v910_v16, 1  ;;  %vm2916_vm1 = vcmp.ge.s32.totalorder %v908_v17, 1  ;;  %vm2926_vm2 = vcmp.ge.s32.totalorder %v4273_v18, 1 }
  0x2a   : > { %2328 = vmatprep.subr.bf16.mxu0 %v2502_v1  ;;  %2342 = vmatprep.mubr.bf16.mxu0 %v641_v4  ;;  %v643_v9 = vld [vmem:[%s2880_s1 + $0x8] sm:$0xff]   ;;  %v645_v10 = vld [vmem:[%s2880_s1 + $0x10] sm:$0xff]   ;;  %v647_v11 = vld [vmem:[%s2880_s1 + $0x18] sm:$0xff]   ;;  %v4315_v21 = vsel %vm2912_vm0, 4294967295, %v4314_v21  ;;  %vm2931_vm3 = vcmp.le.s32.totalorder %v910_v16, 6  ;;  %vm2944_vm5 = vcmp.le.s32.totalorder %v908_v17, 6 }
  0x2b   : > { %v2938_v28 = vld [vmem:[%s4322_s25] sm:$0xff]  ;;  %vm951_vm4 = vmand %vm2926_vm2, %vm2912_vm0  ;;  %vm2948_vm6 = vcmp.le.s32.totalorder %v900_v19, 6  ;;  %v914_v34 = vand.u32 7, %v2910_v20  ;;  %v2966_v37 = vsel %vm2926_vm2, 1.0, %v4275_v36  ;;  %v4272_v38 = vshra.s32 %v2922_v24, 3  ;;  %s4343_s3 = sld [smem:[#allocation53_spill]] }
  0x2c   : > { %vm1214_vm7 = vmand %vm2948_vm6, %vm2916_vm1  ;;  %v2974_v39 = vrot.slane %v2938_v28, %v1143_v23  ;;  %v2979_v40 = vsel %vm2948_vm6, 1.0, %v4275_v36  ;;  %vm2985_vm10 = vcmp.ge.s32.totalorder %v900_v19, 1  ;;  %v2996_v43 = vrot.slane %v2938_v28, %v1018_v26  ;;  %s2268_s28 = sshll.u32 %s2836_s2, 4  ;;  %s629_s29 = scalar_lea.vmem [#allocation2], %s628_s27 }
  0x2d   : > { %2329 = vmatpush3.bf16.msra.mxu0 %v2502_v1  ;;  %vm1056_vm8 = vmand %vm2926_vm2, %vm2931_vm3  ;;  %vm2991_vm11 = vcmp.ge.s32.totalorder %v914_v34, 1  ;;  %vm3004_vm13 = vcmp.le.s32.totalorder %v4274_v31, 6  ;;  %v909_v45 = vand.u32 7, %v2961_v35  ;;  %vm3009_vm14 = vcmp.ge.s32.totalorder %v911_v32, 1  ;;  %s4508_s0 = sld [smem:[#allocation57_spill]]  ;;  %s2709_s2 = smov [#allocation2]  }
  0x2e   : > { %2330 = vmatprep.subr.bf16.mxu0 %v2503_v2  ;;  %v4330_v42 = vsel %vm2991_vm11, 4294967295, %v4329_v42  ;;  %v4332_v44 = vsel %vm3004_vm13, 4294967295, %v4331_v44  ;;  %v3019_v47 = vsel %vm951_vm4, 1.0, %v4275_v36  ;;  %v3022_v48 = vrot.slane %v2938_v28, %v1291_v33  ;;  %vm1054_vm15 = vmand %vm2985_vm10, %vm2944_vm5 }
  0x2f   : > { %v901_v49 = vshra.s32 %v2961_v35, 3  ;;  %vm3029_vm12 = vcmp.le.s32.totalorder %v911_v32, 6  ;;  %v3039_v51 = vsel %vm1214_vm7, 1.0, %v4275_v36  ;;  %v3044_v52 = vsel %vm2985_vm10, 1.0, %v4275_v36  ;;  %vm1220_vm4 = vmand %vm3004_vm13, %vm2991_vm11 }
  0x30   : > { %v4336_v50 = vsel %vm3029_vm12, 4294967295, %v4335_v50  ;;  %4337 = vst [vmem:[#allocation11_spill] sm:$0xff] %v3039_v51  ;;  %vm3052_vm9 = vcmp.ge.s32.totalorder %v4272_v38, 1  ;;  %v4271_v54 = vsub.s32 0, %v2901_v13  ;;  %v3063_v55 = vsel %vm1056_vm8, 1.0, %v4275_v36  ;;  %vm4340_vm7 = vmand %vm2948_vm6, %vm2944_vm5 }
  0x31   : > { %2331 = vmatpush3.bf16.msra.mxu0 %v2503_v2  ;;  %v3071_v56 = vsel %vm4340_vm7, 1.0, %v4275_v36  ;;  %vm4341_vm11 = vmand %vm2985_vm10, %vm2916_vm1  ;;  %v3084_v58 = vsel %vm3004_vm13, 1.0, %v4275_v36  ;;  %v3093_v59 = vld [vmem:[%s4343_s3] ss:$0 sm:$0xff]  ;;  %v3096_v60 = vsel %vm1054_vm15, 1.0, %v4275_v36  ;;  %vm3098_vm6 = vcmp.le.s32.totalorder %v909_v45, 6 }
  0x32   : > { %2332 = vmatprep.subr.bf16.mxu0 %v2504_v3  ;;  %v3079_v57 = vsel %vm4341_vm11, 1.0, %v4275_v36  ;;  %vm952_vm2 = vmand %vm3052_vm9, %vm3009_vm14  ;;  %v1087_v62 = vsub.s32 2, %v2901_v13  ;;  %v1123_v63 = vsub.s32 3, %v2901_v13  ;;  %v3109_v0 = vsel %vm1220_vm4, 1.0, %v4275_v36  ;;  %s2645_s3 = sshll.u32 %s2709_s2, 4  ;;  %s2646_s3 = int_to_ptr.vmem [resolvable:$false] %s2645_s3 }
  0x33   : > { %4342 = vst [vmem:[#allocation12_spill] sm:$0xff] %v3079_v57  ;;  %vm1057_vm8 = vmand %vm3052_vm9, %vm3029_vm12  ;;  %vm3111_vm10 = vcmp.ge.s32.totalorder %v909_v45, 1  ;;  %v1187_v2 = vsub.s32 5, %v2901_v13  ;;  %vm3116_vm11 = vcmp.le.s32.totalorder %v901_v49, 6  ;;  %v3150_v15 = vsel %vm3098_vm6, 1.0, %v4275_v36  ;;  %s4197_s26 = scalar_lea.hbm %s4508_s0, %s2268_s28 }
  0x34   : > { %4346 = vst [vmem:[#allocation13_spill] sm:$0xff] %v3109_v0  ;;  %v3145_v12 = vsel %vm1057_vm8, 1.0, %v4275_v36  ;;  %v1247_v16 = vsub.s32 6, %v2901_v13  ;;  %v3155_v23 = vrot.slane %v2938_v28, %v1087_v62  ;;  %v3158_v25 = vrot.slane %v2938_v28, %v1123_v63  ;;  %vm1311_vm15 = vmand %vm3116_vm11, %vm3098_vm6 }
  0x35   : > { %2333 = vmatpush3.bf16.msra.mxu0 %v2504_v3  ;;  %4352 = vst [vmem:[#allocation14_spill] sm:$0xff] %v3145_v12  ;;  %v3167_v26 = vsel %vm3116_vm11, 1.0, %v4275_v36  ;;  %v3174_v33 = vrot.slane %v2938_v28, %v1187_v2  ;;  %v4277_v41 = vshra.s32 %v2901_v13, 3  ;;  %v907_v62 = vand.u32 7, %v2901_v13 }
  0x36   : > { %2334 = vmatprep.subr.bf16.mxu0 %v2505_v5  ;;  %vm3186_vm4 = vcmp.ge.s32.totalorder %v901_v49, 1  ;;  %vm3193_vm7 = vcmp.le.s32.totalorder %v914_v34, 6  ;;  %v3212_v34 = vsel %vm1311_vm15, 1.0, %v4275_v36  ;;  %v4366_v1 = vshra.s32 %v2910_v20, 3 }
  0x37   : > { %4357 = vst [vmem:[#allocation15_spill] sm:$0xff] %v3212_v34  ;;  %vm3230_vm8 = vcmp.ge.s32.totalorder %v907_v62, 1  ;;  %v4371_v34 = vmov 0  ;;  %v4386_v31 = vshra.s32 %v2904_v14, 3 }
  0x38   : > { %vm3280_vm15 = vcmp.ge.s32.totalorder %v4366_v1, 1  ;;  %v897_v1 = vadd.s32 48, %v2901_v13 }
  0x39   : > { %2335 = vmatpush3.bf16.msra.mxu0 %v2505_v5  ;;  %v3123_v5 = vld [vmem:[%s4351_s20] ss:$0 sm:$0xff]  ;;  %s2053_s20 = sshll.u32 %s629_s29, 4  ;;  %s4199_s20 = int_to_ptr.vmem [resolvable:$true] %s2053_s20 }
  0x3a   : > { %2336 = vmatprep.subr.bf16.mxu0 %v2506_v6  ;;  %p2648_p0 = scmp.lt.s32.totalorder %s4199_s20, %s2646_s3 }
  0x3d   : > { %2337 = vmatpush3.bf16.msra.mxu0 %v2506_v6  ;;  %v3126_v6 = vsel %vm952_vm2, 1.0, %v4275_v36  ;;  %vm950_vm2 = vmand %vm3186_vm4, %vm3111_vm10 }
  0x3e   : > { %2338 = vmatprep.subr.bf16.mxu0 %v2507_v7 }
  0x41   : > { %2339 = vmatpush3.bf16.msra.mxu0 %v2507_v7  ;;  %v3131_v7 = vrot.slane %v2938_v28, %v4271_v54 }
  0x42   : > { %2340 = vmatprep.subr.bf16.mxu0 %v2508_v8 }
  0x45   : > { %2341 = vmatpush3.bf16.msra.mxu0 %v2508_v8  ;;  %v3136_v8 = vsel %vm3052_vm9, 1.0, %v4275_v36  ;;  %vm1215_vm9 = vmand %vm3116_vm11, %vm3111_vm10 }
  0x46   : > { %vm1055_vm11 = vmand %vm3186_vm4, %vm3098_vm6 }
  0x48   : > { %2343 = vmatmul.mubr.bf16.vlgmr.msra.gmra.mrb[0].mxu0 %v643_v9  ;;  %v3141_v9 = vsel %vm2912_vm0, 1.0, %v4275_v36  ;;  %vm4399_vm0 = vmand %vm3280_vm15, %vm3193_vm7 }
  0x49   : > { %2346 = vmatprep.mubr.bf16.mxu0 %v645_v10 }
  0x50   : > { %2347 = vmatmul.mubr.bf16.gmra.mrb[4].mxu0 %v647_v11 }
 0x11b   : > { %v2344_v4 = vpop.f32.mrb[0].mxu0 }
 0x11c   : > { %v811_v10 = vmul.f32 %v2344_v4, %v3093_v59  ;;  %v771_v11 = vpop.f32.mrb[1].mxu0 }
 0x11d   : > { %v809_v17 = vmul.f32 %v3093_v59, %v771_v11  ;;  %v2345_v19 = vpop.f32.mrb[2].mxu0  ;;  %v3204_v11 = vrot.slane %v2938_v28, %v1247_v16  ;;  %v3222_v28 = vsel %vm3186_vm4, 1.0, %v4275_v36  ;;  %v3227_v16 = vsel %vm2916_vm1, 1.0, %v4275_v36 }
 0x11e   : > { %v3170_v30 = vadd.f32 %v3123_v5, %v811_v10  ;;  %v812_v32 = vmul.f32 %v2345_v19, %v3093_v59  ;;  %v774_v35 = vpop.f32.mrb[3].mxu0  ;;  %v3201_v10 = vsel %vm1215_vm9, 1.0, %v4275_v36  ;;  %v896_v19 = vadd.s32 40, %v2901_v13 }
 0x11f   : > { %v3182_v45 = vadd.f32 %v3123_v5, %v809_v17  ;;  %v810_v53 = vmul.f32 %v3093_v59, %v774_v35  ;;  %vm3241_vm9 = vcmp.le.s32.totalorder %v907_v62, 6  ;;  %vm3248_vm1 = vcmp.le.s32.totalorder %v4277_v41, 6 }
 0x120   : > { %v2157_v2 = vmul.f32 -1.442695, %v3170_v30  ;;  %v3198_v4 = vadd.f32 %v3123_v5, %v812_v32  ;;  %v912_v38 = vand.u32 7, %v896_v19  ;;  %v904_v61 = vshra.s32 %v896_v19, 3  ;;  %vm4382_vm6 = vmand %vm3248_vm1, %vm3230_vm8 }
 0x121   : > { %v2155_v49 = vmul.f32 -1.442695, %v3182_v45  ;;  %v3215_v17 = vadd.f32 %v3123_v5, %v810_v53  ;;  %v4358_v53 = vmov 0  ;;  %vm4370_vm4 = vnez %v4330_v42 }
 0x122   : > { %2533 = vpow2.f32 %v2157_v2  ;;  %v2158_v32 = vmul.f32 -1.442695, %v3198_v4  ;;  %v4359_v53 = vsel %vm3230_vm8, 4294967295, %v4358_v53  ;;  %v3235_v2 = vsel %vm950_vm2, 1.0, %v4275_v36  ;;  %vm4383_vm2 = vmand %vm3248_vm1, %vm3241_vm9 }
 0x123   : > { %2535 = vpow2.f32 %v2155_v49  ;;  %v2156_v35 = vmul.f32 -1.442695, %v3215_v17  ;;  %v2348_v54 = vpop.f32.mrb[4].mxu0  ;;  %vm3309_vm12 = vcmp.le.s32.totalorder %v904_v61, 6 }
 0x124   : > { %2537 = vpow2.f32 %v2158_v32  ;;  %v815_v49 = vmul.f32 %v2348_v54, %v3093_v59  ;;  %v787_v18 = vpop.f32.mrb[5].mxu0  ;;  %v4364_v32 = vmov 0.0  }
 0x125   : > { %2539 = vpow2.f32 %v2156_v35  ;;  %v813_v63 = vmul.f32 %v3093_v59, %v787_v18  ;;  %v2349_v36 = vpop.f32.mrb[6].mxu0  ;;  %v3254_v62 = vsel %vm1055_vm11, 1.0, %v4364_v32  ;;  %v3259_v54 = vsel %vm3111_vm10, 1.0, %v4364_v32 }
 0x126   : > { %v3266_v35 = vadd.f32 %v3123_v5, %v815_v49  ;;  %v816_v19 = vmul.f32 %v2349_v36, %v3093_v59  ;;  %v790_v18 = vpop.f32.mrb[7].mxu0  ;;  %v3272_v41 = vsel %vm3241_vm9, 1.0, %v4364_v32  ;;  %vm3293_vm11 = vcmp.le.s32.totalorder %v912_v38, 6 }
 0x127   : > { %v3285_v49 = vadd.f32 %v3123_v5, %v813_v63  ;;  %v814_v36 = vmul.f32 %v3093_v59, %v790_v18  ;;  %v4372_v34 = vsel %vm3293_vm11, 4294967295, %v4371_v34  ;;  %vm3301_vm10 = vcmp.ge.s32.totalorder %v912_v38, 1 }
 0x128   : > { %4365 = vst [vmem:[#allocation16_spill] sm:$0xff] %v3266_v35  ;;  %v2161_v57 = vmul.f32 -1.442695, %v3266_v35  ;;  %v3298_v20 = vadd.f32 %v3123_v5, %v816_v19  ;;  %v3320_v38 = vsel %vm2944_vm5, 1.0, %v4364_v32  ;;  %v3325_v12 = vsel %vm3248_vm1, 1.0, %v4364_v32 }
 0x129   : > { %4369 = vst [vmem:[#allocation17_spill] sm:$0xff] %v3285_v49  ;;  %v2159_v18 = vmul.f32 -1.442695, %v3285_v49  ;;  %v3315_v19 = vadd.f32 %v3123_v5, %v814_v36  ;;  %4379 = vst [vmem:[#allocation20_spill] sm:$0xff] %v3325_v12  ;;  %vm3336_vm5 = vcmp.ge.s32.totalorder %v904_v61, 1  ;;  %v913_v5 = vand.u32 7, %v897_v1 }
 0x12a   : > { %4373 = vst [vmem:[#allocation18_spill] sm:$0xff] %v3298_v20  ;;  %2541 = vpow2.f32 %v2161_v57  ;;  %v2162_v49 = vmul.f32 -1.442695, %v3298_v20  ;;  %v3347_v20 = vsel %vm4382_vm6, 1.0, %v4364_v32  ;;  %v3355_v61 = vsel %vm4383_vm2, 1.0, %v4364_v32  ;;  %vm4389_vm2 = vmand %vm3280_vm15, %vm4370_vm4 }
 0x12b   : > { %4378 = vst [vmem:[#allocation19_spill] sm:$0xff] %v3315_v19  ;;  %2543 = vpow2.f32 %v2159_v18  ;;  %v2160_v57 = vmul.f32 -1.442695, %v3315_v19  ;;  %4384 = vst [vmem:[#allocation21_spill] sm:$0xff] %v3355_v61  ;;  %v3360_v18 = vsel %vm3280_vm15, 1.0, %v4364_v32  ;;  %vm3372_vm6 = vcmp.le.s32.totalorder %v4386_v31, 6 }
 0x12c   : > { %v2534_v36 = vpop.eup %2533  ;;  %4385 = vst [vmem:[#allocation22_spill] sm:$0xff] %v3360_v18  ;;  %2545 = vpow2.f32 %v2162_v49  ;;  %v4387_v61 = vmov 0  ;;  %v905_v18 = vshra.s32 %v897_v1, 3  ;;  %v3382_v49 = vsel %vm4389_vm2, 1.0, %v4364_v32 }
 0x12d   : > { %v2536_v19 = vpop.eup %2535  ;;  %v858_v35 = vadd.f32 1.0, %v2534_v36  ;;  %v4388_v61 = vsel %vm3372_vm6, 4294967295, %v4387_v61  ;;  %2547 = vpow2.f32 %v2160_v57  ;;  %4390 = vst [vmem:[#allocation23_spill] sm:$0xff] %v3382_v49  ;;  %v3387_v14 = vsel %vm3309_vm12, 1.0, %v4364_v32 }
 0x12e   : > { %v2538_v12 = vpop.eup %2537  ;;  %v856_v51 = vadd.f32 1.0, %v2536_v19  ;;  %v3392_v1 = vsel %vm3336_vm5, 1.0, %v4364_v32  ;;  %v4392_v36 = vshra.s32 %v2901_v13, 3  ;;  %vm3408_vm4 = vcmp.ge.s32.totalorder %v913_v5, 1 }
 0x12f   : > { %4391 = vst [vmem:[#allocation24_spill] sm:$0xff] %v3392_v1  ;;  %v2540_v19 = vpop.eup %2539  ;;  %2549 = vrcp.f32 %v858_v35  ;;  %v859_v57 = vadd.f32 1.0, %v2538_v12  ;;  %v3415_v12 = vsel %vm3372_vm6, 1.0, %v4364_v32  ;;  %vm3421_vm1 = vcmp.le.s32.totalorder %v913_v5, 6  ;;  %vm4401_vm6 = vmand %vm3309_vm12, %vm3301_vm10 }
 0x130   : > { %vm3404_vm13 = vcmp.ge.s32.totalorder %v4392_v36, 1  ;;  %2551 = vrcp.f32 %v856_v51  ;;  %v857_v1 = vadd.f32 1.0, %v2540_v19  ;;  %v3431_v51 = vsel %vm4399_vm0, 1.0, %v4364_v32  ;;  %vm4405_vm0 = vmand %vm3309_vm12, %vm3293_vm11 }
 0x131   : > { %2553 = vrcp.f32 %v859_v57  ;;  %4400 = vst [vmem:[#allocation25_spill] sm:$0xff] %v3431_v51  ;;  %v3439_v19 = vsel %vm4401_vm6, 1.0, %v4364_v32  ;;  %vm3445_vm8 = vcmp.le.s32.totalorder %v905_v18, 6  ;;  %v3455_v5 = vsel %vm4405_vm0, 1.0, %v4364_v32  ;;  %vm4407_vm12 = vmand %vm3336_vm5, %vm3301_vm10 }
 0x132   : > { %4402 = vst [vmem:[#allocation26_spill] sm:$0xff] %v3439_v19  ;;  %2555 = vrcp.f32 %v857_v1  ;;  %4406 = vst [vmem:[#allocation27_spill] sm:$0xff] %v3455_v5  ;;  %v3460_v57 = vsel %vm3009_vm14, 1.0, %v4364_v32  ;;  %v3465_v36 = vsel %vm2931_vm3, 1.0, %v4364_v32  ;;  %v3477_v59 = vsel %vm4407_vm12, 1.0, %v4364_v32 }
 0x133   : > { %vm4408_vm6 = vmand %vm3336_vm5, %vm3293_vm11  ;;  %v3490_v19 = vsel %vm3404_vm13, 1.0, %v4364_v32  ;;  %vm3496_vm12 = vcmp.ge.s32.totalorder %v905_v18, 1  ;;  %vm4413_vm5 = vnez %v4388_v61  ;;  %vm4418_vm0 = vnez %v4359_v53 }
 0x134   : > { %v3485_v1 = vsel %vm4408_vm6, 1.0, %v4364_v32  ;;  %4410 = vst [vmem:[#allocation29_spill] sm:$0xff] %v3490_v19  ;;  %v2542_v29 = vpop.eup %2541  ;;  %vm4414_vm6 = vnez %v4315_v21  ;;  %vm4416_vm2 = vmand %vm4413_vm5, %vm2931_vm3  ;;  %v3527_v21 = vsel %vm3445_vm8, 1.0, %v4364_v32  ;;  %v3544_v19 = vsel %vm4418_vm0, 1.0, %v4364_v32 }
 0x135   : > { %4409 = vst [vmem:[#allocation28_spill] sm:$0xff] %v3485_v1  ;;  %vm4415_vm15 = vmand %vm4413_vm5, %vm4414_vm6  ;;  %v3514_v51 = vsel %vm4416_vm2, 1.0, %v4364_v32  ;;  %v2544_v27 = vpop.eup %2543  ;;  %v862_v61 = vadd.f32 1.0, %v2542_v29  ;;  %v3562_v53 = vsel %vm3421_vm1, 1.0, %v4364_v32  ;;  %v4427_v29 = vshra.s32 %v2922_v24, 3 }
 0x136   : > { %v3506_v1 = vsel %vm4415_vm15, 1.0, %v4364_v32  ;;  %4417 = vst [vmem:[#allocation30_spill] sm:$0xff] %v3514_v51  ;;  %vm4419_vm11 = vmand %vm3404_vm13, %vm4418_vm0  ;;  %v2546_v31 = vpop.eup %2545  ;;  %v860_v22 = vadd.f32 1.0, %v2544_v27  ;;  %vm923_vm5 = vcmp.lt.s32.totalorder %v2901_v13, 1  ;;  %v3621_v46 = vsel %vm3301_vm10, 1.0, %v4364_v32 }
 0x137   : > { %v3522_v18 = vsel %vm4419_vm11, 1.0, %v4364_v32  ;;  %4420 = vst [vmem:[#allocation31_spill] sm:$0xff] %v3527_v21  ;;  %vm954_vm3 = vmand %vm3496_vm12, %vm3408_vm4  ;;  %vm4423_vm11 = vnez %v4330_v42  ;;  %v3567_v42 = vsel %vm3193_vm7, 1.0, %v4364_v32  ;;  %vm3571_vm0 = vcmp.le.s32.totalorder %v4427_v29, 6 }
 0x138   : > { %vm4421_vm2 = vmand %vm3404_vm13, %vm3241_vm9  ;;  %v3549_v21 = vsel %vm4423_vm11, 1.0, %v4364_v32  ;;  %vm4425_vm13 = vnez %v4332_v44  ;;  %4426 = vst [vmem:[#allocation34_spill] sm:$0xff] %v3562_v53  ;;  %v863_v27 = vadd.f32 1.0, %v2546_v31  ;;  %v3596_v31 = vsel %vm3496_vm12, 1.0, %v4364_v32 }
 0x139   : > { %v3539_v51 = vsel %vm4421_vm2, 1.0, %v4364_v32  ;;  %4424 = vst [vmem:[#allocation33_spill] sm:$0xff] %v3549_v21  ;;  %vm1059_vm15 = vmand %vm3496_vm12, %vm3421_vm1  ;;  %v2548_v21 = vpop.eup %2547  ;;  %v3608_v0 = vsel %vm954_vm3, 1.0, %v4364_v32  ;;  %2557 = vrcp.f32 %v862_v61  ;;  %v3630_v5 = vsel %vm3408_vm4, 1.0, %v4364_v32 }
 0x13a   : > { %4422 = vst [vmem:[#allocation32_spill] sm:$0xff] %v3539_v51  ;;  %vm1316_vm9 = vmand %vm4425_vm13, %vm3193_vm7  ;;  %v861_v29 = vadd.f32 1.0, %v2548_v21  ;;  %v2550_v21 = vpop.eup %2549  ;;  %v3640_v63 = vsel %vm3571_vm0, 1.0, %v4364_v32  ;;  %2559 = vrcp.f32 %v860_v22  ;;  %vm4442_vm10 = vnez %v4372_v34 }
 0x13b   : > { %vm4430_vm2 = vmand %vm3445_vm8, %vm3408_vm4  ;;  %4434 = vst [vmem:[#allocation37_spill] sm:$0xff] %v3596_v31  ;;  %v3616_v31 = vsel %vm1059_vm15, 1.0, %v4364_v32  ;;  %v3648_v49 = vsel %vm4442_vm10, 1.0, %v4364_v32  ;;  %2561 = vrcp.f32 %v863_v27  ;;  %vm4448_vm7 = vcmp.lt.s32.totalorder %v2901_v13, 7 }
 0x13c   : > { %v3583_v53 = vsel %vm4430_vm2, 1.0, %v4364_v32  ;;  %vm4432_vm11 = vmand %vm3445_vm8, %vm3421_vm1  ;;  %4435 = vst [vmem:[#allocation38_spill] sm:$0xff] %v3608_v0  ;;  %2563 = vrcp.f32 %v861_v29 }
 0x13d   : > { %4431 = vst [vmem:[#allocation35_spill] sm:$0xff] %v3583_v53  ;;  %v3591_v24 = vsel %vm4432_vm11, 1.0, %v4364_v32  ;;  %vm1217_vm6 = vmand %vm3571_vm0, %vm3009_vm14  ;;  %vm4438_vm14 = vnez %v4336_v50 }
 0x13e   : > { %4433 = vst [vmem:[#allocation36_spill] sm:$0xff] %v3591_v24  ;;  %4436 = vst [vmem:[#allocation39_spill] sm:$0xff] %v3616_v31  ;;  %v3635_v35 = vsel %vm4438_vm14, 1.0, %v4364_v32  ;;  %v3643_v31 = vmul.f32 %v2550_v21, %v3170_v30  ;;  %v3651_v61 = vsel %vm1217_vm6, 1.0, %v4364_v32  ;;  %v3665_v30 = vsel %vm1316_vm9, 1.0, %v4364_v32 }
 0x13f   : > { %4437 = vst [vmem:[#allocation40_spill] sm:$0xff] %v3621_v46  ;;  %vm1313_vm8 = vmand %vm3571_vm0, %vm4438_vm14  ;;  %v2552_v46 = vpop.eup %2551  ;;  %vm2708_vm0 = vmmov 0  }
 0x140   : > { %4439 = vst [vmem:[#allocation41_spill] sm:$0xff] %v3630_v5  ;;  %4440 = vst [vmem:[#allocation42_spill] sm:$0xff] %v3635_v35  ;;  %v2554_v50 = vpop.eup %2553  ;;  %v3654_v35 = vmul.f32 %v2552_v46, %v3182_v45  ;;  %v3657_v51 = vsel %vm1313_vm8, 1.0, %v4364_v32  ;;  %v917_v22 = vrot.slane %v3643_v31, 7  ;;  %v1011_v21 = vmul.f32 %v2966_v37, %v3643_v31 }
 0x141   : > { %4441 = vst [vmem:[#allocation43_spill] sm:$0xff] %v3640_v63  ;;  %4443 = vst [vmem:[#allocation44_spill] sm:$0xff] %v3648_v49  ;;  %v2556_v34 = vpop.eup %2555  ;;  %v1030_v45 = vrot.slane %v3643_v31, 1  ;;  %v1147_v27 = vmul.f32 %v2974_v39, %v3643_v31  ;;  %v1282_v44 = vmul.f32 %v2979_v40, %v3643_v31  ;;  %v3683_v29 = vmul.f32 %v2554_v50, %v3198_v4 }
 0x142   : > { %4444 = vst [vmem:[#allocation45_spill] sm:$0xff] %v3651_v61  ;;  %4445 = vst [vmem:[#allocation46_spill] sm:$0xff] %v3657_v51  ;;  %v1009_v46 = vmul.f32 %v3044_v52, %v3654_v35  ;;  %v1023_v32 = vmul.f32 %v2996_v43, %v1011_v21  ;;  %v1288_v37 = vmul.f32 %v3084_v58, %v3654_v35 }
 0x143   : > { %4446 = vst [vmem:[#allocation47_spill] sm:$0xff] %v3665_v30  ;;  %v3686_v51 = vmul.f32 %v3022_v48, %v1282_v44  ;;  %v3691_v31 = vmul.f32 %v2974_v39, %v3654_v35  ;;  %v881_v52 = vmul.f32 %v2556_v34, %v3215_v17  ;;  %v4294_v30 = vrot.slane %v3683_v29, 7  ;;  %vm4452_vm4 = vmmov %vm4448_vm7 }
 0x144   : > { %v1021_v40 = vmul.f32 %v2996_v43, %v1009_v46  ;;  %v3695_v21 = vmul.f32 %v3022_v48, %v1288_v37  ;;  %v1012_v58 = vmul.f32 %v3136_v8, %v3683_v29  ;;  %v4295_v4 = vrot.slane %v3683_v29, 1  ;;  %vm4454_vm1 = vmmov %vm4452_vm4 }
 0x145   : > { %v1148_v50 = vmul.f32 %v2974_v39, %v3683_v29  ;;  %v1283_v44 = vmul.f32 %v3167_v26, %v3683_v29  ;;  %v916_v46 = vrot.slane %v881_v52, 7  ;;  %v1010_v3 = vmul.f32 %v3222_v28, %v881_v52  ;;  %v3720_v26 = vld [vmem:[%s4322_s25 + $0x8] ss:$0 sm:$0xff]  ;;  %vm4465_vm12 = vmmov %vm4454_vm1 }
 0x146   : > { %4447 = vst [vmem:[#allocation48_spill] sm:$0xff] %v3695_v21  ;;  %v928_v17 = vsel %vm923_vm5, %v917_v22, %v4294_v30  ;;  %v3711_v34 = vmul.f32 %v2996_v43, %v1012_v58  ;;  %v1041_v8 = vsel %vm4448_vm7, %v1030_v45, %v4295_v4  ;;  %v1029_v37 = vrot.slane %v881_v52, 1  ;;  %v2558_v21 = vpop.eup %2557  ;;  %vm4472_vm3 = vmmov %vm4454_vm1 }
 0x147   : > { %v976_v28 = vmul.f32 %v3126_v6, %v928_v17  ;;  %v1080_v61 = vmul.f32 %v3063_v55, %v1041_v8  ;;  %v1116_v30 = vmul.f32 %v3141_v9, %v928_v17  ;;  %v3725_v58 = vadd.f32 %v1148_v50, %v1023_v32  ;;  %v2560_v49 = vpop.eup %2559  ;;  %vm4474_vm15 = vmmov %vm4454_vm1 }
 0x148   : > { %v1179_v5 = vmul.f32 %v3150_v15, %v1041_v8  ;;  %v1239_v4 = vmul.f32 %v3201_v10, %v928_v17  ;;  %v1295_v0 = vmul.f32 %v3022_v48, %v1283_v44  ;;  %v1334_v63 = vmul.f32 %v3071_v56, %v1041_v8  ;;  %v2562_v24 = vpop.eup %2561  ;;  %vm4490_vm13 = vmmov %vm4454_vm1 }
 0x149   : > { %v3732_v53 = vmul.f32 %v3131_v7, %v976_v28  ;;  %v3735_v6 = vmul.f32 %v3155_v23, %v1080_v61  ;;  %v1128_v55 = vmul.f32 %v3158_v25, %v1116_v30  ;;  %v929_v9 = vsel %vm923_vm5, %v916_v46, %v917_v22  ;;  %v3740_v32 = vpop.eup %2563  ;;  %vm4492_vm9 = vmmov %vm4454_vm1 }
 0x14a   : > { %4450 = vst [vmem:[#allocation50_spill] sm:$0xff] %v3740_v32  ;;  %v1191_v15 = vmul.f32 %v3174_v33, %v1179_v5  ;;  %v1251_v10 = vmul.f32 %v3204_v11, %v1239_v4  ;;  %v1346_v56 = vmul.f32 %v3720_v26, %v1334_v63  ;;  %v4451_v50 = vrot.slane %v3654_v35, 7  ;;  %v4455_v32 = vld [vmem:[#allocation11_spill] sm:$0xff] }
 0x14b   : > { %4449 = vst [vmem:[#allocation49_spill] sm:$0xff] %v3732_v53  ;;  %v975_v30 = vmul.f32 %v3019_v47, %v929_v9  ;;  %v1022_v17 = vmul.f32 %v2996_v43, %v1010_v3  ;;  %v1042_v22 = vsel %vm4452_vm4, %v1029_v37, %v1030_v45  ;;  %v4453_v5 = vrot.slane %v3654_v35, 1 }
 0x14c   : > { %v930_v44 = vsel %vm923_vm5, %v4451_v50, %v916_v46  ;;  %v1079_v63 = vmul.f32 %v3254_v62, %v1042_v22  ;;  %v1115_v46 = vmul.f32 %v3259_v54, %v929_v9  ;;  %v1146_v45 = vmul.f32 %v2974_v39, %v881_v52 }
 0x14d   : > { %v974_v61 = vmul.f32 %v3235_v2, %v930_v44  ;;  %v3758_v4 = vsel %vm4454_vm1, %v4453_v5, %v1029_v37  ;;  %v1114_v8 = vmul.f32 %v3227_v16, %v930_v44  ;;  %v987_v47 = vmul.f32 %v3131_v7, %v975_v30 }
 0x14e   : > { %v1078_v3 = vmul.f32 %v3096_v60, %v3758_v4  ;;  %v1091_v28 = vmul.f32 %v3155_v23, %v1079_v63  ;;  %v1127_v62 = vmul.f32 %v3158_v25, %v1115_v46  ;;  %v1155_v50 = vadd.f32 %v1147_v27, %v1022_v17  ;;  %v4456_v27 = vld [vmem:[#allocation20_spill] sm:$0xff] }
 0x14f   : > { %v986_v2 = vmul.f32 %v3131_v7, %v974_v61  ;;  %v3770_v37 = vmul.f32 %v3158_v25, %v1114_v8  ;;  %v1154_v54 = vadd.f32 %v1146_v45, %v1021_v40  ;;  %v1177_v61 = vmul.f32 %v3272_v41, %v3758_v4 }
 0x150   : > { %v1090_v16 = vmul.f32 %v3155_v23, %v1078_v3  ;;  %v1178_v30 = vmul.f32 %v3320_v38, %v1042_v22  ;;  %v1199_v60 = vadd.f32 %v1191_v15, %v1091_v28  ;;  %v1237_v53 = vmul.f32 %v3347_v20, %v930_v44  ;;  %v4458_v3 = vld [vmem:[#allocation16_spill] sm:$0xff] }
 0x151   : > { %v1135_v5 = vadd.f32 %v1127_v62, %v986_v2  ;;  %v1238_v63 = vmul.f32 %v4455_v32, %v929_v9  ;;  %v3780_v8 = vmul.f32 %v3174_v33, %v1177_v61  ;;  %v1281_v17 = vmul.f32 %v4456_v27, %v881_v52  ;;  %v4457_v32 = vld [vmem:[#allocation21_spill] sm:$0xff]  ;;  %v4460_v62 = vld [vmem:[#allocation18_spill] sm:$0xff] }
 0x152   : > { %v1190_v46 = vmul.f32 %v3174_v33, %v1178_v30  ;;  %v3785_v40 = vadd.f32 %v3686_v51, %v1154_v54  ;;  %v3788_v41 = vmul.f32 %v3204_v11, %v1237_v53  ;;  %v1303_v20 = vadd.f32 %v1295_v0, %v1155_v50  ;;  %v4459_v51 = vld [vmem:[#allocation17_spill] sm:$0xff] }
 0x153   : > { %v3791_v38 = vmul.f32 %v3204_v11, %v1238_v63  ;;  %v1259_v15 = vadd.f32 %v1251_v10, %v1135_v5  ;;  %v3794_v9 = vmul.f32 %v3022_v48, %v1281_v17  ;;  %v1333_v2 = vmul.f32 %v4457_v32, %v1042_v22  ;;  %v4461_v22 = vld [vmem:[#allocation22_spill] sm:$0xff] }
 0x154   : > { %v1198_v44 = vadd.f32 %v1190_v46, %v1090_v16  ;;  %v3798_v45 = vmul.f32 %v2558_v21, %v4458_v3  ;;  %v3803_v28 = vmul.f32 %v2560_v49, %v4459_v51  ;;  %v1136_v53 = vadd.f32 %v1128_v55, %v987_v47  ;;  %v4466_v3 = vld [vmem:[#allocation14_spill] sm:$0xff] }
 0x155   : > { %v3800_v52 = vadd.f32 %v1303_v20, %v1259_v15  ;;  %v3806_v54 = vmul.f32 %v2562_v24, %v4460_v62  ;;  %v3809_v0 = vmul.f32 %v3720_v26, %v1333_v2  ;;  %v4463_v46 = vrot.slane %v3683_v29, 7 }
 0x156   : > { %v3811_v10 = vadd.f32 %v1346_v56, %v1198_v44  ;;  %v921_v50 = vrot.slane %v3798_v45, 7  ;;  %v1015_v21 = vmul.f32 %v4461_v22, %v3798_v45  ;;  %v1034_v16 = vrot.slane %v3798_v45, 1  ;;  %v4462_v56 = vld [vmem:[#allocation24_spill] sm:$0xff] }
 0x157   : > { %v3819_v49 = vmul.f32 %v2974_v39, %v3798_v45  ;;  %v1286_v24 = vmul.f32 %v3387_v14, %v3798_v45  ;;  %v919_v55 = vrot.slane %v3803_v28, 7  ;;  %v1013_v61 = vmul.f32 %v4462_v56, %v3803_v28 }
 0x158   : > { %v1027_v47 = vmul.f32 %v2996_v43, %v1015_v21  ;;  %v4296_v30 = vrot.slane %v3803_v28, 1  ;;  %v1149_v5 = vmul.f32 %v2974_v39, %v3803_v28  ;;  %v1284_v27 = vmul.f32 %v3415_v12, %v3803_v28 }
 0x159   : > { %v3831_v63 = vmul.f32 %v3022_v48, %v1286_v24  ;;  %v927_v14 = vsel %vm923_vm5, %v4463_v46, %v919_v55  ;;  %v922_v17 = vrot.slane %v3806_v54, 7  ;;  %v3844_v20 = vmul.f32 %v2996_v43, %v1013_v61  ;;  %v4467_v24 = vld [vmem:[#allocation15_spill] sm:$0xff] }
 0x15a   : > { %v977_v15 = vmul.f32 %v3477_v59, %v927_v14  ;;  %v4464_v44 = vrot.slane %v3683_v29, 1  ;;  %v1117_v2 = vmul.f32 %v3460_v57, %v927_v14  ;;  %v3855_v12 = vadd.f32 %v1149_v5, %v3711_v34 }
 0x15b   : > { %v1240_v59 = vmul.f32 %v3506_v1, %v927_v14  ;;  %v1296_v29 = vmul.f32 %v3022_v48, %v1284_v27  ;;  %v4468_v46 = vrot.slane %v3654_v35, 7 }
 0x15c   : > { %v1040_v32 = vsel %vm4465_vm12, %v4464_v44, %v4296_v30  ;;  %v3860_v22 = vmul.f32 %v3131_v7, %v977_v15  ;;  %v1129_v21 = vmul.f32 %v3158_v25, %v1117_v2  ;;  %v4479_v30 = vld [vmem:[#allocation13_spill] sm:$0xff] }
 0x15d   : > { %v1081_v51 = vmul.f32 %v4466_v3, %v1040_v32  ;;  %v1180_v62 = vmul.f32 %v3465_v36, %v1040_v32  ;;  %v1335_v56 = vmul.f32 %v4467_v24, %v1040_v32  ;;  %v1252_v34 = vmul.f32 %v3204_v11, %v1240_v59  ;;  %v4469_v32 = vld [vmem:[#allocation12_spill] sm:$0xff]  ;;  %v4470_v3 = vld [vmem:[#allocation29_spill] sm:$0xff] }
 0x15e   : > { %v924_v36 = vsel %vm923_vm5, %v921_v50, %v922_v17  ;;  %v1304_v1 = vadd.f32 %v1296_v29, %v3725_v58  ;;  %v931_v14 = vsel %vm923_vm5, %v922_v17, %v4468_v46  ;;  %v1035_v59 = vrot.slane %v3806_v54, 1  ;;  %v4476_v46 = vld [vmem:[#allocation25_spill] sm:$0xff] }
 0x15f   : > { %v3866_v57 = vmul.f32 %v3155_v23, %v1081_v51  ;;  %v1192_v61 = vmul.f32 %v3174_v33, %v1180_v62  ;;  %v1347_v5 = vmul.f32 %v3720_v26, %v1335_v56  ;;  %v972_v27 = vmul.f32 %v3522_v18, %v924_v36 }
 0x160   : > { %v1260_v44 = vadd.f32 %v1252_v34, %v1136_v53  ;;  %v973_v2 = vmul.f32 %v4469_v32, %v931_v14  ;;  %v1008_v51 = vmul.f32 %v4470_v3, %v3806_v54  ;;  %v1113_v29 = vmul.f32 %v3544_v19, %v931_v14  ;;  %v4471_v53 = vld [vmem:[#allocation33_spill] sm:$0xff] }
 0x161   : > { %v3882_v15 = vadd.f32 %v1192_v61, %v3735_v6  ;;  %v3887_v62 = vadd.f32 %v1347_v5, %v1199_v60  ;;  %v984_v58 = vmul.f32 %v3131_v7, %v972_v27  ;;  %v1120_v24 = vmul.f32 %v4471_v53, %v924_v36  ;;  %v4478_v53 = vld [vmem:[#allocation35_spill] sm:$0xff] }
 0x162   : > { %v3892_v17 = vadd.f32 %v1304_v1, %v1260_v44  ;;  %v985_v18 = vmul.f32 %v3131_v7, %v973_v2  ;;  %v1020_v6 = vmul.f32 %v2996_v43, %v1008_v51  ;;  %v1037_v60 = vsel %vm4472_vm3, %v1034_v16, %v1035_v59  ;;  %v4475_v1 = vld [vmem:[#allocation32_spill] sm:$0xff] }
 0x163   : > { %v4473_v56 = vrot.slane %v3654_v35, 1  ;;  %v1125_v19 = vmul.f32 %v3158_v25, %v1113_v29  ;;  %v1152_v34 = vmul.f32 %v2974_v39, %v3806_v54  ;;  %v1084_v27 = vmul.f32 %v4476_v46, %v1037_v60  ;;  %v4477_v35 = vld [vmem:[#allocation34_spill] sm:$0xff] }
 0x164   : > { %v1134_v44 = vadd.f32 %v3770_v37, %v985_v18  ;;  %v1153_v32 = vadd.f32 %v3691_v31, %v1020_v6  ;;  %v1183_v51 = vmul.f32 %v4477_v35, %v1037_v60  ;;  %v4480_v37 = vld [vmem:[#allocation31_spill] sm:$0xff] }
 0x165   : > { %v1044_v61 = vsel %vm4474_vm15, %v1035_v59, %v4473_v56  ;;  %v1133_v2 = vadd.f32 %v1125_v19, %v984_v58  ;;  %v3912_v3 = vadd.f32 %v1152_v34, %v1027_v47  ;;  %v3918_v56 = vmul.f32 %v4478_v53, %v924_v36  ;;  %v4481_v18 = vld [vmem:[#allocation27_spill] sm:$0xff]  ;;  %v4482_v36 = vld [vmem:[#allocation36_spill] sm:$0xff] }
 0x166   : > { %v1077_v5 = vmul.f32 %v4475_v1, %v1044_v61  ;;  %v1184_v59 = vmul.f32 %v3567_v42, %v1044_v61  ;;  %v3921_v1 = vmul.f32 %v4479_v30, %v931_v14  ;;  %v3924_v46 = vadd.f32 %v3791_v38, %v1134_v44  ;;  %v4483_v30 = vld [vmem:[#allocation19_spill] sm:$0xff]  ;;  %v4484_v14 = vld [vmem:[#allocation50_spill] sm:$0xff]  ;;  %v4485_v38 = vld [vmem:[#allocation49_spill] sm:$0xff] }
 0x167   : > { %v1257_v31 = vadd.f32 %v3788_v41, %v1133_v2  ;;  %v1287_v47 = vmul.f32 %v4480_v37, %v3806_v54  ;;  %v1301_v58 = vadd.f32 %v3794_v9, %v1153_v32  ;;  %v3931_v42 = vmul.f32 %v4481_v18, %v1037_v60  ;;  %v4486_v2 = vld [vmem:[#allocation37_spill] sm:$0xff] }
 0x168   : > { %v1089_v29 = vmul.f32 %v3155_v23, %v1077_v5  ;;  %v3935_v19 = vmul.f32 %v4482_v36, %v1044_v61  ;;  %v885_v34 = vmul.f32 %v4484_v14, %v4483_v30  ;;  %v1137_v5 = vadd.f32 %v1129_v21, %v4485_v38  ;;  %v4494_v30 = vld [vmem:[#allocation39_spill] sm:$0xff]  ;;  %v4495_v14 = vld [vmem:[#allocation40_spill] sm:$0xff] }
 0x169   : > { %v1299_v41 = vmul.f32 %v3022_v48, %v1287_v47  ;;  %v1361_v44 = vadd.f32 %v1301_v58, %v1257_v31  ;;  %v1096_v54 = vmul.f32 %v3155_v23, %v1084_v27  ;;  %v1132_v9 = vmul.f32 %v3158_v25, %v1120_v24  ;;  %v4488_v27 = vld [vmem:[#allocation38_spill] sm:$0xff]  ;;  %v4489_v58 = vld [vmem:[#allocation23_spill] sm:$0xff] }
 0x16a   : > { %v1197_v6 = vadd.f32 %v3780_v8, %v1089_v29  ;;  %v920_v32 = vrot.slane %v885_v34, 7  ;;  %v1014_v8 = vmul.f32 %v4486_v2, %v885_v34  ;;  %v1033_v35 = vrot.slane %v885_v34, 1  ;;  %v4487_v29 = vld [vmem:[#allocation43_spill] sm:$0xff] }
 0x16b   : > { %v1150_v61 = vmul.f32 %v2974_v39, %v885_v34  ;;  %v1285_v53 = vmul.f32 %v4487_v29, %v885_v34  ;;  %v1195_v37 = vmul.f32 %v3174_v33, %v1183_v51  ;;  %v1196_v21 = vmul.f32 %v3174_v33, %v1184_v59  ;;  %v4496_v34 = vld [vmem:[#allocation41_spill] sm:$0xff] }
 0x16c   : > { %v1353_v60 = vadd.f32 %v3809_v0, %v1197_v6  ;;  %v925_v24 = vsel %vm923_vm5, %v920_v32, %v921_v50  ;;  %v926_v0 = vsel %vm923_vm5, %v919_v55, %v920_v32  ;;  %v1026_v39 = vmul.f32 %v2996_v43, %v1014_v8  ;;  %v4493_v6 = vld [vmem:[#allocation28_spill] sm:$0xff] }
 0x16d   : > { %v978_v31 = vmul.f32 %v4488_v27, %v926_v0  ;;  %v979_v51 = vmul.f32 %v4489_v58, %v925_v24  ;;  %v1038_v59 = vsel %vm4490_vm13, %v1033_v35, %v1034_v16  ;;  %v4491_v18 = vrot.slane %v3803_v28, 1  ;;  %v4497_v16 = vld [vmem:[#allocation42_spill] sm:$0xff]  ;;  %v4499_v58 = vld [vmem:[#allocation45_spill] sm:$0xff] }
 0x16e   : > { %v3949_v47 = vadd.f32 %v1361_v44, %v1353_v60  ;;  %v1083_v55 = vmul.f32 %v4494_v30, %v1038_v59  ;;  %v1118_v43 = vmul.f32 %v4495_v14, %v926_v0  ;;  %v1119_v38 = vmul.f32 %v4496_v34, %v925_v24  ;;  %v4502_v30 = vld [vmem:[#allocation46_spill] sm:$0xff] }
 0x16f   : > { %v1039_v50 = vsel %vm4492_vm9, %v4491_v18, %v1033_v35  ;;  %v990_v44 = vmul.f32 %v3131_v7, %v978_v31  ;;  %v1158_v45 = vadd.f32 %v1150_v61, %v3844_v20  ;;  %v1159_v60 = vadd.f32 %v3819_v49, %v1026_v39  ;;  %v4498_v35 = vld [vmem:[#allocation44_spill] sm:$0xff]  ;;  %v4501_v39 = vld [vmem:[#allocation30_spill] sm:$0xff] }
 0x170   : > { %v1082_v36 = vmul.f32 %v4493_v6, %v1039_v50  ;;  %v1181_v32 = vmul.f32 %v4497_v16, %v1039_v50  ;;  %v1130_v2 = vmul.f32 %v3158_v25, %v1118_v43  ;;  %v1131_v8 = vmul.f32 %v3158_v25, %v1119_v38  ;;  %v4500_v6 = vld [vmem:[#allocation26_spill] sm:$0xff] }
 0x171   : > { %v1182_v29 = vmul.f32 %v4498_v35, %v1038_v59  ;;  %v1241_v18 = vmul.f32 %v4499_v58, %v926_v0  ;;  %v1242_v31 = vmul.f32 %v4500_v6, %v925_v24  ;;  %v1297_v20 = vmul.f32 %v3022_v48, %v1285_v53 }
 0x172   : > { %v1094_v28 = vmul.f32 %v3155_v23, %v1082_v36  ;;  %v1193_v27 = vmul.f32 %v3174_v33, %v1181_v32  ;;  %v1306_v61 = vadd.f32 %v3831_v63, %v1158_v45  ;;  %v1336_v36 = vmul.f32 %v4501_v39, %v1039_v50 }
 0x173   : > { %v1194_v49 = vmul.f32 %v3174_v33, %v1182_v29  ;;  %v1337_v14 = vmul.f32 %v4502_v30, %v1038_v59  ;;  %v1253_v25 = vmul.f32 %v3204_v11, %v1241_v18  ;;  %v1254_v43 = vmul.f32 %v3204_v11, %v1242_v31 }
 0x174   : > { %v1305_v34 = vadd.f32 %v1297_v20, %v3855_v12  ;;  %v991_v0 = vmul.f32 %v3131_v7, %v979_v51  ;;  %v1348_v24 = vmul.f32 %v3720_v26, %v1336_v36  ;;  %v1095_v33 = vmul.f32 %v3155_v23, %v1083_v55 }
 0x175   : > { %v1349_v48 = vmul.f32 %v3720_v26, %v1337_v14  ;;  %v1138_v63 = vadd.f32 %v1130_v2, %v3860_v22  ;;  %v1261_v53 = vadd.f32 %v1253_v25, %v1137_v5  ;;  %v1139_v50 = vadd.f32 %v1131_v8, %v990_v44  ;;  %v4503_v22 = vld [vmem:[#allocation48_spill] sm:$0xff] }
 0x176   : > { %v1140_v38 = vadd.f32 %v1132_v9, %v991_v0  ;;  %v1201_v59 = vadd.f32 %v1193_v27, %v3866_v57  ;;  %v1202_v45 = vadd.f32 %v1194_v49, %v1094_v28  ;;  %v1203_v16 = vadd.f32 %v1195_v37, %v1095_v33  ;;  %v4504_v9 = vld [vmem:[#allocation47_spill] sm:$0xff] }
 0x177   : > { %v1204_v32 = vadd.f32 %v1196_v21, %v1096_v54  ;;  %v1255_v12 = vmul.f32 %v3204_v11, %v3918_v56  ;;  %v1365_v7 = vadd.f32 %v1305_v34, %v1261_v53  ;;  %v1256_v51 = vmul.f32 %v3204_v11, %v3921_v1 }
 0x178   : > { %v1262_v35 = vadd.f32 %v1254_v43, %v1138_v63  ;;  %v1307_v29 = vadd.f32 %v1299_v41, %v1159_v60  ;;  %v1308_v5 = vadd.f32 %v4503_v22, %v3912_v3  ;;  %v1340_v55 = vmul.f32 %v4504_v9, %v3758_v4  ;;  %v2228_v4 = vld [vmem:[%s4505_s5] ss:$0 sm:$0xff]  ;;  %s2647_s5 = scalar_lea.vmem %s2646_s3, 32 }
 0x179   : > { %v1263_v23 = vadd.f32 %v1255_v12, %v1139_v50  ;;  %v1350_v57 = vmul.f32 %v3720_v26, %v3931_v42  ;;  %v1264_v54 = vadd.f32 %v1256_v51, %v1140_v38  ;;  %v1351_v56 = vmul.f32 %v3720_v26, %v3935_v19 }
 0x17a   : > { %v1356_v37 = vadd.f32 %v1348_v24, %v3882_v15  ;;  %v1357_v21 = vadd.f32 %v1349_v48, %v1201_v59  ;;  %v1352_v11 = vmul.f32 %v3720_v26, %v1340_v55  ;;  %v1362_v41 = vadd.f32 %v3785_v40, %v3924_v46  ;;  %v2229_v40 = vld [vmem:[%s4245_s6] ss:$0 sm:$0xff] }
 0x17b   : > { %v1358_v1 = vadd.f32 %v1350_v57, %v1202_v45  ;;  %v1366_v3 = vadd.f32 %v1306_v61, %v1262_v35  ;;  %v1359_v44 = vadd.f32 %v1351_v56, %v1203_v16  ;;  %v1367_v42 = vadd.f32 %v1307_v29, %v1263_v23 }
 0x17c   : > { %v1368_v60 = vadd.f32 %v1308_v5, %v1264_v54  ;;  %v1371_v19 = vadd.f32 %v3800_v52, %v3887_v62  ;;  %v1360_v28 = vadd.f32 %v1352_v11, %v1204_v32  ;;  %v1370_v15 = vadd.f32 %v1362_v41, %v3811_v10 }
 0x17d   : > { %v1372_v26 = vadd.f32 %v3892_v17, %v1356_v37  ;;  %v1373_v2 = vadd.f32 %v1365_v7, %v1357_v21  ;;  %v1374_v46 = vadd.f32 %v1366_v3, %v1358_v1  ;;  %v1375_v8 = vadd.f32 %v1367_v42, %v1359_v44 }
 0x17e   : > { %v1384_v27 = vmul.f32 %v2228_v4, %v3949_v47  ;;  %v1386_v58 = vmul.f32 %v2228_v4, %v1371_v19  ;;  %v1376_v18 = vadd.f32 %v1368_v60, %v1360_v28  ;;  %v1385_v6 = vmul.f32 %v2228_v4, %v1370_v15 }
 0x17f   : > { %v1387_v31 = vmul.f32 %v2228_v4, %v1372_v26  ;;  %v1388_v20 = vmul.f32 %v2228_v4, %v1373_v2  ;;  %v1389_v52 = vmul.f32 %v2228_v4, %v1374_v46  ;;  %v1390_v62 = vmul.f32 %v2228_v4, %v1375_v8 }
 0x180   : > { %v1399_v49 = vadd.f32 %v2229_v40, %v1384_v27  ;;  %v1401_v10 = vadd.f32 %v2229_v40, %v1386_v58  ;;  %v1391_v61 = vmul.f32 %v2228_v4, %v1376_v18  ;;  %v1400_v17 = vadd.f32 %v2229_v40, %v1385_v6 }
 0x181   : > { %v1402_v39 = vadd.f32 %v2229_v40, %v1387_v31  ;;  %v1403_v36 = vadd.f32 %v2229_v40, %v1388_v20  ;;  %v1404_v30 = vadd.f32 %v2229_v40, %v1389_v52  ;;  %v1405_v14 = vadd.f32 %v2229_v40, %v1390_v62  ;;  %v1478_v62 = vld [vmem:[%s4246_s7] sm:$0xff] }
 0x182   : > { %v2230_v25 = vmul.f32 -1.442695, %v1399_v49  ;;  %v2232_v43 = vmul.f32 -1.442695, %v1401_v10  ;;  %v1406_v34 = vadd.f32 %v2229_v40, %v1391_v61  ;;  %v2231_v0 = vmul.f32 -1.442695, %v1400_v17 }
 0x183   : > { %v2233_v47 = vmul.f32 -1.442695, %v1402_v39  ;;  %v2234_v24 = vmul.f32 -1.442695, %v1403_v36  ;;  %v2235_v48 = vmul.f32 -1.442695, %v1404_v30 }
 0x184   : > { %2565 = vpow2.f32 %v2230_v25  ;;  %v2236_v33 = vmul.f32 -1.442695, %v1405_v14  ;;  %v2237_v63 = vmul.f32 -1.442695, %v1406_v34  ;;  %v2706_v61 = vmov 0  }
 0x185   : > { %2567 = vpow2.f32 %v2231_v0  ;;  %2500 = vset.pattern.permute.xlu0 %v2706_v61  ;;  %v2513_v0 = vld [vmem:[%s4250_s11] sm:$0xff]  }
 0x186   : > { %2569 = vpow2.f32 %v2232_v43  ;;  %2350 = vmatprep.subr.bf16.mxu1 %v2513_v0 }
 0x187   : > { %2571 = vpow2.f32 %v2233_v47  ;;  %2351 = vmatpush3.bf16.msra.mxu1 %v2513_v0  ;;  %v2514_v47 = vld [vmem:[%s4250_s11 + $0x8] sm:$0xff]  }
 0x188   : > { %2573 = vpow2.f32 %v2234_v24  ;;  %2352 = vmatprep.subr.bf16.mxu1 %v2514_v47  ;;  %v2515_v24 = vld [vmem:[%s4250_s11 + $0x10] sm:$0xff]  }
 0x189   : > { %2575 = vpow2.f32 %v2235_v48  ;;  %v2516_v48 = vld [vmem:[%s4250_s11 + $0x18] sm:$0xff]  }
 0x18a   : > { %2577 = vpow2.f32 %v2236_v33  ;;  %v2517_v33 = vld [vmem:[%s4250_s11 + $0x20] sm:$0xff]  }
 0x18b   : > { %2579 = vpow2.f32 %v2237_v63  ;;  %2353 = vmatpush3.bf16.msra.mxu1 %v2514_v47  ;;  %v2518_v63 = vld [vmem:[%s4250_s11 + $0x28] sm:$0xff]  }
 0x18c   : > { %2354 = vmatprep.subr.bf16.mxu1 %v2515_v24 }
 0x18e   : > { %v2566_v53 = vpop.eup %2565 }
 0x18f   : > { %v2568_v50 = vpop.eup %2567  ;;  %v1431_v38 = vadd.f32 1.0, %v2566_v53  ;;  %2355 = vmatpush3.bf16.msra.mxu1 %v2515_v24  ;;  %v2519_v53 = vld [vmem:[%s4250_s11 + $0x30] sm:$0xff]  }
 0x190   : > { %v2570_v59 = vpop.eup %2569  ;;  %v1432_v45 = vadd.f32 1.0, %v2568_v50  ;;  %2356 = vmatprep.subr.bf16.mxu1 %v2516_v48  ;;  %v2520_v50 = vld [vmem:[%s4250_s11 + $0x38] sm:$0xff]  }
 0x191   : > { %v2572_v16 = vpop.eup %2571  ;;  %v1433_v32 = vadd.f32 1.0, %v2570_v59  ;;  %2581 = vrcp.f32 %v1431_v38  ;;  %v2521_v38 = vld [vmem:[%s4253_s14] sm:$0xff]   ;;  %v2522_v59 = vld [vmem:[%s4253_s14 + $0x8] sm:$0xff]  }
 0x192   : > { %v2574_v12 = vpop.eup %2573  ;;  %v1434_v7 = vadd.f32 1.0, %v2572_v16  ;;  %2583 = vrcp.f32 %v1432_v45  ;;  %2374 = vmatprep.subr.bf16.mxu0 %v2521_v38  ;;  %v2523_v45 = vld [vmem:[%s4253_s14 + $0x10] sm:$0xff]   ;;  %v2524_v16 = vld [vmem:[%s4253_s14 + $0x18] sm:$0xff]  }
 0x193   : > { %v2576_v51 = vpop.eup %2575  ;;  %v1435_v35 = vadd.f32 1.0, %v2574_v12  ;;  %2585 = vrcp.f32 %v1433_v32  ;;  %2357 = vmatpush3.bf16.msra.mxu1 %v2516_v48  ;;  %2375 = vmatpush3.bf16.msra.mxu0 %v2521_v38  ;;  %v2525_v32 = vld [vmem:[%s4253_s14 + $0x20] sm:$0xff]  }
 0x194   : > { %v2578_v29 = vpop.eup %2577  ;;  %v1436_v23 = vadd.f32 1.0, %v2576_v51  ;;  %2587 = vrcp.f32 %v1434_v7  ;;  %2358 = vmatprep.subr.bf16.mxu1 %v2517_v33  ;;  %2376 = vmatprep.subr.bf16.mxu0 %v2522_v59  ;;  %v1491_v12 = vld [vmem:[%s4248_s9] sm:$0xff] }
 0x195   : > { %v2580_v22 = vpop.eup %2579  ;;  %v1437_v5 = vadd.f32 1.0, %v2578_v29  ;;  %2589 = vrcp.f32 %v1435_v35 }
 0x196   : > { %v1438_v9 = vadd.f32 1.0, %v2580_v22  ;;  %2591 = vrcp.f32 %v1436_v23 }
 0x197   : > { %2593 = vrcp.f32 %v1437_v5  ;;  %2359 = vmatpush3.bf16.msra.mxu1 %v2517_v33  ;;  %2377 = vmatpush3.bf16.msra.mxu0 %v2522_v59 }
 0x198   : > { %2595 = vrcp.f32 %v1438_v9  ;;  %2360 = vmatprep.subr.bf16.mxu1 %v2518_v63  ;;  %2378 = vmatprep.subr.bf16.mxu0 %v2523_v45  ;;  %v1504_v9 = vld [vmem:[%s4249_s10] sm:$0x1] }
 0x19b   : > { %v2582_v55 = vpop.eup %2581  ;;  %2361 = vmatpush3.bf16.msra.mxu1 %v2518_v63  ;;  %2379 = vmatpush3.bf16.msra.mxu0 %v2523_v45 }
 0x19c   : > { %v2584_v57 = vpop.eup %2583  ;;  %v4026_v54 = vmul.f32 %v2582_v55, %v1399_v49  ;;  %2362 = vmatprep.subr.bf16.mxu1 %v2519_v53  ;;  %2380 = vmatprep.subr.bf16.mxu0 %v2524_v16 }
 0x19d   : > { %v2586_v56 = vpop.eup %2585  ;;  %v4028_v37 = vmul.f32 %v2584_v57, %v1400_v17  ;;  %v1482_v17 = vld [vmem:[%s4247_s8] sm:$0xff] }
 0x19e   : > { %v2588_v21 = vpop.eup %2587  ;;  %v4030_v11 = vmul.f32 %v2586_v56, %v1401_v10 }
 0x19f   : > { %v1463_v1 = vadd.f32 %v4028_v37, %v4026_v54  ;;  %v2590_v41 = vpop.eup %2589  ;;  %v4034_v3 = vmul.f32 %v2588_v21, %v1402_v39  ;;  %2363 = vmatpush3.bf16.msra.mxu1 %v2519_v53  ;;  %2381 = vmatpush3.bf16.msra.mxu0 %v2524_v16  ;;  %v2639_v53 = vld [vmem:[%s2880_s1 + $0x18] sm:$0xff]   ;;  %v2640_v16 = vld [vmem:[%s2880_s1 + $0x10] sm:$0xff]  }
 0x1a0   : > { %v2592_v44 = vpop.eup %2591  ;;  %v4037_v42 = vmul.f32 %v2590_v41, %v1403_v36  ;;  %2364 = vmatprep.subr.bf16.mxu1 %v2520_v50  ;;  %2382 = vmatprep.subr.bf16.mxu0 %v2525_v32 }
 0x1a1   : > { %v1464_v4 = vadd.f32 %v1463_v1, %v4030_v11  ;;  %v2594_v19 = vpop.eup %2593  ;;  %v4040_v28 = vmul.f32 %v2592_v44, %v1404_v30 }
 0x1a2   : > { %v2596_v26 = vpop.eup %2595  ;;  %v4043_v2 = vmul.f32 %v2594_v19, %v1405_v14 }
 0x1a3   : > { %v1465_v60 = vadd.f32 %v1464_v4, %v4034_v3  ;;  %v4046_v46 = vmul.f32 %v2596_v26, %v1406_v34  ;;  %2365 = vmatpush3.bf16.msra.mxu1 %v2520_v50  ;;  %2383 = vmatpush3.bf16.msra.mxu0 %v2525_v32  ;;  %v4506_v4 = vsub.s32 0, %v2901_v13  ;;  %v1693_v50 = vunpack.c.l.bf16 %v2639_v53 }
 0x1a4   : > { %v1691_v32 = vunpack.c.l.bf16 %v2640_v16 }
 0x1a5   : > { %v1466_v15 = vadd.f32 %v1465_v60, %v4037_v42 }
 0x1a7   : > { %v1467_v40 = vadd.f32 %v1466_v15, %v4040_v28 }
 0x1a9   : > { %v1468_v8 = vadd.f32 %v1467_v40, %v4043_v2 }
 0x1ab   : > { %v1469_v27 = vadd.f32 %v1468_v8, %v4046_v46 }
 0x1ad   : > { %v1470_v58 = vrot.slane %v1469_v27, 4 }
 0x1af   : > { %v1471_v18 = vadd.f32 %v1470_v58, %v1469_v27 }
 0x1b1   : > { %v1472_v6 = vrot.slane %v1471_v18, 2 }
 0x1b3   : > { %v1473_v31 = vadd.f32 %v1472_v6, %v1471_v18  ;;  %v2637_v6 = vld [vmem:[%s2880_s1 + $0x8] sm:$0xff]  }
 0x1b5   : > { %v1474_v20 = vrot.slane %v1473_v31, 1 }
 0x1b7   : > { %v1475_v52 = vadd.f32 %v1474_v20, %v1473_v31  ;;  %v1689_v31 = vunpack.c.l.bf16 %v2637_v6 }
 0x1b9   : > { %v1477_v49 = vmul.f32 0.015625, %v1475_v52 }
 0x1bb   : > { %v1479_v10 = vmul.f32 %v1478_v62, %v1477_v49  ;;  %v2638_v62 = vld [vmem:[%s2880_s1] sm:$0xff]   ;;  %s2641_s1 = scalar_lea.vmem %s4199_s20, 16 }
 0x1bc   : > { %v1687_v49 = vunpack.c.l.bf16 %v2638_v62  ;;  %p2642_p11 = scmp.ne.s32.totalorder %s4199_s20, %s2641_s1  ;;  %p2649_p1 = scmp.lt.s32.totalorder %s2647_s5, %s2641_s1 }
 0x1bd   : > { %1480 = vadd.xlane.f32.xlu0 %v1479_v10 }
 0x1be   : > { %p2643_p12 = pnand %p2642_p11, %p2853_p5  ;;  %p2650_p2 = por %p2649_p1, %p2648_p0 }
 0x1c0   : > { %p2644_p13 = pneg %p2643_p12 }
 0x1c2   : > { %p2651_p3 = pnand %p2650_p2, %p2644_p13 }
 0x24a   : > { %v1481_v39 = vpop.xlane.xlu0 %1480 }
 0x24b   : > { %v1483_v36 = vadd.f32 %v1482_v17, %v1481_v39  ;;  %v1690_v17 = vunpack.c.h.bf16 %v2637_v6  ;;  %v1954_v6 = vld [vmem:[%s4256_s17 + $0x50] sm:$0xff] }
 0x24d   : > { %v2238_v30 = vmul.f32 -1.442695, %v1483_v36 }
 0x24f   : > { %2597 = vpow2.f32 %v2238_v30 }
 0x259   : > { %v2598_v14 = vpop.eup %2597 }
 0x25a   : > { %v1487_v25 = vadd.f32 1.0, %v2598_v14  ;;  %v1688_v14 = vunpack.c.h.bf16 %v2638_v62  ;;  %v1957_v62 = vld [vmem:[%s4256_s17 + $0x68] sm:$0xff] }
 0x25c   : > { %2599 = vrcp.f32 %v1487_v25 }
 0x266   : > { %v2600_v43 = vpop.eup %2599 }
 0x267   : > { %v1490_v34 = vmul.f32 %v2600_v43, %v1483_v36 }
 0x269   : > { %1494 = vperm.xlu0 %2500, %v1490_v34  }
 0x2e8   : > { %v1495_v7 = vpop.permute.xlu0 %1494 }
 0x2e9   : > { %v1497_v51 = vmul.f32 %v1495_v7, %v1491_v12 }
 0x2eb   : > { %v1498_v35 = vrot.slane %v1497_v51, 4 }
 0x2ed   : > { %v1499_v29 = vadd.f32 %v1498_v35, %v1497_v51  ;;  %v1694_v35 = vunpack.c.h.bf16 %v2639_v53 }
 0x2ef   : > { %v1500_v23 = vrot.slane %v1499_v29, 2 }
 0x2f1   : > { %v1501_v22 = vadd.f32 %v1500_v23, %v1499_v29 }
 0x2f3   : > { %v1502_v5 = vrot.slane %v1501_v22, 1 }
 0x2f5   : > { %v1503_v55 = vadd.f32 %v1502_v5, %v1501_v22  ;;  %v1692_v5 = vunpack.c.h.bf16 %v2640_v16 }
 0x2f7   : > { %v1505_v57 = vadd.f32 %v1504_v9, %v1503_v55 }
 0x2f9   : > { %v2239_v56 = vmul.f32 -1.442695, %v1505_v57 }
 0x2fb   : > { %2601 = vpow2.f32 %v2239_v56 }
 0x305   : > { %v2602_v21 = vpop.eup %2601 }
 0x306   : > { %v1509_v1 = vadd.f32 1.0, %v2602_v21 }
 0x308   : > { %2603 = vrcp.f32 %v1509_v1 }
 0x312   : > { %v2604_v41 = vpop.eup %2603 }
 0x313   : > { %v1515_v44 = vrot.slane %v2604_v41, %v4506_v4 }
 0x315   : > { %v1516_v60 = vmul.f32 %v1515_v44, %v4026_v54  ;;  %v1517_v19 = vmul.f32 %v1515_v44, %v4028_v37  ;;  %v1518_v15 = vmul.f32 %v1515_v44, %v4030_v11  ;;  %v1519_v26 = vmul.f32 %v1515_v44, %v4034_v3  ;;  %v2526_v11 = vld [vmem:[%s4253_s14 + $0x28] sm:$0xff]   ;;  %v2527_v3 = vld [vmem:[%s4253_s14 + $0x30] sm:$0xff]  }
 0x316   : > { %v1520_v40 = vmul.f32 %v1515_v44, %v4037_v42  ;;  %v1521_v8 = vmul.f32 %v1515_v44, %v4040_v28  ;;  %v1522_v13 = vmul.f32 %v1515_v44, %v4043_v2  ;;  %v1523_v54 = vmul.f32 %v1515_v44, %v4046_v46  ;;  %2384 = vmatprep.subr.bf16.mxu0 %v2526_v11  ;;  %v2528_v42 = vld [vmem:[%s4253_s14 + $0x38] sm:$0xff]   ;;  %v2248_v28 = vld [vmem:[%s4251_s12] ss:$0 sm:$0xff] }
 0x317   : > { %v1524_v27 = vpack.c.bf16 %v1517_v19, %v1516_v60  ;;  %v1525_v58 = vpack.c.bf16 %v1519_v26, %v1518_v15  ;;  %2385 = vmatpush3.bf16.msra.mxu0 %v2526_v11  ;;  %v2249_v46 = vld [vmem:[%s4252_s13] ss:$0 sm:$0xff]  ;;  %v1945_v15 = vld [vmem:[%s4256_s17 + $0x8] sm:$0xff]  ;;  %v1951_v11 = vld [vmem:[%s4256_s17 + $0x38] sm:$0xff] }
 0x318   : > { %v1526_v18 = vpack.c.bf16 %v1521_v8, %v1520_v40  ;;  %v1527_v37 = vpack.c.bf16 %v1523_v54, %v1522_v13  ;;  %2386 = vmatprep.subr.bf16.mxu0 %v2527_v3  ;;  %v1944_v19 = vld [vmem:[%s4256_s17] sm:$0xff]  ;;  %v2707_v40 = vmov 0.0|0.0   ;;  %v1946_v8 = vld [vmem:[%s4256_s17 + $0x10] sm:$0xff]  ;;  %v1949_v13 = vld [vmem:[%s4256_s17 + $0x28] sm:$0xff] }
 0x319   : > { %2366 = vmatprep.mubr.bf16.mxu1 %v1524_v27  ;;  %v2434_v26 = vpack.c.bf16 %v1945_v15, %v1944_v19  ;;  %2433 = vmatprep.subr.bf16.mxu1 %v2707_v40  ;;  %v1947_v27 = vld [vmem:[%s4256_s17 + $0x18] sm:$0xff] }
 0x31a   : > { %2367 = vmatmul.mubr.bf16.vlgmr.msra.gmra.mrb[0].mxu1 %v1525_v58  ;;  %v2437_v58 = vpack.c.bf16 %v1947_v27, %v1946_v8 }
 0x31b   : > { %2370 = vmatprep.mubr.bf16.mxu1 %v1526_v18  ;;  %2387 = vmatpush3.bf16.msra.mxu0 %v2527_v3  ;;  %v1948_v18 = vld [vmem:[%s4256_s17 + $0x20] sm:$0xff] }
 0x31c   : > { %2388 = vmatprep.subr.bf16.mxu0 %v2528_v42  ;;  %2435 = vmatpush3.bf16.msra.mxu1 %v2434_v26  ;;  %v2440_v54 = vpack.c.bf16 %v1949_v13, %v1948_v18 }
 0x31d   : > { %2436 = vmatprep.subr.bf16.mxu1 %v2707_v40 }
 0x31f   : > { %2389 = vmatpush3.bf16.msra.mxu0 %v2528_v42  ;;  %v1952_v42 = vld [vmem:[%s4256_s17 + $0x40] sm:$0xff] }
 0x320   : > { %2438 = vmatpush3.bf16.msra.mxu1 %v2437_v58 }
 0x321   : > { %2439 = vmatprep.subr.bf16.mxu1 %v2707_v40 }
 0x322   : > { %2371 = vmatmul.mubr.bf16.gmra.mrb[4].mxu1 %v1527_v37  ;;  %v1950_v37 = vld [vmem:[%s4256_s17 + $0x30] sm:$0xff] }
 0x323   : > { %v2443_v3 = vpack.c.bf16 %v1951_v11, %v1950_v37 }
 0x324   : > { %2441 = vmatpush3.bf16.msra.mxu1 %v2440_v54 }
 0x325   : > { %2442 = vmatprep.subr.bf16.mxu1 %v2707_v40 }
 0x328   : > { %2444 = vmatpush3.bf16.msra.mxu1 %v2443_v3 }
 0x329   : > { %2445 = vmatprep.subr.bf16.mxu1 %v2707_v40 }
 0x3ed   : > { %v2368_v2 = vpop.f32.mrb[0].mxu1 }
 0x3ee   : > { %v1666_v20 = vmul.f32 %v2368_v2, %v2248_v28  ;;  %v1626_v52 = vpop.f32.mrb[1].mxu1  ;;  %v4507_v2 = vmov 0.0  }
 0x3ef   : > { %v1664_v10 = vmul.f32 %v2248_v28, %v1626_v52  ;;  %v2369_v61 = vpop.f32.mrb[2].mxu1  ;;  %2430 = vmatprep.mubr.msk.f32.mxu1 %vm2708_vm0, %v4507_v2  ;;  %v1956_v52 = vld [vmem:[%s4256_s17 + $0x60] sm:$0xff] }
 0x3f0   : > { %v1681_v39 = vadd.f32 %v2249_v46, %v1666_v20  ;;  %v1667_v36 = vmul.f32 %v2369_v61, %v2248_v28  ;;  %v1629_v30 = vpop.f32.mrb[3].mxu1  ;;  %v1959_v61 = vld [vmem:[%s4256_s17 + $0x78] sm:$0xff] }
 0x3f1   : > { %v1679_v25 = vadd.f32 %v2249_v46, %v1664_v10  ;;  %v1665_v43 = vmul.f32 %v2248_v28, %v1629_v30  ;;  %v1958_v10 = vld [vmem:[%s4256_s17 + $0x70] sm:$0xff]  ;;  %v2259_v30 = vld [vmem:[%s4255_s16] ss:$0 sm:$0xff] }
 0x3f2   : > { %v1697_v34 = vadd.f32 %v1689_v31, %v1681_v39  ;;  %v1682_v0 = vadd.f32 %v2249_v46, %v1667_v36  ;;  %v1955_v31 = vld [vmem:[%s4256_s17 + $0x58] sm:$0xff]  ;;  %v2258_v39 = vld [vmem:[%s4254_s15] ss:$0 sm:$0xff] }
 0x3f3   : > { %v1695_v47 = vadd.f32 %v1687_v49, %v1679_v25  ;;  %v1680_v24 = vadd.f32 %v2249_v46, %v1665_v43  ;;  %v2449_v20 = vpack.c.bf16 %v1955_v31, %v1954_v6  ;;  %v2452_v49 = vpack.c.bf16 %v1957_v62, %v1956_v52 }
 0x3f4   : > { %v1698_v48 = vadd.f32 %v1690_v17, %v1682_v0  ;;  %v2455_v17 = vpack.c.bf16 %v1959_v61, %v1958_v10 }
 0x3f5   : > { %v1696_v33 = vadd.f32 %v1688_v14, %v1680_v24  ;;  %v2372_v63 = vpop.f32.mrb[4].mxu1 }
 0x3f6   : > { %v1704_v38 = vpack.c.bf16 %v1698_v48, %v1697_v34  ;;  %v1670_v59 = vmul.f32 %v2372_v63, %v2248_v28  ;;  %v1642_v45 = vpop.f32.mrb[5].mxu1 }
 0x3f7   : > { %v1668_v12 = vmul.f32 %v2248_v28, %v1642_v45  ;;  %v2373_v7 = vpop.f32.mrb[6].mxu1  ;;  %v1703_v51 = vpack.c.bf16 %v1696_v33, %v1695_v47 }
 0x3f8   : > { %v1685_v29 = vadd.f32 %v2249_v46, %v1670_v59  ;;  %v1671_v23 = vmul.f32 %v2373_v7, %v2248_v28  ;;  %v1645_v22 = vpop.f32.mrb[7].mxu1 }
 0x3f9   : > { %v1683_v9 = vadd.f32 %v2249_v46, %v1668_v12  ;;  %v1669_v55 = vmul.f32 %v2248_v28, %v1645_v22  ;;  %2390 = vmatprep.mubr.bf16.mxu0 %v1703_v51  ;;  %v1953_v28 = vld [vmem:[%s4256_s17 + $0x48] sm:$0xff] }
 0x3fa   : > { %v1701_v57 = vadd.f32 %v1693_v50, %v1685_v29  ;;  %v1686_v56 = vadd.f32 %v2249_v46, %v1671_v23  ;;  %2391 = vmatmul.mubr.bf16.vlgmr.msra.gmra.mrb[8].mxu0 %v1704_v38 }
 0x3fb   : > { %v1699_v21 = vadd.f32 %v1691_v32, %v1683_v9  ;;  %v1684_v1 = vadd.f32 %v2249_v46, %v1669_v55  ;;  %v2446_v46 = vpack.c.bf16 %v1953_v28, %v1952_v42 }
 0x3fc   : > { %v1702_v41 = vadd.f32 %v1694_v35, %v1686_v56 }
 0x3fd   : > { %v1700_v4 = vadd.f32 %v1692_v5, %v1684_v1  ;;  %2447 = vmatpush3.bf16.msra.mxu1 %v2446_v46 }
 0x3fe   : > { %v1706_v44 = vpack.c.bf16 %v1702_v41, %v1701_v57  ;;  %2448 = vmatprep.subr.bf16.mxu1 %v2707_v40 }
 0x3ff   : > { %v1705_v60 = vpack.c.bf16 %v1700_v4, %v1699_v21 }
 0x401   : > { %2394 = vmatprep.mubr.bf16.mxu0 %v1705_v60  ;;  %2450 = vmatpush3.bf16.msra.mxu1 %v2449_v20 }
 0x402   : > { %2395 = vmatmul.mubr.bf16.gmra.mrb[12].mxu0 %v1706_v44  ;;  %2451 = vmatprep.subr.bf16.mxu1 %v2707_v40 }
 0x405   : > { %2453 = vmatpush3.bf16.msra.mxu1 %v2452_v49 }
 0x406   : > { %2454 = vmatprep.subr.bf16.mxu1 %v2707_v40 }
 0x409   : > { %2456 = vmatpush3.bf16.msra.mxu1 %v2455_v17 }
 0x4cd   : > { %v2392_v36 = vpop.f32.mrb[8].mxu0 }
 0x4ce   : > { %v1845_v14 = vmul.f32 %v2392_v36, %v2258_v39  ;;  %v1805_v25 = vpop.f32.mrb[9].mxu0 }
 0x4cf   : > { %v1843_v43 = vmul.f32 %v2258_v39, %v1805_v25  ;;  %v2393_v34 = vpop.f32.mrb[10].mxu0 }
 0x4d0   : > { %v1860_v0 = vadd.f32 %v2259_v30, %v1845_v14  ;;  %v1846_v47 = vmul.f32 %v2393_v34, %v2258_v39  ;;  %v1808_v24 = vpop.f32.mrb[11].mxu0 }
 0x4d1   : > { %v1858_v48 = vadd.f32 %v2259_v30, %v1843_v43  ;;  %v1844_v33 = vmul.f32 %v2258_v39, %v1808_v24 }
 0x4d2   : > { %v2262_v63 = vmul.f32 -1.442695, %v1860_v0  ;;  %v1861_v53 = vadd.f32 %v2259_v30, %v1846_v47 }
 0x4d3   : > { %v2260_v50 = vmul.f32 -1.442695, %v1858_v48  ;;  %v1859_v38 = vadd.f32 %v2259_v30, %v1844_v33 }
 0x4d4   : > { %2605 = vpow2.f32 %v2262_v63  ;;  %v2263_v59 = vmul.f32 -1.442695, %v1861_v53 }
 0x4d5   : > { %2607 = vpow2.f32 %v2260_v50  ;;  %v2261_v45 = vmul.f32 -1.442695, %v1859_v38  ;;  %v2396_v16 = vpop.f32.mrb[12].mxu0 }
 0x4d6   : > { %2609 = vpow2.f32 %v2263_v59  ;;  %v1849_v32 = vmul.f32 %v2396_v16, %v2258_v39  ;;  %v1821_v12 = vpop.f32.mrb[13].mxu0  ;;  %v1960_v59 = vld [vmem:[%s4257_s18] sm:$0x1] }
 0x4d7   : > { %2611 = vpow2.f32 %v2261_v45  ;;  %v1847_v7 = vmul.f32 %v2258_v39, %v1821_v12  ;;  %v2397_v51 = vpop.f32.mrb[14].mxu0 }
 0x4d8   : > { %v1864_v35 = vadd.f32 %v2259_v30, %v1849_v32  ;;  %v1850_v29 = vmul.f32 %v2397_v51, %v2258_v39  ;;  %v1824_v23 = vpop.f32.mrb[15].mxu0 }
 0x4d9   : > { %v1862_v22 = vadd.f32 %v2259_v30, %v1847_v7  ;;  %v1848_v5 = vmul.f32 %v2258_v39, %v1824_v23 }
 0x4da   : > { %v2266_v9 = vmul.f32 -1.442695, %v1864_v35  ;;  %v1865_v55 = vadd.f32 %v2259_v30, %v1850_v29 }
 0x4db   : > { %v2264_v57 = vmul.f32 -1.442695, %v1862_v22  ;;  %v1863_v56 = vadd.f32 %v2259_v30, %v1848_v5 }
 0x4dc   : > { %2613 = vpow2.f32 %v2266_v9  ;;  %v2267_v21 = vmul.f32 -1.442695, %v1865_v55 }
 0x4dd   : > { %2615 = vpow2.f32 %v2264_v57  ;;  %v2265_v1 = vmul.f32 -1.442695, %v1863_v56 }
 0x4de   : > { %v2606_v41 = vpop.eup %2605  ;;  %2617 = vpow2.f32 %v2267_v21 }
 0x4df   : > { %v2608_v4 = vpop.eup %2607  ;;  %v1892_v44 = vadd.f32 1.0, %v2606_v41  ;;  %2619 = vpow2.f32 %v2265_v1 }
 0x4e0   : > { %v2610_v60 = vpop.eup %2609  ;;  %v1890_v19 = vadd.f32 1.0, %v2608_v4 }
 0x4e1   : > { %v2612_v15 = vpop.eup %2611  ;;  %2621 = vrcp.f32 %v1892_v44  ;;  %v1893_v26 = vadd.f32 1.0, %v2610_v60 }
 0x4e2   : > { %2623 = vrcp.f32 %v1890_v19  ;;  %v1891_v40 = vadd.f32 1.0, %v2612_v15 }
 0x4e3   : > { %2625 = vrcp.f32 %v1893_v26 }
 0x4e4   : > { %2627 = vrcp.f32 %v1891_v40 }
 0x4e6   : > { %v2614_v8 = vpop.eup %2613 }
 0x4e7   : > { %v2616_v27 = vpop.eup %2615  ;;  %v1896_v58 = vadd.f32 1.0, %v2614_v8 }
 0x4e8   : > { %v2618_v18 = vpop.eup %2617  ;;  %v1894_v13 = vadd.f32 1.0, %v2616_v27 }
 0x4e9   : > { %v2620_v54 = vpop.eup %2619  ;;  %2629 = vrcp.f32 %v1896_v58  ;;  %v1897_v37 = vadd.f32 1.0, %v2618_v18 }
 0x4ea   : > { %2631 = vrcp.f32 %v1894_v13  ;;  %v1895_v11 = vadd.f32 1.0, %v2620_v54 }
 0x4eb   : > { %v2622_v3 = vpop.eup %2621  ;;  %2633 = vrcp.f32 %v1897_v37 }
 0x4ec   : > { %v2624_v42 = vpop.eup %2623  ;;  %v1916_v28 = vmul.f32 %v2622_v3, %v1860_v0  ;;  %2635 = vrcp.f32 %v1895_v11 }
 0x4ed   : > { %v2626_v2 = vpop.eup %2625  ;;  %v1914_v46 = vmul.f32 %v2624_v42, %v1858_v48 }
 0x4ee   : > { %v2628_v6 = vpop.eup %2627  ;;  %1924 = vst [vmem:[%s639_s23 + $0x10] sm:$0xff] %v1916_v28  ;;  %v1917_v31 = vmul.f32 %v2626_v2, %v1861_v53 }
 0x4ef   : > { %1922 = vst [vmem:[%s639_s23] sm:$0xff] %v1914_v46  ;;  %v1915_v20 = vmul.f32 %v2628_v6, %v1859_v38 }
 0x4f0   : > { %1925 = vst [vmem:[%s639_s23 + $0x18] sm:$0xff] %v1917_v31 }
 0x4f1   : > { %1923 = vst [vmem:[%s639_s23 + $0x8] sm:$0xff] %v1915_v20  ;;  %v1930_v52 = vadd.f32 %v1915_v20, %v1914_v46 }
 0x4f3   : > { %v2630_v62 = vpop.eup %2629  ;;  %v1931_v49 = vadd.f32 %v1930_v52, %v1916_v28 }
 0x4f4   : > { %v2632_v10 = vpop.eup %2631  ;;  %v1920_v61 = vmul.f32 %v2630_v62, %v1864_v35 }
 0x4f5   : > { %v2634_v17 = vpop.eup %2633  ;;  %v1918_v39 = vmul.f32 %v2632_v10, %v1862_v22  ;;  %v1932_v36 = vadd.f32 %v1931_v49, %v1917_v31 }
 0x4f6   : > { %v2636_v30 = vpop.eup %2635  ;;  %1928 = vst [vmem:[%s639_s23 + $0x30] sm:$0xff] %v1920_v61  ;;  %v1921_v14 = vmul.f32 %v2634_v17, %v1865_v55 }
 0x4f7   : > { %1926 = vst [vmem:[%s639_s23 + $0x20] sm:$0xff] %v1918_v39  ;;  %v1933_v25 = vadd.f32 %v1932_v36, %v1918_v39  ;;  %v1919_v43 = vmul.f32 %v2636_v30, %v1863_v56 }
 0x4f8   : > { %1929 = vst [vmem:[%s639_s23 + $0x38] sm:$0xff] %v1921_v14 }
 0x4f9   : > { %1927 = vst [vmem:[%s639_s23 + $0x28] sm:$0xff] %v1919_v43  ;;  %v1934_v34 = vadd.f32 %v1933_v25, %v1919_v43  ;;  %s2038_s23 = scalar_lea.sflag [#allocation3], %s628_s27 }
 0x4fb   : > { %v1935_v0 = vadd.f32 %v1934_v34, %v1920_v61 }
 0x4fd   : > { %v1936_v47 = vadd.f32 %v1935_v0, %v1921_v14 }
 0x4ff   : > { %v1937_v24 = vrot.slane %v1936_v47, 4 }
 0x501   : > { %v1938_v48 = vadd.f32 %v1937_v24, %v1936_v47 }
 0x503   : > { %v1939_v33 = vrot.slane %v1938_v48, 2 }
 0x505   : > { %v1940_v63 = vadd.f32 %v1939_v33, %v1938_v48 }
 0x507   : > { %v1941_v53 = vrot.slane %v1940_v63, 1 }
 0x509   : > { %v1942_v50 = vadd.f32 %v1941_v53, %v1940_v63 }
 0x50b   : > { %v1943_v38 = vmul.f32 0.015625, %v1942_v50 }
 0x50d   : > { %2431 = vmatmul.mubr.f32.vlgmr.msra.gmra.mrb[8].mxu1 %v1943_v38 }
 0x5e0   : > { %v2027_v45 = vpop.f32.mrb[8].mxu1 }
 0x5e1   : > { %v2028_v16 = vadd.f32 %v2027_v45, %v1960_v59  ;;  %v2432_v32 = vpop.f32.mrb[9].mxu1 }
 0x5e3   : > { %2031 = vst [vmem:[%s629_s29] sm:$0x1] %v2028_v16 }
 0x5e4   : > { %2654 = shalt.err (!%p2651_p3)
}
 0x5e5   : > { %s2655_s27 = scalar_lea.hbm %s4197_s26, 16  ;;  %s2659_s24 = scalar_lea.hbm %s4508_s0, 32 }
 0x5e6   : > { %p2656_p4 = scmp.ne.s32.totalorder %s4197_s26, %s2655_s27  ;;  %p2660_p9 = scmp.lt.u32.totalorder %s4197_s26, %s4508_s0 }
 0x5e7   : > { %p2661_p10 = scmp.lt.u32.totalorder %s2659_s24, %s2655_s27  ;;  %p2663_p12 = scmp.lt.u32.totalorder %s2655_s27, %s4197_s26 }
 0x5e8   : > { %p2657_p7 = pnand %p2656_p4, %p2853_p5 }
 0x5e9   : > { %p2662_p11 = por %p2661_p10, %p2660_p9 }
 0x5ea   : > { %p2658_p8 = pneg %p2657_p7 }
 0x5eb   : > { %p2664_p13 = por %p2663_p12, %p2662_p11 }
 0x5ed   : > { %p2665_p0 = pnand %p2664_p13, %p2658_p8 }
 0x5ef   : > { %2668 = shalt.err (!%p2665_p0)
}
 0x5f0   : > { %2457 = dma.vmem_to_hbm [thread:$0]  (%p2853_p5), %s4199_s20, 16, %s4197_s26, %s2038_s23  }
 0x5f1 PF: > { %s4509_s5 = sld [smem:[#allocation7_spill]]  ;;  %s4510_s1 = sld [smem:[#allocation5_spill]] }
 0x5f7   : > { %p2463_p1 = scmp.ge.s32.totalorder %s4509_s5, 2  ;;  %s2073_s28 = sand.u32 1, %s4510_s1  }
 0x5f8   : > { %s2074_s29 = scalar_lea.sflag [#allocation3], %s2073_s28 }
 0x5f9   : > { %p2460_p2 = pnand %p2463_p1, %p2857_p6 }
 0x5fb   : > { %2686 = dma.done.wait (!%p2460_p2), %s2074_s29, 16  }
 0x5fc   : > { %2688 = vsyncadd (!%p2460_p2), %s2074_s29, 4294967280  ;;  %s4512_s24 = sld [smem:[#allocation8_spill]]  ;;  %s4513_s27 = sld [smem:[#allocation6_spill]] }
 0x5fd   : > { %s4514_s23 = sld [smem:[#allocation9_spill]]  ;;  %s4515_s1 = smov %s2695_s22 }
 0x602   : > { %p31_p3 = scmp.ge.s32.totalorder %s4512_s24, 4   ;;  %s4516_s22 = smov %s4513_s27 }
 0x604   :  { %33 = sbr.rel (!%p31_p3) target bundleno = 11 (0xb), region = 143 }
 0x60b   :  { %2078 = vsyncpa [#allocation3], 1 }
 0x60c   :  { %2080 = vsyncpa [#allocation3 + $0x1], 1 }

// kernel: _forward.3
= control target key start
LH: loop header
LB: loop body
LE: loop exit
PB: predicated region body
PF: predicated region fallthrough
CT: control target
= control target key end

     0   :  { %s4947_s29 = smov 0   ;;  %s9001_s0 = inlined_call_operand.vmem [shape: bf16[2,256,128], index: 0, kind: input, shape index: {}]   ;;  %s9002_s1 = inlined_call_operand.vmem [shape: bf16[128,128], index: 1, kind: input, shape index: {}]   ;;  %s9003_s2 = inlined_call_operand.vmem [shape: f32[1,128], index: 2, kind: input, shape index: {}]   ;;  %s9004_s3 = inlined_call_operand.vmem [shape: f32[1,128], index: 3, kind: input, shape index: {}]   ;;  %s9005_s4 = inlined_call_operand.vmem [shape: f32[9,128], index: 4, kind: input, shape index: {}]   ;;  %s9006_s5 = inlined_call_operand.vmem [shape: f32[1,128], index: 5, kind: input, shape index: {}]   ;;  %s9007_s6 = inlined_call_operand.vmem [shape: f32[1,128], index: 6, kind: input, shape index: {}]   ;;  %s9008_s7 = inlined_call_operand.vmem [shape: f32[8,128], index: 7, kind: input, shape index: {}]   ;;  %s9009_s8 = inlined_call_operand.vmem [shape: f32[8,1], index: 8, kind: input, shape index: {}]   ;;  %s9010_s9 = inlined_call_operand.vmem [shape: f32[8,128], index: 9, kind: input, shape index: {}]   ;;  %s9011_s10 = inlined_call_operand.vmem [shape: f32[1,128], index: 10, kind: input, shape index: {}]   ;;  %s9012_s11 = inlined_call_operand.vmem [shape: bf16[128,128], index: 11, kind: input, shape index: {}]   ;;  %s9013_s12 = inlined_call_operand.vmem [shape: f32[1,128], index: 12, kind: input, shape index: {}]   ;;  %s9014_s13 = inlined_call_operand.vmem [shape: f32[1,128], index: 13, kind: input, shape index: {}]   ;;  %s9015_s14 = inlined_call_operand.vmem [shape: bf16[2,256,128], index: 14, kind: output, shape index: {}]  }
   0x1 LB: > { %s3902_s30 = sadd.s32 4294967295, %s4868_s29   ;;  %p3906_p0 = scmp.ge.s32.totalorder %s4868_s29, 1  ;;  %s4868_s29 = sphi %s4947_s29, %s24_s29  }
   0x2   : > { %p412_p1 = scmp.lt.s32.totalorder %s4868_s29, 3 }
   0x4   : > { %p413_p2 = pnand %p3906_p0, %p412_p1 }
   0x6   : > { %416 = sbr.rel (%p413_p2) target bundleno = 1404 (0x57c), region = 76 }
   0xd   : > { %v4558_v0 = vld [vmem:[%s9002_s1] sm:$0xff]   ;;  %p458_p3 = scmp.lt.s32.totalorder %s3902_s30, 1  ;;  %v4559_v1 = vld [vmem:[%s9002_s1 + $0x8] sm:$0xff]   ;;  %v4560_v2 = vld [vmem:[%s9002_s1 + $0x10] sm:$0xff]   ;;  %v1126_v24 = vlaneseq }
   0xe   : > { %4451 = vmatprep.subr.bf16.mxu0 %v4558_v0  ;;  %v4561_v3 = vld [vmem:[%s9002_s1 + $0x18] sm:$0xff]   ;;  %v4562_v5 = vld [vmem:[%s9002_s1 + $0x20] sm:$0xff]   ;;  %v4563_v6 = vld [vmem:[%s9002_s1 + $0x28] sm:$0xff]  }
   0xf   : > { %s10012_s30 = smov (!%p458_p3, %s3902_s30), 1  ;;  %4452 = vmatpush3.bf16.msra.mxu0 %v4558_v0  ;;  %v4564_v7 = vld [vmem:[%s9002_s1 + $0x30] sm:$0xff]   ;;  %v4565_v8 = vld [vmem:[%s9002_s1 + $0x38] sm:$0xff]   ;;  %v5008_v25 = vld [vmem:[%s9003_s2] ss:$0 sm:$0xff]  ;;  %v5015_v28 = vshrl.u32 %v1126_v24, 7 }
  0x10   : > { %4453 = vmatprep.subr.bf16.mxu0 %v4559_v1  ;;  %s4274_s21 = sshll.u32 %s10012_s30, 7  ;;  %v5013_v27 = vld [vmem:[%s9004_s3] ss:$0 sm:$0xff] }
  0x11   : > { %s4972_s24 = scalar_lea.vmem %s9001_s0, %s4274_s21  ;;  %9208 = vst [vmem:[#allocation2_spill] sm:$0xff] %v5013_v27  ;;  %9209 = vst [vmem:[#allocation3_spill] sm:$0xff] %v5015_v28  ;;  %v5024_v36 = vadd.s32 32, %v5015_v28  ;;  %v5043_v48 = vadd.s32 16, %v5015_v28  ;;  %v5051_v52 = vadd.s32 40, %v5015_v28  ;;  %v1614_v55 = vsub.s32 1, %v5015_v28  ;;  %s8923_s28 = scalar_lea.vmem %s9015_s14, %s4274_s21 }
  0x12   : > { %v4566_v4 = vld [vmem:[%s4972_s24] sm:$0xff]   ;;  %v4567_v9 = vld [vmem:[%s4972_s24 + $0x8] sm:$0xff]   ;;  %v4568_v10 = vld [vmem:[%s4972_s24 + $0x10] sm:$0xff]   ;;  %v2075_v56 = vsub.s32 4, %v5015_v28  ;;  %v2631_v62 = vsub.s32 7, %v5015_v28  ;;  %vm9081_vm11 = vcmp.lt.s32.totalorder %v5015_v28, 1 }
  0x13   : > { %4454 = vmatpush3.bf16.msra.mxu0 %v4559_v1  ;;  %4467 = vmatprep.mubr.bf16.mxu0 %v4566_v4  ;;  %v4569_v11 = vld [vmem:[%s4972_s24 + $0x18] sm:$0xff]   ;;  %v4570_v12 = vld [vmem:[%s4972_s24 + $0x20] sm:$0xff]   ;;  %v4571_v13 = vld [vmem:[%s4972_s24 + $0x28] sm:$0xff]   ;;  %v1195_v41 = vand.u32 15, %v5024_v36  ;;  %v1163_v45 = vshra.s32 %v5024_v36, 4  ;;  %9210 = vst [vmem:[#allocation4_spill] sm:$0xff] %v5043_v48 }
  0x14   : > { %4455 = vmatprep.subr.bf16.mxu0 %v4560_v2  ;;  %v4572_v14 = vld [vmem:[%s4972_s24 + $0x30] sm:$0xff]   ;;  %v4573_v15 = vld [vmem:[%s4972_s24 + $0x38] sm:$0xff]   ;;  %v4574_v16 = vld [vmem:[%s4972_s24 + $0x40] sm:$0xff]   ;;  %v9022_v0 = vshra.s32 %v5043_v48, 4  ;;  %v5086_v4 = vadd.s32 240, %v5015_v28  ;;  %vm9080_vm12 = vcmp.lt.s32.totalorder %v5015_v28, 7 }
  0x15   : > { %v4575_v17 = vld [vmem:[%s4972_s24 + $0x48] sm:$0xff]   ;;  %v4576_v18 = vld [vmem:[%s4972_s24 + $0x50] sm:$0xff]   ;;  %v4577_v19 = vld [vmem:[%s4972_s24 + $0x58] sm:$0xff]   ;;  %vm5046_vm0 = vcmp.ge.s32.totalorder %v1195_v41, 1  ;;  %vm5067_vm1 = vcmp.ge.s32.totalorder %v1163_v45, 1  ;;  %v5140_v41 = vadd.s32 248, %v5015_v28 }
  0x16   : > { %v4578_v20 = vld [vmem:[%s4972_s24 + $0x60] sm:$0xff]   ;;  %v4579_v21 = vld [vmem:[%s4972_s24 + $0x68] sm:$0xff]   ;;  %v4580_v22 = vld [vmem:[%s4972_s24 + $0x70] sm:$0xff]   ;;  %9215 = vst [vmem:[#allocation5_spill] sm:$0xff] %v5086_v4  ;;  %vm5116_vm3 = vcmp.ge.s32.totalorder %v9022_v0, 1  ;;  %vm5267_vm15 = vcmp.le.s32.totalorder %v1163_v45, 14 }
  0x17   : > { %4456 = vmatpush3.bf16.msra.mxu0 %v4560_v2  ;;  %v4581_v23 = vld [vmem:[%s4972_s24 + $0x78] sm:$0xff]   ;;  %v5063_v60 = vld [vmem:[%s9005_s4] sm:$0xff]  ;;  %vm1356_vm2 = vmand %vm5067_vm1, %vm5046_vm0  ;;  %9223 = vst [vmem:[#allocation9_spill] sm:$0xff] %v5140_v41  ;;  %v9017_v61 = vshra.s32 %v5140_v41, 4  ;;  %v5285_v36 = vadd.s32 72, %v5015_v28 }
  0x18   : > { %4457 = vmatprep.subr.bf16.mxu0 %v4561_v3 }
  0x19   : > { %vm5244_vm13 = vcmp.le.s32.totalorder %v9017_v61, 14 }
  0x1b   : > { %4458 = vmatpush3.bf16.msra.mxu0 %v4561_v3 }
  0x1c   : > { %4459 = vmatprep.subr.bf16.mxu0 %v4562_v5 }
  0x1f   : > { %4460 = vmatpush3.bf16.msra.mxu0 %v4562_v5  ;;  %v9019_v5 = vshra.s32 %v5051_v52, 4 }
  0x20   : > { %4461 = vmatprep.subr.bf16.mxu0 %v4563_v6 }
  0x21   : > { %vm5128_vm4 = vcmp.ge.s32.totalorder %v9019_v5, 1 }
  0x23   : > { %4462 = vmatpush3.bf16.msra.mxu0 %v4563_v6 }
  0x24   : > { %4463 = vmatprep.subr.bf16.mxu0 %v4564_v7 }
  0x27   : > { %4464 = vmatpush3.bf16.msra.mxu0 %v4564_v7  ;;  %v9020_v7 = vmov 0.0  }
  0x28   : > { %4465 = vmatprep.subr.bf16.mxu0 %v4565_v8 }
  0x2b   : > { %4466 = vmatpush3.bf16.msra.mxu0 %v4565_v8  ;;  %v5093_v8 = vsel %vm5067_vm1, 1.0, %v9020_v7 }
  0x2e   : > { %4468 = vmatmul.mubr.bf16.vlgmr.msra.gmra.mrb[0].mxu0 %v4567_v9  ;;  %v5096_v9 = vrot.slane %v5063_v60, %v1614_v55  ;;  %v2239_v55 = vsub.s32 5, %v5015_v28 }
  0x2f   : > { %4471 = vmatprep.mubr.bf16.mxu0 %v4568_v10  ;;  %v5099_v10 = vrot.slane %v5063_v60, %v2075_v56 }
  0x30   : > { %9216 = vst [vmem:[#allocation6_spill] sm:$0xff] %v5096_v9 }
  0x31   : > { %9217 = vst [vmem:[#allocation7_spill] sm:$0xff] %v5099_v10 }
  0x36   : > { %4472 = vmatmul.mubr.bf16.gmra.mrb[4].mxu0 %v4569_v11 }
  0x37   : > { %4475 = vmatprep.mubr.bf16.mxu0 %v4570_v12  ;;  %v5103_v12 = vsel %vm1356_vm2, 1.0, %v9020_v7 }
  0x3e   : > { %4476 = vmatmul.mubr.bf16.gmra.mrb[8].mxu0 %v4571_v13  ;;  %v5108_v13 = vsel %vm5046_vm0, 1.0, %v9020_v7 }
  0x3f   : > { %4479 = vmatprep.mubr.bf16.mxu0 %v4572_v14  ;;  %v5111_v14 = vrot.slane %v5063_v60, %v2631_v62 }
  0x46   : > { %4480 = vmatmul.mubr.bf16.gmra.mrb[12].mxu0 %v4573_v15 }
  0x47   : > { %4483 = vmatprep.mubr.bf16.mxu0 %v4574_v16 }
  0x4e   : > { %4484 = vmatmul.mubr.bf16.gmra.mrb[16].mxu0 %v4575_v17 }
  0x4f   : > { %4487 = vmatprep.mubr.bf16.mxu0 %v4576_v18  ;;  %v9218_v18 = vmov 0 }
  0x50   : > { %v9219_v18 = vsel %vm5116_vm3, 4294967295, %v9218_v18 }
  0x51   : > { %9220 = vst [vmem:[#allocation8_spill] sm:$0xff] %v9219_v18  ;;  %v9253_v18 = vmov 0 }
  0x56   : > { %4488 = vmatmul.mubr.bf16.gmra.mrb[20].mxu0 %v4577_v19  ;;  %v1196_v19 = vand.u32 15, %v5051_v52 }
  0x57   : > { %4491 = vmatprep.mubr.bf16.mxu0 %v4578_v20  ;;  %v5122_v20 = vadd.s32 24, %v5015_v28 }
  0x58   : > { %vm5145_vm5 = vcmp.le.s32.totalorder %v1196_v19, 14 }
  0x59   : > { %vm1750_vm7 = vmand %vm5128_vm4, %vm5145_vm5 }
  0x5e   : > { %4492 = vmatmul.mubr.bf16.gmra.mrb[24].mxu0 %v4579_v21 }
  0x5f   : > { %4495 = vmatprep.mubr.bf16.mxu0 %v4580_v22 }
  0x66   : > { %4496 = vmatmul.mubr.bf16.gmra.mrb[28].mxu0 %v4581_v23 }
 0x101   : > { %v4469_v26 = vpop.f32.mrb[0].mxu0 }
 0x102   : > { %v831_v29 = vmul.f32 %v4469_v26, %v5008_v25  ;;  %v695_v30 = vpop.f32.mrb[1].mxu0  ;;  %v9016_v26 = vsub.s32 0, %v5015_v28 }
 0x103   : > { %v829_v31 = vmul.f32 %v5008_v25, %v695_v30  ;;  %v4470_v32 = vpop.f32.mrb[2].mxu0 }
 0x104   : > { %v5020_v33 = vadd.f32 %v5013_v27, %v831_v29  ;;  %v832_v34 = vmul.f32 %v4470_v32, %v5008_v25  ;;  %v698_v35 = vpop.f32.mrb[3].mxu0  ;;  %v1875_v32 = vsub.s32 2, %v5015_v28 }
 0x105   : > { %v5027_v37 = vadd.f32 %v5013_v27, %v829_v31  ;;  %v830_v38 = vmul.f32 %v5008_v25, %v698_v35 }
 0x106   : > { %v3939_v39 = vmul.f32 -1.442695, %v5020_v33  ;;  %v5032_v40 = vadd.f32 %v5013_v27, %v832_v34  ;;  %v1194_v34 = vand.u32 15, %v5122_v20 }
 0x107   : > { %v3937_v42 = vmul.f32 -1.442695, %v5027_v37  ;;  %v5037_v43 = vadd.f32 %v5013_v27, %v830_v38 }
 0x108   : > { %4590 = vpow2.f32 %v3939_v39  ;;  %v3940_v44 = vmul.f32 -1.442695, %v5032_v40  ;;  %vm5159_vm6 = vcmp.le.s32.totalorder %v1194_v34, 14 }
 0x109   : > { %4592 = vpow2.f32 %v3937_v42  ;;  %v3938_v46 = vmul.f32 -1.442695, %v5037_v43  ;;  %v4473_v47 = vpop.f32.mrb[4].mxu0 }
 0x10a   : > { %4594 = vpow2.f32 %v3940_v44  ;;  %v835_v49 = vmul.f32 %v4473_v47, %v5008_v25  ;;  %v711_v50 = vpop.f32.mrb[5].mxu0  ;;  %v9224_v44 = vmov 0  ;;  %v9018_v47 = vshra.s32 %v5122_v20, 4 }
 0x10b   : > { %4596 = vpow2.f32 %v3938_v46  ;;  %v833_v53 = vmul.f32 %v5008_v25, %v711_v50  ;;  %v4474_v54 = vpop.f32.mrb[6].mxu0  ;;  %v9225_v44 = vsel %vm5145_vm5, 4294967295, %v9224_v44  ;;  %v5152_v50 = vadd.s32 64, %v5015_v28 }
 0x10c   : > { %v5057_v57 = vadd.f32 %v5013_v27, %v835_v49  ;;  %v836_v58 = vmul.f32 %v4474_v54, %v5008_v25  ;;  %v714_v59 = vpop.f32.mrb[7].mxu0  ;;  %9226 = vst [vmem:[#allocation10_spill] sm:$0xff] %v9225_v44  ;;  %v1222_v49 = vand.u32 15, %v5140_v41  ;;  %v2007_v54 = vsub.s32 3, %v5015_v28 }
 0x10d   : > { %v5073_v63 = vadd.f32 %v5013_v27, %v833_v53  ;;  %v834_v15 = vmul.f32 %v5008_v25, %v714_v59  ;;  %v5155_v53 = vadd.s32 48, %v5015_v28  ;;  %v2467_v59 = vsub.s32 6, %v5015_v28 }
 0x10e   : > { %v3943_v1 = vmul.f32 -1.442695, %v5057_v57  ;;  %v5082_v2 = vadd.f32 %v5013_v27, %v836_v58  ;;  %v5166_v58 = vsel %vm5116_vm3, 1.0, %v9020_v7  ;;  %vm5192_vm8 = vcmp.ge.s32.totalorder %v9018_v47, 1 }
 0x10f   : > { %v3941_v6 = vmul.f32 -1.442695, %v5073_v63  ;;  %v5143_v42 = vadd.f32 %v5013_v27, %v834_v15  ;;  %9227 = vst [vmem:[#allocation11_spill] sm:$0xff] %v5155_v53  ;;  %v5188_v15 = vrot.slane %v5063_v60, %v1875_v32  ;;  %vm5198_vm9 = vcmp.le.s32.totalorder %v1222_v49, 14  ;;  %vm1748_vm10 = vmand %vm5192_vm8, %vm5159_vm6 }
 0x110   : > { %v3944_v11 = vmul.f32 -1.442695, %v5082_v2  ;;  %4598 = vpow2.f32 %v3943_v1  ;;  %v5235_v24 = vrot.slane %v5063_v60, %v2467_v59  ;;  %v5259_v59 = vsel %vm5159_vm6, 1.0, %v9020_v7  ;;  %vm2728_vm14 = vmand %vm5244_vm13, %vm5198_vm9 }
 0x111   : > { %v4477_v16 = vpop.f32.mrb[8].mxu0  ;;  %4600 = vpow2.f32 %v3941_v6  ;;  %v3942_v62 = vmul.f32 -1.442695, %v5143_v42  ;;  %v5180_v6 = vsel %vm5128_vm4, 1.0, %v9020_v7  ;;  %9231 = vst [vmem:[#allocation13_spill] sm:$0xff] %v5188_v15  ;;  %v9246_v47 = vmov 0 }
 0x112   : > { %v4591_v17 = vpop.eup %4590  ;;  %v5124_v21 = vpop.f32.mrb[9].mxu0  ;;  %4602 = vpow2.f32 %v3944_v11  ;;  %v5185_v11 = vrot.slane %v5063_v60, %v9016_v26 }
 0x113   : > { %v4593_v22 = vpop.eup %4592  ;;  %v998_v23 = vadd.f32 1.0, %v4591_v17  ;;  %v5133_v29 = vpop.f32.mrb[10].mxu0  ;;  %v1197_v17 = vand.u32 15, %v5155_v53 }
 0x114   : > { %v4595_v30 = vpop.eup %4594  ;;  %v996_v31 = vadd.f32 1.0, %v4593_v22  ;;  %v5137_v35 = vpop.f32.mrb[11].mxu0  ;;  %9230 = vst [vmem:[#allocation12_spill] sm:$0xff] %v5185_v11  ;;  %v9235_v22 = vmov 0 }
 0x115   : > { %v4597_v38 = vpop.eup %4596  ;;  %4604 = vrcp.f32 %v998_v23  ;;  %v999_v39 = vadd.f32 1.0, %v4595_v30  ;;  %v9236_v22 = vsel %vm5198_vm9, 4294967295, %v9235_v22  ;;  %v9024_v23 = vshra.s32 %v5152_v50, 4 }
 0x116   : > { %4606 = vrcp.f32 %v996_v31  ;;  %v997_v46 = vadd.f32 1.0, %v4597_v38  ;;  %9237 = vst [vmem:[#allocation15_spill] sm:$0xff] %v9236_v22  ;;  %v9027_v30 = vshra.s32 %v5155_v53, 4  ;;  %v839_v31 = vmul.f32 %v4477_v16, %v5008_v25 }
 0x117   : > { %4608 = vrcp.f32 %v999_v39  ;;  %v5217_v38 = vsel %vm1750_vm7, 1.0, %v9020_v7  ;;  %v5220_v39 = vrot.slane %v5063_v60, %v2007_v54  ;;  %v5228_v16 = vrot.slane %v5063_v60, %v2239_v55 }
 0x118   : > { %4610 = vrcp.f32 %v997_v46  ;;  %v5225_v46 = vsel %vm5145_vm5, 1.0, %v9020_v7  ;;  %v5240_v54 = vsel %vm5192_vm8, 1.0, %v9020_v7  ;;  %v9241_v55 = vmov 0  ;;  %vm2341_vm8 = vmand %vm5267_vm15, %vm5046_vm0 }
 0x119   : > { %v5175_v1 = vpop.f32.mrb[12].mxu0  ;;  %9239 = vst [vmem:[#allocation17_spill] sm:$0xff] %v5225_v46  ;;  %v9242_v55 = vsel %vm5244_vm13, 4294967295, %v9241_v55  ;;  %4612 = vpow2.f32 %v3942_v62  ;;  %v5254_v60 = vsel %vm1748_vm10, 1.0, %v9020_v7  ;;  %vm5274_vm1 = vcmp.ge.s32.totalorder %v9024_v23, 1 }
 0x11a   : > { %v5196_v19 = vpop.f32.mrb[13].mxu0  ;;  %v4599_v34 = vpop.eup %4598  ;;  %9243 = vst [vmem:[#allocation19_spill] sm:$0xff] %v9242_v55  ;;  %v9247_v47 = vsel %vm5274_vm1, 4294967295, %v9246_v47  ;;  %vm5280_vm2 = vcmp.ge.s32.totalorder %v9027_v30, 1  ;;  %v5288_v45 = vadd.f32 %v5013_v27, %v839_v31  ;;  %v9252_v23 = vshra.s32 %v5043_v48, 4 }
 0x11b   : > { %9234 = vst [vmem:[#allocation14_spill] sm:$0xff] %v5196_v19  ;;  %v5209_v32 = vpop.f32.mrb[14].mxu0  ;;  %v4601_v26 = vpop.eup %4600  ;;  %9248 = vst [vmem:[#allocation20_spill] sm:$0xff] %v9247_v47  ;;  %v1002_v0 = vadd.f32 1.0, %v4599_v34  ;;  %v5298_v30 = vadd.s32 56, %v5015_v28  ;;  %vm5326_vm7 = vcmp.ge.s32.totalorder %v1197_v17, 1 }
 0x11c   : > { %9238 = vst [vmem:[#allocation16_spill] sm:$0xff] %v5209_v32  ;;  %v5230_v49 = vpop.f32.mrb[15].mxu0  ;;  %v4603_v3 = vpop.eup %4602  ;;  %9251 = vst [vmem:[#allocation21_spill] sm:$0xff] %v5288_v45  ;;  %vm5293_vm4 = vcmp.le.s32.totalorder %v9252_v23, 14  ;;  %v9259_v32 = vmov 0.0   ;;  %v1000_v34 = vadd.f32 1.0, %v4601_v26 }
 0x11d   : > { %9240 = vst [vmem:[#allocation18_spill] sm:$0xff] %v5230_v49  ;;  %v9254_v18 = vsel %vm5293_vm4, 4294967295, %v9253_v18  ;;  %9256 = vst [vmem:[#allocation23_spill] sm:$0xff] %v5298_v30  ;;  %v5312_v23 = vsel %vm2728_vm14, 1.0, %v9259_v32  ;;  %v5333_v26 = vsel %vm5280_vm2, 1.0, %v9259_v32  ;;  %v5342_v22 = vsel %vm5293_vm4, 1.0, %v9259_v32 }
 0x11e   : > { %9255 = vst [vmem:[#allocation22_spill] sm:$0xff] %v9254_v18  ;;  %4614 = vrcp.f32 %v1002_v0  ;;  %v1003_v53 = vadd.f32 1.0, %v4603_v3  ;;  %vm1358_vm10 = vmand %vm5280_vm2, %vm5326_vm7 }
 0x11f   : > { %v4605_v61 = vpop.eup %4604  ;;  %4616 = vrcp.f32 %v1000_v34  ;;  %v5404_v34 = vsel %vm1358_vm10, 1.0, %v9259_v32 }
 0x120   : > { %v4607_v7 = vpop.eup %4606  ;;  %v5301_v49 = vmul.f32 %v4605_v61, %v5020_v33  ;;  %v5319_v33 = vsel %vm5274_vm1, 1.0, %v9259_v32 }
 0x121   : > { %v4609_v4 = vpop.eup %4608  ;;  %v5304_v31 = vmul.f32 %v4607_v7, %v5027_v37  ;;  %v5314_v41 = vpop.f32.mrb[16].mxu0  ;;  %9261 = vst [vmem:[#allocation27_spill] sm:$0xff] %v5319_v33  ;;  %v5324_v37 = vsel %vm5267_vm15, 1.0, %v9259_v32  ;;  %v9262_v7 = vmov 0 }
 0x122   : > { %9257 = vst [vmem:[#allocation24_spill] sm:$0xff] %v5301_v49  ;;  %9260 = vst [vmem:[#allocation26_spill] sm:$0xff] %v5314_v41  ;;  %v4611_v48 = vpop.eup %4610  ;;  %v9263_v7 = vsel %vm5326_vm7, 4294967295, %v9262_v7  ;;  %v5335_v61 = vpop.f32.mrb[17].mxu0  ;;  %v3947_v41 = vmul.f32 -1.442695, %v5288_v45  ;;  %v5349_v19 = vmul.f32 %v4609_v4, %v5032_v40  ;;  %v2079_v18 = vmul.f32 %v5099_v10, %v5301_v49 }
 0x123   : > { %9258 = vst [vmem:[#allocation25_spill] sm:$0xff] %v5304_v31  ;;  %9264 = vst [vmem:[#allocation28_spill] sm:$0xff] %v9263_v7  ;;  %v1582_v55 = vmul.f32 %v5166_v58, %v5304_v31  ;;  %v5346_v33 = vpop.f32.mrb[18].mxu0  ;;  %v5358_v17 = vmul.f32 %v4611_v48, %v5037_v43  ;;  %v1650_v40 = vrot.slane %v5301_v49, 1  ;;  %v4613_v4 = vpop.eup %4612  ;;  %v837_v48 = vmul.f32 %v5008_v25, %v5124_v21 }
 0x124   : > { %9265 = vst [vmem:[#allocation29_spill] sm:$0xff] %v5335_v61  ;;  %9266 = vst [vmem:[#allocation30_spill] sm:$0xff] %v5346_v33  ;;  %v5352_v44 = vpop.f32.mrb[19].mxu0  ;;  %v1225_v33 = vrot.slane %v5301_v49, 7  ;;  %v9040_v0 = vrot.slane %v5349_v19, 7  ;;  %v9039_v3 = vrot.slane %v5349_v19, 1  ;;  %4618 = vpow2.f32 %v3947_v41 }
 0x125   : > { %9267 = vst [vmem:[#allocation31_spill] sm:$0xff] %v5349_v19  ;;  %9268 = vst [vmem:[#allocation32_spill] sm:$0xff] %v5352_v44  ;;  %v1618_v47 = vmul.f32 %v5096_v9, %v1582_v55  ;;  %v1224_v43 = vrot.slane %v5358_v17, 7  ;;  %v1583_v5 = vmul.f32 %v5240_v54, %v5358_v17  ;;  %4620 = vrcp.f32 %v1003_v53 }
 0x126   : > { %9269 = vst [vmem:[#allocation33_spill] sm:$0xff] %v5358_v17  ;;  %v5381_v51 = vsel %vm9081_vm11, %v1225_v33, %v9040_v0  ;;  %v9042_v41 = vrot.slane %v5304_v31, 7  ;;  %v5393_v21 = vsel %vm2341_vm8, 1.0, %v9259_v32  ;;  %v838_v55 = vmul.f32 %v5008_v25, %v5137_v35 }
 0x127   : > { %v5368_v61 = vadd.f32 %v2079_v18, %v1618_v47  ;;  %9270 = vst [vmem:[#allocation34_spill] sm:$0xff] %v5381_v51  ;;  %v5387_v18 = vsel %vm9080_vm12, %v1650_v40, %v9039_v3  ;;  %9272 = vst [vmem:[#allocation36_spill] sm:$0xff] %v5393_v21  ;;  %v840_v47 = vmul.f32 %v5133_v29, %v5008_v25  ;;  %v5409_v53 = vsel %vm5326_vm7, 1.0, %v9259_v32 }
 0x128   : > { %9271 = vst [vmem:[#allocation35_spill] sm:$0xff] %v5387_v18  ;;  %v5401_v62 = vsel %vm9081_vm11, %v1224_v43, %v1225_v33  ;;  %v1001_v3 = vadd.f32 1.0, %v4613_v4  ;;  %v5415_v29 = vsel %vm9081_vm11, %v9042_v41, %v1224_v43  ;;  %v9275_v35 = vshra.s32 %v5051_v52, 4  ;;  %v4615_v46 = vpop.eup %4614 }
 0x129   : > { %9273 = vst [vmem:[#allocation37_spill] sm:$0xff] %v5401_v62  ;;  %9274 = vst [vmem:[#allocation38_spill] sm:$0xff] %v5415_v29  ;;  %v9278_v0 = vshra.s32 %v5298_v30, 4  ;;  %v9279_v44 = vmov 0  ;;  %v5430_v4 = vadd.f32 %v5013_v27, %v837_v48  ;;  %v2080_v7 = vmul.f32 %v5099_v10, %v5349_v19 }
 0x12a   : > { %vm5419_vm0 = vcmp.le.s32.totalorder %v9275_v35, 14  ;;  %v1451_v43 = vmul.f32 %v5240_v54, %v5415_v29  ;;  %v1619_v52 = vmul.f32 %v5096_v9, %v1583_v5  ;;  %v9283_v35 = vshra.s32 %v5122_v20, 4 }
 0x12b   : > { %vm5425_vm14 = vcmp.ge.s32.totalorder %v9278_v0, 1  ;;  %9282 = vst [vmem:[#allocation40_spill] sm:$0xff] %v5430_v4  ;;  %v9046_v0 = vrot.slane %v5304_v31, 1  ;;  %v1649_v45 = vrot.slane %v5358_v17, 1  ;;  %v5446_v48 = vadd.f32 %v5013_v27, %v840_v47 }
 0x12c   : > { %v9280_v44 = vsel %vm5425_vm14, 4294967295, %v9279_v44  ;;  %vm5439_vm15 = vcmp.le.s32.totalorder %v9283_v35, 14  ;;  %v5449_v21 = vadd.f32 %v5013_v27, %v838_v55  ;;  %v2012_v54 = vmul.f32 %v5220_v39, %v5381_v51  ;;  %v4617_v35 = vpop.eup %4616 }
 0x12d   : > { %9281 = vst [vmem:[#allocation39_spill] sm:$0xff] %v9280_v44  ;;  %9286 = vst [vmem:[#allocation41_spill] sm:$0xff] %v5446_v48  ;;  %v1487_v20 = vmul.f32 %v5185_v11, %v1451_v43  ;;  %v5454_v5 = vadd.f32 %v2080_v7, %v1619_v52  ;;  %4622 = vrcp.f32 %v1001_v3  ;;  %v5462_v47 = vsel %vm9080_vm12, %v1649_v45, %v1650_v40 }
 0x12e   : > { %9287 = vst [vmem:[#allocation42_spill] sm:$0xff] %v5449_v21  ;;  %vm2700_vm2 = vmand %vm5439_vm15, %vm5159_vm6  ;;  %v5468_v55 = vsel %vm9080_vm12, %v9046_v0, %v1649_v45  ;;  %v3945_v3 = vmul.f32 -1.442695, %v5430_v4  ;;  %v1584_v56 = vmul.f32 %v5093_v8, %v5301_v49  ;;  %v5481_v40 = vsel %vm5419_vm0, 1.0, %v9259_v32  ;;  %v4619_v17 = vpop.eup %4618 }
 0x12f   : > { %9288 = vst [vmem:[#allocation43_spill] sm:$0xff] %v5462_v47  ;;  %9289 = vst [vmem:[#allocation44_spill] sm:$0xff] %v5468_v55  ;;  %v1843_v43 = vmul.f32 %v5166_v58, %v5468_v55  ;;  %v5476_v52 = vadd.f32 %v2012_v54, %v1487_v20  ;;  %v5487_v0 = vsel %vm5425_vm14, 1.0, %v9259_v32  ;;  %v5492_v7 = vsel %vm5439_vm15, 1.0, %v9259_v32  ;;  %v4621_v54 = vpop.eup %4620 }
 0x130   : > { %v5495_v58 = vsel %vm2700_vm2, 1.0, %v9259_v32  ;;  %v2243_v20 = vmul.f32 %v5228_v16, %v5387_v18  ;;  %v3948_v45 = vmul.f32 -1.442695, %v5446_v48  ;;  %v3946_v29 = vmul.f32 -1.442695, %v5449_v21 }
 0x131   : > { %v1879_v55 = vmul.f32 %v5188_v15, %v1843_v43  ;;  %v5504_v31 = vmul.f32 %v5312_v23, %v5462_v47  ;;  %v5507_v41 = vmul.f32 %v4615_v46, %v5057_v57  ;;  %v5510_v49 = vmul.f32 %v4617_v35, %v5073_v63 }
 0x132   : > { %4624 = vpow2.f32 %v3945_v3  ;;  %v1620_v4 = vmul.f32 %v5096_v9, %v1584_v56  ;;  %v1585_v43 = vmul.f32 %v5180_v6, %v5349_v19  ;;  %v1006_v48 = vadd.f32 1.0, %v4619_v17 }
 0x133   : > { %9290 = vst [vmem:[#allocation45_spill] sm:$0xff] %v5504_v31  ;;  %v5515_v27 = vadd.f32 %v2243_v20, %v1879_v55  ;;  %v1453_v21 = vmul.f32 %v5180_v6, %v5381_v51  ;;  %v1452_v23 = vmul.f32 %v5103_v12, %v5401_v62  ;;  %v1844_v57 = vmul.f32 %v5254_v60, %v5462_v47 }
 0x134   : > { %v5524_v63 = vmul.f32 %v4621_v54, %v5082_v2  ;;  %v2601_v46 = vmul.f32 %v5324_v37, %v5507_v41  ;;  %v1227_v35 = vrot.slane %v5510_v49, 7  ;;  %v1586_v17 = vmul.f32 %v5333_v26, %v5510_v49 }
 0x135   : > { %v9066_v55 = vrot.slane %v5510_v49, 1  ;;  %v1845_v6 = vmul.f32 %v5093_v8, %v5387_v18  ;;  %v2083_v12 = vmul.f32 %v5099_v10, %v5507_v41  ;;  %v2081_v2 = vmul.f32 %v5099_v10, %v5510_v49 }
 0x136   : > { %9291 = vst [vmem:[#allocation46_spill] sm:$0xff] %v5524_v63  ;;  %v2599_v60 = vmul.f32 %v5342_v22, %v5510_v49  ;;  %v2637_v56 = vmul.f32 %v5111_v14, %v2601_v46  ;;  %v9292_v54 = vrot.slane %v5349_v19, 7  ;;  %v1622_v8 = vmul.f32 %v5096_v9, %v1586_v17 }
 0x137   : > { %v4623_v3 = vpop.eup %4622  ;;  %v9294_v31 = vrot.slane %v5349_v19, 1  ;;  %v1488_v62 = vmul.f32 %v5185_v11, %v1452_v23  ;;  %v2113_v18 = vadd.f32 %v2081_v2, %v1620_v4  ;;  %v9068_v51 = vrot.slane %v5524_v63, 7 }
 0x138   : > { %v5545_v20 = vsel %vm9081_vm11, %v9292_v54, %v1227_v35  ;;  %v1880_v54 = vmul.f32 %v5188_v15, %v1844_v57  ;;  %v5561_v44 = vadd.f32 %v2083_v12, %v1622_v8  ;;  %v2635_v19 = vmul.f32 %v5111_v14, %v2599_v60 }
 0x139   : > { %9293 = vst [vmem:[#allocation47_spill] sm:$0xff] %v5545_v20  ;;  %v5554_v47 = vsel %vm9080_vm12, %v9294_v31, %v9066_v55  ;;  %v1977_v46 = vmul.f32 %v5108_v13, %v5545_v20  ;;  %v1229_v31 = vrot.slane %v5507_v41, 7  ;;  %v5568_v23 = vadd.f32 %v2637_v56, %v2113_v18 }
 0x13a   : > { %9295 = vst [vmem:[#allocation48_spill] sm:$0xff] %v5554_v47  ;;  %9296 = vst [vmem:[#allocation49_spill] sm:$0xff] %v5561_v44  ;;  %v2208_v17 = vmul.f32 %v5259_v59, %v5554_v47  ;;  %v5571_v13 = vmul.f32 %v4623_v3, %v5143_v42  ;;  %v1454_v4 = vmul.f32 %v5404_v34, %v5545_v20  ;;  %v1654_v60 = vrot.slane %v5507_v41, 1 }
 0x13b   : > { %v2013_v55 = vmul.f32 %v5220_v39, %v1977_v46  ;;  %v1846_v57 = vmul.f32 %v5217_v38, %v5554_v47  ;;  %v5579_v59 = vadd.f32 %v2635_v19, %v5368_v61  ;;  %v5590_v42 = vsel %vm9081_vm11, %v1229_v31, %v9068_v51  ;;  %v5602_v61 = vpop.f32.mrb[20].mxu0 }
 0x13c   : > { %v2244_v12 = vmul.f32 %v5228_v16, %v2208_v17  ;;  %v5581_v2 = vpop.eup %4624  ;;  %9298 = vst [vmem:[#allocation51_spill] sm:$0xff] %v5590_v42  ;;  %v9067_v34 = vrot.slane %v5524_v63, 1  ;;  %v5596_v3 = vadd.s32 80, %v5015_v28  ;;  %4626 = vpow2.f32 %v3948_v45  ;;  %9300 = vst [vmem:[#allocation53_spill] sm:$0xff] %v5602_v61 }
 0x13d   : > { %9297 = vst [vmem:[#allocation50_spill] sm:$0xff] %v5579_v59  ;;  %v5584_v18 = vadd.f32 %v2013_v55, %v1488_v62  ;;  %v5600_v19 = vmul.f32 %v5175_v1, %v5008_v25  ;;  %v1489_v62 = vmul.f32 %v5185_v11, %v1453_v21  ;;  %v1621_v55 = vmul.f32 %v5096_v9, %v1585_v43 }
 0x13e   : > { %v5593_v38 = vadd.f32 %v2244_v12, %v1880_v54  ;;  %9299 = vst [vmem:[#allocation52_spill] sm:$0xff] %v5596_v3  ;;  %v5610_v56 = vsel %vm9080_vm12, %v1654_v60, %v9067_v34  ;;  %4628 = vpow2.f32 %v3946_v29  ;;  %v1881_v8 = vmul.f32 %v5188_v15, %v1845_v6  ;;  %v5637_v12 = vpop.f32.mrb[21].mxu0 }
 0x13f   : > { %9301 = vst [vmem:[#allocation54_spill] sm:$0xff] %v5610_v56  ;;  %v5614_v45 = vmul.f32 %v5185_v11, %v1454_v4  ;;  %v1882_v1 = vmul.f32 %v5188_v15, %v1846_v57  ;;  %4630 = vrcp.f32 %v1006_v48  ;;  %v2016_v21 = vmul.f32 %v5220_v39, %v5590_v42  ;;  %9305 = vst [vmem:[#allocation55_spill] sm:$0xff] %v5637_v12 }
 0x140   : > { %v2438_v43 = vmul.f32 %v5481_v40, %v5590_v42  ;;  %v1228_v46 = vrot.slane %v5571_v13, 7  ;;  %v1587_v54 = vmul.f32 %v5487_v0, %v5571_v13  ;;  %v9302_v29 = vand.u32 15, %v5152_v50 }
 0x141   : > { %v2084_v48 = vmul.f32 %v5099_v10, %v5524_v63  ;;  %v2602_v17 = vmul.f32 %v5481_v40, %v5524_v63  ;;  %v1653_v4 = vrot.slane %v5571_v13, 1  ;;  %v2082_v57 = vmul.f32 %v5099_v10, %v5571_v13 }
 0x142   : > { %vm5626_vm6 = vcmp.ge.s32.totalorder %v9302_v29, 1  ;;  %v9306_v34 = vand.u32 15, %v5285_v36  ;;  %v9307_v29 = vmov 0  ;;  %v2797_v51 = vmul.f32 %v5324_v37, %v5610_v56 }
 0x143   : > { %v5649_v59 = vsel %vm9081_vm11, %v1228_v46, %v1229_v31  ;;  %v1282_v40 = vsel %vm9081_vm11, %v1227_v35, %v1228_v46  ;;  %v1623_v47 = vmul.f32 %v5096_v9, %v1587_v54  ;;  %v2247_v20 = vmul.f32 %v5228_v16, %v5610_v56  ;;  %vm1360_vm2 = vmand %vm5274_vm1, %vm5626_vm6 }
 0x144   : > { %vm5641_vm8 = vcmp.le.s32.totalorder %v9306_v34, 14  ;;  %v1455_v34 = vmul.f32 %v5487_v0, %v1282_v40  ;;  %v5659_v12 = vsel %vm9080_vm12, %v1653_v4, %v1654_v60  ;;  %v9310_v37 = vrot.slane %v5510_v49, 1  ;;  %vm2702_vm1 = vmand %vm5419_vm0, %vm5145_vm5 }
 0x145   : > { %v9308_v29 = vsel %vm5641_vm8, 4294967295, %v9307_v29  ;;  %v9311_v61 = vshra.s32 %v5285_v36, 4  ;;  %v2474_v46 = vmul.f32 %v5235_v24, %v2438_v43  ;;  %v9314_v54 = vand.u32 15, %v5298_v30  ;;  %v9319_v30 = vld [vmem:[#allocation17_spill] sm:$0xff] }
 0x146   : > { %9309 = vst [vmem:[#allocation56_spill] sm:$0xff] %v9308_v29  ;;  %v1707_v31 = vsel %vm9080_vm12, %v9310_v37, %v1653_v4  ;;  %v1979_v49 = vmul.f32 %v5409_v53, %v5649_v59  ;;  %v2014_v4 = vmul.f32 %v5220_v39, %v1282_v40  ;;  %v2638_v43 = vmul.f32 %v5111_v14, %v2602_v17  ;;  %v4627_v63 = vpop.eup %4626 }
 0x147   : > { %vm5667_vm10 = vcmp.ge.s32.totalorder %v9311_v61, 1  ;;  %vm5674_vm15 = vcmp.le.s32.totalorder %v9314_v54, 14  ;;  %v1847_v60 = vmul.f32 %v5333_v26, %v1707_v31  ;;  %v5685_v61 = vld [vmem:[%s9005_s4 + $0x8] ss:$0 sm:$0xff]  ;;  %v1491_v37 = vmul.f32 %v5185_v11, %v1455_v34 }
 0x148   : > { %v2114_v54 = vadd.f32 %v2082_v57, %v1621_v55  ;;  %v5689_v56 = vadd.f32 %v2084_v48, %v1623_v47  ;;  %v2833_v42 = vmul.f32 %v5685_v61, %v2797_v51  ;;  %v2015_v53 = vmul.f32 %v5220_v39, %v1979_v49  ;;  %v5700_v55 = vpop.eup %4628  ;;  %v9321_v51 = vld [vmem:[#allocation36_spill] sm:$0xff]  ;;  %vm1754_vm12 = vmand %vm5667_vm10, %vm5641_vm8 }
 0x149   : > { %v1883_v26 = vmul.f32 %v5188_v15, %v1847_v60  ;;  %v2046_v44 = vadd.f32 %v2014_v4, %v1489_v62  ;;  %v5694_v10 = vadd.f32 %v2016_v21, %v1491_v37  ;;  %v2210_v9 = vmul.f32 %v9319_v30, %v5659_v12  ;;  %v4631_v21 = vpop.eup %4630  ;;  %vm1752_vm11 = vmand %vm5425_vm14, %vm5674_vm15 }
 0x14a   : > { %9317 = vst [vmem:[#allocation57_spill] sm:$0xff] %v5689_v56  ;;  %v2245_v17 = vmul.f32 %v5228_v16, %v1707_v31  ;;  %v2436_v34 = vmul.f32 %v5492_v7, %v1282_v40  ;;  %v2437_v48 = vmul.f32 %v9321_v51, %v5649_v59  ;;  %v2600_v62 = vmul.f32 %v5492_v7, %v5571_v13 }
 0x14b   : > { %9318 = vst [vmem:[#allocation58_spill] sm:$0xff] %v5694_v10  ;;  %v5702_v47 = vadd.f32 %v2247_v20, %v1883_v26  ;;  %v2506_v57 = vadd.f32 %v2474_v46, %v2046_v44  ;;  %v2246_v60 = vmul.f32 %v5228_v16, %v2210_v9  ;;  %v2670_v4 = vadd.f32 %v2638_v43, %v2114_v54  ;;  %v5715_v44 = vpop.f32.mrb[22].mxu0 }
 0x14c   : > { %v2277_v49 = vadd.f32 %v2245_v17, %v1881_v8  ;;  %v2472_v30 = vmul.f32 %v5235_v24, %v2436_v34  ;;  %v2473_v40 = vmul.f32 %v5235_v24, %v2437_v48  ;;  %v2636_v37 = vmul.f32 %v5111_v14, %v2600_v62  ;;  %9322 = vst [vmem:[#allocation36_spill] sm:$0xff] %v5715_v44  ;;  %v9329_v48 = vld [vmem:[#allocation2_spill] sm:$0xff]  ;;  %v9345_v8 = vld [vmem:[#allocation21_spill] sm:$0xff] }
 0x14d   : > { %9320 = vst [vmem:[#allocation17_spill] sm:$0xff] %v5702_v47  ;;  %v2795_v20 = vmul.f32 %v5342_v22, %v1707_v31  ;;  %v2796_v26 = vmul.f32 %v5495_v58, %v5659_v12  ;;  %v5717_v46 = vadd.f32 %v2246_v60, %v1882_v1  ;;  %v5720_v13 = vadd.f32 %v2670_v4, %v2506_v57 }
 0x14e   : > { %v2504_v7 = vadd.f32 %v2472_v30, %v5476_v52  ;;  %v2865_v9 = vadd.f32 %v2833_v42, %v2277_v49  ;;  %v2505_v43 = vadd.f32 %v2473_v40, %v5584_v18  ;;  %v2668_v22 = vadd.f32 %v2636_v37, %v5454_v5  ;;  %v9340_v37 = vld [vmem:[#allocation11_spill] sm:$0xff] }
 0x14f   : > { %v2831_v58 = vmul.f32 %v5685_v61, %v2795_v20  ;;  %v2832_v31 = vmul.f32 %v5685_v61, %v2796_v26  ;;  %v1004_v52 = vadd.f32 1.0, %v5581_v2  ;;  %v1201_v42 = vand.u32 15, %v5596_v3  ;;  %v9354_v49 = vld [vmem:[#allocation27_spill] sm:$0xff] }
 0x150   : > { %v5737_v1 = vadd.f32 %v2015_v53, %v5614_v45  ;;  %v1007_v54 = vadd.f32 1.0, %v4627_v63  ;;  %v2896_v34 = vadd.f32 %v2668_v22, %v2504_v7  ;;  %v2897_v51 = vadd.f32 %v5568_v23, %v2505_v43  ;;  %v9344_v7 = vld [vmem:[#allocation14_spill] sm:$0xff] }
 0x151   : > { %v5744_v5 = vadd.f32 %v2831_v58, %v5515_v27  ;;  %v2864_v17 = vadd.f32 %v2832_v31, %v5593_v38  ;;  %v3977_v2 = vsel %vm1360_vm2, 1.0, %v9259_v32  ;;  %v5752_v45 = vsel %vm5626_vm6, 1.0, %v9259_v32  ;;  %v9353_v27 = vld [vmem:[#allocation16_spill] sm:$0xff] }
 0x152   : > { %v5757_v63 = vsel %vm5667_vm10, 1.0, %v9259_v32  ;;  %v9083_v38 = vshra.s32 %v5596_v3, 4  ;;  %v5766_v53 = vadd.f32 %v2897_v51, %v2865_v9  ;;  %4632 = vrcp.f32 %v1004_v52  ;;  %v9357_v52 = vld [vmem:[#allocation6_spill] sm:$0xff] }
 0x153   : > { %9325 = vst [vmem:[#allocation20_spill] sm:$0xff] %v5744_v5  ;;  %v5764_v23 = vadd.f32 %v2896_v34, %v2864_v17  ;;  %v5770_v57 = vadd.f32 %v9329_v48, %v5600_v19  ;;  %v5773_v62 = vadd.s32 96, %v5015_v28  ;;  %v9331_v60 = vshra.s32 %v5152_v50, 4 }
 0x154   : > { %9328 = vst [vmem:[#allocation39_spill] sm:$0xff] %v5766_v53  ;;  %vm5781_vm14 = vcmp.ge.s32.totalorder %v1201_v42, 1  ;;  %v9334_v30 = vmov 0  ;;  %4634 = vrcp.f32 %v1007_v54  ;;  %v5791_v19 = vsel %vm1754_vm12, 1.0, %v9259_v32 }
 0x155   : > { %9327 = vst [vmem:[#allocation10_spill] sm:$0xff] %v5764_v23  ;;  %9330 = vst [vmem:[#allocation2_spill] sm:$0xff] %v5770_v57  ;;  %vm5777_vm2 = vcmp.le.s32.totalorder %v9331_v60, 14  ;;  %v9335_v30 = vsel %vm5781_vm14, 4294967295, %v9334_v30  ;;  %v5796_v50 = vsel %vm5641_vm8, 1.0, %v9259_v32  ;;  %v5804_v4 = vsel %vm2702_vm1, 1.0, %v9259_v32 }
 0x156   : > { %9336 = vst [vmem:[#allocation59_spill] sm:$0xff] %v9335_v30  ;;  %9337 = vst [vmem:[#allocation60_spill] sm:$0xff] %v5796_v50  ;;  %v4040_v35 = vsel %vm1752_vm11, 1.0, %v9259_v32  ;;  %vm5813_vm10 = vcmp.ge.s32.totalorder %v9083_v38, 1  ;;  %v9341_v33 = vshra.s32 %v9340_v37, 4  ;;  %v5824_v26 = vadd.s32 104, %v5015_v28 }
 0x157   : > { %vm2345_vm12 = vmand %vm5777_vm2, %vm5626_vm6  ;;  %v841_v6 = vmul.f32 %v5008_v25, %v9344_v7  ;;  %v4084_v9 = vsel %vm5674_vm15, 1.0, %v9259_v32  ;;  %v5832_v43 = vmul.f32 %v4631_v21, %v9345_v8  ;;  %v5839_v22 = vadd.s32 88, %v5015_v28  ;;  %v9359_v23 = vld [vmem:[#allocation18_spill] sm:$0xff]  ;;  %v9360_v38 = vld [vmem:[#allocation41_spill] sm:$0xff] }
 0x158   : > { %vm5819_vm13 = vcmp.le.s32.totalorder %v9341_v33, 14  ;;  %vm1362_vm5 = vmand %vm5813_vm10, %vm5781_vm14  ;;  %v3951_v58 = vmul.f32 -1.442695, %v5770_v57  ;;  %v5845_v42 = vsel %vm2345_vm12, 1.0, %v9259_v32  ;;  %v5850_v21 = vsel %vm5777_vm2, 1.0, %v9259_v32 }
 0x159   : > { %9346 = vst [vmem:[#allocation11_spill] sm:$0xff] %v5845_v42  ;;  %v5855_v54 = vsel %vm5813_vm10, 1.0, %v9259_v32  ;;  %vm2343_vm11 = vmand %vm5819_vm13, %vm5326_vm7  ;;  %v5864_v17 = vsel %vm5819_vm13, 1.0, %v9259_v32  ;;  %v9349_v34 = vshra.s32 %v5285_v36, 4  ;;  %v9350_v51 = vmov 0 }
 0x15a   : > { %9348 = vst [vmem:[#allocation14_spill] sm:$0xff] %v5864_v17  ;;  %v844_v60 = vmul.f32 %v9353_v27, %v5008_v25  ;;  %v1588_v40 = vmul.f32 %v9354_v49, %v5507_v41  ;;  %v5877_v37 = vsel %vm1362_vm5, 1.0, %v9259_v32  ;;  %v5881_v20 = vadd.f32 %v9329_v48, %v841_v6 }
 0x15b   : > { %vm5868_vm0 = vcmp.le.s32.totalorder %v9349_v34, 14  ;;  %v2605_v36 = vmul.f32 %v5850_v21, %v5832_v43  ;;  %v1005_v7 = vadd.f32 1.0, %v5700_v55  ;;  %4636 = vpow2.f32 %v3951_v58  ;;  %v9358_v34 = vld [vmem:[#allocation40_spill] sm:$0xff] }
 0x15c   : > { %v9351_v51 = vsel %vm5868_vm0, 4294967295, %v9350_v51  ;;  %9355 = vst [vmem:[#allocation28_spill] sm:$0xff] %v5881_v20  ;;  %v5890_v41 = vsel %vm5781_vm14, 1.0, %v9259_v32  ;;  %v4103_v18 = vsel %vm2343_vm11, 1.0, %v9259_v32  ;;  %v5897_v6 = vsel %vm5868_vm0, 1.0, %v9259_v32  ;;  %v4633_v27 = vpop.eup %4632 }
 0x15d   : > { %9352 = vst [vmem:[#allocation21_spill] sm:$0xff] %v9351_v51  ;;  %v1456_v55 = vmul.f32 %v3977_v2, %v5649_v59  ;;  %v5902_v58 = vadd.s32 128, %v5015_v28  ;;  %v5905_v33 = vadd.f32 %v9329_v48, %v844_v60  ;;  %v1624_v8 = vmul.f32 %v9357_v52, %v1588_v40 }
 0x15e   : > { %v4635_v31 = vpop.eup %4634  ;;  %v5909_v5 = vmul.f32 %v4633_v27, %v9358_v34  ;;  %v3949_v53 = vmul.f32 -1.442695, %v5881_v20  ;;  %v842_v44 = vmul.f32 %v5008_v25, %v9359_v23  ;;  %v1848_v59 = vmul.f32 %v4040_v35, %v5659_v12  ;;  %v9364_v34 = vld [vmem:[#allocation23_spill] sm:$0xff]  ;;  %v5931_v25 = vpop.f32.mrb[23].mxu0 }
 0x15f   : > { %9356 = vst [vmem:[#allocation16_spill] sm:$0xff] %v5905_v33  ;;  %v2641_v2 = vmul.f32 %v5111_v14, %v2605_v36  ;;  %v5917_v30 = vmul.f32 %v4635_v31, %v9360_v38  ;;  %4638 = vrcp.f32 %v1005_v7  ;;  %v9361_v60 = vshra.s32 %v5839_v22, 4  ;;  %9368 = vst [vmem:[#allocation27_spill] sm:$0xff] %v5931_v25  ;;  %v9369_v35 = vld [vmem:[#allocation7_spill] sm:$0xff] }
 0x160   : > { %v9365_v27 = vshra.s32 %v9364_v34, 4  ;;  %v9092_v12 = vrot.slane %v5909_v5, 7  ;;  %v1590_v38 = vmul.f32 %v5855_v54, %v5909_v5  ;;  %v2085_v31 = vmul.f32 %v9369_v35, %v5909_v5 }
 0x161   : > { %vm5921_vm13 = vcmp.ge.s32.totalorder %v9361_v60, 1  ;;  %v1492_v36 = vmul.f32 %v5185_v11, %v1456_v55  ;;  %v2087_v7 = vmul.f32 %v9369_v35, %v5832_v43  ;;  %v2603_v60 = vmul.f32 %v5864_v17, %v5909_v5 }
 0x162   : > { %vm5927_vm7 = vcmp.le.s32.totalorder %v9365_v27, 14  ;;  %v3952_v34 = vmul.f32 -1.442695, %v5905_v33  ;;  %v9370_v27 = vld [vmem:[#allocation46_spill] sm:$0xff]  ;;  %vm9372_vm6 = vcmp.lt.s32.totalorder %v5015_v28, 1  ;;  %v1626_v3 = vmul.f32 %v9357_v52, %v1590_v38 }
 0x163   : > { %v9371_v25 = vrot.slane %v9370_v27, 7  ;;  %v9373_v57 = vrot.slane %v5909_v5, 1  ;;  %v9374_v55 = vrot.slane %v9370_v27, 1  ;;  %vm9375_vm1 = vcmp.lt.s32.totalorder %v5015_v28, 7  ;;  %vm9378_vm2 = vmmov %vm9372_vm6 }
 0x164   : > { %v2117_v29 = vadd.f32 %v2085_v31, %v1624_v8  ;;  %v1884_v47 = vmul.f32 %v5188_v15, %v1848_v59  ;;  %v9094_v56 = vrot.slane %v5917_v30, 7  ;;  %v5961_v17 = vadd.f32 %v2087_v7, %v1626_v3  ;;  %v9377_v3 = vld [vmem:[#allocation49_spill] sm:$0xff]  ;;  %vm2704_vm12 = vmand %vm5927_vm7, %vm5674_vm15 }
 0x165   : > { %v1279_v23 = vsel %vm9372_vm6, %v9371_v25, %v9092_v12  ;;  %v1704_v51 = vsel %vm9375_vm1, %v9374_v55, %v9373_v57  ;;  %v2639_v38 = vmul.f32 %v5111_v14, %v2603_v60  ;;  %v4637_v42 = vpop.eup %4636  ;;  %v1233_v50 = vrot.slane %v5832_v43, 7  ;;  %vm9382_vm10 = vmmov %vm9375_vm1 }
 0x166   : > { %v1981_v33 = vmul.f32 %v5752_v45, %v1279_v23  ;;  %v2212_v10 = vmul.f32 %v4084_v9, %v1704_v51  ;;  %9376 = vst [vmem:[#allocation6_spill] sm:$0xff] %v5961_v17  ;;  %v2439_v25 = vmul.f32 %v4103_v18, %v1279_v23  ;;  %v5964_v12 = vadd.f32 %v2641_v2, %v2117_v29  ;;  %vm9388_vm15 = vmmov %vm9378_vm2 }
 0x167   : > { %v9093_v59 = vrot.slane %v5917_v30, 1  ;;  %v1658_v45 = vrot.slane %v5832_v43, 1  ;;  %v2671_v31 = vadd.f32 %v2639_v38, %v9377_v3  ;;  %v2798_v18 = vmul.f32 %v5804_v4, %v1704_v51  ;;  %vm9390_vm5 = vmmov %vm9378_vm2 }
 0x168   : > { %v2017_v57 = vmul.f32 %v5220_v39, %v1981_v33  ;;  %v2248_v8 = vmul.f32 %v5228_v16, %v2212_v10  ;;  %v2475_v9 = vmul.f32 %v5235_v24, %v2439_v25  ;;  %v5982_v33 = vsel %vm9378_vm2, %v1233_v50, %v9094_v56  ;;  %v9381_v25 = vld [vmem:[#allocation54_spill] sm:$0xff]  ;;  %vm9391_vm11 = vmmov %vm9375_vm1 }
 0x169   : > { %9379 = vst [vmem:[#allocation40_spill] sm:$0xff] %v5982_v33  ;;  %4640 = vpow2.f32 %v3949_v53  ;;  %v1589_v10 = vmul.f32 %v5757_v63, %v9370_v27  ;;  %v2834_v60 = vmul.f32 %v5685_v61, %v2798_v18  ;;  %v4639_v4 = vpop.eup %4638  ;;  %v1849_v53 = vmul.f32 %v9354_v49, %v9381_v25 }
 0x16a   : > { %v5974_v7 = vadd.f32 %v2017_v57, %v1492_v36  ;;  %v5976_v29 = vadd.f32 %v2248_v8, %v1884_v47  ;;  %v2507_v2 = vadd.f32 %v2475_v9, %v5737_v1  ;;  %v1010_v47 = vadd.f32 1.0, %v4637_v42  ;;  %v9380_v36 = vld [vmem:[#allocation51_spill] sm:$0xff] }
 0x16b   : > { %v1457_v55 = vmul.f32 %v5757_v63, %v9380_v36  ;;  %v6000_v1 = vsel %vm9382_vm10, %v1658_v45, %v9093_v59  ;;  %v6003_v27 = vadd.f32 %v9329_v48, %v842_v44  ;;  %v1850_v0 = vmul.f32 %v5791_v19, %v1704_v51  ;;  %v9386_v51 = vld [vmem:[#allocation42_spill] sm:$0xff] }
 0x16c   : > { %9383 = vst [vmem:[#allocation18_spill] sm:$0xff] %v6000_v1  ;;  %v2866_v42 = vadd.f32 %v2834_v60, %v5717_v46  ;;  %v6007_v38 = vadd.f32 %v2671_v31, %v2507_v2  ;;  %v3980_v63 = vsel %vm5921_vm13, 1.0, %v9259_v32  ;;  %v4104_v49 = vsel %vm5927_vm7, 1.0, %v9259_v32  ;;  %vm9393_vm7 = vmmov %vm9375_vm1 }
 0x16d   : > { %9384 = vst [vmem:[#allocation41_spill] sm:$0xff] %v6003_v27  ;;  %v6016_v57 = vsel %vm2704_vm12, 1.0, %v9259_v32  ;;  %v6020_v48 = vadd.s32 112, %v5015_v28  ;;  %v1625_v46 = vmul.f32 %v9357_v52, %v1589_v10  ;;  %v1101_v8 = vmul.f32 %v4639_v4, %v9386_v51 }
 0x16e   : > { %v6024_v19 = vadd.f32 %v5720_v13, %v2866_v42  ;;  %4642 = vrcp.f32 %v1010_v47  ;;  %v1493_v9 = vmul.f32 %v5185_v11, %v1457_v55  ;;  %v1885_v20 = vmul.f32 %v5188_v15, %v1849_v53  ;;  %v6036_v13 = vpop.f32.mrb[24].mxu0 }
 0x16f   : > { %4644 = vpow2.f32 %v3952_v34  ;;  %v6030_v3 = vmul.f32 -1.442695, %v6003_v27  ;;  %v6033_v31 = vmul.f32 %v5877_v37, %v1279_v23  ;;  %v1886_v18 = vmul.f32 %v5188_v15, %v1850_v0  ;;  %9387 = vst [vmem:[#allocation46_spill] sm:$0xff] %v6036_v13 }
 0x170   : > { %9385 = vst [vmem:[#allocation23_spill] sm:$0xff] %v6024_v19  ;;  %v1232_v10 = vrot.slane %v1101_v8, 7  ;;  %v1591_v2 = vmul.f32 %v3980_v63, %v1101_v8  ;;  %v2020_v60 = vmul.f32 %v5220_v39, %v5982_v33  ;;  %v2088_v47 = vmul.f32 %v9369_v35, %v5917_v30 }
 0x171   : > { %v2442_v34 = vmul.f32 %v5897_v6, %v5982_v33  ;;  %v1657_v4 = vrot.slane %v1101_v8, 1  ;;  %v2606_v37 = vmul.f32 %v5897_v6, %v5917_v30  ;;  %v2801_v23 = vmul.f32 %v5850_v21, %v6000_v1 }
 0x172   : > { %v6050_v36 = vsel %vm9388_vm15, %v1232_v10, %v1233_v50  ;;  %v9389_v55 = vrot.slane %v5909_v5, 7  ;;  %v9392_v6 = vrot.slane %v5909_v5, 1  ;;  %v2086_v51 = vmul.f32 %v9369_v35, %v1101_v8 }
 0x173   : > { %v4641_v53 = vpop.eup %4640  ;;  %v6058_v42 = vsel %vm9391_vm11, %v1657_v4, %v1658_v45  ;;  %v2251_v50 = vmul.f32 %v5228_v16, %v6000_v1  ;;  %v1627_v59 = vmul.f32 %v9357_v52, %v1591_v2  ;;  %v9394_v45 = vand.u32 15, %v5773_v62 }
 0x174   : > { %v1278_v25 = vsel %vm9390_vm5, %v9389_v55, %v1232_v10  ;;  %v1703_v21 = vsel %vm9393_vm7, %v9392_v6, %v1657_v4  ;;  %v2478_v5 = vmul.f32 %v5235_v24, %v2442_v34  ;;  %v2604_v56 = vmul.f32 %v4104_v49, %v1101_v8  ;;  %vm2706_vm5 = vmand %vm5868_vm0, %vm5641_vm8 }
 0x175   : > { %v1459_v0 = vmul.f32 %v3980_v63, %v1278_v25  ;;  %v1851_v10 = vmul.f32 %v5855_v54, %v1703_v21  ;;  %v1983_v63 = vmul.f32 %v5890_v41, %v6050_v36  ;;  %vm6073_vm6 = vcmp.ge.s32.totalorder %v9394_v45, 1 }
 0x176   : > { %v2018_v6 = vmul.f32 %v5220_v39, %v1278_v25  ;;  %v9397_v2 = vand.u32 15, %v5824_v26  ;;  %v9398_v54 = vmov 0  ;;  %v2642_v41 = vmul.f32 %v5111_v14, %v2606_v37 }
 0x177   : > { %v1495_v4 = vmul.f32 %v5185_v11, %v1459_v0  ;;  %v2837_v45 = vmul.f32 %v5685_v61, %v2801_v23  ;;  %v1887_v44 = vmul.f32 %v5188_v15, %v1851_v10  ;;  %v1008_v19 = vadd.f32 1.0, %v4641_v53 }
 0x178   : > { %vm6082_vm1 = vcmp.le.s32.totalorder %v9397_v2, 14  ;;  %v9401_v34 = vshra.s32 %v5773_v62, 4  ;;  %v9404_v8 = vand.u32 15, %v5839_v22  ;;  %v2019_v13 = vmul.f32 %v5220_v39, %v1983_v63  ;;  %v4643_v10 = vpop.eup %4642 }
 0x179   : > { %v9399_v54 = vsel %vm6082_vm1, 4294967295, %v9398_v54  ;;  %v2050_v37 = vadd.f32 %v2018_v6, %v1493_v9  ;;  %v6102_v27 = vadd.f32 %v2020_v60, %v1495_v4  ;;  %v2118_v23 = vadd.f32 %v2086_v51, %v1625_v46  ;;  %v4645_v9 = vpop.eup %4644  ;;  %v9413_v46 = vld [vmem:[#allocation11_spill] sm:$0xff] }
 0x17a   : > { %9400 = vst [vmem:[#allocation49_spill] sm:$0xff] %v9399_v54  ;;  %vm6091_vm2 = vcmp.ge.s32.totalorder %v9401_v34, 1  ;;  %vm6097_vm12 = vcmp.le.s32.totalorder %v9404_v8, 14  ;;  %v9408_v53 = vshra.s32 %v5824_v26, 4  ;;  %v6110_v1 = vadd.f32 %v2088_v47, %v1627_v59  ;;  %v9412_v8 = vld [vmem:[#allocation60_spill] sm:$0xff]  ;;  %v9414_v47 = vld [vmem:[#allocation14_spill] sm:$0xff] }
 0x17b   : > { %9407 = vst [vmem:[#allocation51_spill] sm:$0xff] %v6102_v27  ;;  %v2214_v33 = vmul.f32 %v9412_v8, %v6058_v42  ;;  %v2249_v17 = vmul.f32 %v5228_v16, %v1703_v21  ;;  %v6115_v15 = vadd.f32 %v2251_v50, %v1887_v44  ;;  %v2440_v60 = vmul.f32 %v4104_v49, %v1278_v25  ;;  %v9415_v44 = vld [vmem:[#allocation57_spill] sm:$0xff]  ;;  %vm9433_vm11 = vmand %vm6091_vm2, %vm6073_vm6 }
 0x17c   : > { %vm6106_vm10 = vcmp.ge.s32.totalorder %v9408_v53, 1  ;;  %9411 = vst [vmem:[#allocation54_spill] sm:$0xff] %v6110_v1  ;;  %v2441_v51 = vmul.f32 %v9413_v46, %v6050_v36  ;;  %v2510_v63 = vadd.f32 %v2478_v5, %v2050_v37  ;;  %v2640_v4 = vmul.f32 %v5111_v14, %v2604_v56  ;;  %vm9445_vm0 = vmand %vm5921_vm13, %vm6097_vm12 }
 0x17d   : > { %v2250_v6 = vmul.f32 %v5228_v16, %v2214_v33  ;;  %v2281_v53 = vadd.f32 %v2249_v17, %v1885_v20  ;;  %v2674_v59 = vadd.f32 %v2642_v41, %v2118_v23  ;;  %v2799_v27 = vmul.f32 %v9414_v47, %v1703_v21  ;;  %v9416_v17 = vld [vmem:[#allocation58_spill] sm:$0xff]  ;;  %v9417_v23 = vld [vmem:[#allocation17_spill] sm:$0xff]  ;;  %vm9444_vm8 = vmand %vm6106_vm10, %vm6082_vm1 }
 0x17e   : > { %v2476_v8 = vmul.f32 %v5235_v24, %v2440_v60  ;;  %v2477_v1 = vmul.f32 %v5235_v24, %v2441_v51  ;;  %v2672_v50 = vadd.f32 %v2640_v4, %v9415_v44  ;;  %v2800_v49 = vmul.f32 %v6016_v57, %v6058_v42 }
 0x17f   : > { %v6127_v25 = vadd.f32 %v2250_v6, %v1886_v18  ;;  %v2835_v5 = vmul.f32 %v5685_v61, %v2799_v27  ;;  %v2869_v56 = vadd.f32 %v2837_v45, %v2281_v53  ;;  %v6130_v37 = vadd.f32 %v2674_v59, %v2510_v63  ;;  %v6143_v27 = vld [vmem:[%s9003_s2] ss:$0 sm:$0xff]  ;;  %v9421_v63 = vld [vmem:[#allocation29_spill] sm:$0xff]  ;;  %v9456_v59 = vld [vmem:[#allocation28_spill] sm:$0xff] }
 0x180   : > { %v2508_v33 = vadd.f32 %v2476_v8, %v9416_v17  ;;  %v2509_v20 = vadd.f32 %v2477_v1, %v5974_v7  ;;  %v2836_v21 = vmul.f32 %v5685_v61, %v2800_v49  ;;  %4646 = vpow2.f32 %v6030_v3  ;;  %9418 = vst [vmem:[#allocation42_spill] sm:$0xff] %v6143_v27  ;;  %v9419_v45 = vld [vmem:[#allocation26_spill] sm:$0xff] }
 0x181   : > { %v1494_v41 = vmul.f32 %v5185_v11, %v6033_v31  ;;  %v2867_v57 = vadd.f32 %v2835_v5, %v9417_v23  ;;  %v1207_v18 = vand.u32 15, %v5902_v58  ;;  %v847_v60 = vmul.f32 %v6143_v27, %v9419_v45  ;;  %v6193_v8 = vld [vmem:[%s9004_s3] ss:$0 sm:$0xff] }
 0x182   : > { %v2868_v7 = vadd.f32 %v2836_v21, %v5976_v29  ;;  %v2900_v1 = vadd.f32 %v2672_v50, %v2508_v33  ;;  %v2901_v3 = vadd.f32 %v5964_v12, %v2509_v20  ;;  %v1205_v46 = vand.u32 15, %v6020_v48  ;;  %9432 = vst [vmem:[#allocation26_spill] sm:$0xff] %v6193_v8  ;;  %v9436_v33 = vld [vmem:[#allocation2_spill] sm:$0xff] }
 0x183   : > { %v6155_v31 = vadd.f32 %v6007_v38, %v2867_v57  ;;  %4648 = vrcp.f32 %v1008_v19  ;;  %v6157_v51 = vadd.f32 %v2019_v13, %v1494_v41  ;;  %v845_v4 = vmul.f32 %v6143_v27, %v9421_v63  ;;  %v6173_v19 = vpop.f32.mrb[25].mxu0 }
 0x184   : > { %v6163_v12 = vadd.s32 8, %v5015_v28  ;;  %v6169_v6 = vadd.f32 %v2900_v1, %v2868_v7  ;;  %v6171_v38 = vadd.f32 %v2901_v3, %v2869_v56  ;;  %9425 = vst [vmem:[#allocation58_spill] sm:$0xff] %v6173_v19  ;;  %vm6179_vm7 = vcmp.ge.s32.totalorder %v1207_v18, 1 }
 0x185   : > { %9420 = vst [vmem:[#allocation60_spill] sm:$0xff] %v6155_v31  ;;  %v9426_v13 = vmov 0  ;;  %v9429_v53 = vshra.s32 %v5773_v62, 4  ;;  %v9102_v47 = vshra.s32 %v6020_v48, 4  ;;  %v6196_v44 = vadd.f32 %v6193_v8, %v847_v60 }
 0x186   : > { %9422 = vst [vmem:[#allocation11_spill] sm:$0xff] %v6163_v12  ;;  %9423 = vst [vmem:[#allocation14_spill] sm:$0xff] %v6169_v6  ;;  %v9427_v13 = vsel %vm6179_vm7, 4294967295, %v9426_v13  ;;  %v3981_v62 = vsel %vm9433_vm11, 1.0, %v9259_v32  ;;  %v6207_v50 = vsel %vm6091_vm2, 1.0, %v9259_v32  ;;  %v4071_v49 = vsel %vm6073_vm6, 1.0, %v9259_v32 }
 0x187   : > { %9424 = vst [vmem:[#allocation57_spill] sm:$0xff] %v6171_v38  ;;  %9428 = vst [vmem:[#allocation17_spill] sm:$0xff] %v9427_v13  ;;  %vm6185_vm15 = vcmp.le.s32.totalorder %v9429_v53, 14  ;;  %v1011_v17 = vadd.f32 1.0, %v4645_v9  ;;  %v6217_v20 = vmul.f32 %v4643_v10, %v9436_v33  ;;  %v9437_v21 = vshra.s32 %v5902_v58, 4  ;;  %v6399_v12 = vpop.f32.mrb[26].mxu0 }
 0x188   : > { %vm6225_vm2 = vcmp.ge.s32.totalorder %v1205_v46, 1  ;;  %v9440_v0 = vmov 0  ;;  %v6230_v23 = vadd.f32 %v6193_v8, %v845_v4  ;;  %v6235_v9 = vsel %vm6106_vm10, 1.0, %v9259_v32  ;;  %vm2349_vm10 = vmand %vm6185_vm15, %vm6073_vm6  ;;  %v9449_v46 = vld [vmem:[#allocation52_spill] sm:$0xff]  ;;  %9468 = vst [vmem:[#allocation59_spill] sm:$0xff] %v6399_v12 }
 0x189   : > { %vm6221_vm11 = vcmp.ge.s32.totalorder %v9437_v21, 1  ;;  %v9441_v0 = vsel %vm6225_vm2, 4294967295, %v9440_v0  ;;  %v6243_v10 = vsel %vm9444_vm8, 1.0, %v9259_v32  ;;  %v4044_v57 = vsel %vm9445_vm0, 1.0, %v9259_v32 }
 0x18a   : > { %9442 = vst [vmem:[#allocation29_spill] sm:$0xff] %v9441_v0  ;;  %9443 = vst [vmem:[#allocation56_spill] sm:$0xff] %v6230_v23  ;;  %v6258_v34 = vsel %vm6185_vm15, 1.0, %v9259_v32  ;;  %v6261_v18 = vsel %vm2706_vm5, 1.0, %v9259_v32  ;;  %vm6269_vm13 = vcmp.ge.s32.totalorder %v9102_v47, 1  ;;  %v6274_v45 = vadd.s32 120, %v5015_v28  ;;  %v4647_v7 = vpop.eup %4646 }
 0x18b   : > { %vm1368_vm9 = vmand %vm6221_vm11, %vm6179_vm7  ;;  %v3955_v60 = vmul.f32 -1.442695, %v6196_v44  ;;  %v6280_v1 = vsel %vm6082_vm1, 1.0, %v9259_v32  ;;  %v6285_v3 = vsel %vm6221_vm11, 1.0, %v9259_v32  ;;  %v9450_v63 = vshra.s32 %v9449_v46, 4 }
 0x18c   : > { %9448 = vst [vmem:[#allocation21_spill] sm:$0xff] %v6274_v45  ;;  %vm1366_vm5 = vmand %vm6269_vm13, %vm6225_vm2  ;;  %4650 = vrcp.f32 %v1011_v17  ;;  %v1592_v53 = vmul.f32 %v6207_v50, %v5832_v43  ;;  %v4086_v5 = vsel %vm6097_vm12, 1.0, %v9259_v32  ;;  %v2609_v56 = vmul.f32 %v6258_v34, %v6217_v20 }
 0x18d   : > { %vm6293_vm8 = vcmp.le.s32.totalorder %v9450_v63, 14  ;;  %v3953_v21 = vmul.f32 -1.442695, %v6230_v23  ;;  %v6315_v43 = vsel %vm1368_vm9, 1.0, %v9259_v32  ;;  %v6320_v17 = vsel %vm6179_vm7, 1.0, %v9259_v32  ;;  %v4649_v63 = vpop.eup %4648 }
 0x18e   : > { %vm2347_vm0 = vmand %vm6293_vm8, %vm5781_vm14  ;;  %9454 = vst [vmem:[#allocation2_spill] sm:$0xff] %v6315_v43  ;;  %v6328_v46 = vsel %vm2349_vm10, 1.0, %v9259_v32  ;;  %v6333_v41 = vsel %vm6269_vm13, 1.0, %v9259_v32  ;;  %v6338_v33 = vsel %vm6293_vm8, 1.0, %v9259_v32  ;;  %v1009_v29 = vadd.f32 1.0, %v4647_v7 }
 0x18f   : > { %9455 = vst [vmem:[#allocation52_spill] sm:$0xff] %v6320_v17  ;;  %4652 = vpow2.f32 %v3955_v60  ;;  %v6342_v55 = vmul.f32 %v4649_v63, %v9456_v59  ;;  %v6350_v38 = vsel %vm1366_vm5, 1.0, %v9259_v32  ;;  %v6355_v4 = vsel %vm6225_vm2, 1.0, %v9259_v32 }
 0x190   : > { %v4107_v7 = vsel %vm2347_vm0, 1.0, %v9259_v32  ;;  %v1628_v60 = vmul.f32 %v9357_v52, %v1592_v53  ;;  %v1460_v63 = vmul.f32 %v3981_v62, %v6050_v36  ;;  %v2645_v59 = vmul.f32 %v5111_v14, %v2609_v56 }
 0x191   : > { %4654 = vpow2.f32 %v3953_v21  ;;  %v9106_v40 = vrot.slane %v6342_v55, 7  ;;  %v1594_v47 = vmul.f32 %v6333_v41, %v6342_v55  ;;  %v2089_v31 = vmul.f32 %v9369_v35, %v6342_v55 }
 0x192   : > { %v1852_v19 = vmul.f32 %v4044_v57, %v6058_v42  ;;  %v2091_v53 = vmul.f32 %v9369_v35, %v6217_v20  ;;  %v2607_v36 = vmul.f32 %v6338_v33, %v6342_v55  ;;  %v9457_v62 = vshra.s32 %v5824_v26, 4 }
 0x193   : > { %4656 = vrcp.f32 %v1009_v29  ;;  %v9460_v21 = vshra.s32 %v6274_v45, 4  ;;  %v9463_v42 = vrot.slane %v5917_v30, 7  ;;  %vm9464_vm6 = vcmp.lt.s32.totalorder %v5015_v28, 1 }
 0x194   : > { %vm6374_vm9 = vcmp.le.s32.totalorder %v9457_v62, 14  ;;  %v1630_v26 = vmul.f32 %v9357_v52, %v1594_v47  ;;  %v9465_v62 = vrot.slane %v6342_v55, 1  ;;  %v9466_v29 = vrot.slane %v5917_v30, 1  ;;  %v9472_v47 = vld [vmem:[#allocation30_spill] sm:$0xff]  ;;  %vm9485_vm5 = vmmov %vm9464_vm6 }
 0x195   : > { %vm6380_vm14 = vcmp.ge.s32.totalorder %v9460_v21, 1  ;;  %v6390_v57 = vsel %vm9464_vm6, %v9463_v42, %v9106_v40  ;;  %vm9467_vm15 = vcmp.lt.s32.totalorder %v5015_v28, 7  ;;  %v2121_v13 = vadd.f32 %v2089_v31, %v1628_v60  ;;  %vm9494_vm0 = vmmov %vm9485_vm5 }
 0x196   : > { %v1700_v21 = vsel %vm9467_vm15, %v9466_v29, %v9465_v62  ;;  %v1985_v17 = vmul.f32 %v4071_v49, %v6390_v57  ;;  %v9469_v54 = vshra.s32 %v5839_v22, 4  ;;  %v848_v40 = vmul.f32 %v6143_v27, %v9472_v47  ;;  %v4651_v0 = vpop.eup %4650  ;;  %v9475_v47 = vld [vmem:[#allocation6_spill] sm:$0xff]  ;;  %vm9487_vm8 = vmmov %vm9467_vm15 }
 0x197   : > { %v2216_v43 = vmul.f32 %v4086_v5, %v1700_v21  ;;  %v6410_v23 = vadd.f32 %v2091_v53, %v1630_v26  ;;  %v2443_v62 = vmul.f32 %v4107_v7, %v6390_v57  ;;  %v2643_v31 = vmul.f32 %v5111_v14, %v2607_v36  ;;  %v9474_v5 = vld [vmem:[#allocation13_spill] sm:$0xff]  ;;  %vm9497_vm15 = vmmov %vm9487_vm8 }
 0x198   : > { %vm6404_vm11 = vcmp.le.s32.totalorder %v9469_v54, 14  ;;  %v6414_v60 = vadd.f32 %v2645_v59, %v2121_v13  ;;  %v1496_v49 = vmul.f32 %v5185_v11, %v1460_v63  ;;  %v1888_v22 = vmul.f32 %v9474_v5, %v1852_v19 }
 0x199   : > { %9473 = vst [vmem:[#allocation28_spill] sm:$0xff] %v6410_v23  ;;  %v2021_v54 = vmul.f32 %v5220_v39, %v1985_v17  ;;  %v2252_v29 = vmul.f32 %v5228_v16, %v2216_v43  ;;  %v2479_v12 = vmul.f32 %v5235_v24, %v2443_v62  ;;  %v2675_v27 = vadd.f32 %v2643_v31, %v9475_v47  ;;  %v4653_v13 = vpop.eup %4652  ;;  %v9480_v17 = vld [vmem:[#allocation16_spill] sm:$0xff]  ;;  %vm2708_vm13 = vmand %vm6404_vm11, %vm6097_vm12 }
 0x19a   : > { %v2802_v53 = vmul.f32 %v6261_v18, %v1700_v21  ;;  %v9476_v7 = vshra.s32 %v5902_v58, 4  ;;  %v9477_v36 = vmov 0  ;;  %v6434_v59 = vmul.f32 %v4651_v0, %v9480_v17  ;;  %vm9492_vm12 = vmmov %vm9485_vm5 }
 0x19b   : > { %v6429_v63 = vadd.f32 %v2021_v54, %v1496_v49  ;;  %v6431_v19 = vadd.f32 %v2252_v29, %v1888_v22  ;;  %v6437_v43 = vadd.f32 %v6193_v8, %v848_v40  ;;  %v1593_v18 = vmul.f32 %v6235_v9, %v5917_v30  ;;  %v4655_v31 = vpop.eup %4654  ;;  %v9483_v54 = vld [vmem:[#allocation40_spill] sm:$0xff] }
 0x19c   : > { %vm6425_vm10 = vcmp.le.s32.totalorder %v9476_v7, 14  ;;  %v2511_v58 = vadd.f32 %v2479_v12, %v6157_v51  ;;  %v2838_v26 = vmul.f32 %v5685_v61, %v2802_v53  ;;  %v6444_v62 = vadd.s32 144, %v5015_v28  ;;  %v9484_v53 = vld [vmem:[#allocation18_spill] sm:$0xff] }
 0x19d   : > { %v9478_v36 = vsel %vm6425_vm10, 4294967295, %v9477_v36  ;;  %9481 = vst [vmem:[#allocation13_spill] sm:$0xff] %v6437_v43  ;;  %v1237_v49 = vrot.slane %v6217_v20, 7  ;;  %v1662_v22 = vrot.slane %v6217_v20, 1  ;;  %v9112_v0 = vrot.slane %v6434_v59, 7  ;;  %v4657_v47 = vpop.eup %4656 }
 0x19e   : > { %9479 = vst [vmem:[#allocation30_spill] sm:$0xff] %v9478_v36  ;;  %9482 = vst [vmem:[#allocation6_spill] sm:$0xff] %v6444_v62  ;;  %v9111_v40 = vrot.slane %v6434_v59, 1  ;;  %v1461_v29 = vmul.f32 %v6235_v9, %v9483_v54  ;;  %v2870_v30 = vadd.f32 %v2838_v26, %v6127_v25  ;;  %v6453_v51 = vadd.f32 %v2675_v27, %v2511_v58  ;;  %v6474_v27 = vpop.f32.mrb[27].mxu0 }
 0x19f   : > { %v1014_v12 = vadd.f32 1.0, %v4653_v13  ;;  %v1853_v7 = vmul.f32 %v6207_v50, %v9484_v53  ;;  %v6465_v17 = vsel %vm9485_vm5, %v1237_v49, %v9112_v0  ;;  %v3956_v2 = vmul.f32 -1.442695, %v6437_v43  ;;  %9489 = vst [vmem:[#allocation18_spill] sm:$0xff] %v6474_v27 }
 0x1a0   : > { %9486 = vst [vmem:[#allocation16_spill] sm:$0xff] %v6465_v17  ;;  %v6471_v25 = vsel %vm9487_vm8, %v1662_v22, %v9111_v40  ;;  %v6477_v9 = vadd.f32 %v6130_v37, %v2870_v30  ;;  %v4110_v50 = vsel %vm6374_vm9, 1.0, %v9259_v32  ;;  %v1206_v13 = vand.u32 15, %v6274_v45  ;;  %v9491_v30 = vld [vmem:[#allocation41_spill] sm:$0xff] }
 0x1a1   : > { %9488 = vst [vmem:[#allocation40_spill] sm:$0xff] %v6471_v25  ;;  %v3984_v58 = vsel %vm6380_vm14, 1.0, %v9259_v32  ;;  %v1854_v26 = vmul.f32 %v6243_v10, %v1700_v21  ;;  %v4108_v54 = vsel %vm6404_vm11, 1.0, %v9259_v32  ;;  %v6491_v53 = vsel %vm2708_vm13, 1.0, %v9259_v32  ;;  %vm9499_vm11 = vmmov %vm9487_vm8 }
 0x1a2   : > { %9490 = vst [vmem:[#allocation61_spill] sm:$0xff] %v6477_v9  ;;  %v6496_v37 = vsel %vm6425_vm10, 1.0, %v9259_v32  ;;  %v1105_v40 = vmul.f32 %v4657_v47, %v9491_v30  ;;  %4658 = vrcp.f32 %v1014_v12  ;;  %v1012_v0 = vadd.f32 1.0, %v4655_v31 }
 0x1a3   : > { %v9117_v9 = vshra.s32 %v6444_v62, 4  ;;  %v1497_v10 = vmul.f32 %v5185_v11, %v1461_v29  ;;  %v1629_v21 = vmul.f32 %v9357_v52, %v1593_v18  ;;  %v1889_v42 = vmul.f32 %v9474_v5, %v1853_v7 }
 0x1a4   : > { %4660 = vpow2.f32 %v3956_v2  ;;  %v2610_v27 = vmul.f32 %v4110_v50, %v6434_v59  ;;  %v1236_v45 = vrot.slane %v1105_v40, 7  ;;  %v1595_v43 = vmul.f32 %v3984_v58, %v1105_v40 }
 0x1a5   : > { %v1661_v36 = vrot.slane %v1105_v40, 1  ;;  %v1462_v23 = vmul.f32 %v6350_v38, %v6390_v57  ;;  %v1890_v12 = vmul.f32 %v9474_v5, %v1854_v26  ;;  %v2446_v31 = vmul.f32 %v4110_v50, %v6465_v17 }
 0x1a6   : > { %v2805_v29 = vmul.f32 %v6258_v34, %v6471_v25  ;;  %v6512_v18 = vsel %vm9492_vm12, %v1236_v45, %v1237_v49  ;;  %v9493_v47 = vrot.slane %v6342_v55, 7  ;;  %vm6518_vm6 = vcmp.le.s32.totalorder %v1206_v13, 14 }
 0x1a7   : > { %v2090_v38 = vmul.f32 %v9369_v35, %v1105_v40  ;;  %4662 = vrcp.f32 %v1012_v0  ;;  %v2092_v57 = vmul.f32 %v9369_v35, %v6434_v59  ;;  %v1631_v50 = vmul.f32 %v9357_v52, %v1595_v43  ;;  %vm1760_vm5 = vmand %vm6380_vm14, %vm6518_vm6 }
 0x1a8   : > { %v1274_v7 = vsel %vm9494_vm0, %v9493_v47, %v1236_v45  ;;  %v6528_v49 = vsel %vm9497_vm15, %v1661_v36, %v1662_v22  ;;  %v2024_v45 = vmul.f32 %v5220_v39, %v6465_v17  ;;  %v2255_v13 = vmul.f32 %v5228_v16, %v6471_v25  ;;  %vm2710_vm0 = vmand %vm6374_vm9, %vm6082_vm1 }
 0x1a9   : > { %v1463_v34 = vmul.f32 %v3984_v58, %v1274_v7  ;;  %v2646_v26 = vmul.f32 %v5111_v14, %v2610_v27  ;;  %v9498_v0 = vrot.slane %v6342_v55, 1  ;;  %vm6541_vm13 = vcmp.ge.s32.totalorder %v9117_v9, 1  ;;  %vm9523_vm1 = vmmov %vm9499_vm11 }
 0x1aa   : > { %v2482_v22 = vmul.f32 %v5235_v24, %v2446_v31  ;;  %v2608_v25 = vmul.f32 %v4108_v54, %v1105_v40  ;;  %v2841_v27 = vmul.f32 %v5685_v61, %v2805_v29  ;;  %v1987_v55 = vmul.f32 %v6355_v4, %v6512_v18 }
 0x1ab   : > { %v1699_v30 = vsel %vm9499_vm11, %v9498_v0, %v1661_v36  ;;  %v1499_v58 = vmul.f32 %v5185_v11, %v1463_v34  ;;  %v2022_v36 = vmul.f32 %v5220_v39, %v1274_v7  ;;  %v2122_v0 = vadd.f32 %v2090_v38, %v1629_v21 }
 0x1ac   : > { %v1855_v47 = vmul.f32 %v6333_v41, %v1699_v30  ;;  %v6555_v62 = vadd.f32 %v2092_v57, %v1631_v50  ;;  %v2218_v31 = vmul.f32 %v6280_v1, %v6528_v49  ;;  %v4659_v34 = vpop.eup %4658  ;;  %v2023_v41 = vmul.f32 %v5220_v39, %v1987_v55 }
 0x1ad   : > { %v6553_v17 = vadd.f32 %v2024_v45, %v1499_v58  ;;  %v2054_v40 = vadd.f32 %v2022_v36, %v1497_v10  ;;  %v2253_v29 = vmul.f32 %v5228_v16, %v1699_v30  ;;  %v2444_v8 = vmul.f32 %v4108_v54, %v1274_v7  ;;  %v6569_v45 = vpop.f32.mrb[28].mxu0  ;;  %v9503_v7 = vld [vmem:[#allocation54_spill] sm:$0xff] }
 0x1ae   : > { %v1891_v9 = vmul.f32 %v9474_v5, %v1855_v47  ;;  %v6561_v4 = vpop.eup %4660  ;;  %v2254_v21 = vmul.f32 %v5228_v16, %v2218_v31  ;;  %v2445_v57 = vmul.f32 %v6328_v46, %v6512_v18  ;;  %v2644_v50 = vmul.f32 %v5111_v14, %v2608_v25  ;;  %9502 = vst [vmem:[#allocation41_spill] sm:$0xff] %v6569_v45  ;;  %v9504_v31 = vld [vmem:[#allocation51_spill] sm:$0xff] }
 0x1af   : > { %v2285_v1 = vadd.f32 %v2253_v29, %v1889_v42  ;;  %v2480_v58 = vmul.f32 %v5235_v24, %v2444_v8  ;;  %v2514_v10 = vadd.f32 %v2482_v22, %v2054_v40  ;;  %v2678_v47 = vadd.f32 %v2646_v26, %v2122_v0 }
 0x1b0   : > { %v6564_v38 = vadd.f32 %v2255_v13, %v1891_v9  ;;  %v6572_v55 = vadd.f32 %v2254_v21, %v1890_v12  ;;  %v2481_v54 = vmul.f32 %v5235_v24, %v2445_v57  ;;  %v2676_v36 = vadd.f32 %v2644_v50, %v9503_v7  ;;  %v9519_v7 = vld [vmem:[#allocation2_spill] sm:$0xff] }
 0x1b1   : > { %v2803_v9 = vmul.f32 %v6338_v33, %v1699_v30  ;;  %v4663_v13 = vpop.eup %4662  ;;  %v2512_v46 = vadd.f32 %v2480_v58, %v9504_v31  ;;  %v2804_v25 = vmul.f32 %v6491_v53, %v6528_v49  ;;  %v2873_v45 = vadd.f32 %v2841_v27, %v2285_v1  ;;  %v6597_v53 = vpop.f32.mrb[29].mxu0  ;;  %v9525_v30 = vld [vmem:[#allocation52_spill] sm:$0xff] }
 0x1b2   : > { %v6580_v42 = vadd.f32 %v2678_v47, %v2514_v10  ;;  %v2513_v8 = vadd.f32 %v2481_v54, %v6429_v63  ;;  %v6589_v33 = vmul.f32 %v4659_v34, %v6196_v44  ;;  %v9505_v26 = vshra.s32 %v6020_v48, 4  ;;  %9508 = vst [vmem:[#allocation54_spill] sm:$0xff] %v6597_v53  ;;  %v9509_v34 = vld [vmem:[#allocation56_spill] sm:$0xff]  ;;  %v9530_v54 = vld [vmem:[#allocation5_spill] sm:$0xff] }
 0x1b3   : > { %v2839_v12 = vmul.f32 %v5685_v61, %v2803_v9  ;;  %v1596_v22 = vmul.f32 %v6285_v3, %v6217_v20  ;;  %v1498_v6 = vmul.f32 %v5185_v11, %v1462_v23  ;;  %v2840_v63 = vmul.f32 %v5685_v61, %v2804_v25  ;;  %v9529_v10 = vld [vmem:[#allocation4_spill] sm:$0xff] }
 0x1b4   : > { %vm6593_vm8 = vcmp.le.s32.totalorder %v9505_v26, 14  ;;  %v2904_v27 = vadd.f32 %v2676_v36, %v2512_v46  ;;  %v2905_v44 = vadd.f32 %v6414_v60, %v2513_v8  ;;  %v6606_v48 = vmul.f32 %v4663_v13, %v9509_v34 }
 0x1b5   : > { %v2871_v0 = vadd.f32 %v2839_v12, %v6115_v15  ;;  %v6611_v40 = vsel %vm6541_vm13, 1.0, %v9259_v32  ;;  %v4048_v29 = vsel %vm1760_vm5, 1.0, %v9259_v32  ;;  %v2872_v20 = vadd.f32 %v2840_v63, %v6431_v19  ;;  %vm2351_vm14 = vmand %vm6593_vm8, %vm6225_vm2  ;;  %v6676_v12 = vpop.f32.mrb[30].mxu0  ;;  %v9526_v63 = vld [vmem:[#allocation32_spill] sm:$0xff] }
 0x1b6   : > { %v2055_v23 = vadd.f32 %v2023_v41, %v1498_v6  ;;  %v6618_v21 = vsel %vm6593_vm8, 1.0, %v9259_v32  ;;  %v6623_v60 = vadd.f32 %v2905_v44, %v2873_v45  ;;  %v2613_v57 = vmul.f32 %v6496_v37, %v6589_v33  ;;  %9524 = vst [vmem:[#allocation49_spill] sm:$0xff] %v6676_v12 }
 0x1b7   : > { %v6621_v15 = vadd.f32 %v6453_v51, %v2871_v0  ;;  %v9126_v50 = vrot.slane %v6606_v48, 7  ;;  %v6628_v1 = vadd.f32 %v2904_v27, %v2872_v20  ;;  %v1598_v19 = vmul.f32 %v6611_v40, %v6606_v48  ;;  %v9527_v27 = vld [vmem:[#allocation42_spill] sm:$0xff] }
 0x1b8   : > { %9511 = vst [vmem:[#allocation56_spill] sm:$0xff] %v6623_v60  ;;  %v9123_v41 = vrot.slane %v6606_v48, 1  ;;  %v2093_v58 = vmul.f32 %v9369_v35, %v6606_v48  ;;  %v9514_v51 = vand.u32 15, %v5015_v28  ;;  %v9515_v45 = vmov 0  ;;  %v9570_v60 = vld [vmem:[#allocation19_spill] sm:$0xff] }
 0x1b9   : > { %9510 = vst [vmem:[#allocation51_spill] sm:$0xff] %v6621_v15  ;;  %9512 = vst [vmem:[#allocation62_spill] sm:$0xff] %v6628_v1  ;;  %v1632_v47 = vmul.f32 %v9357_v52, %v1596_v22  ;;  %v1464_v36 = vmul.f32 %v9519_v7, %v6512_v18  ;;  %v4088_v9 = vsel %vm6518_vm6, 1.0, %v9259_v32  ;;  %v9520_v13 = vrot.slane %v6434_v59, 7 }
 0x1ba   : > { %vm6641_vm12 = vcmp.ge.s32.totalorder %v9514_v51, 1  ;;  %vm9521_vm2 = vcmp.lt.s32.totalorder %v5015_v28, 1  ;;  %v2095_v46 = vmul.f32 %v9369_v35, %v6589_v33  ;;  %v1634_v56 = vmul.f32 %v9357_v52, %v1598_v19 }
 0x1bb   : > { %v9516_v45 = vsel %vm6641_vm12, 4294967295, %v9515_v45  ;;  %v6661_v31 = vsel %vm9521_vm2, %v9520_v13, %v9126_v50  ;;  %v9522_v18 = vrot.slane %v6434_v59, 1  ;;  %v2611_v8 = vmul.f32 %v6618_v21, %v6606_v48  ;;  %v9565_v50 = vld [vmem:[#allocation6_spill] sm:$0xff] }
 0x1bc   : > { %9517 = vst [vmem:[#allocation29_spill] sm:$0xff] %v9516_v45  ;;  %v2649_v26 = vmul.f32 %v5111_v14, %v2613_v57  ;;  %v1989_v22 = vmul.f32 %v9525_v30, %v6661_v31  ;;  %v4111_v6 = vsel %vm2351_vm14, 1.0, %v9259_v32  ;;  %v846_v0 = vmul.f32 %v9527_v27, %v9526_v63 }
 0x1bd   : > { %v6672_v25 = vsel %vm9523_vm1, %v9522_v18, %v9123_v41  ;;  %v4174_v44 = vsel %vm2710_vm0, 1.0, %v9259_v32  ;;  %v1856_v34 = vmul.f32 %v4048_v29, %v6528_v49  ;;  %v2125_v20 = vadd.f32 %v2093_v58, %v1632_v47  ;;  %v9531_v47 = vld [vmem:[#allocation26_spill] sm:$0xff] }
 0x1be   : > { %v6686_v19 = vadd.f32 %v2095_v46, %v1634_v56  ;;  %v1193_v51 = vand.u32 15, %v9529_v10  ;;  %v1221_v7 = vand.u32 15, %v9530_v54  ;;  %v1500_v57 = vmul.f32 %v5185_v11, %v1464_v36 }
 0x1bf   : > { %v2025_v13 = vmul.f32 %v5220_v39, %v1989_v22  ;;  %v2220_v18 = vmul.f32 %v4088_v9, %v6672_v25  ;;  %v2447_v30 = vmul.f32 %v4111_v6, %v6661_v31  ;;  %v2647_v63 = vmul.f32 %v5111_v14, %v2611_v8  ;;  %v9532_v22 = vld [vmem:[#allocation28_spill] sm:$0xff] }
 0x1c0   : > { %9528 = vst [vmem:[#allocation2_spill] sm:$0xff] %v6686_v19  ;;  %v1015_v41 = vadd.f32 1.0, %v6561_v4  ;;  %v6698_v29 = vadd.f32 %v2649_v26, %v2125_v20  ;;  %v2806_v58 = vmul.f32 %v4174_v44, %v6672_v25  ;;  %v6702_v46 = vadd.f32 %v9531_v47, %v846_v0  ;;  %v9533_v4 = vld [vmem:[#allocation11_spill] sm:$0xff] }
 0x1c1   : > { %v6696_v49 = vadd.f32 %v2025_v13, %v1500_v57  ;;  %v1892_v36 = vmul.f32 %v9474_v5, %v1856_v34  ;;  %v2256_v56 = vmul.f32 %v5228_v16, %v2220_v18  ;;  %v2483_v9 = vmul.f32 %v5235_v24, %v2447_v30 }
 0x1c2   : > { %v2679_v6 = vadd.f32 %v2647_v63, %v9532_v22  ;;  %v9125_v8 = vshra.s32 %v9530_v54, 4  ;;  %v9124_v10 = vshra.s32 %v9533_v4, 4  ;;  %v6711_v26 = vadd.s32 136, %v5015_v28  ;;  %v9581_v54 = vld [vmem:[#allocation31_spill] sm:$0xff] }
 0x1c3   : > { %v2842_v44 = vmul.f32 %v5685_v61, %v2806_v58  ;;  %v1192_v0 = vand.u32 15, %v9533_v4  ;;  %v6715_v20 = vadd.f32 %v2256_v56, %v1892_v36  ;;  %v2515_v34 = vadd.f32 %v2483_v9, %v2055_v23  ;;  %v6753_v58 = vpop.f32.mrb[31].mxu0 }
 0x1c4   : > { %4664 = vrcp.f32 %v1015_v41  ;;  %v9534_v57 = vshra.s32 %v5015_v28, 4  ;;  %vm6723_vm15 = vcmp.ge.s32.totalorder %v1221_v7, 1  ;;  %v9537_v18 = vmov 0  ;;  %9547 = vst [vmem:[#allocation4_spill] sm:$0xff] %v6753_v58  ;;  %v9580_v58 = vld [vmem:[#allocation34_spill] sm:$0xff] }
 0x1c5   : > { %v9538_v18 = vsel %vm6723_vm15, 4294967295, %v9537_v18  ;;  %v2874_v30 = vadd.f32 %v2842_v44, %v6572_v55  ;;  %v3954_v61 = vmul.f32 -1.442695, %v6702_v46  ;;  %vm6733_vm5 = vcmp.ge.s32.totalorder %v1193_v51, 1  ;;  %v9567_v55 = vld [vmem:[#allocation15_spill] sm:$0xff] }
 0x1c6   : > { %vm6719_vm9 = vcmp.le.s32.totalorder %v9534_v57, 14  ;;  %9539 = vst [vmem:[#allocation52_spill] sm:$0xff] %v9538_v18  ;;  %v6737_v41 = vadd.f32 %v2679_v6, %v2515_v34  ;;  %vm1354_vm8 = vmand %vm5116_vm3, %vm6733_vm5  ;;  %vm6745_vm14 = vcmp.le.s32.totalorder %v9125_v8, 14  ;;  %v9127_v63 = vshra.s32 %v6711_v26, 4  ;;  %v9577_v18 = vld [vmem:[#allocation25_spill] sm:$0xff] }
 0x1c7   : > { %vm2337_vm11 = vmand %vm6719_vm9, %vm6641_vm12  ;;  %v6751_v51 = vadd.f32 %v6580_v42, %v2874_v30  ;;  %4666 = vpow2.f32 %v3954_v61  ;;  %vm6759_vm2 = vcmp.le.s32.totalorder %v1192_v0, 14  ;;  %v9548_v36 = vmov 0  ;;  %v9553_v42 = vld [vmem:[#allocation53_spill] sm:$0xff]  ;;  %v9555_v0 = vld [vmem:[#allocation55_spill] sm:$0xff] }
 0x1c8   : > { %9542 = vst [vmem:[#allocation32_spill] sm:$0xff] %v6737_v41  ;;  %v9549_v36 = vsel %vm6759_vm2, 4294967295, %v9548_v36  ;;  %vm6765_vm1 = vcmp.le.s32.totalorder %v9124_v10, 14  ;;  %v851_v9 = vmul.f32 %v9527_v27, %v9553_v42  ;;  %v6774_v22 = vsel %vm6641_vm12, 1.0, %v9259_v32  ;;  %vm9562_vm3 = vmand %vm6745_vm14, %vm6723_vm15 }
 0x1c9   : > { %9546 = vst [vmem:[#allocation42_spill] sm:$0xff] %v6751_v51  ;;  %9550 = vst [vmem:[#allocation26_spill] sm:$0xff] %v9549_v36  ;;  %v6777_v6 = vsel %vm2337_vm11, 1.0, %v9259_v32  ;;  %v4129_v44 = vsel %vm6719_vm9, 1.0, %v9259_v32  ;;  %v849_v34 = vmul.f32 %v9527_v27, %v9555_v0  ;;  %v4066_v57 = vsel %vm6733_vm5, 1.0, %v9259_v32 }
 0x1ca   : > { %9554 = vst [vmem:[#allocation28_spill] sm:$0xff] %v6774_v22  ;;  %vm2698_vm0 = vmand %vm6765_vm1, %vm6759_vm2  ;;  %v6794_v30 = vsel %vm6745_vm14, 1.0, %v9259_v32  ;;  %v1208_v61 = vand.u32 15, %v6711_v26  ;;  %v6802_v42 = vadd.f32 %v9531_v47, %v851_v9  ;;  %v6810_v0 = vsel %vm1354_vm8, 1.0, %v9259_v32 }
 0x1cb   : > { %9556 = vst [vmem:[#allocation8_spill] sm:$0xff] %v6794_v30  ;;  %vm2339_vm9 = vmand %vm5293_vm4, %vm6733_vm5  ;;  %v6815_v10 = vsel %vm6723_vm15, 1.0, %v9259_v32  ;;  %vm6819_vm4 = vcmp.ge.s32.totalorder %v9127_v63, 1  ;;  %v6824_v9 = vadd.f32 %v9531_v47, %v849_v34  ;;  %v6832_v23 = vsel %vm9562_vm3, 1.0, %v9259_v32 }
 0x1cc   : > { %9558 = vst [vmem:[#allocation53_spill] sm:$0xff] %v6810_v0  ;;  %9559 = vst [vmem:[#allocation55_spill] sm:$0xff] %v6815_v10  ;;  %v6837_v7 = vsel %vm6759_vm2, 1.0, %v9259_v32  ;;  %v4098_v8 = vsel %vm6765_vm1, 1.0, %v9259_v32  ;;  %v1209_v34 = vand.u32 15, %v9565_v50  ;;  %v6844_v63 = vsel %vm2698_vm0, 1.0, %v9259_v32 }
 0x1cd   : > { %9563 = vst [vmem:[#allocation22_spill] sm:$0xff] %v6832_v23  ;;  %9564 = vst [vmem:[#allocation63_spill] sm:$0xff] %v6837_v7  ;;  %vm9568_vm11 = vnez %v9567_v55  ;;  %vm9571_vm5 = vnez %v9570_v60  ;;  %v6857_v23 = vsel %vm2339_vm9, 1.0, %v9259_v32  ;;  %v3986_v22 = vsel %vm6819_vm4, 1.0, %v9259_v32  ;;  %v9576_v60 = vld [vmem:[#allocation24_spill] sm:$0xff]  ;;  %v9578_v0 = vld [vmem:[#allocation13_spill] sm:$0xff] }
 0x1ce   : > { %9566 = vst [vmem:[#allocation64_spill] sm:$0xff] %v6844_v63  ;;  %v6849_v51 = vsel %vm9568_vm11, 1.0, %v9259_v32  ;;  %v6854_v10 = vsel %vm9571_vm5, 1.0, %v9259_v32  ;;  %9573 = vst [vmem:[#allocation66_spill] sm:$0xff] %v6857_v23  ;;  %v4665_v56 = vpop.eup %4664  ;;  %vm6862_vm8 = vcmp.le.s32.totalorder %v1208_v61, 14  ;;  %v6867_v55 = vadd.s32 160, %v5015_v28 }
 0x1cf   : > { %9569 = vst [vmem:[#allocation65_spill] sm:$0xff] %v6849_v51  ;;  %9572 = vst [vmem:[#allocation19_spill] sm:$0xff] %v6854_v10  ;;  %v3959_v51 = vmul.f32 -1.442695, %v6802_v42  ;;  %v2597_v15 = vmul.f32 %v4129_v44, %v9576_v60  ;;  %v2627_v45 = vmul.f32 %v6794_v30, %v9577_v18  ;;  %v6874_v36 = vmul.f32 %v4665_v56, %v9578_v0  ;;  %v9615_v7 = vld [vmem:[#allocation40_spill] sm:$0xff] }
 0x1d0   : > { %v3957_v4 = vmul.f32 -1.442695, %v6824_v9  ;;  %v2434_v61 = vmul.f32 %v4098_v8, %v9580_v58  ;;  %v2598_v12 = vmul.f32 %v4098_v8, %v9581_v54  ;;  %v1211_v53 = vand.u32 15, %v6867_v55  ;;  %vm1762_vm0 = vmand %vm6819_vm4, %vm6862_vm8  ;;  %v9585_v8 = vld [vmem:[#allocation35_spill] sm:$0xff] }
 0x1d1   : > { %9579 = vst [vmem:[#allocation24_spill] sm:$0xff] %v6874_v36  ;;  %vm6880_vm14 = vcmp.ge.s32.totalorder %v1209_v34, 1  ;;  %v9582_v63 = vmov 0  ;;  %v4667_v23 = vpop.eup %4666  ;;  %v9137_v0 = vrot.slane %v6589_v33, 7  ;;  %v9139_v56 = vrot.slane %v6589_v33, 1 }
 0x1d2   : > { %v9583_v63 = vsel %vm6880_vm14, 4294967295, %v9582_v63  ;;  %v9136_v58 = vrot.slane %v6874_v36, 7  ;;  %v9138_v54 = vrot.slane %v6874_v36, 1  ;;  %v2793_v60 = vmul.f32 %v4129_v44, %v9585_v8  ;;  %vm1370_vm1 = vmand %vm6541_vm13, %vm6880_vm14 }
 0x1d3   : > { %9584 = vst [vmem:[#allocation13_spill] sm:$0xff] %v9583_v63  ;;  %v1013_v30 = vadd.f32 1.0, %v4667_v23  ;;  %4668 = vpow2.f32 %v3959_v51  ;;  %vm9586_vm9 = vcmp.lt.s32.totalorder %v5015_v28, 1  ;;  %vm9588_vm4 = vcmp.lt.s32.totalorder %v5015_v28, 7 }
 0x1d4   : > { %v6904_v13 = vsel %vm9586_vm9, %v9137_v0, %v9136_v58  ;;  %v6912_v51 = vsel %vm9588_vm4, %v9139_v56, %v9138_v54  ;;  %v6915_v44 = vadd.s32 152, %v5015_v28  ;;  %4670 = vpow2.f32 %v3957_v4 }
 0x1d5   : > { %9587 = vst [vmem:[#allocation34_spill] sm:$0xff] %v6904_v13  ;;  %9589 = vst [vmem:[#allocation31_spill] sm:$0xff] %v6912_v51  ;;  %v6919_v23 = vmul.f32 %v9369_v35, %v9577_v18  ;;  %v4050_v8 = vsel %vm1762_vm0, 1.0, %v9259_v32  ;;  %v6925_v58 = vsel %vm6862_vm8, 1.0, %v9259_v32  ;;  %vm6927_vm3 = vcmp.ge.s32.totalorder %v1211_v53, 1 }
 0x1d6   : > { %9590 = vst [vmem:[#allocation35_spill] sm:$0xff] %v6915_v44  ;;  %v6932_v54 = vmul.f32 %v5111_v14, %v2597_v15  ;;  %v6935_v4 = vmul.f32 %v5111_v14, %v2627_v45  ;;  %v6938_v56 = vmul.f32 %v5111_v14, %v2598_v12  ;;  %4672 = vrcp.f32 %v1013_v30  ;;  %v6946_v53 = vld [vmem:[%s9005_s4 + $0x8] ss:$0 sm:$0xff]  ;;  %vm2353_vm0 = vmand %vm6425_vm10, %vm6179_vm7 }
 0x1d7   : > { %9591 = vst [vmem:[#allocation67_spill] sm:$0xff] %v6919_v23  ;;  %v6941_v34 = vmul.f32 %v5235_v24, %v2434_v61  ;;  %v6949_v18 = vmul.f32 %v6946_v53, %v2793_v60  ;;  %v9599_v15 = vshra.s32 %v6867_v55, 4  ;;  %v3987_v61 = vsel %vm1370_vm1, 1.0, %v9259_v32  ;;  %v9604_v60 = vld [vmem:[#allocation37_spill] sm:$0xff] }
 0x1d8   : > { %9594 = vst [vmem:[#allocation68_spill] sm:$0xff] %v6932_v54  ;;  %9595 = vst [vmem:[#allocation69_spill] sm:$0xff] %v6935_v4  ;;  %v9608_v12 = vshra.s32 %v6711_v26, 4  ;;  %v9614_v4 = vld [vmem:[#allocation16_spill] sm:$0xff]  ;;  %v1597_v23 = vmul.f32 %v3986_v22, %v6434_v59  ;;  %v1857_v26 = vmul.f32 %v6285_v3, %v9615_v7  ;;  %v7003_v30 = vsel %vm2353_vm0, 1.0, %v9259_v32 }
 0x1d9   : > { %9596 = vst [vmem:[#allocation70_spill] sm:$0xff] %v6938_v56  ;;  %9597 = vst [vmem:[#allocation71_spill] sm:$0xff] %v6941_v34  ;;  %vm6953_vm5 = vcmp.ge.s32.totalorder %v9599_v15, 1  ;;  %v9606_v34 = vld [vmem:[#allocation38_spill] sm:$0xff]  ;;  %v9611_v56 = vld [vmem:[#allocation33_spill] sm:$0xff]  ;;  %v1465_v54 = vmul.f32 %v3986_v22, %v9614_v4  ;;  %v1858_v4 = vmul.f32 %v4050_v8, %v6672_v25  ;;  %v4074_v59 = vsel %vm6880_vm14, 1.0, %v9259_v32 }
 0x1da   : > { %9598 = vst [vmem:[#allocation72_spill] sm:$0xff] %v6949_v18  ;;  %v6968_v18 = vmul.f32 %v4066_v57, %v9604_v60  ;;  %v6972_v15 = vmul.f32 %v5220_v39, %v9606_v34  ;;  %vm1372_vm9 = vmand %vm6953_vm5, %vm6927_vm3  ;;  %vm6980_vm7 = vcmp.le.s32.totalorder %v9608_v12, 14  ;;  %v6987_v57 = vmul.f32 %v9369_v35, %v9611_v56  ;;  %v9625_v25 = vld [vmem:[#allocation36_spill] sm:$0xff] }
 0x1db   : > { %v7000_v12 = vsel %vm6953_vm5, 1.0, %v9259_v32  ;;  %v4114_v3 = vsel %vm6980_vm7, 1.0, %v9259_v32  ;;  %v9618_v22 = vshra.s32 %v6915_v44, 4  ;;  %v852_v8 = vmul.f32 %v9527_v27, %v9625_v25 }
 0x1dc   : > { %9605 = vst [vmem:[#allocation17_spill] sm:$0xff] %v6968_v18  ;;  %9607 = vst [vmem:[#allocation30_spill] sm:$0xff] %v6972_v15  ;;  %v6991_v15 = vmul.f32 %v6777_v6, %v9604_v60  ;;  %v7007_v6 = vsel %vm1372_vm9, 1.0, %v9259_v32  ;;  %v9626_v60 = vld [vmem:[#allocation27_spill] sm:$0xff]  ;;  %v1501_v18 = vmul.f32 %v5185_v11, %v1465_v54  ;;  %v1210_v19 = vand.u32 15, %v6915_v44 }
 0x1dd   : > { %9612 = vst [vmem:[#allocation37_spill] sm:$0xff] %v6987_v57  ;;  %9616 = vst [vmem:[#allocation16_spill] sm:$0xff] %v7000_v12  ;;  %v1466_v57 = vmul.f32 %v3987_v61, %v6661_v31  ;;  %vm7018_vm10 = vcmp.ge.s32.totalorder %v9618_v22, 1  ;;  %v9621_v31 = vld [vmem:[#allocation21_spill] sm:$0xff]  ;;  %v850_v56 = vmul.f32 %v9527_v27, %v9626_v60  ;;  %v1633_v22 = vmul.f32 %v9357_v52, %v1597_v23 }
 0x1de   : > { %9613 = vst [vmem:[#allocation73_spill] sm:$0xff] %v6991_v15  ;;  %9617 = vst [vmem:[#allocation40_spill] sm:$0xff] %v7007_v6  ;;  %v9622_v45 = vshra.s32 %v9621_v31, 4  ;;  %v4669_v15 = vpop.eup %4668  ;;  %v7040_v31 = vadd.s32 176, %v5015_v28  ;;  %v1893_v25 = vmul.f32 %v9474_v5, %v1857_v26  ;;  %v7045_v27 = vmul.f32 %v7000_v12, %v6589_v33 }
 0x1df   : > { %v7048_v54 = vmul.f32 %v5185_v11, %v1466_v57  ;;  %v1018_v23 = vadd.f32 1.0, %v4669_v15  ;;  %v1894_v60 = vmul.f32 %v9474_v5, %v1858_v4  ;;  %v3988_v2 = vsel %vm7018_vm10, 1.0, %v9259_v32 }
 0x1e0   : > { %vm7024_vm13 = vcmp.le.s32.totalorder %v9622_v45, 14  ;;  %9627 = vst [vmem:[#allocation21_spill] sm:$0xff] %v7040_v31  ;;  %v4671_v45 = vpop.eup %4670  ;;  %9628 = vst [vmem:[#allocation36_spill] sm:$0xff] %v7045_v27  ;;  %v2614_v34 = vmul.f32 %v4114_v3, %v6874_v36  ;;  %v7060_v57 = vadd.f32 %v9531_v47, %v852_v8  ;;  %v7063_v15 = vadd.f32 %v9531_v47, %v850_v56 }
 0x1e1   : > { %vm2712_vm1 = vmand %vm7024_vm13, %vm6518_vm6  ;;  %v4112_v44 = vsel %vm7024_vm13, 1.0, %v9259_v32  ;;  %v1016_v10 = vadd.f32 1.0, %v4671_v45  ;;  %v4673_v26 = vpop.eup %4672  ;;  %v2096_v4 = vmul.f32 %v9369_v35, %v6874_v36  ;;  %4674 = vrcp.f32 %v1018_v23 }
 0x1e2   : > { %v4176_v12 = vsel %vm2712_vm1, 1.0, %v9259_v32  ;;  %9629 = vst [vmem:[#allocation27_spill] sm:$0xff] %v7060_v57  ;;  %9630 = vst [vmem:[#allocation74_spill] sm:$0xff] %v7063_v15  ;;  %v1109_v27 = vmul.f32 %v4673_v26, %v6702_v46  ;;  %v2028_v45 = vmul.f32 %v5220_v39, %v6904_v13  ;;  %v2450_v63 = vmul.f32 %v4114_v3, %v6904_v13 }
 0x1e3   : > { %v2809_v8 = vmul.f32 %v6496_v37, %v6912_v51  ;;  %4676 = vrcp.f32 %v1016_v10  ;;  %v2259_v46 = vmul.f32 %v5228_v16, %v6912_v51  ;;  %v2650_v23 = vmul.f32 %v5111_v14, %v2614_v34 }
 0x1e4   : > { %v1240_v41 = vrot.slane %v1109_v27, 7  ;;  %v1599_v47 = vmul.f32 %v3988_v2, %v1109_v27  ;;  %v1665_v56 = vrot.slane %v1109_v27, 1  ;;  %v2094_v50 = vmul.f32 %v9369_v35, %v1109_v27 }
 0x1e5   : > { %v9631_v26 = vshra.s32 %v6867_v55, 4  ;;  %v3960_v3 = vmul.f32 -1.442695, %v7060_v57  ;;  %v3958_v37 = vmul.f32 -1.442695, %v7063_v15  ;;  %v9634_v10 = vrot.slane %v6589_v33, 7 }
 0x1e6   : > { %vm9635_vm4 = vcmp.lt.s32.totalorder %v5015_v28, 1  ;;  %v9636_v35 = vrot.slane %v6606_v48, 7  ;;  %v1635_v55 = vmul.f32 %v9357_v52, %v1599_v47  ;;  %vm9639_vm0 = vcmp.lt.s32.totalorder %v5015_v28, 7 }
 0x1e7   : > { %vm7080_vm6 = vcmp.le.s32.totalorder %v9631_v26, 14  ;;  %v1269_v13 = vsel %vm9635_vm4, %v1240_v41, %v9634_v10  ;;  %vm9637_vm5 = vmmov %vm9635_vm4  ;;  %v9638_v26 = vrot.slane %v6589_v33, 1  ;;  %v2486_v15 = vmul.f32 %v5235_v24, %v2450_v63 }
 0x1e8   : > { %v1270_v34 = vsel %vm9637_vm5, %v9636_v35, %v1240_v41  ;;  %v2845_v57 = vmul.f32 %v6946_v53, %v2809_v8  ;;  %v9640_v10 = vrot.slane %v6606_v48, 1  ;;  %vm9641_vm9 = vmmov %vm9639_vm0  ;;  %vm7107_vm13 = vcmp.le.s32.totalorder %v1210_v19, 14 }
 0x1e9   : > { %v7099_v51 = vsel %vm9639_vm0, %v1665_v56, %v9638_v26  ;;  %v1467_v36 = vmul.f32 %v3988_v2, %v1270_v34  ;;  %v9644_v33 = vshra.s32 %v7040_v31, 4  ;;  %v1991_v47 = vmul.f32 %v4074_v59, %v1269_v13  ;;  %vm1764_vm4 = vmand %vm7018_vm10, %vm7107_vm13 }
 0x1ea   : > { %v1695_v6 = vsel %vm9641_vm9, %v9640_v10, %v1665_v56  ;;  %v2026_v2 = vmul.f32 %v5220_v39, %v1270_v34  ;;  %v2126_v8 = vadd.f32 %v2094_v50, %v1633_v22  ;;  %v7120_v26 = vadd.f32 %v2096_v4, %v1635_v55  ;;  %vm2714_vm5 = vmand %vm6980_vm7, %vm6862_vm8 }
 0x1eb   : > { %vm7113_vm1 = vcmp.ge.s32.totalorder %v9644_v33, 1  ;;  %v1859_v63 = vmul.f32 %v6611_v40, %v1695_v6  ;;  %v1503_v48 = vmul.f32 %v5185_v11, %v1467_v36  ;;  %v2612_v19 = vmul.f32 %v4112_v44, %v1109_v27  ;;  %v4675_v22 = vpop.eup %4674 }
 0x1ec   : > { %4678 = vpow2.f32 %v3960_v3  ;;  %v2058_v10 = vadd.f32 %v2026_v2, %v1501_v18  ;;  %v2222_v33 = vmul.f32 %v6925_v58, %v7099_v51  ;;  %v2027_v31 = vmul.f32 %v5220_v39, %v1991_v47 }
 0x1ed   : > { %v1895_v56 = vmul.f32 %v9474_v5, %v1859_v63  ;;  %4680 = vpow2.f32 %v3958_v37  ;;  %v7126_v40 = vadd.f32 %v2028_v45, %v1503_v48  ;;  %v2257_v59 = vmul.f32 %v5228_v16, %v1695_v6  ;;  %v4677_v18 = vpop.eup %4676 }
 0x1ee   : > { %v2448_v50 = vmul.f32 %v4112_v44, %v1270_v34  ;;  %v2258_v36 = vmul.f32 %v5228_v16, %v2222_v33  ;;  %v2449_v27 = vmul.f32 %v7003_v30, %v1269_v13  ;;  %v2518_v3 = vadd.f32 %v2486_v15, %v2058_v10  ;;  %v9653_v10 = vld [vmem:[#allocation32_spill] sm:$0xff] }
 0x1ef   : > { %v7130_v4 = vadd.f32 %v2259_v46, %v1895_v56  ;;  %v2289_v55 = vadd.f32 %v2257_v59, %v1893_v25  ;;  %v2648_v37 = vmul.f32 %v5111_v14, %v2612_v19  ;;  %v2682_v63 = vadd.f32 %v2650_v23, %v2126_v8 }
 0x1f0   : > { %v2484_v58 = vmul.f32 %v5235_v24, %v2448_v50  ;;  %v7135_v45 = vadd.f32 %v2258_v36, %v1894_v60  ;;  %v2485_v47 = vmul.f32 %v5235_v24, %v2449_v27  ;;  %v2807_v44 = vmul.f32 %v6618_v21, %v1695_v6 }
 0x1f1   : > { %v2808_v34 = vmul.f32 %v4176_v12, %v7099_v51  ;;  %v2680_v30 = vadd.f32 %v2648_v37, %v6555_v62  ;;  %v2877_v15 = vadd.f32 %v2845_v57, %v2289_v55  ;;  %v7142_v2 = vadd.f32 %v2682_v63, %v2518_v3  ;;  %v9658_v3 = vld [vmem:[#allocation36_spill] sm:$0xff] }
 0x1f2   : > { %v2516_v46 = vadd.f32 %v2484_v58, %v6553_v17  ;;  %v2517_v25 = vadd.f32 %v2485_v47, %v6696_v49  ;;  %v2843_v48 = vmul.f32 %v6946_v53, %v2807_v44  ;;  %v7150_v23 = vsel %vm7080_vm6, 1.0, %v9259_v32  ;;  %v9659_v58 = vld [vmem:[#allocation24_spill] sm:$0xff]  ;;  %v7228_v47 = vld [vmem:[%s9006_s5] ss:$0 sm:$0xff]  ;;  %v9663_v44 = vld [vmem:[#allocation7_spill] sm:$0xff] }
 0x1f3   : > { %v2844_v60 = vmul.f32 %v6946_v53, %v2808_v34  ;;  %v7153_v12 = vmul.f32 %v4675_v22, %v6802_v42  ;;  %v7156_v62 = vmul.f32 %v4677_v18, %v6824_v9  ;;  %v2059_v17 = vadd.f32 %v2027_v31, %v7048_v54  ;;  %9662 = vst [vmem:[#allocation13_spill] sm:$0xff] %v7228_v47 }
 0x1f4   : > { %v2908_v21 = vadd.f32 %v2680_v30, %v2516_v46  ;;  %v2875_v49 = vadd.f32 %v2843_v48, %v6564_v38  ;;  %v2909_v57 = vadd.f32 %v6698_v29, %v2517_v25  ;;  %v7169_v42 = vsel %vm7113_vm1, 1.0, %v9259_v32  ;;  %v9648_v38 = vld [vmem:[#allocation40_spill] sm:$0xff] }
 0x1f5   : > { %9647 = vst [vmem:[#allocation75_spill] sm:$0xff] %v7153_v12  ;;  %v2876_v6 = vadd.f32 %v2844_v60, %v6715_v20  ;;  %v4075_v31 = vsel %vm6927_vm3, 1.0, %v9259_v32  ;;  %v7175_v54 = vadd.s32 168, %v5015_v28  ;;  %v1468_v29 = vmul.f32 %v9648_v38, %v1269_v13  ;;  %v9649_v20 = vld [vmem:[#allocation6_spill] sm:$0xff] }
 0x1f6   : > { %v4679_v9 = vpop.eup %4678  ;;  %v9650_v8 = vshra.s32 %v9649_v20, 4  ;;  %v7189_v33 = vadd.f32 %v9653_v10, %v2875_v49  ;;  %v7193_v50 = vadd.f32 %v2909_v57, %v2877_v15  ;;  %v9155_v1 = vrot.slane %v7156_v62, 7 }
 0x1f7   : > { %v4681_v56 = vpop.eup %4680  ;;  %v7191_v59 = vadd.f32 %v2908_v21, %v2876_v6  ;;  %v4052_v13 = vsel %vm1764_vm4, 1.0, %v9259_v32  ;;  %v2617_v43 = vmul.f32 %v7150_v23, %v7153_v12  ;;  %v1602_v22 = vmul.f32 %v7169_v42, %v7156_v62 }
 0x1f8   : > { %vm7184_vm0 = vcmp.le.s32.totalorder %v9650_v8, 14  ;;  %9654 = vst [vmem:[#allocation40_spill] sm:$0xff] %v7189_v33  ;;  %9656 = vst [vmem:[#allocation32_spill] sm:$0xff] %v7193_v50  ;;  %v9154_v36 = vrot.slane %v7156_v62, 1  ;;  %v1636_v7 = vmul.f32 %v9357_v52, %v9658_v3  ;;  %v4178_v18 = vsel %vm2714_vm5, 1.0, %v9259_v32 }
 0x1f9   : > { %9655 = vst [vmem:[#allocation6_spill] sm:$0xff] %v7191_v59  ;;  %vm2355_vm8 = vmand %vm7184_vm0, %vm6880_vm14  ;;  %v4090_v55 = vsel %vm7107_vm13, 1.0, %v9259_v32  ;;  %v9660_v37 = vrot.slane %v9659_v58, 7  ;;  %vm9661_vm7 = vcmp.lt.s32.totalorder %v5015_v28, 1  ;;  %v2099_v34 = vmul.f32 %v9663_v44, %v7153_v12  ;;  %v7416_v59 = vld [vmem:[%s9004_s3] ss:$0 sm:$0xff] }
 0x1fa   : > { %v1638_v46 = vmul.f32 %v9357_v52, %v1602_v22  ;;  %v9664_v30 = vrot.slane %v9659_v58, 1  ;;  %vm9665_vm14 = vmmov %vm9641_vm9  ;;  %v1504_v48 = vmul.f32 %v5185_v11, %v1468_v29  ;;  %v1860_v60 = vmul.f32 %v4052_v13, %v7099_v51  ;;  %v9668_v29 = vld [vmem:[#allocation19_spill] sm:$0xff]  ;;  %v9669_v51 = vld [vmem:[#allocation10_spill] sm:$0xff] }
 0x1fb   : > { %v7223_v63 = vsel %vm9661_vm7, %v9660_v37, %v9155_v1  ;;  %v4115_v21 = vsel %vm2355_vm8, 1.0, %v9259_v32  ;;  %v7248_v49 = vsel %vm7184_vm0, 1.0, %v9259_v32  ;;  %v2653_v6 = vmul.f32 %v5111_v14, %v2617_v43  ;;  %v9679_v1 = vld [vmem:[#allocation63_spill] sm:$0xff]  ;;  %vm2357_vm0 = vmand %vm7080_vm6, %vm6927_vm3 }
 0x1fc   : > { %v7239_v15 = vsel %vm9665_vm14, %v9664_v30, %v9154_v36  ;;  %v1993_v25 = vmul.f32 %v4075_v31, %v7223_v63  ;;  %v2097_v38 = vmul.f32 %v9663_v44, %v7156_v62  ;;  %v7254_v20 = vadd.f32 %v2099_v34, %v1638_v46  ;;  %v9667_v31 = vld [vmem:[#allocation38_spill] sm:$0xff]  ;;  %v9678_v36 = vld [vmem:[#allocation43_spill] sm:$0xff] }
 0x1fd   : > { %v2464_v8 = vmul.f32 %v9668_v29, %v9667_v31  ;;  %v2967_v10 = vmul.f32 %v7228_v47, %v9669_v51  ;;  %v9156_v13 = vshra.s32 %v7175_v54, 4  ;;  %v1019_v19 = vadd.f32 1.0, %v4679_v9 }
 0x1fe   : > { %v2029_v57 = vmul.f32 %v5220_v39, %v1993_v25  ;;  %9666 = vst [vmem:[#allocation36_spill] sm:$0xff] %v7254_v20  ;;  %v2129_v27 = vadd.f32 %v2097_v38, %v1636_v7  ;;  %v2224_v43 = vmul.f32 %v4090_v55, %v7239_v15  ;;  %v2451_v3 = vmul.f32 %v4115_v21, %v7223_v63  ;;  %v9670_v7 = vld [vmem:[#allocation39_spill] sm:$0xff] }
 0x1ff   : > { %v1212_v37 = vand.u32 15, %v7175_v54  ;;  %v2615_v34 = vmul.f32 %v7248_v49, %v7156_v62  ;;  %v2810_v46 = vmul.f32 %v4178_v18, %v7239_v15  ;;  %v1017_v30 = vadd.f32 1.0, %v4681_v56  ;;  %v9700_v21 = vld [vmem:[#allocation47_spill] sm:$0xff] }
 0x200   : > { %v7261_v22 = vadd.f32 %v2029_v57, %v1504_v48  ;;  %v1896_v25 = vmul.f32 %v9474_v5, %v1860_v60  ;;  %v2260_v31 = vmul.f32 %v5228_v16, %v2224_v43  ;;  %v2487_v9 = vmul.f32 %v5235_v24, %v2451_v3  ;;  %v7287_v60 = vld [vmem:[%s9007_s6] ss:$0 sm:$0xff] }
 0x201   : > { %v7272_v48 = vadd.f32 %v2653_v6, %v2129_v27  ;;  %v2968_v55 = vmul.f32 %v7228_v47, %v9670_v7  ;;  %vm7278_vm10 = vcmp.ge.s32.totalorder %v9156_v13, 1  ;;  %v2651_v18 = vmul.f32 %v5111_v14, %v2615_v34  ;;  %9673 = vst [vmem:[#allocation24_spill] sm:$0xff] %v7287_v60  ;;  %v9674_v6 = vld [vmem:[#allocation21_spill] sm:$0xff]  ;;  %v9675_v27 = vld [vmem:[#allocation2_spill] sm:$0xff] }
 0x202   : > { %v2846_v56 = vmul.f32 %v6946_v53, %v2810_v46  ;;  %v1213_v57 = vand.u32 15, %v9674_v6  ;;  %v7290_v38 = vadd.f32 %v2260_v31, %v1896_v25  ;;  %v2519_v51 = vadd.f32 %v2487_v9, %v2059_v17  ;;  %v9676_v46 = vld [vmem:[#allocation17_spill] sm:$0xff] }
 0x203   : > { %4682 = vrcp.f32 %v1019_v19  ;;  %v2683_v43 = vadd.f32 %v2651_v18, %v9675_v27  ;;  %v7295_v34 = vadd.s32 184, %v5015_v28  ;;  %v7299_v7 = vmul.f32 %v5220_v39, %v9676_v46  ;;  %v9688_v9 = vld [vmem:[#allocation73_spill] sm:$0xff] }
 0x204   : > { %v2878_v3 = vadd.f32 %v2846_v56, %v7135_v45  ;;  %4684 = vrcp.f32 %v1017_v30  ;;  %v2206_v13 = vmul.f32 %v9679_v1, %v9678_v36  ;;  %v3990_v17 = vsel %vm7278_vm10, 1.0, %v9259_v32  ;;  %v9686_v1 = vld [vmem:[#allocation44_spill] sm:$0xff] }
 0x205   : > { %9677 = vst [vmem:[#allocation38_spill] sm:$0xff] %v7299_v7  ;;  %vm7306_vm9 = vcmp.le.s32.totalorder %v1212_v37, 14  ;;  %v9680_v19 = vmov 0  ;;  %v7311_v45 = vadd.f32 %v7287_v60, %v2967_v10  ;;  %v7314_v30 = vadd.f32 %v7287_v60, %v2968_v55 }
 0x206   : > { %v9681_v19 = vsel %vm7306_vm9, 4294967295, %v9680_v19  ;;  %v7316_v25 = vadd.f32 %v2683_v43, %v2519_v51  ;;  %v7319_v31 = vadd.f32 %v7142_v2, %v2878_v3  ;;  %v7323_v36 = vmul.f32 %v5228_v16, %v9686_v1  ;;  %v9694_v2 = vld [vmem:[#allocation33_spill] sm:$0xff]  ;;  %vm1766_vm5 = vmand %vm7278_vm10, %vm7306_vm9  ;;  %v9696_v43 = vld [vmem:[#allocation8_spill] sm:$0xff] }
 0x207   : > { %9682 = vst [vmem:[#allocation19_spill] sm:$0xff] %v9681_v19  ;;  %9683 = vst [vmem:[#allocation10_spill] sm:$0xff] %v7311_v45  ;;  %v7327_v37 = vmul.f32 %v5235_v24, %v9688_v9  ;;  %v7330_v18 = vadd.s32 192, %v5015_v28  ;;  %vm7332_vm4 = vcmp.ge.s32.totalorder %v1213_v57, 1  ;;  %v9690_v10 = vmov 0  ;;  %v9698_v3 = vld [vmem:[#allocation34_spill] sm:$0xff] }
 0x208   : > { %9684 = vst [vmem:[#allocation39_spill] sm:$0xff] %v7314_v30  ;;  %9685 = vst [vmem:[#allocation2_spill] sm:$0xff] %v7319_v31  ;;  %v9691_v10 = vsel %vm7332_vm4, 4294967295, %v9690_v10  ;;  %v7337_v55 = vmul.f32 %v5235_v24, %v2464_v8  ;;  %v7341_v56 = vmul.f32 %v9668_v29, %v9694_v2  ;;  %v1601_v51 = vmul.f32 %v3990_v17, %v9659_v58  ;;  %v7364_v58 = vld [vmem:[%s9003_s2] ss:$0 sm:$0xff]  ;;  %v9711_v31 = vld [vmem:[#allocation16_spill] sm:$0xff] }
 0x209   : > { %9687 = vst [vmem:[#allocation17_spill] sm:$0xff] %v7323_v36  ;;  %9689 = vst [vmem:[#allocation43_spill] sm:$0xff] %v7327_v37  ;;  %v9159_v27 = vshra.s32 %v7295_v34, 4  ;;  %v7350_v57 = vmul.f32 %v5228_v16, %v2206_v13  ;;  %v7354_v8 = vmul.f32 %v9696_v43, %v9686_v1  ;;  %v1469_v46 = vmul.f32 %v3990_v17, %v9698_v3  ;;  %v9699_v29 = vld [vmem:[#allocation46_spill] sm:$0xff]  ;;  %v9703_v1 = vld [vmem:[#allocation48_spill] sm:$0xff] }
 0x20a   : > { %9692 = vst [vmem:[#allocation63_spill] sm:$0xff] %v9691_v10  ;;  %9693 = vst [vmem:[#allocation44_spill] sm:$0xff] %v7337_v55  ;;  %v855_v13 = vmul.f32 %v7364_v58, %v9699_v29  ;;  %v9701_v9 = vld [vmem:[#allocation66_spill] sm:$0xff]  ;;  %v9704_v43 = vld [vmem:[#allocation64_spill] sm:$0xff]  ;;  %v7377_v0 = vmul.f32 -1.442695, %v7311_v45 }
 0x20b   : > { %9695 = vst [vmem:[#allocation73_spill] sm:$0xff] %v7350_v57  ;;  %9697 = vst [vmem:[#allocation33_spill] sm:$0xff] %v7354_v8  ;;  %v7370_v2 = vmul.f32 %v9701_v9, %v9700_v21  ;;  %v7374_v17 = vmul.f32 %v9704_v43, %v9703_v1  ;;  %v7380_v61 = vmul.f32 -1.442695, %v7314_v30  ;;  %v4054_v3 = vsel %vm1766_vm5, 1.0, %v9259_v32  ;;  %v9710_v9 = vld [vmem:[#allocation31_spill] sm:$0xff] }
 0x20c   : > { %vm1374_vm3 = vmand %vm7113_vm1, %vm7332_vm4  ;;  %v7390_v29 = vsel %vm7306_vm9, 1.0, %v9259_v32  ;;  %v7395_v1 = vmul.f32 %v9357_v52, %v1601_v51  ;;  %v7398_v43 = vsel %vm2357_vm0, 1.0, %v9259_v32  ;;  %v4076_v41 = vsel %vm7332_vm4, 1.0, %v9259_v32  ;;  %v9713_v55 = vld [vmem:[#allocation27_spill] sm:$0xff] }
 0x20d   : > { %9702 = vst [vmem:[#allocation8_spill] sm:$0xff] %v7370_v2  ;;  %9705 = vst [vmem:[#allocation34_spill] sm:$0xff] %v7374_v17  ;;  %vm7405_vm6 = vcmp.ge.s32.totalorder %v9159_v27, 1  ;;  %v9707_v30 = vmov 0  ;;  %v4683_v45 = vpop.eup %4682  ;;  %v1505_v21 = vmul.f32 %v5185_v11, %v1469_v46  ;;  %v1861_v51 = vmul.f32 %v9711_v31, %v9710_v9  ;;  %v9719_v31 = vld [vmem:[#allocation58_spill] sm:$0xff]  ;;  %v9720_v57 = vld [vmem:[#allocation59_spill] sm:$0xff] }
 0x20e   : > { %9706 = vst [vmem:[#allocation46_spill] sm:$0xff] %v7380_v61  ;;  %v9708_v30 = vsel %vm7405_vm6, 4294967295, %v9707_v30  ;;  %v3991_v50 = vsel %vm1374_vm3, 1.0, %v9259_v32  ;;  %v7419_v33 = vadd.f32 %v7416_v59, %v855_v13  ;;  %v4685_v27 = vpop.eup %4684  ;;  %v7422_v37 = vmul.f32 %v4683_v45, %v9713_v55  ;;  %v9721_v13 = vld [vmem:[#allocation74_spill] sm:$0xff]  ;;  %v9722_v55 = vld [vmem:[#allocation35_spill] sm:$0xff] }
 0x20f   : > { %9709 = vst [vmem:[#allocation47_spill] sm:$0xff] %v9708_v30  ;;  %v9715_v8 = vshra.s32 %v7175_v54, 4  ;;  %v9716_v46 = vmov 0  ;;  %v853_v9 = vmul.f32 %v7364_v58, %v9719_v31  ;;  %v856_v36 = vmul.f32 %v7364_v58, %v9720_v57 }
 0x210   : > { %9712 = vst [vmem:[#allocation66_spill] sm:$0xff] %v7419_v33  ;;  %9714 = vst [vmem:[#allocation48_spill] sm:$0xff] %v7422_v37  ;;  %v1245_v7 = vrot.slane %v7153_v12, 7  ;;  %v1113_v20 = vmul.f32 %v4685_v27, %v9721_v13  ;;  %v3992_v45 = vsel %vm7405_vm6, 1.0, %v9259_v32  ;;  %v9723_v54 = vshra.s32 %v9722_v55, 4 }
 0x211   : > { %vm7426_vm1 = vcmp.le.s32.totalorder %v9715_v8, 14  ;;  %v1670_v10 = vrot.slane %v7153_v12, 1  ;;  %v1470_v31 = vmul.f32 %v3991_v50, %v7223_v63  ;;  %v9162_v57 = vrot.slane %v7422_v37, 7 }
 0x212   : > { %v9717_v46 = vsel %vm7426_vm1, 4294967295, %v9716_v46  ;;  %vm7441_vm8 = vcmp.le.s32.totalorder %v9723_v54, 14  ;;  %v9164_v6 = vrot.slane %v7422_v37, 1  ;;  %v1897_v27 = vmul.f32 %v9474_v5, %v1861_v51 }
 0x213   : > { %9718 = vst [vmem:[#allocation64_spill] sm:$0xff] %v9717_v46  ;;  %v1862_v13 = vmul.f32 %v4054_v3, %v7239_v15  ;;  %v1244_v30 = vrot.slane %v1113_v20, 7  ;;  %vm2716_vm7 = vmand %vm7441_vm8, %vm7107_vm13  ;;  %v3963_v55 = vmul.f32 -1.442695, %v7419_v33  ;;  %vm9726_vm14 = vcmp.lt.s32.totalorder %v5015_v28, 1 }
 0x214   : > { %v7460_v50 = vsel %vm9726_vm14, %v1245_v7, %v9162_v57  ;;  %vm9727_vm10 = vcmp.lt.s32.totalorder %v5015_v28, 7  ;;  %v7469_v15 = vadd.f32 %v7416_v59, %v853_v9  ;;  %v7472_v35 = vadd.f32 %v7416_v59, %v856_v36  ;;  %vm9731_vm13 = vmmov %vm9726_vm14 }
 0x215   : > { %v7466_v63 = vsel %vm9727_vm10, %v1670_v10, %v9164_v6  ;;  %v7475_v3 = vadd.s32 200, %v5015_v28  ;;  %v4118_v51 = vsel %vm7426_vm1, 1.0, %v9259_v32  ;;  %v1603_v54 = vmul.f32 %v3992_v45, %v1113_v20  ;;  %vm9733_vm5 = vmmov %vm9731_vm13 }
 0x216   : > { %9728 = vst [vmem:[#allocation31_spill] sm:$0xff] %v7466_v63  ;;  %9729 = vst [vmem:[#allocation16_spill] sm:$0xff] %v7469_v15  ;;  %v1669_v57 = vrot.slane %v1113_v20, 1  ;;  %v1506_v33 = vmul.f32 %v5185_v11, %v1470_v31  ;;  %v7483_v6 = vsel %vm9731_vm13, %v1244_v30, %v1245_v7  ;;  %v4116_v36 = vsel %vm7441_vm8, 1.0, %v9259_v32 }
 0x217   : > { %9730 = vst [vmem:[#allocation27_spill] sm:$0xff] %v7472_v35  ;;  %v4180_v9 = vsel %vm2716_vm7, 1.0, %v9259_v32  ;;  %v1898_v12 = vmul.f32 %v9474_v5, %v1862_v13  ;;  %v2454_v60 = vmul.f32 %v4118_v51, %v7460_v50  ;;  %v9732_v46 = vrot.slane %v7156_v62, 7  ;;  %vm9734_vm0 = vmmov %vm9727_vm10 }
 0x218   : > { %4686 = vpow2.f32 %v3963_v55  ;;  %v2618_v31 = vmul.f32 %v4118_v51, %v7422_v37  ;;  %v3961_v61 = vmul.f32 -1.442695, %v7469_v15  ;;  %v3964_v8 = vmul.f32 -1.442695, %v7472_v35  ;;  %vm9736_vm3 = vmmov %vm9734_vm0 }
 0x219   : > { %v1266_v19 = vsel %vm9733_vm5, %v9732_v46, %v1244_v30  ;;  %v2813_v32 = vmul.f32 %v7150_v23, %v7466_v63  ;;  %v1639_v13 = vmul.f32 %v9357_v52, %v1603_v54  ;;  %v7503_v17 = vsel %vm9734_vm0, %v1669_v57, %v1670_v10  ;;  %vm2718_vm5 = vmand %vm7426_vm1, %vm7306_vm9 }
 0x21a   : > { %v1471_v7 = vmul.f32 %v3992_v45, %v1266_v19  ;;  %v9735_v2 = vrot.slane %v7156_v62, 1  ;;  %v2032_v46 = vmul.f32 %v5220_v39, %v7460_v50  ;;  %v2100_v45 = vmul.f32 %v9663_v44, %v7422_v37 }
 0x21b   : > { %v2490_v51 = vmul.f32 %v5235_v24, %v2454_v60  ;;  %v1995_v10 = vmul.f32 %v4076_v41, %v7483_v6  ;;  %v2030_v54 = vmul.f32 %v5220_v39, %v1266_v19  ;;  %v2098_v62 = vmul.f32 %v9663_v44, %v1113_v20 }
 0x21c   : > { %v1691_v30 = vsel %vm9736_vm3, %v9735_v2, %v1669_v57  ;;  %v1507_v55 = vmul.f32 %v5185_v11, %v1471_v7  ;;  %v2263_v2 = vmul.f32 %v5228_v16, %v7466_v63  ;;  %v2654_v57 = vmul.f32 %v5111_v14, %v2618_v31 }
 0x21d   : > { %v1863_v23 = vmul.f32 %v7169_v42, %v1691_v30  ;;  %v2849_v7 = vmul.f32 %v6946_v53, %v2813_v32  ;;  %v2062_v42 = vadd.f32 %v2030_v54, %v1505_v21  ;;  %v2130_v60 = vadd.f32 %v2098_v62, %v7395_v1 }
 0x21e   : > { %v7523_v15 = vadd.f32 %v2032_v46, %v1507_v55  ;;  %v7527_v11 = vadd.f32 %v2100_v45, %v1639_v13  ;;  %v2226_v41 = vmul.f32 %v7390_v29, %v7503_v17  ;;  %v2261_v44 = vmul.f32 %v5228_v16, %v1691_v30 }
 0x21f   : > { %v1899_v35 = vmul.f32 %v9474_v5, %v1863_v23  ;;  %v2452_v63 = vmul.f32 %v4116_v36, %v1266_v19  ;;  %v9740_v31 = vshra.s32 %v7330_v18, 4  ;;  %v2031_v32 = vmul.f32 %v5220_v39, %v1995_v10 }
 0x220   : > { %9737 = vst [vmem:[#allocation58_spill] sm:$0xff] %v7523_v15  ;;  %9738 = vst [vmem:[#allocation59_spill] sm:$0xff] %v7527_v11  ;;  %v2453_v21 = vmul.f32 %v7398_v43, %v7483_v6  ;;  %v2522_v1 = vadd.f32 %v2490_v51, %v2062_v42  ;;  %v2616_v13 = vmul.f32 %v4116_v36, %v1113_v20  ;;  %4688 = vpow2.f32 %v3961_v61 }
 0x221   : > { %v7532_v37 = vadd.f32 %v2263_v2, %v1899_v35  ;;  %vm7536_vm8 = vcmp.ge.s32.totalorder %v9740_v31, 1  ;;  %v2262_v29 = vmul.f32 %v5228_v16, %v2226_v41  ;;  %v2293_v45 = vadd.f32 %v2261_v44, %v1897_v27  ;;  %v9746_v41 = vld [vmem:[#allocation18_spill] sm:$0xff] }
 0x222   : > { %v2488_v35 = vmul.f32 %v5235_v24, %v2452_v63  ;;  %v2686_v55 = vadd.f32 %v2654_v57, %v2130_v60  ;;  %v4687_v19 = vpop.eup %4686  ;;  %v2489_v23 = vmul.f32 %v5235_v24, %v2453_v21  ;;  %v2652_v54 = vmul.f32 %v5111_v14, %v2616_v13 }
 0x223   : > { %9739 = vst [vmem:[#allocation74_spill] sm:$0xff] %v7532_v37  ;;  %v2811_v62 = vmul.f32 %v7248_v49, %v1691_v30  ;;  %v2812_v10 = vmul.f32 %v4180_v9, %v7503_v17  ;;  %v7549_v2 = vadd.f32 %v2262_v29, %v1898_v12  ;;  %v2881_v20 = vadd.f32 %v2849_v7, %v2293_v45  ;;  %v9831_v37 = vld [vmem:[#allocation27_spill] sm:$0xff] }
 0x224   : > { %v2520_v43 = vadd.f32 %v2488_v35, %v7126_v40  ;;  %v7552_v36 = vadd.f32 %v2686_v55, %v2522_v1  ;;  %v2521_v44 = vadd.f32 %v2489_v23, %v7261_v22  ;;  %v2684_v27 = vadd.f32 %v2652_v54, %v7120_v26  ;;  %v9752_v1 = vld [vmem:[#allocation8_spill] sm:$0xff]  ;;  %v9782_v23 = vld [vmem:[#allocation41_spill] sm:$0xff] }
 0x225   : > { %v2847_v63 = vmul.f32 %v6946_v53, %v2811_v62  ;;  %v2848_v51 = vmul.f32 %v6946_v53, %v2812_v10  ;;  %v9743_v57 = vand.u32 15, %v7330_v18  ;;  %v1022_v12 = vadd.f32 1.0, %v4687_v19  ;;  %v9759_v19 = vld [vmem:[#allocation46_spill] sm:$0xff] }
 0x226   : > { %v7564_v40 = vadd.f32 %v2031_v32, %v1506_v33  ;;  %v2912_v30 = vadd.f32 %v2684_v27, %v2520_v43  ;;  %v2913_v26 = vadd.f32 %v7272_v48, %v2521_v44  ;;  %v9180_v7 = vshra.s32 %v7475_v3, 4  ;;  %v9750_v48 = vld [vmem:[#allocation23_spill] sm:$0xff]  ;;  %v9766_v43 = vld [vmem:[#allocation24_spill] sm:$0xff] }
 0x227   : > { %vm7560_vm7 = vcmp.ge.s32.totalorder %v9743_v57, 1  ;;  %v2879_v9 = vadd.f32 %v2847_v63, %v7130_v4  ;;  %v2880_v22 = vadd.f32 %v2848_v51, %v7290_v38  ;;  %v1216_v42 = vand.u32 15, %v7475_v3  ;;  %v9768_v44 = vld [vmem:[#allocation60_spill] sm:$0xff]  ;;  %v9770_v63 = vld [vmem:[#allocation14_spill] sm:$0xff] }
 0x228   : > { %v1214_v60 = vand.u32 15, %v7295_v34  ;;  %v854_v31 = vmul.f32 %v7364_v58, %v9746_v41  ;;  %v7579_v4 = vadd.f32 %v2913_v26, %v2881_v20  ;;  %4690 = vpow2.f32 %v3964_v8  ;;  %v9754_v8 = vld [vmem:[#allocation34_spill] sm:$0xff]  ;;  %vm1376_vm14 = vmand %vm7536_vm8, %vm7560_vm7 }
 0x229   : > { %v7575_v61 = vadd.f32 %v7316_v25, %v2879_v9  ;;  %v7577_v33 = vadd.f32 %v2912_v30, %v2880_v22  ;;  %4692 = vpow2.f32 %v7377_v0  ;;  %v2969_v38 = vmul.f32 %v7228_v47, %v9750_v48  ;;  %v9772_v9 = vld [vmem:[#allocation75_spill] sm:$0xff] }
 0x22a   : > { %9749 = vst [vmem:[#allocation76_spill] sm:$0xff] %v7579_v4  ;;  %v7585_v32 = vadd.s32 224, %v5015_v28  ;;  %v7588_v21 = vadd.f32 %v7416_v59, %v854_v31  ;;  %v7592_v25 = vmul.f32 %v5111_v14, %v7341_v56  ;;  %v7596_v13 = vmul.f32 %v5235_v24, %v9752_v1  ;;  %v4689_v26 = vpop.eup %4688 }
 0x22b   : > { %9747 = vst [vmem:[#allocation35_spill] sm:$0xff] %v7575_v61  ;;  %9748 = vst [vmem:[#allocation18_spill] sm:$0xff] %v7577_v33  ;;  %v7600_v0 = vmul.f32 %v6946_v53, %v9754_v8  ;;  %4694 = vrcp.f32 %v1022_v12  ;;  %v9756_v29 = vmov 0.0   ;;  %vm7611_vm10 = vcmp.le.s32.totalorder %v1216_v42, 14 }
 0x22c   : > { %9751 = vst [vmem:[#allocation23_spill] sm:$0xff] %v7592_v25  ;;  %9753 = vst [vmem:[#allocation8_spill] sm:$0xff] %v7596_v13  ;;  %v7609_v45 = vsel %vm7536_vm8, 1.0, %v9756_v29  ;;  %v1219_v35 = vand.u32 15, %v7585_v32  ;;  %v3962_v55 = vmul.f32 -1.442695, %v7588_v21  ;;  %4696 = vpow2.f32 %v9759_v19 }
 0x22d   : > { %9755 = vst [vmem:[#allocation34_spill] sm:$0xff] %v7600_v0  ;;  %vm7620_vm13 = vcmp.ge.s32.totalorder %v9180_v7, 1  ;;  %vm7628_vm0 = vcmp.le.s32.totalorder %v1214_v60, 14  ;;  %v7633_v10 = vadd.s32 208, %v5015_v28  ;;  %v7636_v20 = vadd.f32 %v9766_v43, %v2969_v38  ;;  %v9808_v0 = vld [vmem:[#allocation48_spill] sm:$0xff] }
 0x22e   : > { %v7640_v27 = vmul.f32 %v7228_v47, %v9768_v44  ;;  %v7644_v51 = vmul.f32 %v7228_v47, %v9770_v63  ;;  %v9179_v57 = vshra.s32 %v7585_v32, 4  ;;  %v3993_v12 = vsel %vm1376_vm14, 1.0, %v9756_v29  ;;  %vm1770_vm9 = vmand %vm7620_vm13, %vm7611_vm10 }
 0x22f   : > { %9767 = vst [vmem:[#allocation46_spill] sm:$0xff] %v7636_v20  ;;  %v1604_v22 = vmul.f32 %v7609_v45, %v9772_v9  ;;  %v7653_v30 = vsel %vm7560_vm7, 1.0, %v9756_v29  ;;  %4698 = vpow2.f32 %v3962_v55  ;;  %v3994_v42 = vsel %vm7620_vm13, 1.0, %v9756_v29  ;;  %vm1768_vm1 = vmand %vm7405_vm6, %vm7628_vm0  ;;  %v9783_v9 = vld [vmem:[#allocation21_spill] sm:$0xff] }
 0x230   : > { %9769 = vst [vmem:[#allocation19_spill] sm:$0xff] %v7640_v27  ;;  %9771 = vst [vmem:[#allocation64_spill] sm:$0xff] %v7644_v51  ;;  %v7663_v60 = vsel %vm2718_vm5, 1.0, %v9756_v29  ;;  %vm7669_vm3 = vcmp.ge.s32.totalorder %v1219_v35, 1  ;;  %v9774_v31 = vmov 0  ;;  %v9777_v48 = vshra.s32 %v7330_v18, 4 }
 0x231   : > { %v9775_v31 = vsel %vm7669_vm3, 4294967295, %v9774_v31  ;;  %v7682_v1 = vsel %vm7611_vm10, 1.0, %v9756_v29  ;;  %v1020_v8 = vadd.f32 1.0, %v4689_v26  ;;  %v1217_v55 = vand.u32 15, %v7633_v10  ;;  %v9809_v51 = vld [vmem:[#allocation31_spill] sm:$0xff] }
 0x232   : > { %9776 = vst [vmem:[#allocation60_spill] sm:$0xff] %v9775_v31  ;;  %vm7675_vm8 = vcmp.le.s32.totalorder %v9777_v48, 14  ;;  %v7691_v18 = vsel %vm1770_vm9, 1.0, %v9756_v29  ;;  %v7696_v19 = vsel %vm7628_vm0, 1.0, %v9756_v29  ;;  %vm7700_vm14 = vcmp.ge.s32.totalorder %v9179_v57, 1  ;;  %v4691_v46 = vpop.eup %4690  ;;  %v9787_v48 = vld [vmem:[#allocation54_spill] sm:$0xff] }
 0x233   : > { %vm2361_vm6 = vmand %vm7675_vm8, %vm7560_vm7  ;;  %v859_v54 = vmul.f32 %v7364_v58, %v9782_v23  ;;  %v7707_v44 = vmul.f32 %v9357_v52, %v1604_v22  ;;  %v4056_v63 = vsel %vm1768_vm1, 1.0, %v9756_v29  ;;  %v9784_v26 = vshra.s32 %v9783_v9, 4  ;;  %v7722_v57 = vpop.eup %4692 }
 0x234   : > { %vm1380_vm7 = vmand %vm7700_vm14, %vm7669_vm3  ;;  %v857_v23 = vmul.f32 %v7364_v58, %v9787_v48  ;;  %9788 = vst [vmem:[#allocation14_spill] sm:$0xff] %v7722_v57  ;;  %v7725_v22 = vsel %vm2361_vm6, 1.0, %v9756_v29  ;;  %4700 = vrcp.f32 %v1020_v8  ;;  %v1023_v35 = vadd.f32 1.0, %v4691_v46 }
 0x235   : > { %vm7716_vm13 = vcmp.le.s32.totalorder %v9784_v26, 14  ;;  %v7732_v9 = vadd.s32 216, %v5015_v28  ;;  %v4695_v26 = vpop.eup %4694  ;;  %v7737_v48 = vsel %vm7700_vm14, 1.0, %v9756_v29  ;;  %v7742_v4 = vsel %vm7675_vm8, 1.0, %v9756_v29 }
 0x236   : > { %vm2359_vm5 = vmand %vm7716_vm13, %vm7332_vm4  ;;  %9791 = vst [vmem:[#allocation47_spill] sm:$0xff] %v7737_v48  ;;  %v9792_v7 = vshra.s32 %v7633_v10, 4  ;;  %vm7750_vm4 = vcmp.ge.s32.totalorder %v1217_v55, 1  ;;  %v9795_v46 = vmov 0  ;;  %v7757_v33 = vsel %vm7669_vm3, 1.0, %v9756_v29  ;;  %v7763_v57 = vpop.eup %4696 }
 0x237   : > { %9790 = vst [vmem:[#allocation75_spill] sm:$0xff] %v7732_v9  ;;  %v9796_v46 = vsel %vm7750_vm4, 4294967295, %v9795_v46  ;;  %9798 = vst [vmem:[#allocation21_spill] sm:$0xff] %v7757_v33  ;;  %4702 = vrcp.f32 %v1023_v35  ;;  %v1218_v38 = vand.u32 15, %v7732_v9  ;;  %v7761_v61 = vadd.f32 %v7416_v59, %v859_v54  ;;  %v9824_v33 = vld [vmem:[#allocation7_spill] sm:$0xff] }
 0x238   : > { %vm7746_vm9 = vcmp.ge.s32.totalorder %v9792_v7, 1  ;;  %9797 = vst [vmem:[#allocation41_spill] sm:$0xff] %v9796_v46  ;;  %9800 = vst [vmem:[#allocation63_spill] sm:$0xff] %v7763_v57  ;;  %v7771_v55 = vsel %vm1380_vm7, 1.0, %v9756_v29  ;;  %v7774_v7 = vsel %vm2359_vm5, 1.0, %v9756_v29  ;;  %v7779_v35 = vsel %vm7716_vm13, 1.0, %v9756_v29 }
 0x239   : > { %9799 = vst [vmem:[#allocation54_spill] sm:$0xff] %v7761_v61  ;;  %9801 = vst [vmem:[#allocation77_spill] sm:$0xff] %v7771_v55  ;;  %v7782_v54 = vadd.f32 %v7416_v59, %v857_v23  ;;  %v9804_v57 = vld [vmem:[#allocation66_spill] sm:$0xff]  ;;  %v7794_v49 = vsel %vm7746_vm9, 1.0, %v9756_v29  ;;  %v9805_v41 = vshra.s32 %v7475_v3, 4  ;;  %v9185_v23 = vshra.s32 %v7732_v9, 4 }
 0x23a   : > { %9802 = vst [vmem:[#allocation78_spill] sm:$0xff] %v7779_v35  ;;  %v7785_v25 = vmul.f32 %v4695_v26, %v9804_v57  ;;  %vm1378_vm1 = vmand %vm7746_vm9, %vm7750_vm4  ;;  %v4699_v57 = vpop.eup %4698  ;;  %v1473_v26 = vmul.f32 %v3994_v42, %v7460_v50  ;;  %v1605_v13 = vmul.f32 %v3994_v42, %v9808_v0  ;;  %v1865_v43 = vmul.f32 %v7609_v45, %v9809_v51 }
 0x23b   : > { %9803 = vst [vmem:[#allocation79_spill] sm:$0xff] %v7782_v54  ;;  %vm7798_vm8 = vcmp.le.s32.totalorder %v9805_v41, 14  ;;  %v7810_v8 = vsel %vm7750_vm4, 1.0, %v9756_v29  ;;  %v1472_v3 = vmul.f32 %v3993_v12, %v7483_v6  ;;  %v1864_v41 = vmul.f32 %v4056_v63, %v7503_v17 }
 0x23c   : > { %vm2722_vm6 = vmand %vm7798_vm8, %vm7611_vm10  ;;  %vm7818_vm14 = vcmp.le.s32.totalorder %v1218_v38, 14  ;;  %v9810_v50 = vmov 0  ;;  %v3967_v45 = vmul.f32 -1.442695, %v7761_v61  ;;  %v7824_v51 = vsel %vm1378_vm1, 1.0, %v9756_v29 }
 0x23d   : > { %v9811_v50 = vsel %vm7818_vm14, 4294967295, %v9810_v50  ;;  %v7829_v6 = vsel %vm7798_vm8, 1.0, %v9756_v29  ;;  %v9813_v17 = vshra.s32 %v7295_v34, 4  ;;  %v3965_v12 = vmul.f32 -1.442695, %v7782_v54  ;;  %v9818_v34 = vld [vmem:[#allocation49_spill] sm:$0xff] }
 0x23e   : > { %9812 = vst [vmem:[#allocation66_spill] sm:$0xff] %v9811_v50  ;;  %v2621_v42 = vmul.f32 %v7742_v4, %v7785_v25  ;;  %v1021_v63 = vadd.f32 1.0, %v4699_v57  ;;  %vm7842_vm10 = vcmp.ge.s32.totalorder %v9185_v23, 1  ;;  %v860_v31 = vmul.f32 %v7364_v58, %v9818_v34  ;;  %v4701_v62 = vpop.eup %4700 }
 0x23f   : > { %vm7833_vm7 = vcmp.le.s32.totalorder %v9813_v17, 14  ;;  %v9819_v17 = vld [vmem:[#allocation12_spill] sm:$0xff]  ;;  %v7856_v47 = vmul.f32 %v9357_v52, %v1605_v13  ;;  %v7859_v57 = vmul.f32 %v9474_v5, %v1865_v43  ;;  %v7862_v23 = vsel %vm2722_vm6, 1.0, %v9756_v29 }
 0x240   : > { %vm2720_vm13 = vmand %vm7833_vm7, %vm7628_vm0  ;;  %v7853_v27 = vmul.f32 %v9819_v17, %v1473_v26  ;;  %9820 = vst [vmem:[#allocation48_spill] sm:$0xff] %v7862_v23  ;;  %v1508_v34 = vmul.f32 %v9819_v17, %v1472_v3  ;;  %v1900_v26 = vmul.f32 %v9474_v5, %v1864_v41  ;;  %v7873_v13 = vsel %vm7833_vm7, 1.0, %v9756_v29  ;;  %v9821_v43 = vld [vmem:[#allocation16_spill] sm:$0xff] }
 0x241   : > { %vm1772_vm0 = vmand %vm7842_vm10, %vm7818_vm14  ;;  %4704 = vpow2.f32 %v3967_v45  ;;  %v7876_v9 = vmul.f32 %v4701_v62, %v9821_v43  ;;  %v7881_v20 = vsel %vm7842_vm10, 1.0, %v9756_v29  ;;  %v7884_v23 = vsel %vm2720_vm13, 1.0, %v9756_v29  ;;  %v4703_v3 = vpop.eup %4702 }
 0x242   : > { %9822 = vst [vmem:[#allocation31_spill] sm:$0xff] %v7884_v23  ;;  %4706 = vpow2.f32 %v3965_v12  ;;  %v2657_v41 = vmul.f32 %v5111_v14, %v2621_v42  ;;  %v7888_v56 = vsel %vm1772_vm0, 1.0, %v9756_v29  ;;  %v7891_v45 = vadd.f32 %v7416_v59, %v860_v31 }
 0x243   : > { %4708 = vrcp.f32 %v1021_v63  ;;  %9823 = vst [vmem:[#allocation49_spill] sm:$0xff] %v7888_v56  ;;  %v1606_v38 = vmul.f32 %v7794_v49, %v7876_v9  ;;  %v2101_v12 = vmul.f32 %v9824_v33, %v7876_v9  ;;  %v9825_v55 = vshra.s32 %v5015_v28, 4 }
 0x244   : > { %v9828_v63 = vshra.s32 %v7585_v32, 4  ;;  %v2103_v43 = vmul.f32 %v9824_v33, %v7785_v25  ;;  %v2619_v56 = vmul.f32 %v7779_v35, %v7876_v9  ;;  %v7917_v54 = vmul.f32 %v4703_v3, %v9831_v37 }
 0x245   : > { %vm7901_vm5 = vcmp.ge.s32.totalorder %v9825_v55, 1  ;;  %v9832_v55 = vrot.slane %v7876_v9, 7  ;;  %v9833_v61 = vrot.slane %v9808_v0, 7  ;;  %vm9834_vm1 = vcmp.lt.s32.totalorder %v5015_v28, 1 }
 0x246   : > { %vm7907_vm9 = vcmp.le.s32.totalorder %v9828_v63, 14  ;;  %v1642_v63 = vmul.f32 %v9357_v52, %v1606_v38  ;;  %v9835_v62 = vrot.slane %v7876_v9, 1  ;;  %v9836_v46 = vrot.slane %v9808_v0, 1  ;;  %vm9845_vm7 = vmmov %vm9834_vm1 }
 0x247   : > { %v1263_v32 = vsel %vm9834_vm1, %v9833_v61, %v9832_v55  ;;  %vm9837_vm8 = vcmp.lt.s32.totalorder %v5015_v28, 7  ;;  %v2133_v23 = vadd.f32 %v2101_v12, %v7707_v44  ;;  %v1608_v37 = vmul.f32 %v7737_v48, %v7785_v25  ;;  %v9839_v12 = vld [vmem:[#allocation5_spill] sm:$0xff]  ;;  %vm9854_vm0 = vmmov %vm9834_vm1 }
 0x248   : > { %v1688_v15 = vsel %vm9837_vm8, %v9836_v46, %v9835_v62  ;;  %v1997_v3 = vmul.f32 %v7653_v30, %v1263_v32  ;;  %v3968_v61 = vmul.f32 -1.442695, %v7891_v45  ;;  %v7938_v55 = vadd.f32 %v2103_v43, %v1642_v63  ;;  %v9843_v63 = vld [vmem:[#allocation36_spill] sm:$0xff]  ;;  %vm9847_vm10 = vmmov %vm9837_vm8 }
 0x249   : > { %v2228_v35 = vmul.f32 %v7696_v19, %v1688_v15  ;;  %v2455_v38 = vmul.f32 %v7774_v7, %v1263_v32  ;;  %v2655_v0 = vmul.f32 %v5111_v14, %v2619_v56  ;;  %v7942_v11 = vadd.f32 %v2657_v41, %v2133_v23  ;;  %vm9856_vm1 = vmmov %vm9854_vm0 }
 0x24a   : > { %9838 = vst [vmem:[#allocation12_spill] sm:$0xff] %v7938_v55  ;;  %v1674_v46 = vrot.slane %v7785_v25, 1  ;;  %v2033_v44 = vmul.f32 %v5220_v39, %v1997_v3  ;;  %v9840_v30 = vshra.s32 %v9839_v12, 4  ;;  %v2814_v56 = vmul.f32 %v7663_v60, %v1688_v15 }
 0x24b   : > { %v2264_v62 = vmul.f32 %v5228_v16, %v2228_v35  ;;  %v2491_v43 = vmul.f32 %v5235_v24, %v2455_v38  ;;  %v2687_v7 = vadd.f32 %v2655_v0, %v9843_v63  ;;  %v9194_v23 = vrot.slane %v7917_v54, 7  ;;  %v4705_v41 = vpop.eup %4704 }
 0x24c   : > { %vm7949_vm6 = vcmp.ge.s32.totalorder %v9840_v30, 1  ;;  %v7957_v48 = vadd.f32 %v2033_v44, %v1508_v34  ;;  %v9193_v35 = vrot.slane %v7917_v54, 1  ;;  %4710 = vpow2.f32 %v3968_v61  ;;  %v4707_v12 = vpop.eup %4706  ;;  %v9846_v34 = vld [vmem:[#allocation4_spill] sm:$0xff] }
 0x24d   : > { %v7959_v3 = vadd.f32 %v2264_v62, %v1900_v26  ;;  %v2523_v30 = vadd.f32 %v2491_v43, %v7564_v40  ;;  %v2850_v55 = vmul.f32 %v6946_v53, %v2814_v56  ;;  %v9844_v38 = vrot.slane %v7785_v25, 7  ;;  %v4709_v0 = vpop.eup %4708 }
 0x24e   : > { %v858_v26 = vmul.f32 %v7364_v58, %v9846_v34  ;;  %v1474_v44 = vmul.f32 %v7824_v51, %v1263_v32  ;;  %v1866_v61 = vmul.f32 %v7691_v18, %v1688_v15  ;;  %v7980_v53 = vsel %vm9847_vm10, %v1674_v46, %v9193_v35 }
 0x24f   : > { %v7970_v60 = vsel %vm9845_vm7, %v9844_v38, %v9194_v23  ;;  %9848 = vst [vmem:[#allocation16_spill] sm:$0xff] %v7980_v53  ;;  %v9849_v40 = vshra.s32 %v7633_v10, 4  ;;  %v2882_v43 = vadd.f32 %v2850_v55, %v7549_v2  ;;  %v7989_v58 = vadd.f32 %v2687_v7, %v2523_v30  ;;  %vm9858_vm7 = vmmov %vm9837_vm8 }
 0x250   : > { %v7994_v15 = vsel %vm7818_vm14, 1.0, %v9756_v29  ;;  %v1026_v18 = vadd.f32 1.0, %v4705_v41  ;;  %v7997_v51 = vmul.f32 %v9357_v52, %v1608_v37  ;;  %v8002_v10 = vsel %vm7901_vm5, 1.0, %v9756_v29 }
 0x251   : > { %vm7984_vm13 = vcmp.le.s32.totalorder %v9849_v40, 14  ;;  %v8007_v2 = vsel %vm7907_vm9, 1.0, %v9756_v29  ;;  %v8012_v32 = vsel %vm7949_vm6, 1.0, %v9756_v29  ;;  %v8015_v55 = vadd.f32 %v7552_v36, %v2882_v43 }
 0x252   : > { %v2458_v37 = vmul.f32 %v7829_v6, %v7970_v60  ;;  %v8022_v63 = vsel %vm7984_vm13, 1.0, %v9756_v29  ;;  %v8025_v7 = vadd.f32 %v7416_v59, %v858_v26  ;;  %v8028_v56 = vmul.f32 %v9819_v17, %v1474_v44  ;;  %vm2363_vm10 = vmand %vm7984_vm13, %vm7750_vm4 }
 0x253   : > { %9852 = vst [vmem:[#allocation7_spill] sm:$0xff] %v8015_v55  ;;  %v1902_v41 = vmul.f32 %v9474_v5, %v1866_v61  ;;  %v1117_v30 = vmul.f32 %v4709_v0, %v7588_v21  ;;  %v1024_v36 = vadd.f32 1.0, %v4707_v12  ;;  %v2036_v38 = vmul.f32 %v5220_v39, %v7970_v60  ;;  %vm9879_vm13 = vmmov %vm9854_vm0 }
 0x254   : > { %v2104_v34 = vmul.f32 %v9824_v33, %v7917_v54  ;;  %v2622_v40 = vmul.f32 %v7829_v6, %v7917_v54  ;;  %4712 = vrcp.f32 %v1026_v18  ;;  %v2267_v21 = vmul.f32 %v5228_v16, %v7980_v53 }
 0x255   : > { %v1248_v59 = vrot.slane %v1117_v30, 7  ;;  %v1607_v26 = vmul.f32 %v7881_v20, %v1117_v30  ;;  %v1673_v44 = vrot.slane %v1117_v30, 1  ;;  %v2102_v43 = vmul.f32 %v9824_v33, %v1117_v30 }
 0x256   : > { %v2494_v12 = vmul.f32 %v5235_v24, %v2458_v37  ;;  %v2817_v0 = vmul.f32 %v7742_v4, %v7980_v53  ;;  %4714 = vrcp.f32 %v1024_v36  ;;  %v4711_v61 = vpop.eup %4710  ;;  %v9853_v35 = vrot.slane %v7785_v25, 7 }
 0x257   : > { %v9855_v18 = vrot.slane %v7876_v9, 7  ;;  %v1643_v55 = vmul.f32 %v9357_v52, %v1607_v26  ;;  %v8058_v37 = vsel %vm9837_vm8, %v1673_v44, %v1674_v46  ;;  %v2658_v4 = vmul.f32 %v5111_v14, %v2622_v40 }
 0x258   : > { %v8049_v6 = vsel %vm9854_vm0, %v1248_v59, %v9853_v35  ;;  %v9857_v25 = vrot.slane %v7876_v9, 1  ;;  %v2620_v53 = vmul.f32 %v7873_v13, %v1117_v30  ;;  %v2134_v46 = vadd.f32 %v2102_v43, %v7856_v47  ;;  %vm9881_vm0 = vmmov %vm9858_vm7 }
 0x259   : > { %v1262_v23 = vsel %vm9856_vm1, %v9855_v18, %v1248_v59  ;;  %v1999_v59 = vmul.f32 %v7810_v8, %v8049_v6  ;;  %v1027_v30 = vadd.f32 1.0, %v4711_v61  ;;  %v2230_v47 = vmul.f32 %v7682_v1, %v8058_v37 }
 0x25a   : > { %v1475_v36 = vmul.f32 %v7881_v20, %v1262_v23  ;;  %v1687_v35 = vsel %vm9858_vm7, %v9857_v25, %v1673_v44  ;;  %v2034_v26 = vmul.f32 %v5220_v39, %v1262_v23  ;;  %v8075_v20 = vld [vmem:[%s9005_s4 + $0x8] ss:$0 sm:$0xff]  ;;  %v8079_v44 = vadd.f32 %v2104_v34, %v1643_v55  ;;  %vm9896_vm7 = vmmov %vm9881_vm0 }
 0x25b   : > { %v1867_v50 = vmul.f32 %v7794_v49, %v1687_v35  ;;  %v2853_v9 = vmul.f32 %v8075_v20, %v2817_v0  ;;  %v2035_v8 = vmul.f32 %v5220_v39, %v1999_v59  ;;  %v2265_v25 = vmul.f32 %v5228_v16, %v1687_v35 }
 0x25c   : > { %v1511_v40 = vmul.f32 %v9819_v17, %v1475_v36  ;;  %9859 = vst [vmem:[#allocation27_spill] sm:$0xff] %v8079_v44  ;;  %v2066_v18 = vadd.f32 %v2034_v26, %v7853_v27  ;;  %v2456_v0 = vmul.f32 %v7873_v13, %v1262_v23  ;;  %v2457_v55 = vmul.f32 %v7725_v22, %v8049_v6  ;;  %v9860_v13 = vld [vmem:[#allocation59_spill] sm:$0xff]  ;;  %v9861_v22 = vld [vmem:[#allocation78_spill] sm:$0xff] }
 0x25d   : > { %v1903_v49 = vmul.f32 %v9474_v5, %v1867_v50  ;;  %v2266_v34 = vmul.f32 %v5228_v16, %v2230_v47  ;;  %v2656_v36 = vmul.f32 %v5111_v14, %v2620_v53  ;;  %v2297_v59 = vadd.f32 %v2265_v25, %v7859_v57 }
 0x25e   : > { %v8086_v43 = vadd.f32 %v2036_v38, %v1511_v40  ;;  %v2526_v50 = vadd.f32 %v2494_v12, %v2066_v18  ;;  %v4713_v27 = vpop.eup %4712  ;;  %v2492_v1 = vmul.f32 %v5235_v24, %v2456_v0  ;;  %v2493_v38 = vmul.f32 %v5235_v24, %v2457_v55  ;;  %v9863_v18 = vld [vmem:[#allocation58_spill] sm:$0xff]  ;;  %v9866_v55 = vld [vmem:[#allocation79_spill] sm:$0xff] }
 0x25f   : > { %v8093_v61 = vadd.f32 %v2267_v21, %v1903_v49  ;;  %v2690_v26 = vadd.f32 %v2658_v4, %v2134_v46  ;;  %v8099_v40 = vadd.f32 %v2266_v34, %v1902_v41  ;;  %v2688_v23 = vadd.f32 %v2656_v36, %v9860_v13  ;;  %v9862_v21 = vld [vmem:[#allocation31_spill] sm:$0xff] }
 0x260   : > { %v2815_v44 = vmul.f32 %v9861_v22, %v1687_v35  ;;  %v2816_v49 = vmul.f32 %v9862_v21, %v8058_v37  ;;  %v4715_v12 = vpop.eup %4714  ;;  %v2524_v53 = vadd.f32 %v2492_v1, %v9863_v18  ;;  %v2525_v47 = vadd.f32 %v2493_v38, %v7957_v48  ;;  %v9865_v35 = vld [vmem:[#allocation54_spill] sm:$0xff]  ;;  %v9875_v22 = vld [vmem:[#allocation77_spill] sm:$0xff] }
 0x261   : > { %v2885_v57 = vadd.f32 %v2853_v9, %v2297_v59  ;;  %v8107_v25 = vadd.f32 %v2690_v26, %v2526_v50  ;;  %v8116_v46 = vmul.f32 %v4713_v27, %v9865_v35  ;;  %v8119_v34 = vmul.f32 %v4715_v12, %v9866_v55  ;;  %v9867_v50 = vld [vmem:[#allocation74_spill] sm:$0xff]  ;;  %v9869_v26 = vld [vmem:[#allocation11_spill] sm:$0xff] }
 0x262   : > { %v2851_v41 = vmul.f32 %v8075_v20, %v2815_v44  ;;  %v2852_v4 = vmul.f32 %v8075_v20, %v2816_v49  ;;  %v2916_v36 = vadd.f32 %v2688_v23, %v2524_v53  ;;  %v2917_v48 = vadd.f32 %v7942_v11, %v2525_v47  ;;  %v9877_v47 = vld [vmem:[#allocation67_spill] sm:$0xff] }
 0x263   : > { %v2067_v9 = vadd.f32 %v2035_v8, %v8028_v56  ;;  %4716 = vrcp.f32 %v1027_v30  ;;  %v1580_v44 = vmul.f32 %v8002_v10, %v8116_v46  ;;  %v4123_v1 = vsel %vm2363_vm10, 1.0, %v9756_v29  ;;  %vm9898_vm10 = vmmov %vm9881_vm0 }
 0x264   : > { %v2883_v59 = vadd.f32 %v2851_v41, %v9867_v50  ;;  %v2884_v62 = vadd.f32 %v2852_v4, %v7959_v3  ;;  %v8128_v27 = vadd.f32 %v2917_v48, %v2885_v57  ;;  %v2625_v38 = vmul.f32 %v8007_v2, %v8116_v46  ;;  %v9883_v50 = vld [vmem:[#allocation68_spill] sm:$0xff] }
 0x265   : > { %v9870_v13 = vshra.s32 %v9869_v26, 4  ;;  %v3966_v56 = vmul.f32 -1.442695, %v8025_v7  ;;  %v1616_v8 = vmul.f32 %v9357_v52, %v1580_v44  ;;  %v9199_v23 = vrot.slane %v8119_v34, 7 }
 0x266   : > { %9868 = vst [vmem:[#allocation5_spill] sm:$0xff] %v8128_v27  ;;  %v8140_v3 = vadd.f32 %v7989_v58, %v2883_v59  ;;  %v8142_v30 = vadd.f32 %v2916_v36, %v2884_v62  ;;  %v1476_v21 = vmul.f32 %v9875_v22, %v8049_v6  ;;  %v1610_v49 = vmul.f32 %v8012_v32, %v8119_v34  ;;  %v9876_v58 = vld [vmem:[#allocation49_spill] sm:$0xff] }
 0x267   : > { %vm8134_vm4 = vcmp.ge.s32.totalorder %v9870_v13, 1  ;;  %v9197_v12 = vrot.slane %v8119_v34, 1  ;;  %v2105_v18 = vmul.f32 %v9824_v33, %v8119_v34  ;;  %v1868_v53 = vmul.f32 %v9876_v58, %v8058_v37  ;;  %v9882_v36 = vld [vmem:[#allocation21_spill] sm:$0xff] }
 0x268   : > { %9873 = vst [vmem:[#allocation36_spill] sm:$0xff] %v8140_v3  ;;  %9874 = vst [vmem:[#allocation4_spill] sm:$0xff] %v8142_v30  ;;  %v2109_v57 = vadd.f32 %v9877_v47, %v1616_v8  ;;  %v2661_v0 = vmul.f32 %v5111_v14, %v2625_v38  ;;  %v9878_v41 = vrot.slane %v7917_v54, 7  ;;  %v2107_v4 = vmul.f32 %v9824_v33, %v8116_v46  ;;  %v9915_v3 = vld [vmem:[#allocation17_spill] sm:$0xff] }
 0x269   : > { %v1646_v35 = vmul.f32 %v9357_v52, %v1610_v49  ;;  %v9880_v37 = vrot.slane %v7917_v54, 1  ;;  %v2137_v62 = vadd.f32 %v2105_v18, %v7997_v51  ;;  %v3970_v38 = vsel %vm8134_vm4, 1.0, %v9756_v29  ;;  %vm1746_vm1 = vmand %vm8134_vm4, %vm6759_vm2 }
 0x26a   : > { %v8163_v6 = vsel %vm9879_vm13, %v9878_v41, %v9199_v23  ;;  %v8179_v59 = vadd.f32 %v9883_v50, %v2109_v57  ;;  %v1512_v26 = vmul.f32 %v9819_v17, %v1476_v21  ;;  %v1904_v49 = vmul.f32 %v9474_v5, %v1868_v53  ;;  %v9885_v21 = vld [vmem:[#allocation48_spill] sm:$0xff]  ;;  %vm9891_vm2 = vmmov %vm9879_vm13 }
 0x26b   : > { %v8174_v55 = vsel %vm9881_vm0, %v9880_v37, %v9197_v12  ;;  %v2001_v48 = vmul.f32 %v9882_v36, %v8163_v6  ;;  %v2139_v8 = vadd.f32 %v2107_v4, %v1646_v35  ;;  %v2459_v22 = vmul.f32 %v4123_v1, %v8163_v6  ;;  %vm9894_vm8 = vmmov %vm9891_vm2 }
 0x26c   : > { %v2232_v44 = vmul.f32 %v7994_v15, %v8174_v55  ;;  %v2623_v51 = vmul.f32 %v8022_v63, %v8119_v34  ;;  %v8194_v18 = vadd.f32 %v2661_v0, %v2137_v62  ;;  %v2818_v41 = vmul.f32 %v9885_v21, %v8174_v55  ;;  %v9887_v0 = vld [vmem:[#allocation69_spill] sm:$0xff]  ;;  %v9889_v62 = vld [vmem:[#allocation12_spill] sm:$0xff] }
 0x26d   : > { %v2037_v13 = vmul.f32 %v5220_v39, %v2001_v48  ;;  %v4717_v15 = vpop.eup %4716  ;;  %v2495_v57 = vmul.f32 %v5235_v24, %v2459_v22  ;;  %4718 = vpow2.f32 %v3966_v56  ;;  %v8212_v37 = vadd.f32 %v9887_v0, %v2139_v8 }
 0x26e   : > { %v2268_v58 = vmul.f32 %v5228_v16, %v2232_v44  ;;  %9884 = vst [vmem:[#allocation59_spill] sm:$0xff] %v8194_v18  ;;  %v2659_v1 = vmul.f32 %v5111_v14, %v2623_v51  ;;  %v8205_v53 = vmul.f32 %v4717_v15, %v7891_v45  ;;  %v1156_v36 = vadd.s32 232, %v5015_v28  ;;  %v9892_v51 = vld [vmem:[#allocation25_spill] sm:$0xff] }
 0x26f   : > { %v8196_v47 = vadd.f32 %v2037_v13, %v1512_v26  ;;  %9888 = vst [vmem:[#allocation78_spill] sm:$0xff] %v8212_v37  ;;  %v9200_v48 = vrot.slane %v8116_v46, 7  ;;  %v2527_v56 = vadd.f32 %v2495_v57, %v2067_v9  ;;  %v2854_v50 = vmul.f32 %v8075_v20, %v2818_v41  ;;  %v9895_v41 = vld [vmem:[#allocation53_spill] sm:$0xff]  ;;  %v9917_v37 = vld [vmem:[#allocation70_spill] sm:$0xff] }
 0x270   : > { %v8201_v4 = vadd.f32 %v2268_v58, %v1904_v49  ;;  %v2691_v44 = vadd.f32 %v2659_v1, %v9889_v62  ;;  %v1254_v45 = vrot.slane %v8205_v53, 7  ;;  %v1581_v26 = vmul.f32 %v3970_v38, %v8205_v53 }
 0x271   : > { %v1679_v13 = vrot.slane %v8205_v53, 1  ;;  %v1220_v11 = vand.u32 15, %v1156_v36  ;;  %v9198_v22 = vrot.slane %v8116_v46, 1  ;;  %v2886_v8 = vadd.f32 %v2854_v50, %v8099_v40  ;;  %v9899_v50 = vld [vmem:[#allocation46_spill] sm:$0xff] }
 0x272   : > { %v4034_v49 = vsel %vm1746_vm1, 1.0, %v9756_v29  ;;  %v8224_v58 = vadd.f32 %v2691_v44, %v2527_v56  ;;  %v8230_v9 = vsel %vm9891_vm2, %v9200_v48, %v1254_v45  ;;  %v9893_v15 = vrot.slane %v9892_v51, 7  ;;  %v9903_v48 = vld [vmem:[#allocation19_spill] sm:$0xff]  ;;  %vm1382_vm2 = vmand %vm7949_vm6, %vm6723_vm15 }
 0x273   : > { %v1617_v21 = vmul.f32 %v9357_v52, %v1581_v26  ;;  %v1449_v40 = vmul.f32 %v3970_v38, %v8230_v9  ;;  %v8246_v35 = vsel %vm9896_vm7, %v9198_v22, %v1679_v13  ;;  %v9897_v0 = vrot.slane %v9892_v51, 1  ;;  %v9900_v26 = vld [vmem:[#allocation57_spill] sm:$0xff]  ;;  %vm9947_vm15 = vmand %vm7901_vm5, %vm6641_vm12 }
 0x274   : > { %9890 = vst [vmem:[#allocation31_spill] sm:$0xff] %v8224_v58  ;;  %v8236_v57 = vsel %vm9894_vm8, %v1254_v45, %v9893_v15  ;;  %v4201_v62 = vmul.f32 -1.442695, %v9899_v50  ;;  %v1188_v44 = vshra.s32 %v1156_v36, 4  ;;  %v1841_v38 = vmul.f32 %v8002_v10, %v8246_v35  ;;  %v9901_v15 = vld [vmem:[#allocation13_spill] sm:$0xff]  ;;  %vm9949_vm6 = vmand %vm7907_vm9, %vm7669_vm3 }
 0x275   : > { %v1450_v1 = vmul.f32 %v9895_v41, %v8236_v57  ;;  %v8252_v56 = vsel %vm9898_vm10, %v1679_v13, %v9897_v0  ;;  %v2972_v41 = vmul.f32 %v9901_v15, %v9900_v26  ;;  %v1485_v12 = vmul.f32 %v9819_v17, %v1449_v40  ;;  %v9902_v51 = vld [vmem:[#allocation37_spill] sm:$0xff]  ;;  %v9904_v13 = vld [vmem:[#allocation24_spill] sm:$0xff] }
 0x276   : > { %v1842_v45 = vmul.f32 %v4034_v49, %v8252_v56  ;;  %v2110_v23 = vadd.f32 %v9902_v51, %v1617_v21  ;;  %v8265_v0 = vadd.f32 %v9904_v13, %v9903_v48  ;;  %vm8267_vm4 = vcmp.le.s32.totalorder %v1220_v11, 14  ;;  %v9908_v26 = vld [vmem:[#allocation64_spill] sm:$0xff]  ;;  %v9911_v51 = vld [vmem:[#allocation30_spill] sm:$0xff]  ;;  %v9916_v58 = vld [vmem:[#allocation73_spill] sm:$0xff] }
 0x277   : > { %v1486_v22 = vmul.f32 %v9819_v17, %v1450_v1  ;;  %v1877_v10 = vmul.f32 %v9474_v5, %v1841_v38  ;;  %v4719_v50 = vpop.eup %4718  ;;  %v8275_v40 = vadd.f32 %v9904_v13, %v9908_v26  ;;  %v9910_v1 = vld [vmem:[#allocation61_spill] sm:$0xff]  ;;  %v2042_v27 = vadd.f32 %v9911_v51, %v1485_v12  ;;  %v9912_v48 = vld [vmem:[#allocation38_spill] sm:$0xff]  ;;  %v9919_v12 = vld [vmem:[#allocation71_spill] sm:$0xff] }
 0x278   : > { %9905 = vst [vmem:[#allocation58_spill] sm:$0xff] %v8265_v0  ;;  %v1878_v49 = vmul.f32 %v9474_v5, %v1842_v45  ;;  %v2973_v21 = vmul.f32 %v9901_v15, %v9910_v1  ;;  %vm8281_vm13 = vcmp.ge.s32.totalorder %v1188_v44, 1  ;;  %v2666_v18 = vadd.f32 %v9917_v37, %v2110_v23  ;;  %v9920_v15 = vld [vmem:[#allocation8_spill] sm:$0xff] }
 0x279   : > { %9909 = vst [vmem:[#allocation41_spill] sm:$0xff] %v8275_v40  ;;  %v2043_v30 = vadd.f32 %v9912_v48, %v1486_v22  ;;  %v2273_v38 = vadd.f32 %v9915_v3, %v1877_v10  ;;  %4720 = vpow2.f32 %v4201_v62  ;;  %v8289_v26 = vadd.f32 %v9904_v13, %v2972_v41  ;;  %vm1774_vm0 = vmand %vm8281_vm13, %vm8267_vm4  ;;  %v9923_v23 = vld [vmem:[#allocation72_spill] sm:$0xff]  ;;  %v9928_v48 = vld [vmem:[#allocation50_spill] sm:$0xff] }
 0x27a   : > { %v2274_v45 = vadd.f32 %v9916_v58, %v1878_v49  ;;  %v2502_v22 = vadd.f32 %v9919_v12, %v2042_v27  ;;  %v8298_v51 = vmul.f32 -1.442695, %v8265_v0  ;;  %v9924_v58 = vld [vmem:[#allocation34_spill] sm:$0xff]  ;;  %v1025_v41 = vadd.f32 1.0, %v4719_v50  ;;  %v9951_v3 = vld [vmem:[#allocation16_spill] sm:$0xff] }
 0x27b   : > { %9918 = vst [vmem:[#allocation54_spill] sm:$0xff] %v8289_v26  ;;  %v2503_v1 = vadd.f32 %v9920_v15, %v2043_v30  ;;  %v8305_v37 = vadd.f32 %v9923_v23, %v2273_v38  ;;  %v8309_v10 = vmul.f32 -1.442695, %v8275_v40  ;;  %v8312_v27 = vadd.f32 %v9904_v13, %v2973_v21  ;;  %v9933_v21 = vld [vmem:[#allocation51_spill] sm:$0xff]  ;;  %v9935_v15 = vld [vmem:[#allocation20_spill] sm:$0xff]  ;;  %v9936_v23 = vld [vmem:[#allocation9_spill] sm:$0xff] }
 0x27c   : > { %9921 = vst [vmem:[#allocation79_spill] sm:$0xff] %v8298_v51  ;;  %v2862_v62 = vadd.f32 %v9924_v58, %v2274_v45  ;;  %v2894_v49 = vadd.f32 %v2666_v18, %v2502_v22  ;;  %v3998_v38 = vsel %vm8281_vm13, 1.0, %v9756_v29  ;;  %vm8326_vm7 = vcmp.le.s32.totalorder %v1188_v44, 14  ;;  %v8336_v18 = vld [vmem:[%s9006_s5] ss:$0 sm:$0xff] }
 0x27d   : > { %9925 = vst [vmem:[#allocation74_spill] sm:$0xff] %v8309_v10  ;;  %9926 = vst [vmem:[#allocation11_spill] sm:$0xff] %v8312_v27  ;;  %v2895_v12 = vadd.f32 %v9928_v48, %v2503_v1  ;;  %4722 = vrcp.f32 %v1025_v41  ;;  %v8331_v13 = vadd.f32 %v8107_v25, %v2886_v8  ;;  %v8340_v22 = vmul.f32 %v8336_v18, %v9933_v21  ;;  %v9940_v58 = vld [vmem:[#allocation62_spill] sm:$0xff]  ;;  %v9953_v8 = vld [vmem:[#allocation33_spill] sm:$0xff] }
 0x27e   : > { %v2926_v44 = vadd.f32 %v2894_v49, %v2862_v62  ;;  %v9937_v25 = vshra.s32 %v9936_v23, 4  ;;  %v8355_v41 = vmul.f32 %v8336_v18, %v9940_v58  ;;  %v4062_v48 = vsel %vm1774_vm0, 1.0, %v9756_v29  ;;  %vm9950_vm12 = vmand %vm8326_vm7, %vm8267_vm4 }
 0x27f   : > { %9932 = vst [vmem:[#allocation77_spill] sm:$0xff] %v8331_v13  ;;  %9934 = vst [vmem:[#allocation49_spill] sm:$0xff] %v8340_v22  ;;  %v2927_v1 = vadd.f32 %v2895_v12, %v9935_v15  ;;  %v3999_v62 = vsel %vm1382_vm2, 1.0, %v9756_v29  ;;  %v9943_v12 = vld [vmem:[#allocation75_spill] sm:$0xff]  ;;  %v1477_v15 = vmul.f32 %v3998_v38, %v7970_v60  ;;  %v1609_v23 = vmul.f32 %v3998_v38, %v7917_v54  ;;  %v9958_v13 = vld [vmem:[#allocation65_spill] sm:$0xff] }
 0x280   : > { %vm8349_vm8 = vcmp.ge.s32.totalorder %v9937_v25, 1  ;;  %9941 = vst [vmem:[#allocation67_spill] sm:$0xff] %v8355_v41  ;;  %v9944_v21 = vshra.s32 %v9943_v12, 4  ;;  %v8384_v19 = vsel %vm8267_vm4, 1.0, %v9756_v29  ;;  %v3969_v30 = vsel %vm9947_vm15, 1.0, %v9756_v29  ;;  %v9952_v38 = vld [vmem:[#allocation47_spill] sm:$0xff] }
 0x281   : > { %vm1776_vm10 = vmand %vm8349_vm8, %vm9568_vm11  ;;  %v8402_v54 = vsel %vm9949_vm6, 1.0, %v9756_v29  ;;  %v4126_v42 = vsel %vm8326_vm7, 1.0, %v9756_v29  ;;  %v4190_v60 = vsel %vm9950_vm12, 1.0, %v9756_v29  ;;  %v4000_v31 = vsel %vm8349_vm8, 1.0, %v9756_v29  ;;  %v9970_v22 = vld [vmem:[#allocation55_spill] sm:$0xff] }
 0x282   : > { %vm8375_vm1 = vcmp.le.s32.totalorder %v9944_v21, 14  ;;  %v1869_v45 = vmul.f32 %v9952_v38, %v9951_v3  ;;  %v1478_v58 = vmul.f32 %v3999_v62, %v8163_v6  ;;  %v1870_v49 = vmul.f32 %v4062_v48, %v8174_v55  ;;  %v9955_v48 = vld [vmem:[#allocation28_spill] sm:$0xff]  ;;  %v9956_v62 = vld [vmem:[#allocation45_spill] sm:$0xff] }
 0x283   : > { %vm2724_vm11 = vmand %vm8375_vm1, %vm7818_vm14  ;;  %v4064_v12 = vsel %vm1776_vm10, 1.0, %v9756_v29  ;;  %v2965_v21 = vmul.f32 %v8336_v18, %v2926_v44  ;;  %v4124_v36 = vsel %vm8375_vm1, 1.0, %v9756_v29  ;;  %v8430_v25 = vmul.f32 %v8075_v20, %v9953_v8  ;;  %v8432_v3 = vpop.eup %4720 }
 0x284   : > { %v8426_v50 = vsel %vm2724_vm11, 1.0, %v9756_v29  ;;  %9954 = vst [vmem:[#allocation21_spill] sm:$0xff] %v8432_v3  ;;  %v1513_v6 = vmul.f32 %v9819_v17, %v1477_v15  ;;  %v1645_v55 = vmul.f32 %v9357_v52, %v1609_v23  ;;  %v1973_v44 = vmul.f32 %v9955_v48, %v8236_v57  ;;  %v9959_v3 = vld [vmem:[#allocation22_spill] sm:$0xff] }
 0x285   : > { %v8440_v11 = vmul.f32 %v8075_v20, %v9956_v62  ;;  %v2462_v29 = vmul.f32 %v4126_v42, %v8230_v9  ;;  %v2626_v38 = vmul.f32 %v4126_v42, %v8205_v53  ;;  %v2821_v8 = vmul.f32 %v8007_v2, %v8246_v35 }
 0x286   : > { %v2966_v40 = vmul.f32 %v8336_v18, %v2927_v1  ;;  %v1905_v15 = vmul.f32 %v9474_v5, %v1869_v45  ;;  %v8449_v23 = vmul.f32 %v9819_v17, %v1478_v58  ;;  %v8452_v48 = vmul.f32 %v9474_v5, %v1870_v49  ;;  %v8464_v45 = vld [vmem:[%s9007_s6] ss:$0 sm:$0xff] }
 0x287   : > { %9957 = vst [vmem:[#allocation68_spill] sm:$0xff] %v8440_v11  ;;  %v2108_v62 = vmul.f32 %v9824_v33, %v8205_v53  ;;  %v4723_v0 = vpop.eup %4722  ;;  %v2236_v42 = vmul.f32 %v9958_v13, %v8252_v56  ;;  %v2463_v2 = vmul.f32 %v9959_v3, %v8236_v57  ;;  %v2822_v1 = vmul.f32 %v4190_v60, %v8252_v56 }
 0x288   : > { %v8467_v58 = vadd.f32 %v8464_v45, %v2965_v21  ;;  %v2009_v49 = vmul.f32 %v5220_v39, %v1973_v44  ;;  %v2040_v53 = vmul.f32 %v5220_v39, %v8230_v9  ;;  %v2271_v13 = vmul.f32 %v5228_v16, %v8246_v35 }
 0x289   : > { %v1121_v57 = vmul.f32 %v4723_v0, %v8025_v7  ;;  %v8476_v56 = vmul.f32 %v5235_v24, %v2462_v29  ;;  %v2662_v60 = vmul.f32 %v5111_v14, %v2626_v38  ;;  %v8480_v3 = vmul.f32 %v8075_v20, %v2821_v8 }
 0x28a   : > { %9960 = vst [vmem:[#allocation48_spill] sm:$0xff] %v8467_v58  ;;  %v8483_v21 = vadd.f32 %v8464_v45, %v2966_v40  ;;  %v8487_v35 = vmul.f32 %v8075_v20, %v2822_v1  ;;  %v4197_v7 = vmul.f32 -1.442695, %v8467_v58  ;;  %v2272_v0 = vmul.f32 %v5228_v16, %v2236_v42 }
 0x28b   : > { %v1252_v44 = vrot.slane %v1121_v57, 7  ;;  %v1611_v41 = vmul.f32 %v4000_v31, %v1121_v57  ;;  %v1677_v10 = vrot.slane %v1121_v57, 1  ;;  %v2106_v9 = vmul.f32 %v9824_v33, %v1121_v57 }
 0x28c   : > { %9961 = vst [vmem:[#allocation26_spill] sm:$0xff] %v8483_v21  ;;  %v2499_v29 = vmul.f32 %v5235_v24, %v2463_v2  ;;  %v9962_v38 = vrot.slane %v8116_v46, 7  ;;  %vm9963_vm3 = vcmp.lt.s32.totalorder %v5015_v28, 1  ;;  %v9964_v8 = vrot.slane %v8119_v34, 7 }
 0x28d   : > { %vm9965_vm14 = vmmov %vm9963_vm3  ;;  %v1647_v33 = vmul.f32 %v9357_v52, %v1611_v41  ;;  %v9966_v1 = vrot.slane %v8116_v46, 1  ;;  %vm9967_vm5 = vcmp.lt.s32.totalorder %v5015_v28, 7  ;;  %v4198_v42 = vmul.f32 -1.442695, %v8483_v21 }
 0x28e   : > { %v1257_v40 = vsel %vm9963_vm3, %v1252_v44, %v9962_v38  ;;  %v1258_v27 = vsel %vm9965_vm14, %v9964_v8, %v1252_v44  ;;  %v9968_v51 = vrot.slane %v8119_v34, 1  ;;  %vm9969_vm9 = vmmov %vm9967_vm5  ;;  %v2138_v8 = vadd.f32 %v2106_v9, %v1645_v55 }
 0x28f   : > { %v1682_v58 = vsel %vm9967_vm5, %v1677_v10, %v9966_v1  ;;  %v1448_v2 = vmul.f32 %v3969_v30, %v1257_v40  ;;  %v1479_v26 = vmul.f32 %v4000_v31, %v1258_v27  ;;  %v2003_v11 = vmul.f32 %v9970_v22, %v1257_v40 }
 0x290   : > { %v1683_v38 = vsel %vm9969_vm9, %v9968_v51, %v1677_v10  ;;  %v2038_v44 = vmul.f32 %v5220_v39, %v1258_v27  ;;  %v2624_v52 = vmul.f32 %v4124_v36, %v1121_v57  ;;  %4724 = vpow2.f32 %v4197_v7 }
 0x291   : > { %v1484_v46 = vmul.f32 %v9819_v17, %v1448_v2  ;;  %v2140_v41 = vadd.f32 %v2108_v62, %v1647_v33  ;;  %v2234_v1 = vmul.f32 %v8384_v19, %v1682_v58  ;;  %v1872_v21 = vmul.f32 %v4064_v12, %v1682_v58  ;;  %v9971_v12 = vld [vmem:[#allocation43_spill] sm:$0xff] }
 0x292   : > { %v2070_v30 = vadd.f32 %v2038_v44, %v1513_v6  ;;  %v2269_v31 = vmul.f32 %v5228_v16, %v1683_v38  ;;  %v2460_v34 = vmul.f32 %v4124_v36, %v1258_v27  ;;  %v1515_v28 = vmul.f32 %v9819_v17, %v1479_v26  ;;  %v9972_v26 = vld [vmem:[#allocation27_spill] sm:$0xff]  ;;  %v9977_v44 = vld [vmem:[#allocation78_spill] sm:$0xff] }
 0x293   : > { %v1871_v51 = vmul.f32 %v8012_v32, %v1683_v38  ;;  %v2041_v10 = vadd.f32 %v2009_v49, %v1484_v46  ;;  %v2461_v22 = vmul.f32 %v8402_v54, %v1257_v40  ;;  %v2039_v55 = vmul.f32 %v5220_v39, %v2003_v11  ;;  %v9976_v2 = vld [vmem:[#allocation59_spill] sm:$0xff] }
 0x294   : > { %v2301_v57 = vadd.f32 %v2269_v31, %v1905_v15  ;;  %v2496_v9 = vmul.f32 %v5235_v24, %v2460_v34  ;;  %v2660_v62 = vmul.f32 %v5111_v14, %v2624_v52  ;;  %4726 = vpow2.f32 %v4198_v42  ;;  %v9974_v42 = vld [vmem:[#allocation23_spill] sm:$0xff] }
 0x295   : > { %v2270_v19 = vmul.f32 %v5228_v16, %v2234_v1  ;;  %v2501_v6 = vadd.f32 %v9971_v12, %v2041_v10  ;;  %v2694_v27 = vadd.f32 %v2662_v60, %v2138_v8  ;;  %v2497_v17 = vmul.f32 %v5235_v24, %v2461_v22  ;;  %v9978_v52 = vld [vmem:[#allocation31_spill] sm:$0xff]  ;;  %v9984_v12 = vld [vmem:[#allocation74_spill] sm:$0xff] }
 0x296   : > { %v2528_v32 = vadd.f32 %v2496_v9, %v8086_v43  ;;  %v2692_v36 = vadd.f32 %v2660_v62, %v9972_v26  ;;  %v2819_v54 = vmul.f32 %v8022_v63, %v1683_v38  ;;  %v2820_v39 = vmul.f32 %v8426_v50, %v1682_v58  ;;  %v9980_v34 = vld [vmem:[#allocation79_spill] sm:$0xff] }
 0x297   : > { %v2893_v11 = vadd.f32 %v8179_v59, %v2501_v6  ;;  %v1907_v14 = vmul.f32 %v9474_v5, %v1871_v51  ;;  %v1908_v15 = vmul.f32 %v9474_v5, %v1872_v21  ;;  %v2071_v60 = vadd.f32 %v2039_v55, %v8449_v23  ;;  %v9981_v51 = vld [vmem:[#allocation56_spill] sm:$0xff]  ;;  %v9983_v62 = vld [vmem:[#allocation11_spill] sm:$0xff] }
 0x298   : > { %v2855_v16 = vmul.f32 %v8075_v20, %v2819_v54  ;;  %v2920_v49 = vadd.f32 %v2692_v36, %v2528_v32  ;;  %v2072_v24 = vadd.f32 %v2040_v53, %v1515_v28  ;;  %v2856_v43 = vmul.f32 %v8075_v20, %v2820_v39  ;;  %v9973_v53 = vld [vmem:[#allocation44_spill] sm:$0xff]  ;;  %v9985_v6 = vld [vmem:[#allocation67_spill] sm:$0xff]  ;;  %v9986_v32 = vld [vmem:[#allocation42_spill] sm:$0xff] }
 0x299   : > { %v2925_v7 = vadd.f32 %v2893_v11, %v8305_v37  ;;  %v2302_v63 = vadd.f32 %v2270_v19, %v8452_v48  ;;  %v2303_v40 = vadd.f32 %v2271_v13, %v1907_v14  ;;  %v2304_v59 = vadd.f32 %v2272_v0, %v1908_v15  ;;  %v9987_v36 = vld [vmem:[#allocation14_spill] sm:$0xff]  ;;  %v9988_v11 = vld [vmem:[#allocation63_spill] sm:$0xff]  ;;  %v9989_v15 = vld [vmem:[#allocation40_spill] sm:$0xff] }
 0x29a   : > { %v2887_v50 = vadd.f32 %v2855_v16, %v8093_v61  ;;  %v2529_v58 = vadd.f32 %v2497_v17, %v8196_v47  ;;  %v2530_v5 = vadd.f32 %v8476_v56, %v2070_v30  ;;  %v4725_v21 = vpop.eup %4724  ;;  %v2888_v33 = vadd.f32 %v2856_v43, %v8201_v4  ;;  %v9975_v56 = vld [vmem:[#allocation68_spill] sm:$0xff]  ;;  %v9990_v43 = vld [vmem:[#allocation6_spill] sm:$0xff] }
 0x29b   : > { %v2964_v23 = vmul.f32 %v8336_v18, %v2925_v7  ;;  %v2531_v28 = vadd.f32 %v2499_v29, %v2071_v60  ;;  %v2532_v20 = vadd.f32 %v9973_v53, %v2072_v24  ;;  %v2696_v37 = vadd.f32 %v9974_v42, %v2140_v41 }
 0x29c   : > { %v2889_v48 = vadd.f32 %v8480_v3, %v2301_v57  ;;  %v2890_v13 = vadd.f32 %v8487_v35, %v2302_v63  ;;  %v2891_v61 = vadd.f32 %v8430_v25, %v2303_v40  ;;  %v2892_v0 = vadd.f32 %v9975_v56, %v2304_v59  ;;  %v9979_v35 = vld [vmem:[#allocation49_spill] sm:$0xff]  ;;  %v9982_v57 = vld [vmem:[#allocation54_spill] sm:$0xff]  ;;  %v9991_v40 = vld [vmem:[#allocation32_spill] sm:$0xff] }
 0x29d   : > { %v8547_v47 = vadd.f32 %v8464_v45, %v2964_v23  ;;  %v2921_v4 = vadd.f32 %v9976_v2, %v2529_v58  ;;  %v2922_v38 = vadd.f32 %v2694_v27, %v2530_v5  ;;  %v2923_v29 = vadd.f32 %v9977_v44, %v2531_v28  ;;  %v9992_v28 = vld [vmem:[#allocation21_spill] sm:$0xff] }
 0x29e   : > { %v2924_v8 = vadd.f32 %v2696_v37, %v2532_v20  ;;  %v8553_v46 = vadd.f32 %v9978_v52, %v2887_v50  ;;  %v8555_v41 = vadd.f32 %v2920_v49, %v2888_v33  ;;  %v4727_v3 = vpop.eup %4726  ;;  %v8559_v25 = vadd.f32 %v8464_v45, %v9979_v35 }
 0x29f   : > { %v4196_v1 = vmul.f32 -1.442695, %v8547_v47  ;;  %v8562_v30 = vadd.f32 %v2921_v4, %v2889_v48  ;;  %v8564_v31 = vadd.f32 %v2922_v38, %v2890_v13  ;;  %4728 = vpow2.f32 %v9980_v34  ;;  %v9995_v34 = vld [vmem:[#allocation18_spill] sm:$0xff] }
 0x2a0   : > { %v2976_v10 = vmul.f32 %v8336_v18, %v9981_v51  ;;  %v8569_v22 = vadd.f32 %v2923_v29, %v2891_v61  ;;  %v8571_v55 = vadd.f32 %v2924_v8, %v2892_v0  ;;  %v4204_v9 = vmul.f32 -1.442695, %v9982_v57  ;;  %v9993_v61 = vld [vmem:[#allocation2_spill] sm:$0xff]  ;;  %v9994_v8 = vld [vmem:[#allocation35_spill] sm:$0xff] }
 0x2a1   : > { %4730 = vpow2.f32 %v4196_v1  ;;  %v4205_v19 = vmul.f32 -1.442695, %v9983_v62  ;;  %v8578_v27 = vadd.f32 %v8464_v45, %v9985_v6  ;;  %v4206_v17 = vmul.f32 -1.442695, %v8559_v25 }
 0x2a2   : > { %4732 = vpow2.f32 %v9984_v12  ;;  %v2977_v26 = vmul.f32 %v8336_v18, %v9986_v32  ;;  %v3134_v54 = vadd.f32 1.0, %v9987_v36  ;;  %v8585_v39 = vadd.f32 %v8464_v45, %v2976_v10 }
 0x2a3   : > { %v3135_v14 = vadd.f32 1.0, %v9988_v11  ;;  %4734 = vpow2.f32 %v4204_v9  ;;  %v2978_v16 = vmul.f32 %v8336_v18, %v9989_v15  ;;  %v3132_v49 = vadd.f32 1.0, %v4725_v21  ;;  %v9997_v15 = vld [vmem:[#allocation7_spill] sm:$0xff] }
 0x2a4   : > { %4736 = vpow2.f32 %v4205_v19  ;;  %v4207_v60 = vmul.f32 -1.442695, %v8578_v27  ;;  %v8592_v24 = vadd.f32 %v8464_v45, %v2977_v26  ;;  %v2979_v7 = vmul.f32 %v8336_v18, %v9990_v43 }
 0x2a5   : > { %4738 = vpow2.f32 %v4206_v17  ;;  %v4208_v63 = vmul.f32 -1.442695, %v8585_v39  ;;  %v2980_v50 = vmul.f32 %v8336_v18, %v9991_v40  ;;  %v8600_v59 = vadd.f32 %v8464_v45, %v2978_v16  ;;  %v9996_v17 = vld [vmem:[#allocation76_spill] sm:$0xff] }
 0x2a6   : > { %4740 = vrcp.f32 %v3134_v54  ;;  %v3133_v58 = vadd.f32 1.0, %v4727_v3  ;;  %v4209_v33 = vmul.f32 -1.442695, %v8592_v24  ;;  %v8604_v23 = vadd.f32 %v8464_v45, %v2979_v7 }
 0x2a7   : > { %4742 = vrcp.f32 %v3135_v14  ;;  %v3136_v53 = vadd.f32 1.0, %v9992_v28  ;;  %v8608_v37 = vadd.f32 %v8464_v45, %v2980_v50  ;;  %v4210_v48 = vmul.f32 -1.442695, %v8600_v59 }
 0x2a8   : > { %4744 = vrcp.f32 %v3132_v49  ;;  %v2981_v56 = vmul.f32 %v8336_v18, %v9993_v61  ;;  %v4211_v2 = vmul.f32 -1.442695, %v8604_v23  ;;  %v2982_v52 = vmul.f32 %v8336_v18, %v9994_v8  ;;  %v9998_v49 = vld [vmem:[#allocation48_spill] sm:$0xff] }
 0x2a9   : > { %v4729_v5 = vpop.eup %4728  ;;  %4746 = vpow2.f32 %v4207_v60  ;;  %v4212_v29 = vmul.f32 -1.442695, %v8608_v37  ;;  %v2983_v51 = vmul.f32 %v8336_v18, %v9995_v34  ;;  %v2984_v32 = vmul.f32 %v8336_v18, %v9996_v17 }
 0x2aa   : > { %4748 = vpow2.f32 %v4208_v63  ;;  %v3137_v13 = vadd.f32 1.0, %v4729_v5  ;;  %v8618_v1 = vadd.f32 %v8464_v45, %v2981_v56  ;;  %v8625_v26 = vadd.f32 %v8464_v45, %v2982_v52 }
 0x2ab   : > { %v4731_v21 = vpop.eup %4730  ;;  %4750 = vrcp.f32 %v3133_v58  ;;  %v8629_v11 = vadd.f32 %v8464_v45, %v2983_v51  ;;  %v2985_v16 = vmul.f32 %v8336_v18, %v9997_v15  ;;  %v8637_v40 = vadd.f32 %v8464_v45, %v2984_v32  ;;  %v9999_v58 = vld [vmem:[#allocation36_spill] sm:$0xff]  ;;  %v10006_v15 = vld [vmem:[#allocation46_spill] sm:$0xff] }
 0x2ac   : > { %v3131_v20 = vadd.f32 1.0, %v4731_v21  ;;  %v4733_v42 = vpop.eup %4732  ;;  %v4213_v54 = vmul.f32 -1.442695, %v8618_v1  ;;  %v4214_v50 = vmul.f32 -1.442695, %v8625_v26  ;;  %v2986_v5 = vmul.f32 %v8336_v18, %v9999_v58 }
 0x2ad   : > { %v4735_v0 = vpop.eup %4734  ;;  %v3138_v38 = vadd.f32 1.0, %v4733_v42  ;;  %v10000_v42 = vld [vmem:[#allocation4_spill] sm:$0xff]  ;;  %v4216_v52 = vmul.f32 -1.442695, %v8637_v40 }
 0x2ae   : > { %4752 = vrcp.f32 %v3131_v20  ;;  %v4737_v4 = vpop.eup %4736  ;;  %v3139_v35 = vadd.f32 1.0, %v4735_v0  ;;  %v8654_v0 = vadd.f32 %v8464_v45, %v2985_v16  ;;  %v8664_v34 = vadd.f32 %v8464_v45, %v2986_v5  ;;  %v10007_v5 = vld [vmem:[#allocation58_spill] sm:$0xff] }
 0x2af   : > { %4754 = vpow2.f32 %v4209_v33  ;;  %v4739_v44 = vpop.eup %4738  ;;  %v3140_v9 = vadd.f32 1.0, %v4737_v4 }
 0x2b0   : > { %4756 = vrcp.f32 %v3136_v53  ;;  %v4741_v3 = vpop.eup %4740  ;;  %v3141_v12 = vadd.f32 1.0, %v4739_v44  ;;  %v4215_v53 = vmul.f32 -1.442695, %v8629_v11  ;;  %v10003_v44 = vld [vmem:[#allocation5_spill] sm:$0xff] }
 0x2b1   : > { %4758 = vpow2.f32 %v4210_v48  ;;  %v4743_v10 = vpop.eup %4742  ;;  %v2987_v48 = vmul.f32 %v8336_v18, %v10000_v42  ;;  %v2991_v42 = vmul.f32 %v8336_v18, %v8555_v41 }
 0x2b2   : > { %4760 = vrcp.f32 %v3137_v13  ;;  %v4745_v19 = vpop.eup %4744  ;;  %v10001_v13 = vld [vmem:[#allocation26_spill] sm:$0xff] }
 0x2b3   : > { %4762 = vpow2.f32 %v4211_v2  ;;  %v4747_v6 = vpop.eup %4746  ;;  %v8634_v60 = vmul.f32 %v4745_v19, %v9998_v49  ;;  %v10002_v2 = vld [vmem:[#allocation10_spill] sm:$0xff] }
 0x2b4   : > { %4764 = vrcp.f32 %v3138_v38  ;;  %v4749_v36 = vpop.eup %4748  ;;  %v3142_v7 = vadd.f32 1.0, %v4747_v6  ;;  %v8657_v4 = vmul.f32 %v4741_v3, %v10002_v2 }
 0x2b5   : > { %4766 = vpow2.f32 %v4212_v29  ;;  %v4751_v14 = vpop.eup %4750  ;;  %v3143_v28 = vadd.f32 1.0, %v4749_v36  ;;  %v2988_v29 = vmul.f32 %v8336_v18, %v10003_v44  ;;  %v8673_v36 = vadd.f32 %v8464_v45, %v2987_v48 }
 0x2b6   : > { %4768 = vrcp.f32 %v3139_v35  ;;  %v8649_v61 = vmul.f32 %v4751_v14, %v10001_v13  ;;  %v10008_v13 = vld [vmem:[#allocation41_spill] sm:$0xff] }
 0x2b7   : > { %4770 = vrcp.f32 %v3140_v9  ;;  %v10004_v9 = vld [vmem:[#allocation39_spill] sm:$0xff]  ;;  %v8680_v49 = vadd.f32 %v8464_v45, %v2988_v29  ;;  %v4219_v48 = vmul.f32 -1.442695, %v8673_v36 }
 0x2b8   : > { %v4753_v43 = vpop.eup %4752  ;;  %4772 = vrcp.f32 %v3141_v12  ;;  %v8667_v19 = vmul.f32 %v4743_v10, %v10004_v9  ;;  %v10005_v12 = vld [vmem:[#allocation77_spill] sm:$0xff]  ;;  %v8714_v9 = vadd.f32 %v8464_v45, %v2991_v42 }
 0x2b9   : > { %v4755_v63 = vpop.eup %4754  ;;  %v8643_v21 = vmul.f32 %v4753_v43, %v8547_v47  ;;  %4774 = vpow2.f32 %v4213_v54  ;;  %v2989_v6 = vmul.f32 %v8336_v18, %v10005_v12  ;;  %v4217_v54 = vmul.f32 -1.442695, %v8654_v0 }
 0x2ba   : > { %v4757_v33 = vpop.eup %4756  ;;  %4776 = vrcp.f32 %v3142_v7  ;;  %v3144_v38 = vadd.f32 1.0, %v4755_v63  ;;  %v2990_v63 = vmul.f32 %v8336_v18, %v8553_v46 }
 0x2bb   : > { %v4759_v20 = vpop.eup %4758  ;;  %v3259_v56 = vadd.f32 %v8634_v60, %v8643_v21  ;;  %4778 = vpow2.f32 %v4214_v50  ;;  %v8677_v16 = vmul.f32 %v4757_v33, %v10006_v15  ;;  %v4218_v50 = vmul.f32 -1.442695, %v8664_v34 }
 0x2bc   : > { %v4761_v47 = vpop.eup %4760  ;;  %4780 = vrcp.f32 %v3143_v28  ;;  %v3145_v3 = vadd.f32 1.0, %v4759_v20  ;;  %v8704_v44 = vadd.f32 %v8464_v45, %v2990_v63 }
 0x2bd   : > { %v4763_v8 = vpop.eup %4762  ;;  %v3260_v35 = vadd.f32 %v3259_v56, %v8649_v61  ;;  %4782 = vpow2.f32 %v4215_v53  ;;  %v8687_v28 = vmul.f32 %v4761_v47, %v10007_v5  ;;  %v8690_v53 = vadd.f32 %v8464_v45, %v2989_v6 }
 0x2be   : > { %v4765_v51 = vpop.eup %4764  ;;  %4784 = vrcp.f32 %v3144_v38  ;;  %v3146_v10 = vadd.f32 1.0, %v4763_v8  ;;  %v4220_v47 = vmul.f32 -1.442695, %v8680_v49  ;;  %v2992_v38 = vmul.f32 %v8336_v18, %v8562_v30 }
 0x2bf   : > { %v4767_v17 = vpop.eup %4766  ;;  %v3261_v32 = vadd.f32 %v3260_v35, %v8657_v4  ;;  %4786 = vpow2.f32 %v4216_v52  ;;  %v8697_v56 = vmul.f32 %v4765_v51, %v10008_v13  ;;  %v4221_v8 = vmul.f32 -1.442695, %v8690_v53 }
 0x2c0   : > { %v4769_v14 = vpop.eup %4768  ;;  %v3147_v33 = vadd.f32 1.0, %v4767_v17  ;;  %4788 = vrcp.f32 %v3145_v3  ;;  %v2993_v51 = vmul.f32 %v8336_v18, %v8564_v31  ;;  %v2994_v6 = vmul.f32 %v8336_v18, %v8569_v22 }
 0x2c1   : > { %v4771_v43 = vpop.eup %4770  ;;  %v3262_v7 = vadd.f32 %v3261_v32, %v8667_v19  ;;  %4790 = vpow2.f32 %v4217_v54  ;;  %v8707_v29 = vmul.f32 %v4769_v14, %v9982_v57  ;;  %v8722_v17 = vadd.f32 %v8464_v45, %v2992_v38 }
 0x2c2   : > { %v4773_v58 = vpop.eup %4772  ;;  %4792 = vrcp.f32 %v3146_v10  ;;  %v8717_v3 = vmul.f32 %v4771_v43, %v9983_v62  ;;  %v4222_v32 = vmul.f32 -1.442695, %v8704_v44  ;;  %v2995_v10 = vmul.f32 %v8336_v18, %v8571_v55 }
 0x2c3   : > { %v3263_v20 = vadd.f32 %v3262_v7, %v8677_v16  ;;  %v4775_v46 = vpop.eup %4774  ;;  %4794 = vpow2.f32 %v4218_v50  ;;  %v8727_v14 = vmul.f32 %v4773_v58, %v8559_v25  ;;  %v8732_v43 = vadd.f32 %v8464_v45, %v2993_v51 }
 0x2c4   : > { %v4777_v41 = vpop.eup %4776  ;;  %4796 = vrcp.f32 %v3147_v33  ;;  %v3148_v12 = vadd.f32 1.0, %v4775_v46  ;;  %v4223_v22 = vmul.f32 -1.442695, %v8714_v9  ;;  %v8740_v5 = vadd.f32 %v8464_v45, %v2994_v6 }
 0x2c5   : > { %v3264_v2 = vadd.f32 %v3263_v20, %v8687_v28  ;;  %v4779_v52 = vpop.eup %4778  ;;  %4798 = vpow2.f32 %v4219_v48  ;;  %v8737_v50 = vmul.f32 %v4777_v41, %v8578_v27  ;;  %v4224_v18 = vmul.f32 -1.442695, %v8722_v17 }
 0x2c6   : > { %v4781_v30 = vpop.eup %4780  ;;  %4800 = vpow2.f32 %v4220_v47  ;;  %v3149_v15 = vadd.f32 1.0, %v4779_v52  ;;  %v8748_v27 = vadd.f32 %v8464_v45, %v2995_v10  ;;  %v4225_v46 = vmul.f32 -1.442695, %v8732_v43 }
 0x2c7   : > { %v3265_v35 = vadd.f32 %v3264_v2, %v8697_v56  ;;  %v4783_v57 = vpop.eup %4782  ;;  %4802 = vpow2.f32 %v4221_v8  ;;  %v8745_v20 = vmul.f32 %v4781_v30, %v8585_v39  ;;  %v4226_v39 = vmul.f32 -1.442695, %v8740_v5 }
 0x2c8   : > { %v4785_v54 = vpop.eup %4784  ;;  %4804 = vrcp.f32 %v3148_v12  ;;  %v3150_v25 = vadd.f32 1.0, %v4783_v57  ;;  %v4227_v51 = vmul.f32 -1.442695, %v8748_v27 }
 0x2c9   : > { %v3266_v31 = vadd.f32 %v3265_v35, %v8707_v29  ;;  %v4787_v62 = vpop.eup %4786  ;;  %4806 = vpow2.f32 %v4222_v32  ;;  %v8753_v41 = vmul.f32 %v4785_v54, %v8592_v24 }
 0x2ca   : > { %v4789_v63 = vpop.eup %4788  ;;  %v3151_v42 = vadd.f32 1.0, %v4787_v62  ;;  %4808 = vrcp.f32 %v3149_v15 }
 0x2cb   : > { %v3267_v7 = vadd.f32 %v3266_v31, %v8717_v3  ;;  %v4791_v58 = vpop.eup %4790  ;;  %4810 = vpow2.f32 %v4223_v22  ;;  %v8758_v35 = vmul.f32 %v4789_v63, %v8600_v59 }
 0x2cc   : > { %v4793_v33 = vpop.eup %4792  ;;  %4812 = vrcp.f32 %v3150_v25  ;;  %v3152_v2 = vadd.f32 1.0, %v4791_v58 }
 0x2cd   : > { %v3268_v55 = vadd.f32 %v3267_v7, %v8727_v14  ;;  %v4795_v48 = vpop.eup %4794  ;;  %4814 = vpow2.f32 %v4224_v18  ;;  %v8763_v24 = vmul.f32 %v4793_v33, %v8604_v23 }
 0x2ce   : > { %v4797_v47 = vpop.eup %4796  ;;  %4816 = vrcp.f32 %v3151_v42  ;;  %v3153_v45 = vadd.f32 1.0, %v4795_v48 }
 0x2cf   : > { %v3269_v13 = vadd.f32 %v3268_v55, %v8737_v50  ;;  %v4799_v38 = vpop.eup %4798  ;;  %4818 = vpow2.f32 %v4225_v46  ;;  %v8767_v59 = vmul.f32 %v4797_v47, %v8608_v37 }
 0x2d0   : > { %v4801_v52 = vpop.eup %4800  ;;  %v3154_v57 = vadd.f32 1.0, %v4799_v38  ;;  %4820 = vrcp.f32 %v3152_v2 }
 0x2d1   : > { %v3270_v8 = vadd.f32 %v3269_v13, %v8745_v20  ;;  %v4803_v12 = vpop.eup %4802  ;;  %4822 = vpow2.f32 %v4226_v39  ;;  %v3155_v31 = vadd.f32 1.0, %v4801_v52 }
 0x2d2   : > { %v4805_v32 = vpop.eup %4804  ;;  %4824 = vrcp.f32 %v3153_v45  ;;  %v3156_v10 = vadd.f32 1.0, %v4803_v12 }
 0x2d3   : > { %v3271_v30 = vadd.f32 %v3270_v8, %v8753_v41  ;;  %v4807_v54 = vpop.eup %4806  ;;  %4826 = vpow2.f32 %v4227_v51  ;;  %v8771_v23 = vmul.f32 %v4805_v32, %v8618_v1 }
 0x2d4   : > { %v4809_v62 = vpop.eup %4808  ;;  %4828 = vrcp.f32 %v3154_v57  ;;  %v3157_v25 = vadd.f32 1.0, %v4807_v54 }
 0x2d5   : > { %v3272_v6 = vadd.f32 %v3271_v30, %v8758_v35  ;;  %v4811_v22 = vpop.eup %4810  ;;  %4830 = vrcp.f32 %v3155_v31  ;;  %v8775_v18 = vmul.f32 %v4809_v62, %v8625_v26 }
 0x2d6   : > { %v4813_v63 = vpop.eup %4812  ;;  %v3158_v33 = vadd.f32 1.0, %v4811_v22  ;;  %4832 = vrcp.f32 %v3156_v10 }
 0x2d7   : > { %v3273_v15 = vadd.f32 %v3272_v6, %v8763_v24  ;;  %v4815_v58 = vpop.eup %4814  ;;  %v8779_v48 = vmul.f32 %v4813_v63, %v8629_v11  ;;  %4834 = vrcp.f32 %v3157_v25 }
 0x2d8   : > { %v4817_v55 = vpop.eup %4816  ;;  %v3159_v13 = vadd.f32 1.0, %v4815_v58  ;;  %4836 = vrcp.f32 %v3158_v33 }
 0x2d9   : > { %v3274_v7 = vadd.f32 %v3273_v15, %v8767_v59  ;;  %v4819_v42 = vpop.eup %4818  ;;  %v8783_v2 = vmul.f32 %v4817_v55, %v8637_v40 }
 0x2da   : > { %v4821_v46 = vpop.eup %4820  ;;  %v3160_v39 = vadd.f32 1.0, %v4819_v42  ;;  %4838 = vrcp.f32 %v3159_v13 }
 0x2db   : > { %v3275_v37 = vadd.f32 %v3274_v7, %v8771_v23  ;;  %v4823_v47 = vpop.eup %4822  ;;  %v8787_v52 = vmul.f32 %v4821_v46, %v8654_v0 }
 0x2dc   : > { %v4825_v38 = vpop.eup %4824  ;;  %v3161_v51 = vadd.f32 1.0, %v4823_v47  ;;  %4840 = vrcp.f32 %v3160_v39 }
 0x2dd   : > { %v3276_v1 = vadd.f32 %v3275_v37, %v8775_v18  ;;  %v4827_v8 = vpop.eup %4826  ;;  %v8791_v30 = vmul.f32 %v4825_v38, %v8664_v34 }
 0x2de   : > { %v4829_v45 = vpop.eup %4828  ;;  %v3162_v57 = vadd.f32 1.0, %v4827_v8  ;;  %4842 = vrcp.f32 %v3161_v51 }
 0x2df   : > { %v3277_v26 = vadd.f32 %v3276_v1, %v8779_v48  ;;  %v4831_v12 = vpop.eup %4830  ;;  %v8795_v6 = vmul.f32 %v4829_v45, %v8673_v36  ;;  %v4871_v45 = vmov 0  }
 0x2e0   : > { %v4833_v0 = vpop.eup %4832  ;;  %v8799_v31 = vmul.f32 %v4831_v12, %v8680_v49  ;;  %4844 = vrcp.f32 %v3162_v57  ;;  %4557 = vset.pattern.permute.xlu0 %v4871_v45  ;;  %v10009_v45 = vld [vmem:[#allocation3_spill] sm:$0xff] }
 0x2e1   : > { %v3278_v11 = vadd.f32 %v3277_v26, %v8783_v2  ;;  %v4835_v15 = vpop.eup %4834  ;;  %v8803_v34 = vmul.f32 %v4833_v0, %v8690_v53 }
 0x2e2   : > { %v4837_v10 = vpop.eup %4836  ;;  %v8807_v36 = vmul.f32 %v4835_v15, %v8704_v44  ;;  %v4582_v15 = vld [vmem:[%s9012_s11] sm:$0xff]  }
 0x2e3   : > { %v3279_v40 = vadd.f32 %v3278_v11, %v8787_v52  ;;  %v8811_v63 = vmul.f32 %v4837_v10, %v8714_v9  ;;  %4499 = vmatprep.subr.bf16.mxu1 %v4582_v15  ;;  %v4584_v10 = vld [vmem:[%s9012_s11 + $0x10] sm:$0xff]  }
 0x2e4   : > { %v4839_v7 = vpop.eup %4838  ;;  %4500 = vmatpush3.bf16.msra.mxu1 %v4582_v15 }
 0x2e5   : > { %v3280_v32 = vadd.f32 %v3279_v40, %v8791_v30  ;;  %v8815_v58 = vmul.f32 %v4839_v7, %v8722_v17  ;;  %v4586_v7 = vld [vmem:[%s9012_s11 + $0x20] sm:$0xff]  }
 0x2e6   : > { %v4841_v25 = vpop.eup %4840 }
 0x2e7   : > { %v3281_v54 = vadd.f32 %v3280_v32, %v8795_v6  ;;  %v8819_v55 = vmul.f32 %v4841_v25, %v8732_v43  ;;  %v4588_v25 = vld [vmem:[%s9012_s11 + $0x30] sm:$0xff]  }
 0x2e8   : > { %v4843_v37 = vpop.eup %4842 }
 0x2e9   : > { %v3282_v62 = vadd.f32 %v3281_v54, %v8799_v31  ;;  %v8823_v42 = vmul.f32 %v4843_v37, %v8740_v5  ;;  %v3298_v5 = vld [vmem:[%s9008_s7] sm:$0xff] }
 0x2ea   : > { %v4845_v33 = vpop.eup %4844  ;;  %v3311_v37 = vld [vmem:[%s9010_s9] sm:$0xff] }
 0x2eb   : > { %v3283_v22 = vadd.f32 %v3282_v62, %v8803_v34  ;;  %v8827_v1 = vmul.f32 %v4845_v33, %v8748_v27  ;;  %v3302_v27 = vld [vmem:[%s9009_s8] sm:$0xff]  ;;  %v4583_v62 = vld [vmem:[%s9012_s11 + $0x8] sm:$0xff]  }
 0x2ec   : > { %4501 = vmatprep.subr.bf16.mxu1 %v4583_v62 }
 0x2ed   : > { %v3284_v49 = vadd.f32 %v3283_v22, %v8807_v36  ;;  %4502 = vmatpush3.bf16.msra.mxu1 %v4583_v62  ;;  %v4585_v22 = vld [vmem:[%s9012_s11 + $0x18] sm:$0xff]  }
 0x2ee   : > { %4503 = vmatprep.subr.bf16.mxu1 %v4584_v10 }
 0x2ef   : > { %v3285_v53 = vadd.f32 %v3284_v49, %v8811_v63  ;;  %v4587_v49 = vld [vmem:[%s9012_s11 + $0x28] sm:$0xff]  }
 0x2f1   : > { %v3286_v44 = vadd.f32 %v3285_v53, %v8815_v58  ;;  %4504 = vmatpush3.bf16.msra.mxu1 %v4584_v10  ;;  %v4589_v53 = vld [vmem:[%s9012_s11 + $0x38] sm:$0xff]  }
 0x2f2   : > { %4505 = vmatprep.subr.bf16.mxu1 %v4585_v22 }
 0x2f3   : > { %v3287_v9 = vadd.f32 %v3286_v44, %v8819_v55 }
 0x2f5   : > { %v3288_v17 = vadd.f32 %v3287_v9, %v8823_v42  ;;  %4506 = vmatpush3.bf16.msra.mxu1 %v4585_v22 }
 0x2f6   : > { %4507 = vmatprep.subr.bf16.mxu1 %v4586_v7 }
 0x2f7   : > { %v3289_v46 = vadd.f32 %v3288_v17, %v8827_v1 }
 0x2f9   : > { %v3290_v13 = vrot.slane %v3289_v46, 4  ;;  %4508 = vmatpush3.bf16.msra.mxu1 %v4586_v7 }
 0x2fa   : > { %4509 = vmatprep.subr.bf16.mxu1 %v4587_v49 }
 0x2fb   : > { %v3291_v47 = vadd.f32 %v3290_v13, %v3289_v46 }
 0x2fd   : > { %v3292_v26 = vrot.slane %v3291_v47, 2  ;;  %4510 = vmatpush3.bf16.msra.mxu1 %v4587_v49 }
 0x2fe   : > { %4511 = vmatprep.subr.bf16.mxu1 %v4588_v25 }
 0x2ff   : > { %v3293_v43 = vadd.f32 %v3292_v26, %v3291_v47  ;;  %v3324_v26 = vld [vmem:[%s9011_s10] sm:$0x1] }
 0x301   : > { %v3294_v38 = vrot.slane %v3293_v43, 1  ;;  %4512 = vmatpush3.bf16.msra.mxu1 %v4588_v25 }
 0x302   : > { %4513 = vmatprep.subr.bf16.mxu1 %v4589_v53 }
 0x303   : > { %v3295_v39 = vadd.f32 %v3294_v38, %v3293_v43 }
 0x305   : > { %v3297_v8 = vmul.f32 0.00390625, %v3295_v39  ;;  %4514 = vmatpush3.bf16.msra.mxu1 %v4589_v53 }
 0x307   : > { %v3299_v11 = vmul.f32 %v3298_v5, %v3297_v8 }
 0x309   : > { %3300 = vadd.xlane.f32.xlu0 %v3299_v11 }
 0x396   : > { %v3301_v51 = vpop.xlane.xlu0 %3300 }
 0x397   : > { %v3303_v40 = vadd.f32 %v3302_v27, %v3301_v51  ;;  %v10010_v27 = vsub.s32 0, %v10009_v45 }
 0x399   : > { %v4228_v12 = vmul.f32 -1.442695, %v3303_v40 }
 0x39b   : > { %4846 = vpow2.f32 %v4228_v12 }
 0x3a5   : > { %v4847_v57 = vpop.eup %4846 }
 0x3a6   : > { %v3307_v32 = vadd.f32 1.0, %v4847_v57 }
 0x3a8   : > { %4848 = vrcp.f32 %v3307_v32 }
 0x3b2   : > { %v4849_v0 = vpop.eup %4848 }
 0x3b3   : > { %v3310_v54 = vmul.f32 %v4849_v0, %v3303_v40 }
 0x3b5   : > { %3314 = vperm.xlu0 %4557, %v3310_v54  }
 0x434   : > { %v3315_v44 = vpop.permute.xlu0 %3314 }
 0x435   : > { %v3317_v33 = vmul.f32 %v3315_v44, %v3311_v37 }
 0x437   : > { %v3318_v9 = vrot.slane %v3317_v33, 4 }
 0x439   : > { %v3319_v17 = vadd.f32 %v3318_v9, %v3317_v33 }
 0x43b   : > { %v3320_v46 = vrot.slane %v3319_v17, 2 }
 0x43d   : > { %v3321_v13 = vadd.f32 %v3320_v46, %v3319_v17 }
 0x43f   : > { %v3322_v47 = vrot.slane %v3321_v13, 1 }
 0x441   : > { %v3323_v43 = vadd.f32 %v3322_v47, %v3321_v13 }
 0x443   : > { %v3325_v38 = vadd.f32 %v3324_v26, %v3323_v43  ;;  %v8910_v26 = vld [vmem:[%s9014_s13] ss:$0 sm:$0xff] }
 0x445   : > { %v4229_v39 = vmul.f32 -1.442695, %v3325_v38 }
 0x447   : > { %4850 = vpow2.f32 %v4229_v39 }
 0x451   : > { %v4851_v5 = vpop.eup %4850 }
 0x452   : > { %v3329_v8 = vadd.f32 1.0, %v4851_v5 }
 0x454   : > { %4852 = vrcp.f32 %v3329_v8 }
 0x45e   : > { %v4853_v11 = vpop.eup %4852 }
 0x45f   : > { %v3335_v51 = vrot.slane %v4853_v11, %v10010_v27 }
 0x461   : > { %v3336_v40 = vmul.f32 %v3335_v51, %v8643_v21  ;;  %v3337_v12 = vmul.f32 %v3335_v51, %v8634_v60  ;;  %v3338_v57 = vmul.f32 %v3335_v51, %v8649_v61  ;;  %v3339_v32 = vmul.f32 %v3335_v51, %v8657_v4 }
 0x462   : > { %v3340_v0 = vmul.f32 %v3335_v51, %v8667_v19  ;;  %v3341_v54 = vmul.f32 %v3335_v51, %v8677_v16  ;;  %v3342_v22 = vmul.f32 %v3335_v51, %v8687_v28  ;;  %v3343_v21 = vmul.f32 %v3335_v51, %v8697_v56 }
 0x463   : > { %v3368_v15 = vpack.c.bf16 %v3337_v12, %v3336_v40  ;;  %v3369_v62 = vpack.c.bf16 %v3339_v32, %v3338_v57  ;;  %v3344_v60 = vmul.f32 %v3335_v51, %v8707_v29  ;;  %v3345_v61 = vmul.f32 %v3335_v51, %v8717_v3 }
 0x464   : > { %v3370_v10 = vpack.c.bf16 %v3341_v54, %v3340_v0  ;;  %v3371_v7 = vpack.c.bf16 %v3343_v21, %v3342_v22  ;;  %v3346_v19 = vmul.f32 %v3335_v51, %v8727_v14  ;;  %v3347_v16 = vmul.f32 %v3335_v51, %v8737_v50 }
 0x465   : > { %4515 = vmatprep.mubr.bf16.mxu1 %v3368_v15  ;;  %v3372_v4 = vpack.c.bf16 %v3345_v61, %v3344_v60  ;;  %v3348_v49 = vmul.f32 %v3335_v51, %v8745_v20  ;;  %v3349_v25 = vmul.f32 %v3335_v51, %v8753_v41  ;;  %v3350_v56 = vmul.f32 %v3335_v51, %v8758_v35 }
 0x466   : > { %4516 = vmatmul.mubr.bf16.vlgmr.msra.gmra.mrb[0].mxu1 %v3369_v62  ;;  %v3373_v53 = vpack.c.bf16 %v3347_v16, %v3346_v19  ;;  %v3351_v29 = vmul.f32 %v3335_v51, %v8763_v24  ;;  %v3352_v3 = vmul.f32 %v3335_v51, %v8767_v59  ;;  %v3353_v37 = vmul.f32 %v3335_v51, %v8771_v23 }
 0x467   : > { %4519 = vmatprep.mubr.bf16.mxu1 %v3370_v10  ;;  %v3374_v28 = vpack.c.bf16 %v3349_v25, %v3348_v49  ;;  %v3354_v50 = vmul.f32 %v3335_v51, %v8775_v18  ;;  %v3355_v20 = vmul.f32 %v3335_v51, %v8779_v48  ;;  %v3356_v41 = vmul.f32 %v3335_v51, %v8783_v2 }
 0x468   : > { %v3375_v44 = vpack.c.bf16 %v3351_v29, %v3350_v56  ;;  %v3376_v14 = vpack.c.bf16 %v3353_v37, %v3352_v3  ;;  %v3357_v33 = vmul.f32 %v3335_v51, %v8787_v52  ;;  %v3358_v24 = vmul.f32 %v3335_v51, %v8791_v30 }
 0x469   : > { %v3377_v9 = vpack.c.bf16 %v3355_v20, %v3354_v50  ;;  %v3359_v59 = vmul.f32 %v3335_v51, %v8795_v6  ;;  %v3360_v23 = vmul.f32 %v3335_v51, %v8799_v31  ;;  %v3361_v17 = vmul.f32 %v3335_v51, %v8803_v34 }
 0x46a   : > { %v3378_v35 = vpack.c.bf16 %v3357_v33, %v3356_v41  ;;  %v3362_v48 = vmul.f32 %v3335_v51, %v8807_v36  ;;  %v3363_v2 = vmul.f32 %v3335_v51, %v8811_v63  ;;  %v3364_v52 = vmul.f32 %v3335_v51, %v8815_v58  ;;  %v8904_v36 = vld [vmem:[%s9013_s12] ss:$0 sm:$0xff] }
 0x46b   : > { %v3379_v46 = vpack.c.bf16 %v3359_v59, %v3358_v24  ;;  %v3380_v18 = vpack.c.bf16 %v3361_v17, %v3360_v23  ;;  %v3365_v13 = vmul.f32 %v3335_v51, %v8819_v55  ;;  %v3366_v6 = vmul.f32 %v3335_v51, %v8823_v42 }
 0x46c   : > { %v3381_v47 = vpack.c.bf16 %v3363_v2, %v3362_v48  ;;  %v3367_v31 = vmul.f32 %v3335_v51, %v8827_v1 }
 0x46d   : > { %v3382_v30 = vpack.c.bf16 %v3365_v13, %v3364_v52 }
 0x46e   : > { %4520 = vmatmul.mubr.bf16.gmra.mrb[4].mxu1 %v3371_v7  ;;  %v3383_v34 = vpack.c.bf16 %v3367_v31, %v3366_v6 }
 0x46f   : > { %4523 = vmatprep.mubr.bf16.mxu1 %v3372_v4 }
 0x476   : > { %4524 = vmatmul.mubr.bf16.gmra.mrb[8].mxu1 %v3373_v53 }
 0x477   : > { %4527 = vmatprep.mubr.bf16.mxu1 %v3374_v28 }
 0x47e   : > { %4528 = vmatmul.mubr.bf16.gmra.mrb[12].mxu1 %v3375_v44 }
 0x47f   : > { %4531 = vmatprep.mubr.bf16.mxu1 %v3376_v14 }
 0x486   : > { %4532 = vmatmul.mubr.bf16.gmra.mrb[16].mxu1 %v3377_v9 }
 0x487   : > { %4535 = vmatprep.mubr.bf16.mxu1 %v3378_v35 }
 0x48e   : > { %4536 = vmatmul.mubr.bf16.gmra.mrb[20].mxu1 %v3379_v46 }
 0x48f   : > { %4539 = vmatprep.mubr.bf16.mxu1 %v3380_v18 }
 0x496   : > { %4540 = vmatmul.mubr.bf16.gmra.mrb[24].mxu1 %v3381_v47 }
 0x497   : > { %4543 = vmatprep.mubr.bf16.mxu1 %v3382_v30 }
 0x49e   : > { %4544 = vmatmul.mubr.bf16.gmra.mrb[28].mxu1 %v3383_v34 }
 0x539   : > { %v4517_v63 = vpop.f32.mrb[0].mxu1 }
 0x53a   : > { %v3618_v58 = vmul.f32 %v4517_v63, %v8904_v36  ;;  %v3482_v55 = vpop.f32.mrb[1].mxu1 }
 0x53b   : > { %v3616_v42 = vmul.f32 %v8904_v36, %v3482_v55  ;;  %v4518_v1 = vpop.f32.mrb[2].mxu1 }
 0x53c   : > { %v3619_v43 = vmul.f32 %v4518_v1, %v8904_v36  ;;  %v3485_v38 = vpop.f32.mrb[3].mxu1  ;;  %v3657_v5 = vadd.f32 %v8910_v26, %v3618_v58 }
 0x53d   : > { %v3617_v39 = vmul.f32 %v8904_v36, %v3485_v38  ;;  %v3655_v11 = vadd.f32 %v8910_v26, %v3616_v42 }
 0x53e   : > { %v3658_v8 = vadd.f32 %v8910_v26, %v3619_v43 }
 0x53f   : > { %v3656_v45 = vadd.f32 %v8910_v26, %v3617_v39 }
 0x540   : > { %v4316_v27 = vpack.c.bf16 %v3658_v8, %v3657_v5 }
 0x541   : > { %v4311_v51 = vpack.c.bf16 %v3656_v45, %v3655_v11  ;;  %v4521_v40 = vpop.f32.mrb[4].mxu1 }
 0x542   : > { %4388 = vst [vmem:[%s8923_s28 + $0x8] sm:$0xff] %v4316_v27   ;;  %v3622_v12 = vmul.f32 %v4521_v40, %v8904_v36  ;;  %v3498_v57 = vpop.f32.mrb[5].mxu1 }
 0x543   : > { %4312 = vst [vmem:[%s8923_s28] sm:$0xff] %v4311_v51   ;;  %v3620_v32 = vmul.f32 %v8904_v36, %v3498_v57  ;;  %v4522_v0 = vpop.f32.mrb[6].mxu1 }
 0x544   : > { %v3623_v54 = vmul.f32 %v4522_v0, %v8904_v36  ;;  %v3501_v15 = vpop.f32.mrb[7].mxu1  ;;  %v3661_v10 = vadd.f32 %v8910_v26, %v3622_v12 }
 0x545   : > { %v3621_v62 = vmul.f32 %v8904_v36, %v3501_v15  ;;  %v3659_v21 = vadd.f32 %v8910_v26, %v3620_v32 }
 0x546   : > { %v3662_v22 = vadd.f32 %v8910_v26, %v3623_v54 }
 0x547   : > { %v3660_v60 = vadd.f32 %v8910_v26, %v3621_v62 }
 0x548   : > { %v4326_v61 = vpack.c.bf16 %v3662_v22, %v3661_v10 }
 0x549   : > { %v4321_v7 = vpack.c.bf16 %v3660_v60, %v3659_v21  ;;  %v4525_v4 = vpop.f32.mrb[8].mxu1 }
 0x54a   : > { %4390 = vst [vmem:[%s8923_s28 + $0x18] sm:$0xff] %v4326_v61   ;;  %v3626_v19 = vmul.f32 %v4525_v4, %v8904_v36  ;;  %v3514_v16 = vpop.f32.mrb[9].mxu1 }
 0x54b   : > { %4389 = vst [vmem:[%s8923_s28 + $0x10] sm:$0xff] %v4321_v7   ;;  %v3624_v49 = vmul.f32 %v8904_v36, %v3514_v16  ;;  %v4526_v25 = vpop.f32.mrb[10].mxu1 }
 0x54c   : > { %v3627_v53 = vmul.f32 %v4526_v25, %v8904_v36  ;;  %v3517_v28 = vpop.f32.mrb[11].mxu1  ;;  %v3665_v29 = vadd.f32 %v8910_v26, %v3626_v19 }
 0x54d   : > { %v3625_v56 = vmul.f32 %v8904_v36, %v3517_v28  ;;  %v3663_v37 = vadd.f32 %v8910_v26, %v3624_v49 }
 0x54e   : > { %v3666_v3 = vadd.f32 %v8910_v26, %v3627_v53 }
 0x54f   : > { %v3664_v44 = vadd.f32 %v8910_v26, %v3625_v56 }
 0x550   : > { %v4336_v14 = vpack.c.bf16 %v3666_v3, %v3665_v29 }
 0x551   : > { %v4331_v50 = vpack.c.bf16 %v3664_v44, %v3663_v37  ;;  %v4529_v20 = vpop.f32.mrb[12].mxu1 }
 0x552   : > { %4392 = vst [vmem:[%s8923_s28 + $0x28] sm:$0xff] %v4336_v14   ;;  %v3630_v41 = vmul.f32 %v4529_v20, %v8904_v36  ;;  %v3530_v33 = vpop.f32.mrb[13].mxu1 }
 0x553   : > { %4391 = vst [vmem:[%s8923_s28 + $0x20] sm:$0xff] %v4331_v50   ;;  %v3628_v9 = vmul.f32 %v8904_v36, %v3530_v33  ;;  %v4530_v35 = vpop.f32.mrb[14].mxu1 }
 0x554   : > { %v3631_v24 = vmul.f32 %v4530_v35, %v8904_v36  ;;  %v3533_v59 = vpop.f32.mrb[15].mxu1  ;;  %v3669_v17 = vadd.f32 %v8910_v26, %v3630_v41 }
 0x555   : > { %v3629_v23 = vmul.f32 %v8904_v36, %v3533_v59  ;;  %v3667_v18 = vadd.f32 %v8910_v26, %v3628_v9 }
 0x556   : > { %v3670_v46 = vadd.f32 %v8910_v26, %v3631_v24 }
 0x557   : > { %v3668_v48 = vadd.f32 %v8910_v26, %v3629_v23 }
 0x558   : > { %v4346_v2 = vpack.c.bf16 %v3670_v46, %v3669_v17 }
 0x559   : > { %v4341_v52 = vpack.c.bf16 %v3668_v48, %v3667_v18  ;;  %v4533_v13 = vpop.f32.mrb[16].mxu1 }
 0x55a   : > { %4394 = vst [vmem:[%s8923_s28 + $0x38] sm:$0xff] %v4346_v2   ;;  %v3634_v47 = vmul.f32 %v4533_v13, %v8904_v36  ;;  %v3546_v30 = vpop.f32.mrb[17].mxu1 }
 0x55b   : > { %4393 = vst [vmem:[%s8923_s28 + $0x30] sm:$0xff] %v4341_v52   ;;  %v3632_v6 = vmul.f32 %v8904_v36, %v3546_v30  ;;  %v4534_v31 = vpop.f32.mrb[18].mxu1 }
 0x55c   : > { %v3635_v34 = vmul.f32 %v4534_v31, %v8904_v36  ;;  %v3549_v63 = vpop.f32.mrb[19].mxu1  ;;  %v3673_v55 = vadd.f32 %v8910_v26, %v3634_v47 }
 0x55d   : > { %v3633_v58 = vmul.f32 %v8904_v36, %v3549_v63  ;;  %v3671_v1 = vadd.f32 %v8910_v26, %v3632_v6 }
 0x55e   : > { %v3674_v42 = vadd.f32 %v8910_v26, %v3635_v34 }
 0x55f   : > { %v3672_v43 = vadd.f32 %v8910_v26, %v3633_v58 }
 0x560   : > { %v4356_v38 = vpack.c.bf16 %v3674_v42, %v3673_v55 }
 0x561   : > { %v4351_v39 = vpack.c.bf16 %v3672_v43, %v3671_v1  ;;  %v4537_v5 = vpop.f32.mrb[20].mxu1 }
 0x562   : > { %4396 = vst [vmem:[%s8923_s28 + $0x48] sm:$0xff] %v4356_v38   ;;  %v3638_v8 = vmul.f32 %v4537_v5, %v8904_v36  ;;  %v3562_v11 = vpop.f32.mrb[21].mxu1 }
 0x563   : > { %4395 = vst [vmem:[%s8923_s28 + $0x40] sm:$0xff] %v4351_v39   ;;  %v3636_v45 = vmul.f32 %v8904_v36, %v3562_v11  ;;  %v4538_v27 = vpop.f32.mrb[22].mxu1 }
 0x564   : > { %v3639_v51 = vmul.f32 %v4538_v27, %v8904_v36  ;;  %v3565_v40 = vpop.f32.mrb[23].mxu1  ;;  %v3677_v57 = vadd.f32 %v8910_v26, %v3638_v8 }
 0x565   : > { %v3637_v12 = vmul.f32 %v8904_v36, %v3565_v40  ;;  %v3675_v0 = vadd.f32 %v8910_v26, %v3636_v45 }
 0x566   : > { %v3678_v32 = vadd.f32 %v8910_v26, %v3639_v51 }
 0x567   : > { %v3676_v54 = vadd.f32 %v8910_v26, %v3637_v12 }
 0x568   : > { %v4366_v15 = vpack.c.bf16 %v3678_v32, %v3677_v57 }
 0x569   : > { %v4361_v62 = vpack.c.bf16 %v3676_v54, %v3675_v0  ;;  %v4541_v10 = vpop.f32.mrb[24].mxu1 }
 0x56a   : > { %4398 = vst [vmem:[%s8923_s28 + $0x58] sm:$0xff] %v4366_v15   ;;  %v3642_v22 = vmul.f32 %v4541_v10, %v8904_v36  ;;  %v3578_v21 = vpop.f32.mrb[25].mxu1 }
 0x56b   : > { %4397 = vst [vmem:[%s8923_s28 + $0x50] sm:$0xff] %v4361_v62   ;;  %v3640_v60 = vmul.f32 %v8904_v36, %v3578_v21  ;;  %v4542_v61 = vpop.f32.mrb[26].mxu1 }
 0x56c   : > { %v3643_v7 = vmul.f32 %v4542_v61, %v8904_v36  ;;  %v3581_v4 = vpop.f32.mrb[27].mxu1  ;;  %v3681_v16 = vadd.f32 %v8910_v26, %v3642_v22 }
 0x56d   : > { %v3641_v19 = vmul.f32 %v8904_v36, %v3581_v4  ;;  %v3679_v25 = vadd.f32 %v8910_v26, %v3640_v60 }
 0x56e   : > { %v3682_v49 = vadd.f32 %v8910_v26, %v3643_v7 }
 0x56f   : > { %v3680_v53 = vadd.f32 %v8910_v26, %v3641_v19 }
 0x570   : > { %v4376_v28 = vpack.c.bf16 %v3682_v49, %v3681_v16 }
 0x571   : > { %v4371_v56 = vpack.c.bf16 %v3680_v53, %v3679_v25  ;;  %v4545_v29 = vpop.f32.mrb[28].mxu1 }
 0x572   : > { %4400 = vst [vmem:[%s8923_s28 + $0x68] sm:$0xff] %v4376_v28   ;;  %v3646_v3 = vmul.f32 %v4545_v29, %v8904_v36  ;;  %v3594_v37 = vpop.f32.mrb[29].mxu1 }
 0x573   : > { %4399 = vst [vmem:[%s8923_s28 + $0x60] sm:$0xff] %v4371_v56   ;;  %v3644_v44 = vmul.f32 %v8904_v36, %v3594_v37  ;;  %v4546_v14 = vpop.f32.mrb[30].mxu1 }
 0x574   : > { %v3647_v50 = vmul.f32 %v4546_v14, %v8904_v36  ;;  %v3597_v20 = vpop.f32.mrb[31].mxu1  ;;  %v3685_v33 = vadd.f32 %v8910_v26, %v3646_v3 }
 0x575   : > { %v3645_v41 = vmul.f32 %v8904_v36, %v3597_v20  ;;  %v3683_v35 = vadd.f32 %v8910_v26, %v3644_v44 }
 0x576   : > { %v3686_v9 = vadd.f32 %v8910_v26, %v3647_v50 }
 0x577   : > { %v3684_v24 = vadd.f32 %v8910_v26, %v3645_v41 }
 0x578   : > { %v4386_v59 = vpack.c.bf16 %v3686_v9, %v3685_v33 }
 0x579   : > { %v4381_v23 = vpack.c.bf16 %v3684_v24, %v3683_v35 }
 0x57a   : > { %4402 = vst [vmem:[%s8923_s28 + $0x78] sm:$0xff] %v4386_v59  }
 0x57b   : > { %4401 = vst [vmem:[%s8923_s28 + $0x70] sm:$0xff] %v4381_v23  }
 0x57c PF: > { %s24_s29 = sadd.s32 1, %s4868_s29  }
 0x57d   : > { %p21_p4 = scmp.ge.s32.totalorder %s24_s29, 4  }
 0x57f   :  { %23 = sbr.rel (!%p21_p4) target bundleno = 1 (0x1), region = 106 }

</bundles_post_ra>
